<compile_context>
chip_gen: v7x
topology: tpu7x:2x2x1
jax: 0.10.0
libtpu: 0.0.40
codegen_flags: <defaults>
</compile_context>

<pallas_src>
import functools

import jax
import jax.numpy as jnp
from jax import lax
from jax.experimental import pallas as pl
from jax.experimental.pallas import tpu as pltpu

# ---- "config" constants of the original codebase (synthetic, deterministic) ----
SOS_TOKEN = 1
UNK_TOKEN = 3
MAX_LENGTH = 8          # config.MAX_LENGTH
DECODER_NUM_LAYERS = 1  # config.decoder_num_layers


def _round_up(x, m):
    return ((x + m - 1) // m) * m


def _greedy_decode_kernel(
    enc_hid_ref,      # (B, H)        f32   initial decoder hidden (layer squeezed)
    enc_flat_t_ref,   # (H, BTp)      bf16  encoder states, flattened (beam*time), transposed
    enc_flat_ref,     # (BTp, H)      bf16  encoder states, flattened (beam*time)
    src_onehot_ref,   # (BTp, VPo)    bf16  one-hot of extended-vocab source ids
    att_mask_ref,     # (B, BTp)      f32   0 on own-beam positions, -1e30 elsewhere/pad
    w_emb_ref,        # (VPe, 4H)     bf16  emb->[r|z|gi_n|gh_n] with all biases folded
    w_hh_ref,         # (H, 4H)       bf16  h  ->[r|z| 0  |gh_n]
    w_out_h_ref,      # (H, VPo)      bf16  h-half of [w_out | pgen(h,c) col | 0-pad]
    w_out_c_ref,      # (H, VPo)      bf16  context-half of the same
    b_out_ref,        # (1, VPo)      f32   b_out with -1e30 on non-vocab lanes
    pgen_row_ref,     # (1, VPe)      f32   emb @ w_pgen[2H:3H], lane-padded
    tokens_out_ref,   # (B, L)        i32   greedy tokens (OOV->UNK remapped)
    scores_out_ref,   # (B, L)        f32   max probability at each step
    avg_out_ref,      # (B, 1)        f32   sum(scores)/count(scores>0) per beam
    *,
    vocab_size: int,  # static
):
    B, H = enc_hid_ref.shape
    VPe = w_emb_ref.shape[0]            # padded one-hot width (>= V, mult of 128)
    VPo = b_out_ref.shape[1]            # padded distribution width (>= vext, mult of 128)
    L = tokens_out_ref.shape[1]
    V = vocab_size

    # ---- loop-invariant hoists (small f32 rows / masks / iotas only) ----
    att_mask = att_mask_ref[...]                                         # (B, BTp) f32
    b_out = b_out_ref[...]                                               # (1, VPo) f32
    pgen_row = pgen_row_ref[...]                                         # (1, VPe) f32

    vocab_iota = lax.broadcasted_iota(jnp.int32, (B, VPe), 1)
    idx_iota = lax.broadcasted_iota(jnp.int32, (B, VPo), 1)
    step_iota = lax.broadcasted_iota(jnp.int32, (B, L), 1)

    h0 = enc_hid_ref[...]                                                # (B, H)
    tok0 = jnp.full((B, 1), SOS_TOKEN, dtype=jnp.int32)
    tok_acc0 = jnp.zeros((B, L), jnp.int32)
    sc_acc0 = jnp.zeros((B, L), jnp.float32)

    def step_body(step, carry):
        h, tok, tok_acc, sc_acc = carry

        # --- GRU gates: two accumulating dots replace the [onehot ; h] concat ---
        onehot = (vocab_iota == tok).astype(jnp.float32)                 # (B, VPe)
        g = (jnp.dot(onehot.astype(jnp.bfloat16), w_emb_ref[...],
                     preferred_element_type=jnp.float32)
             + jnp.dot(h.astype(jnp.bfloat16), w_hh_ref[...],
                       preferred_element_type=jnp.float32))              # (B, 4H)
        r = jax.nn.sigmoid(g[:, 0:H])
        z = jax.nn.sigmoid(g[:, H:2 * H])
        n = jnp.tanh(g[:, 2 * H:3 * H] + r * g[:, 3 * H:4 * H])
        h_new = (1.0 - z) * n + z * h                                    # (B, H)

        # pointer-gate embedding term: one VPU mul + one lane reduce
        pgen_emb = jnp.sum(onehot * pgen_row, axis=-1, keepdims=True)    # (B, 1)

        # --- dot attention on the MXU over flattened (beam*time) positions ---
        s = jnp.dot(h_new.astype(jnp.bfloat16), enc_flat_t_ref[...],
                    preferred_element_type=jnp.float32) + att_mask       # (B, BTp)
        s = s - jnp.max(s, axis=-1, keepdims=True)
        e = jnp.exp(s)                                                   # off-block -> 0
        attn = e * pl.reciprocal(
            jnp.sum(e, axis=-1, keepdims=True), approx=True)             # (B, BTp)
        attn_b = attn.astype(jnp.bfloat16)
        context = jnp.dot(attn_b, enc_flat_ref[...],
                          preferred_element_type=jnp.float32)            # (B, H)
        copy_dist = jnp.dot(attn_b, src_onehot_ref[...],
                            preferred_element_type=jnp.float32)          # (B, VPo)

        # --- fused output projection + pointer-gate(h, context): split dots ---
        out2 = (jnp.dot(h_new.astype(jnp.bfloat16), w_out_h_ref[...],
                        preferred_element_type=jnp.float32)
                + jnp.dot(context.astype(jnp.bfloat16), w_out_c_ref[...],
                          preferred_element_type=jnp.float32))           # (B, VPo)
        p_gen = jax.nn.sigmoid(out2[:, V:V + 1] + pgen_emb)              # (B, 1)

        # vocab softmax on lane-dense layout; -1e30 bias kills pad/pgen lanes (f32 path)
        logits = out2 + b_out
        logits = logits - jnp.max(logits, axis=-1, keepdims=True)
        pe = jnp.exp(logits)
        vocab_dist = pe * pl.reciprocal(
            jnp.sum(pe, axis=-1, keepdims=True), approx=True)            # (B, VPo)

        # extended distribution (pad lanes are exactly 0)
        ext_dist = p_gen * vocab_dist + (1.0 - p_gen) * copy_dist        # (B, VPo)

        # --- greedy: first-occurrence argmax (torch.max semantics) ---
        best_score = jnp.max(ext_dist, axis=-1, keepdims=True)           # (B, 1)
        cand = jnp.where(ext_dist == best_score, idx_iota, jnp.int32(VPo))
        best_tok = jnp.min(cand, axis=-1, keepdims=True)                 # (B, 1)
        # decoder_input[decoder_input >= vocab_size] = UNK_token
        best_tok = jnp.where(best_tok >= V, jnp.int32(UNK_TOKEN), best_tok)

        sel = step_iota == step
        tok_acc = jnp.where(sel, best_tok, tok_acc)
        sc_acc = jnp.where(sel, best_score, sc_acc)
        return h_new, best_tok, tok_acc, sc_acc

    _, _, tok_acc, sc_acc = lax.fori_loop(
        0, L, step_body, (h0, tok0, tok_acc0, sc_acc0), unroll=True)

    tokens_out_ref[...] = tok_acc
    scores_out_ref[...] = sc_acc

    # s = (scores > 0).sum(dim=steps); avg = scores.sum(dim=steps) / s  (exact divide)
    cnt = jnp.sum((sc_acc > 0.0).astype(jnp.float32), axis=1, keepdims=True)
    avg_out_ref[...] = jnp.sum(sc_acc, axis=1, keepdims=True) / jnp.maximum(cnt, 1.0)


def _prepare_fused_params(params, vpe, vpo):
    """Fold embedding lookup + biases into the projections and lane-pad the weights."""
    emb = params["embedding"].astype(jnp.float32)            # (V, H)
    V, H = emb.shape
    w_ih = params["w_ih"].astype(jnp.float32)                # (H, 3H)
    w_hh = params["w_hh"].astype(jnp.float32)                # (H, 3H)
    b_ih = params["b_ih"].astype(jnp.float32)[0]             # (3H,)
    b_hh = params["b_hh"].astype(jnp.float32)[0]             # (3H,)
    w_out = params["w_out"].astype(jnp.float32)              # (2H, V)
    b_out = params["b_out"].astype(jnp.float32)[0]           # (V,)
    w_pgen = params["w_pgen"].astype(jnp.float32)            # (3H, 1)

    # matmul1 columns: [r_sum | z_sum | gi_n | gh_n]  (N = 4H exactly)
    emb_gru = emb @ w_ih                                     # (V, 3H)  folded lookup
    w_emb = jnp.zeros((vpe, 4 * H), jnp.float32)
    w_emb = w_emb.at[:V, 0:3 * H].set(emb_gru)
    # Fold every bias piece into the first V rows (one-hot selects exactly one row).
    # NOTE: bias is then rounded with the bf16 weights (exact here: biases are 0).
    bias_row = jnp.concatenate(
        [b_ih[0:2 * H] + b_hh[0:2 * H], b_ih[2 * H:3 * H], b_hh[2 * H:3 * H]])
    w_emb = w_emb.at[:V, :].add(bias_row[None, :])

    w_hh_pad = jnp.zeros((H, 4 * H), jnp.float32)
    w_hh_pad = w_hh_pad.at[:, 0:2 * H].set(w_hh[:, 0:2 * H])
    w_hh_pad = w_hh_pad.at[:, 3 * H:4 * H].set(w_hh[:, 2 * H:3 * H])

    # matmul2: [output projection | pgen(h,ctx) column | zero pad], split into h / ctx halves
    w_out_big = jnp.zeros((2 * H, vpo), jnp.float32)
    w_out_big = w_out_big.at[:, :V].set(w_out)
    w_out_big = w_out_big.at[:, V].set(w_pgen[:2 * H, 0])
    w_out_h = w_out_big[:H]
    w_out_c = w_out_big[H:]

    # -1e30 bias on pad + pgen lanes -> exp underflows to 0 in the vocab softmax.
    b_out_big = jnp.full((1, vpo), -1e30, jnp.float32)
    b_out_big = b_out_big.at[0, :V].set(b_out)

    # pointer-gate embedding row (folded lookup), lane-padded
    pgen_row = jnp.zeros((1, vpe), jnp.float32)
    pgen_row = pgen_row.at[0, :V].set((emb @ w_pgen[2 * H:3 * H])[:, 0])

    return (w_emb.astype(jnp.bfloat16), w_hh_pad.astype(jnp.bfloat16),
            w_out_h.astype(jnp.bfloat16), w_out_c.astype(jnp.bfloat16),
            b_out_big, pgen_row)


def greedy_search_decode(encoder_outputs_tbh, encoder_hidden, params, extend_inp_tb,
                         max_oov_length):
    """Plain-JAX glue around the Pallas greedy-decode kernel.

    encoder_outputs_tbh: (T, B, H) like PyTorch; transposed to (B, T, H) for the kernel.
    encoder_hidden:      (num_layers, B, H); last `DECODER_NUM_LAYERS` layer is used.
    extend_inp_tb:       (T, B) int32; transposed to (B, T).
    """
    enc_out = jnp.transpose(encoder_outputs_tbh, (1, 0, 2)).astype(jnp.float32)  # (B,T,H)
    enc_hid = encoder_hidden[-DECODER_NUM_LAYERS:][0].astype(jnp.float32)        # (B,H)
    extend_inp = jnp.transpose(extend_inp_tb, (1, 0)).astype(jnp.int32)          # (B,T)

    B, T, H = enc_out.shape
    V = params["embedding"].shape[0]
    vext = V + int(max_oov_length)
    L = MAX_LENGTH

    VPe = _round_up(max(V, 128), 128)                 # lane-dense one-hot width
    VPo = _round_up(max(vext, V + 1, 128), 128)       # lane-dense distribution width
    BT = B * T
    BTp = _round_up(max(BT, 128), 128)                # lane-dense flattened (beam*time)

    # Flattened encoder states (loop-invariant MXU operands) + block-diagonal mask.
    enc_flat = jnp.zeros((BTp, H), jnp.float32).at[:BT].set(enc_out.reshape(BT, H))
    enc_flat_b = enc_flat.astype(jnp.bfloat16)                       # (BTp, H)
    enc_flat_t_b = enc_flat_b.T                                      # (H, BTp)

    # Source-copy one-hot over the padded extended vocab, flattened over (beam, time).
    col = lax.broadcasted_iota(jnp.int32, (BT, VPo), 1)
    src_onehot = (extend_inp.reshape(BT, 1) == col).astype(jnp.float32)
    src_onehot_flat = (jnp.zeros((BTp, VPo), jnp.float32)
                       .at[:BT].set(src_onehot).astype(jnp.bfloat16))

    # att_mask[b, c] = 0 if flat position c belongs to beam b (and is not padding), else -1e30
    row_beam = jnp.arange(BTp, dtype=jnp.int32) // T
    valid = (jnp.arange(BTp) < BT)[None, :]
    att_mask = jnp.where(
        (row_beam[None, :] == jnp.arange(B, dtype=jnp.int32)[:, None]) & valid,
        0.0, -1e30).astype(jnp.float32)                              # (B, BTp)

    w_emb, w_hh_pad, w_out_h, w_out_c, b_out_big, pgen_row = _prepare_fused_params(
        params, VPe, VPo)

    kernel = functools.partial(_greedy_decode_kernel, vocab_size=V)
    vmem = pl.BlockSpec(memory_space=pltpu.MemorySpace.VMEM)
    out_shapes = (
        jax.ShapeDtypeStruct((B, L), jnp.int32),    # all_tokens (already transposed)
        jax.ShapeDtypeStruct((B, L), jnp.float32),  # per-step scores
        jax.ShapeDtypeStruct((B, 1), jnp.float32),  # averaged scores
    )

    tokens, step_scores, avg_scores = pl.pallas_call(
        kernel,
        out_shape=out_shapes,
        in_specs=[vmem] * 11,
        out_specs=(vmem, vmem, vmem),
    )(enc_hid, enc_flat_t_b, enc_flat_b, src_onehot_flat, att_mask,
      w_emb, w_hh_pad, w_out_h, w_out_c, b_out_big, pgen_row)
    return tokens, step_scores, avg_scores


def init_params(key, vocab_size, hidden):
    ks = jax.random.split(key, 6)
    s = 0.1
    return {
        "embedding": jax.random.normal(ks[0], (vocab_size, hidden), jnp.float32) * s,
        "w_ih": jax.random.normal(ks[1], (hidden, 3 * hidden), jnp.float32) * s,
        "w_hh": jax.random.normal(ks[2], (hidden, 3 * hidden), jnp.float32) * s,
        "b_ih": jnp.zeros((1, 3 * hidden), jnp.float32),
        "b_hh": jnp.zeros((1, 3 * hidden), jnp.float32),
        "w_out": jax.random.normal(ks[3], (2 * hidden, vocab_size), jnp.float32) * s,
        "b_out": jnp.zeros((1, vocab_size), jnp.float32),
        "w_pgen": jax.random.normal(ks[4], (3 * hidden, 1), jnp.float32) * s,
    }


if __name__ == "__main__":
    key = jax.random.PRNGKey(0)
    k_enc, k_hid, k_ext, k_par = jax.random.split(key, 4)

    # small shapes: beam_size(B)=8, max_input_len(T)=8, hidden=128, vocab=32, oov=8
    B, T, H = 8, 8, 128
    V = 32
    MAX_OOV = 8

    params = init_params(k_par, V, H)

    # TODO(synk): model.encode is opaque — encoder states synthesized deterministically.
    encoder_outputs = jax.random.normal(k_enc, (T, B, H), jnp.float32)          # (T, B, H)
    encoder_hidden = jax.random.normal(k_hid, (DECODER_NUM_LAYERS, B, H), jnp.float32)
    extend_inp = jax.random.randint(k_ext, (T, B), 0, V + MAX_OOV, jnp.int32)   # (T, B)
    batch_oovs = [["oov_%d" % i for i in range(MAX_OOV)] for _ in range(B)]

    tokens, step_scores, avg_scores = greedy_search_decode(
        encoder_outputs, encoder_hidden, params, extend_inp, MAX_OOV)
    jax.block_until_ready((tokens, step_scores, avg_scores))

    # emulate the module's return: (all_tokens, all_scores.tolist(), batch_oovs)
    all_tokens = tokens.tolist()              # (beam, MAX_LENGTH), already transposed
    all_scores = avg_scores[:, 0].tolist()

    assert len(all_tokens) == B and len(all_tokens[0]) == MAX_LENGTH
    assert all(0 <= t < V for row in all_tokens for t in row)        # OOVs remapped to UNK
    assert all(jnp.isfinite(jnp.asarray(all_scores)))

    print("KERNEL_OK")
</pallas_src>

<mosaic_0001>
module attributes {stable_mosaic.version = 11 : i64} {
  func.func @_greedy_decode_kernel(%arg0: memref<8x128xf32, #tpu.memory_space<vmem>>, %arg1: memref<128x128xbf16, #tpu.memory_space<vmem>>, %arg2: memref<128x128xbf16, #tpu.memory_space<vmem>>, %arg3: memref<128x128xbf16, #tpu.memory_space<vmem>>, %arg4: memref<8x128xf32, #tpu.memory_space<vmem>>, %arg5: memref<128x512xbf16, #tpu.memory_space<vmem>>, %arg6: memref<128x512xbf16, #tpu.memory_space<vmem>>, %arg7: memref<128x128xbf16, #tpu.memory_space<vmem>>, %arg8: memref<128x128xbf16, #tpu.memory_space<vmem>>, %arg9: memref<1x128xf32, #tpu.memory_space<vmem>>, %arg10: memref<1x128xf32, #tpu.memory_space<vmem>>, %arg11: memref<8x8xi32, #tpu.memory_space<vmem>>, %arg12: memref<8x8xf32, #tpu.memory_space<vmem>>, %arg13: memref<8x1xf32, #tpu.memory_space<vmem>>) attributes {dimension_semantics = [], scalar_prefetch = 0 : i64, scratch_operands = 0 : i64, tpu.core_type = #tpu.core_type<tc>} {
    %c0 = arith.constant 0 : index
    %c0_0 = arith.constant 0 : index
    %0 = vector.load %arg4[%c0, %c0_0] : memref<8x128xf32, #tpu.memory_space<vmem>>, vector<8x128xf32>
    %c0_1 = arith.constant 0 : index
    %c0_2 = arith.constant 0 : index
    %1 = vector.load %arg9[%c0_1, %c0_2] : memref<1x128xf32, #tpu.memory_space<vmem>>, vector<1x128xf32>
    %c0_3 = arith.constant 0 : index
    %c0_4 = arith.constant 0 : index
    %2 = vector.load %arg10[%c0_3, %c0_4] : memref<1x128xf32, #tpu.memory_space<vmem>>, vector<1x128xf32>
    %3 = tpu.iota {dimensions = array<i32: 1>} : vector<8x128xi32>
    %4 = tpu.iota {dimensions = array<i32: 1>} : vector<8x128xi32>
    %5 = tpu.iota {dimensions = array<i32: 1>} : vector<8x8xi32>
    %c0_5 = arith.constant 0 : index
    %c0_6 = arith.constant 0 : index
    %6 = vector.load %arg0[%c0_5, %c0_6] : memref<8x128xf32, #tpu.memory_space<vmem>>, vector<8x128xf32>
    %c1_i32 = arith.constant 1 : i32
    %7 = vector.broadcast %c1_i32 : i32 to vector<8x1xi32>
    %c0_i32 = arith.constant 0 : i32
    %8 = vector.broadcast %c0_i32 : i32 to vector<8x8xi32>
    %cst = arith.constant 0.000000e+00 : f32
    %9 = vector.broadcast %cst : f32 to vector<8x8xf32>
    %c0_i32_7 = arith.constant 0 : i32
    %10 = vector.broadcast %7 : vector<8x1xi32> to vector<8x128xi32>
    %11 = arith.cmpi eq, %3, %10 : vector<8x128xi32>
    %12 = arith.extui %11 : vector<8x128xi1> to vector<8x128xi32>
    %13 = arith.sitofp %12 : vector<8x128xi32> to vector<8x128xf32>
    %14 = arith.truncf %13 : vector<8x128xf32> to vector<8x128xbf16>
    %c0_8 = arith.constant 0 : index
    %c0_9 = arith.constant 0 : index
    %15 = vector.load %arg5[%c0_8, %c0_9] : memref<128x512xbf16, #tpu.memory_space<vmem>>, vector<128x512xbf16>
    %cst_10 = arith.constant dense<0.000000e+00> : vector<8x512xf32>
    %16 = tpu.matmul %14, %15, %cst_10 {dimension_numbers = #tpu.dot_dimension_numbers<[1], [0], [0], [1], [0, 0, 1, 1], [], []>} : vector<8x128xbf16>, vector<128x512xbf16>, vector<8x512xf32> -> vector<8x512xf32>
    %17 = arith.truncf %6 : vector<8x128xf32> to vector<8x128xbf16>
    %c0_11 = arith.constant 0 : index
    %c0_12 = arith.constant 0 : index
    %18 = vector.load %arg6[%c0_11, %c0_12] : memref<128x512xbf16, #tpu.memory_space<vmem>>, vector<128x512xbf16>
    %cst_13 = arith.constant dense<0.000000e+00> : vector<8x512xf32>
    %19 = tpu.matmul %17, %18, %cst_13 {dimension_numbers = #tpu.dot_dimension_numbers<[1], [0], [0], [1], [0, 0, 1, 1], [], []>} : vector<8x128xbf16>, vector<128x512xbf16>, vector<8x512xf32> -> vector<8x512xf32>
    %20 = arith.addf %16, %19 : vector<8x512xf32>
    %21 = vector.extract_strided_slice %20 {offsets = [0, 0], sizes = [8, 128], strides = [1, 1]} : vector<8x512xf32> to vector<8x128xf32>
    %22 = arith.negf %21 : vector<8x128xf32>
    %23 = math.exp %22 : vector<8x128xf32>
    %cst_14 = arith.constant 1.000000e+00 : f32
    %24 = vector.broadcast %cst_14 : f32 to vector<8x128xf32>
    %25 = arith.addf %24, %23 : vector<8x128xf32>
    %26 = arith.divf %24, %25 : vector<8x128xf32>
    %27 = vector.extract_strided_slice %20 {offsets = [0, 128], sizes = [8, 128], strides = [1, 1]} : vector<8x512xf32> to vector<8x128xf32>
    %28 = arith.negf %27 : vector<8x128xf32>
    %29 = math.exp %28 : vector<8x128xf32>
    %cst_15 = arith.constant 1.000000e+00 : f32
    %30 = vector.broadcast %cst_15 : f32 to vector<8x128xf32>
    %31 = arith.addf %30, %29 : vector<8x128xf32>
    %32 = arith.divf %30, %31 : vector<8x128xf32>
    %33 = vector.extract_strided_slice %20 {offsets = [0, 256], sizes = [8, 128], strides = [1, 1]} : vector<8x512xf32> to vector<8x128xf32>
    %34 = vector.extract_strided_slice %20 {offsets = [0, 384], sizes = [8, 128], strides = [1, 1]} : vector<8x512xf32> to vector<8x128xf32>
    %35 = arith.mulf %26, %34 : vector<8x128xf32>
    %36 = arith.addf %33, %35 : vector<8x128xf32>
    %37 = math.tanh %36 : vector<8x128xf32>
    %cst_16 = arith.constant 1.000000e+00 : f32
    %38 = vector.broadcast %cst_16 : f32 to vector<8x128xf32>
    %39 = arith.subf %38, %32 : vector<8x128xf32>
    %40 = arith.mulf %39, %37 : vector<8x128xf32>
    %41 = arith.mulf %32, %6 : vector<8x128xf32>
    %42 = arith.addf %40, %41 : vector<8x128xf32>
    %43 = vector.broadcast %2 : vector<1x128xf32> to vector<8x128xf32>
    %44 = arith.mulf %13, %43 : vector<8x128xf32>
    %cst_17 = arith.constant dense<0.000000e+00> : vector<8xf32>
    %45 = vector.multi_reduction <add>, %44, %cst_17 [1] : vector<8x128xf32> to vector<8xf32>
    %46 = vector.shape_cast %45 : vector<8xf32> to vector<8x1xf32>
    %47 = arith.truncf %42 : vector<8x128xf32> to vector<8x128xbf16>
    %c0_18 = arith.constant 0 : index
    %c0_19 = arith.constant 0 : index
    %48 = vector.load %arg1[%c0_18, %c0_19] : memref<128x128xbf16, #tpu.memory_space<vmem>>, vector<128x128xbf16>
    %cst_20 = arith.constant dense<0.000000e+00> : vector<8x128xf32>
    %49 = tpu.matmul %47, %48, %cst_20 {dimension_numbers = #tpu.dot_dimension_numbers<[1], [0], [0], [1], [0, 0, 1, 1], [], []>} : vector<8x128xbf16>, vector<128x128xbf16>, vector<8x128xf32> -> vector<8x128xf32>
    %50 = arith.addf %49, %0 : vector<8x128xf32>
    %cst_21 = arith.constant dense<0xFF800000> : vector<8xf32>
    %51 = vector.multi_reduction <maximumf>, %50, %cst_21 [1] : vector<8x128xf32> to vector<8xf32>
    %52 = vector.shape_cast %51 : vector<8xf32> to vector<8x1xf32>
    %53 = vector.broadcast %52 : vector<8x1xf32> to vector<8x128xf32>
    %54 = arith.subf %50, %53 : vector<8x128xf32>
    %55 = math.exp %54 : vector<8x128xf32>
    %cst_22 = arith.constant dense<0.000000e+00> : vector<8xf32>
    %56 = vector.multi_reduction <add>, %55, %cst_22 [1] : vector<8x128xf32> to vector<8xf32>
    %57 = vector.shape_cast %56 : vector<8xf32> to vector<8x1xf32>
    %58 = tpu.reciprocal %57 {approx = true} : vector<8x1xf32> -> vector<8x1xf32>
    %59 = vector.broadcast %58 : vector<8x1xf32> to vector<8x128xf32>
    %60 = arith.mulf %55, %59 : vector<8x128xf32>
    %61 = arith.truncf %60 : vector<8x128xf32> to vector<8x128xbf16>
    %c0_23 = arith.constant 0 : index
    %c0_24 = arith.constant 0 : index
    %62 = vector.load %arg2[%c0_23, %c0_24] : memref<128x128xbf16, #tpu.memory_space<vmem>>, vector<128x128xbf16>
    %cst_25 = arith.constant dense<0.000000e+00> : vector<8x128xf32>
    %63 = tpu.matmul %61, %62, %cst_25 {dimension_numbers = #tpu.dot_dimension_numbers<[1], [0], [0], [1], [0, 0, 1, 1], [], []>} : vector<8x128xbf16>, vector<128x128xbf16>, vector<8x128xf32> -> vector<8x128xf32>
    %c0_26 = arith.constant 0 : index
    %c0_27 = arith.constant 0 : index
    %64 = vector.load %arg3[%c0_26, %c0_27] : memref<128x128xbf16, #tpu.memory_space<vmem>>, vector<128x128xbf16>
    %cst_28 = arith.constant dense<0.000000e+00> : vector<8x128xf32>
    %65 = tpu.matmul %61, %64, %cst_28 {dimension_numbers = #tpu.dot_dimension_numbers<[1], [0], [0], [1], [0, 0, 1, 1], [], []>} : vector<8x128xbf16>, vector<128x128xbf16>, vector<8x128xf32> -> vector<8x128xf32>
    %66 = arith.truncf %42 : vector<8x128xf32> to vector<8x128xbf16>
    %c0_29 = arith.constant 0 : index
    %c0_30 = arith.constant 0 : index
    %67 = vector.load %arg7[%c0_29, %c0_30] : memref<128x128xbf16, #tpu.memory_space<vmem>>, vector<128x128xbf16>
    %cst_31 = arith.constant dense<0.000000e+00> : vector<8x128xf32>
    %68 = tpu.matmul %66, %67, %cst_31 {dimension_numbers = #tpu.dot_dimension_numbers<[1], [0], [0], [1], [0, 0, 1, 1], [], []>} : vector<8x128xbf16>, vector<128x128xbf16>, vector<8x128xf32> -> vector<8x128xf32>
    %69 = arith.truncf %63 : vector<8x128xf32> to vector<8x128xbf16>
    %c0_32 = arith.constant 0 : index
    %c0_33 = arith.constant 0 : index
    %70 = vector.load %arg8[%c0_32, %c0_33] : memref<128x128xbf16, #tpu.memory_space<vmem>>, vector<128x128xbf16>
    %cst_34 = arith.constant dense<0.000000e+00> : vector<8x128xf32>
    %71 = tpu.matmul %69, %70, %cst_34 {dimension_numbers = #tpu.dot_dimension_numbers<[1], [0], [0], [1], [0, 0, 1, 1], [], []>} : vector<8x128xbf16>, vector<128x128xbf16>, vector<8x128xf32> -> vector<8x128xf32>
    %72 = arith.addf %68, %71 : vector<8x128xf32>
    %73 = vector.extract_strided_slice %72 {offsets = [0, 32], sizes = [8, 1], strides = [1, 1]} : vector<8x128xf32> to vector<8x1xf32>
    %74 = arith.addf %73, %46 : vector<8x1xf32>
    %75 = arith.negf %74 : vector<8x1xf32>
    %76 = math.exp %75 : vector<8x1xf32>
    %cst_35 = arith.constant 1.000000e+00 : f32
    %77 = vector.broadcast %cst_35 : f32 to vector<8x1xf32>
    %78 = arith.addf %77, %76 : vector<8x1xf32>
    %79 = arith.divf %77, %78 : vector<8x1xf32>
    %80 = vector.broadcast %1 : vector<1x128xf32> to vector<8x128xf32>
    %81 = arith.addf %72, %80 : vector<8x128xf32>
    %cst_36 = arith.constant dense<0xFF800000> : vector<8xf32>
    %82 = vector.multi_reduction <maximumf>, %81, %cst_36 [1] : vector<8x128xf32> to vector<8xf32>
    %83 = vector.shape_cast %82 : vector<8xf32> to vector<8x1xf32>
    %84 = vector.broadcast %83 : vector<8x1xf32> to vector<8x128xf32>
    %85 = arith.subf %81, %84 : vector<8x128xf32>
    %86 = math.exp %85 : vector<8x128xf32>
    %cst_37 = arith.constant dense<0.000000e+00> : vector<8xf32>
    %87 = vector.multi_reduction <add>, %86, %cst_37 [1] : vector<8x128xf32> to vector<8xf32>
    %88 = vector.shape_cast %87 : vector<8xf32> to vector<8x1xf32>
    %89 = tpu.reciprocal %88 {approx = true} : vector<8x1xf32> -> vector<8x1xf32>
    %90 = vector.broadcast %89 : vector<8x1xf32> to vector<8x128xf32>
    %91 = arith.mulf %86, %90 : vector<8x128xf32>
    %92 = vector.broadcast %79 : vector<8x1xf32> to vector<8x128xf32>
    %93 = arith.mulf %92, %91 : vector<8x128xf32>
    %cst_38 = arith.constant 1.000000e+00 : f32
    %94 = vector.broadcast %cst_38 : f32 to vector<8x1xf32>
    %95 = arith.subf %94, %79 : vector<8x1xf32>
    %96 = vector.broadcast %95 : vector<8x1xf32> to vector<8x128xf32>
    %97 = arith.mulf %96, %65 : vector<8x128xf32>
    %98 = arith.addf %93, %97 : vector<8x128xf32>
    %cst_39 = arith.constant dense<0xFF800000> : vector<8xf32>
    %99 = vector.multi_reduction <maximumf>, %98, %cst_39 [1] : vector<8x128xf32> to vector<8xf32>
    %100 = vector.shape_cast %99 : vector<8xf32> to vector<8x1xf32>
    %101 = vector.broadcast %100 : vector<8x1xf32> to vector<8x128xf32>
    %102 = arith.cmpf oeq, %98, %101 : vector<8x128xf32>
    %c128_i32 = arith.constant 128 : i32
    %103 = vector.broadcast %c128_i32 : i32 to vector<8x128xi32>
    %104 = arith.select %102, %4, %103 : vector<8x128xi1>, vector<8x128xi32>
    %cst_40 = arith.constant dense<2147483647> : vector<8xi32>
    %105 = vector.multi_reduction <minsi>, %104, %cst_40 [1] : vector<8x128xi32> to vector<8xi32>
    %106 = vector.shape_cast %105 : vector<8xi32> to vector<8x1xi32>
    %c32_i32 = arith.constant 32 : i32
    %107 = vector.broadcast %c32_i32 : i32 to vector<8x1xi32>
    %108 = arith.cmpi sge, %106, %107 : vector<8x1xi32>
    %c3_i32 = arith.constant 3 : i32
    %109 = vector.broadcast %c3_i32 : i32 to vector<8x1xi32>
    %110 = arith.select %108, %109, %106 : vector<8x1xi1>, vector<8x1xi32>
    %111 = vector.broadcast %c0_i32_7 : i32 to vector<8x8xi32>
    %112 = arith.cmpi eq, %5, %111 : vector<8x8xi32>
    %113 = vector.shape_cast %110 : vector<8x1xi32> to vector<8x1xi32>
    %114 = vector.broadcast %113 : vector<8x1xi32> to vector<8x8xi32>
    %115 = arith.select %112, %114, %8 : vector<8x8xi1>, vector<8x8xi32>
    %116 = vector.shape_cast %100 : vector<8x1xf32> to vector<8x1xf32>
    %117 = vector.broadcast %116 : vector<8x1xf32> to vector<8x8xf32>
    %118 = arith.select %112, %117, %9 : vector<8x8xi1>, vector<8x8xf32>
    %c1_i32_41 = arith.constant 1 : i32
    %119 = vector.broadcast %110 : vector<8x1xi32> to vector<8x128xi32>
    %120 = arith.cmpi eq, %3, %119 : vector<8x128xi32>
    %121 = arith.extui %120 : vector<8x128xi1> to vector<8x128xi32>
    %122 = arith.sitofp %121 : vector<8x128xi32> to vector<8x128xf32>
    %123 = arith.truncf %122 : vector<8x128xf32> to vector<8x128xbf16>
    %c0_42 = arith.constant 0 : index
    %c0_43 = arith.constant 0 : index
    %124 = vector.load %arg5[%c0_42, %c0_43] : memref<128x512xbf16, #tpu.memory_space<vmem>>, vector<128x512xbf16>
    %cst_44 = arith.constant dense<0.000000e+00> : vector<8x512xf32>
    %125 = tpu.matmul %123, %124, %cst_44 {dimension_numbers = #tpu.dot_dimension_numbers<[1], [0], [0], [1], [0, 0, 1, 1], [], []>} : vector<8x128xbf16>, vector<128x512xbf16>, vector<8x512xf32> -> vector<8x512xf32>
    %126 = arith.truncf %42 : vector<8x128xf32> to vector<8x128xbf16>
    %c0_45 = arith.constant 0 : index
    %c0_46 = arith.constant 0 : index
    %127 = vector.load %arg6[%c0_45, %c0_46] : memref<128x512xbf16, #tpu.memory_space<vmem>>, vector<128x512xbf16>
    %cst_47 = arith.constant dense<0.000000e+00> : vector<8x512xf32>
    %128 = tpu.matmul %126, %127, %cst_47 {dimension_numbers = #tpu.dot_dimension_numbers<[1], [0], [0], [1], [0, 0, 1, 1], [], []>} : vector<8x128xbf16>, vector<128x512xbf16>, vector<8x512xf32> -> vector<8x512xf32>
    %129 = arith.addf %125, %128 : vector<8x512xf32>
    %130 = vector.extract_strided_slice %129 {offsets = [0, 0], sizes = [8, 128], strides = [1, 1]} : vector<8x512xf32> to vector<8x128xf32>
    %131 = arith.negf %130 : vector<8x128xf32>
    %132 = math.exp %131 : vector<8x128xf32>
    %cst_48 = arith.constant 1.000000e+00 : f32
    %133 = vector.broadcast %cst_48 : f32 to vector<8x128xf32>
    %134 = arith.addf %133, %132 : vector<8x128xf32>
    %135 = arith.divf %133, %134 : vector<8x128xf32>
    %136 = vector.extract_strided_slice %129 {offsets = [0, 128], sizes = [8, 128], strides = [1, 1]} : vector<8x512xf32> to vector<8x128xf32>
    %137 = arith.negf %136 : vector<8x128xf32>
    %138 = math.exp %137 : vector<8x128xf32>
    %cst_49 = arith.constant 1.000000e+00 : f32
    %139 = vector.broadcast %cst_49 : f32 to vector<8x128xf32>
    %140 = arith.addf %139, %138 : vector<8x128xf32>
    %141 = arith.divf %139, %140 : vector<8x128xf32>
    %142 = vector.extract_strided_slice %129 {offsets = [0, 256], sizes = [8, 128], strides = [1, 1]} : vector<8x512xf32> to vector<8x128xf32>
    %143 = vector.extract_strided_slice %129 {offsets = [0, 384], sizes = [8, 128], strides = [1, 1]} : vector<8x512xf32> to vector<8x128xf32>
    %144 = arith.mulf %135, %143 : vector<8x128xf32>
    %145 = arith.addf %142, %144 : vector<8x128xf32>
    %146 = math.tanh %145 : vector<8x128xf32>
    %cst_50 = arith.constant 1.000000e+00 : f32
    %147 = vector.broadcast %cst_50 : f32 to vector<8x128xf32>
    %148 = arith.subf %147, %141 : vector<8x128xf32>
    %149 = arith.mulf %148, %146 : vector<8x128xf32>
    %150 = arith.mulf %141, %42 : vector<8x128xf32>
    %151 = arith.addf %149, %150 : vector<8x128xf32>
    %152 = vector.broadcast %2 : vector<1x128xf32> to vector<8x128xf32>
    %153 = arith.mulf %122, %152 : vector<8x128xf32>
    %cst_51 = arith.constant dense<0.000000e+00> : vector<8xf32>
    %154 = vector.multi_reduction <add>, %153, %cst_51 [1] : vector<8x128xf32> to vector<8xf32>
    %155 = vector.shape_cast %154 : vector<8xf32> to vector<8x1xf32>
    %156 = arith.truncf %151 : vector<8x128xf32> to vector<8x128xbf16>
    %c0_52 = arith.constant 0 : index
    %c0_53 = arith.constant 0 : index
    %157 = vector.load %arg1[%c0_52, %c0_53] : memref<128x128xbf16, #tpu.memory_space<vmem>>, vector<128x128xbf16>
    %cst_54 = arith.constant dense<0.000000e+00> : vector<8x128xf32>
    %158 = tpu.matmul %156, %157, %cst_54 {dimension_numbers = #tpu.dot_dimension_numbers<[1], [0], [0], [1], [0, 0, 1, 1], [], []>} : vector<8x128xbf16>, vector<128x128xbf16>, vector<8x128xf32> -> vector<8x128xf32>
    %159 = arith.addf %158, %0 : vector<8x128xf32>
    %cst_55 = arith.constant dense<0xFF800000> : vector<8xf32>
    %160 = vector.multi_reduction <maximumf>, %159, %cst_55 [1] : vector<8x128xf32> to vector<8xf32>
    %161 = vector.shape_cast %160 : vector<8xf32> to vector<8x1xf32>
    %162 = vector.broadcast %161 : vector<8x1xf32> to vector<8x128xf32>
    %163 = arith.subf %159, %162 : vector<8x128xf32>
    %164 = math.exp %163 : vector<8x128xf32>
    %cst_56 = arith.constant dense<0.000000e+00> : vector<8xf32>
    %165 = vector.multi_reduction <add>, %164, %cst_56 [1] : vector<8x128xf32> to vector<8xf32>
    %166 = vector.shape_cast %165 : vector<8xf32> to vector<8x1xf32>
    %167 = tpu.reciprocal %166 {approx = true} : vector<8x1xf32> -> vector<8x1xf32>
    %168 = vector.broadcast %167 : vector<8x1xf32> to vector<8x128xf32>
    %169 = arith.mulf %164, %168 : vector<8x128xf32>
    %170 = arith.truncf %169 : vector<8x128xf32> to vector<8x128xbf16>
    %c0_57 = arith.constant 0 : index
    %c0_58 = arith.constant 0 : index
    %171 = vector.load %arg2[%c0_57, %c0_58] : memref<128x128xbf16, #tpu.memory_space<vmem>>, vector<128x128xbf16>
    %cst_59 = arith.constant dense<0.000000e+00> : vector<8x128xf32>
    %172 = tpu.matmul %170, %171, %cst_59 {dimension_numbers = #tpu.dot_dimension_numbers<[1], [0], [0], [1], [0, 0, 1, 1], [], []>} : vector<8x128xbf16>, vector<128x128xbf16>, vector<8x128xf32> -> vector<8x128xf32>
    %c0_60 = arith.constant 0 : index
    %c0_61 = arith.constant 0 : index
    %173 = vector.load %arg3[%c0_60, %c0_61] : memref<128x128xbf16, #tpu.memory_space<vmem>>, vector<128x128xbf16>
    %cst_62 = arith.constant dense<0.000000e+00> : vector<8x128xf32>
    %174 = tpu.matmul %170, %173, %cst_62 {dimension_numbers = #tpu.dot_dimension_numbers<[1], [0], [0], [1], [0, 0, 1, 1], [], []>} : vector<8x128xbf16>, vector<128x128xbf16>, vector<8x128xf32> -> vector<8x128xf32>
    %175 = arith.truncf %151 : vector<8x128xf32> to vector<8x128xbf16>
    %c0_63 = arith.constant 0 : index
    %c0_64 = arith.constant 0 : index
    %176 = vector.load %arg7[%c0_63, %c0_64] : memref<128x128xbf16, #tpu.memory_space<vmem>>, vector<128x128xbf16>
    %cst_65 = arith.constant dense<0.000000e+00> : vector<8x128xf32>
    %177 = tpu.matmul %175, %176, %cst_65 {dimension_numbers = #tpu.dot_dimension_numbers<[1], [0], [0], [1], [0, 0, 1, 1], [], []>} : vector<8x128xbf16>, vector<128x128xbf16>, vector<8x128xf32> -> vector<8x128xf32>
    %178 = arith.truncf %172 : vector<8x128xf32> to vector<8x128xbf16>
    %c0_66 = arith.constant 0 : index
    %c0_67 = arith.constant 0 : index
    %179 = vector.load %arg8[%c0_66, %c0_67] : memref<128x128xbf16, #tpu.memory_space<vmem>>, vector<128x128xbf16>
    %cst_68 = arith.constant dense<0.000000e+00> : vector<8x128xf32>
    %180 = tpu.matmul %178, %179, %cst_68 {dimension_numbers = #tpu.dot_dimension_numbers<[1], [0], [0], [1], [0, 0, 1, 1], [], []>} : vector<8x128xbf16>, vector<128x128xbf16>, vector<8x128xf32> -> vector<8x128xf32>
    %181 = arith.addf %177, %180 : vector<8x128xf32>
    %182 = vector.extract_strided_slice %181 {offsets = [0, 32], sizes = [8, 1], strides = [1, 1]} : vector<8x128xf32> to vector<8x1xf32>
    %183 = arith.addf %182, %155 : vector<8x1xf32>
    %184 = arith.negf %183 : vector<8x1xf32>
    %185 = math.exp %184 : vector<8x1xf32>
    %cst_69 = arith.constant 1.000000e+00 : f32
    %186 = vector.broadcast %cst_69 : f32 to vector<8x1xf32>
    %187 = arith.addf %186, %185 : vector<8x1xf32>
    %188 = arith.divf %186, %187 : vector<8x1xf32>
    %189 = vector.broadcast %1 : vector<1x128xf32> to vector<8x128xf32>
    %190 = arith.addf %181, %189 : vector<8x128xf32>
    %cst_70 = arith.constant dense<0xFF800000> : vector<8xf32>
    %191 = vector.multi_reduction <maximumf>, %190, %cst_70 [1] : vector<8x128xf32> to vector<8xf32>
    %192 = vector.shape_cast %191 : vector<8xf32> to vector<8x1xf32>
    %193 = vector.broadcast %192 : vector<8x1xf32> to vector<8x128xf32>
    %194 = arith.subf %190, %193 : vector<8x128xf32>
    %195 = math.exp %194 : vector<8x128xf32>
    %cst_71 = arith.constant dense<0.000000e+00> : vector<8xf32>
    %196 = vector.multi_reduction <add>, %195, %cst_71 [1] : vector<8x128xf32> to vector<8xf32>
    %197 = vector.shape_cast %196 : vector<8xf32> to vector<8x1xf32>
    %198 = tpu.reciprocal %197 {approx = true} : vector<8x1xf32> -> vector<8x1xf32>
    %199 = vector.broadcast %198 : vector<8x1xf32> to vector<8x128xf32>
    %200 = arith.mulf %195, %199 : vector<8x128xf32>
    %201 = vector.broadcast %188 : vector<8x1xf32> to vector<8x128xf32>
    %202 = arith.mulf %201, %200 : vector<8x128xf32>
    %cst_72 = arith.constant 1.000000e+00 : f32
    %203 = vector.broadcast %cst_72 : f32 to vector<8x1xf32>
    %204 = arith.subf %203, %188 : vector<8x1xf32>
    %205 = vector.broadcast %204 : vector<8x1xf32> to vector<8x128xf32>
    %206 = arith.mulf %205, %174 : vector<8x128xf32>
    %207 = arith.addf %202, %206 : vector<8x128xf32>
    %cst_73 = arith.constant dense<0xFF800000> : vector<8xf32>
    %208 = vector.multi_reduction <maximumf>, %207, %cst_73 [1] : vector<8x128xf32> to vector<8xf32>
    %209 = vector.shape_cast %208 : vector<8xf32> to vector<8x1xf32>
    %210 = vector.broadcast %209 : vector<8x1xf32> to vector<8x128xf32>
    %211 = arith.cmpf oeq, %207, %210 : vector<8x128xf32>
    %c128_i32_74 = arith.constant 128 : i32
    %212 = vector.broadcast %c128_i32_74 : i32 to vector<8x128xi32>
    %213 = arith.select %211, %4, %212 : vector<8x128xi1>, vector<8x128xi32>
    %cst_75 = arith.constant dense<2147483647> : vector<8xi32>
    %214 = vector.multi_reduction <minsi>, %213, %cst_75 [1] : vector<8x128xi32> to vector<8xi32>
    %215 = vector.shape_cast %214 : vector<8xi32> to vector<8x1xi32>
    %c32_i32_76 = arith.constant 32 : i32
    %216 = vector.broadcast %c32_i32_76 : i32 to vector<8x1xi32>
    %217 = arith.cmpi sge, %215, %216 : vector<8x1xi32>
    %c3_i32_77 = arith.constant 3 : i32
    %218 = vector.broadcast %c3_i32_77 : i32 to vector<8x1xi32>
    %219 = arith.select %217, %218, %215 : vector<8x1xi1>, vector<8x1xi32>
    %220 = vector.broadcast %c1_i32_41 : i32 to vector<8x8xi32>
    %221 = arith.cmpi eq, %5, %220 : vector<8x8xi32>
    %222 = vector.shape_cast %219 : vector<8x1xi32> to vector<8x1xi32>
    %223 = vector.broadcast %222 : vector<8x1xi32> to vector<8x8xi32>
    %224 = arith.select %221, %223, %115 : vector<8x8xi1>, vector<8x8xi32>
    %225 = vector.shape_cast %209 : vector<8x1xf32> to vector<8x1xf32>
    %226 = vector.broadcast %225 : vector<8x1xf32> to vector<8x8xf32>
    %227 = arith.select %221, %226, %118 : vector<8x8xi1>, vector<8x8xf32>
    %c2_i32 = arith.constant 2 : i32
    %228 = vector.broadcast %219 : vector<8x1xi32> to vector<8x128xi32>
    %229 = arith.cmpi eq, %3, %228 : vector<8x128xi32>
    %230 = arith.extui %229 : vector<8x128xi1> to vector<8x128xi32>
    %231 = arith.sitofp %230 : vector<8x128xi32> to vector<8x128xf32>
    %232 = arith.truncf %231 : vector<8x128xf32> to vector<8x128xbf16>
    %c0_78 = arith.constant 0 : index
    %c0_79 = arith.constant 0 : index
    %233 = vector.load %arg5[%c0_78, %c0_79] : memref<128x512xbf16, #tpu.memory_space<vmem>>, vector<128x512xbf16>
    %cst_80 = arith.constant dense<0.000000e+00> : vector<8x512xf32>
    %234 = tpu.matmul %232, %233, %cst_80 {dimension_numbers = #tpu.dot_dimension_numbers<[1], [0], [0], [1], [0, 0, 1, 1], [], []>} : vector<8x128xbf16>, vector<128x512xbf16>, vector<8x512xf32> -> vector<8x512xf32>
    %235 = arith.truncf %151 : vector<8x128xf32> to vector<8x128xbf16>
    %c0_81 = arith.constant 0 : index
    %c0_82 = arith.constant 0 : index
    %236 = vector.load %arg6[%c0_81, %c0_82] : memref<128x512xbf16, #tpu.memory_space<vmem>>, vector<128x512xbf16>
    %cst_83 = arith.constant dense<0.000000e+00> : vector<8x512xf32>
    %237 = tpu.matmul %235, %236, %cst_83 {dimension_numbers = #tpu.dot_dimension_numbers<[1], [0], [0], [1], [0, 0, 1, 1], [], []>} : vector<8x128xbf16>, vector<128x512xbf16>, vector<8x512xf32> -> vector<8x512xf32>
    %238 = arith.addf %234, %237 : vector<8x512xf32>
    %239 = vector.extract_strided_slice %238 {offsets = [0, 0], sizes = [8, 128], strides = [1, 1]} : vector<8x512xf32> to vector<8x128xf32>
    %240 = arith.negf %239 : vector<8x128xf32>
    %241 = math.exp %240 : vector<8x128xf32>
    %cst_84 = arith.constant 1.000000e+00 : f32
    %242 = vector.broadcast %cst_84 : f32 to vector<8x128xf32>
    %243 = arith.addf %242, %241 : vector<8x128xf32>
    %244 = arith.divf %242, %243 : vector<8x128xf32>
    %245 = vector.extract_strided_slice %238 {offsets = [0, 128], sizes = [8, 128], strides = [1, 1]} : vector<8x512xf32> to vector<8x128xf32>
    %246 = arith.negf %245 : vector<8x128xf32>
    %247 = math.exp %246 : vector<8x128xf32>
    %cst_85 = arith.constant 1.000000e+00 : f32
    %248 = vector.broadcast %cst_85 : f32 to vector<8x128xf32>
    %249 = arith.addf %248, %247 : vector<8x128xf32>
    %250 = arith.divf %248, %249 : vector<8x128xf32>
    %251 = vector.extract_strided_slice %238 {offsets = [0, 256], sizes = [8, 128], strides = [1, 1]} : vector<8x512xf32> to vector<8x128xf32>
    %252 = vector.extract_strided_slice %238 {offsets = [0, 384], sizes = [8, 128], strides = [1, 1]} : vector<8x512xf32> to vector<8x128xf32>
    %253 = arith.mulf %244, %252 : vector<8x128xf32>
    %254 = arith.addf %251, %253 : vector<8x128xf32>
    %255 = math.tanh %254 : vector<8x128xf32>
    %cst_86 = arith.constant 1.000000e+00 : f32
    %256 = vector.broadcast %cst_86 : f32 to vector<8x128xf32>
    %257 = arith.subf %256, %250 : vector<8x128xf32>
    %258 = arith.mulf %257, %255 : vector<8x128xf32>
    %259 = arith.mulf %250, %151 : vector<8x128xf32>
    %260 = arith.addf %258, %259 : vector<8x128xf32>
    %261 = vector.broadcast %2 : vector<1x128xf32> to vector<8x128xf32>
    %262 = arith.mulf %231, %261 : vector<8x128xf32>
    %cst_87 = arith.constant dense<0.000000e+00> : vector<8xf32>
    %263 = vector.multi_reduction <add>, %262, %cst_87 [1] : vector<8x128xf32> to vector<8xf32>
    %264 = vector.shape_cast %263 : vector<8xf32> to vector<8x1xf32>
    %265 = arith.truncf %260 : vector<8x128xf32> to vector<8x128xbf16>
    %c0_88 = arith.constant 0 : index
    %c0_89 = arith.constant 0 : index
    %266 = vector.load %arg1[%c0_88, %c0_89] : memref<128x128xbf16, #tpu.memory_space<vmem>>, vector<128x128xbf16>
    %cst_90 = arith.constant dense<0.000000e+00> : vector<8x128xf32>
    %267 = tpu.matmul %265, %266, %cst_90 {dimension_numbers = #tpu.dot_dimension_numbers<[1], [0], [0], [1], [0, 0, 1, 1], [], []>} : vector<8x128xbf16>, vector<128x128xbf16>, vector<8x128xf32> -> vector<8x128xf32>
    %268 = arith.addf %267, %0 : vector<8x128xf32>
    %cst_91 = arith.constant dense<0xFF800000> : vector<8xf32>
    %269 = vector.multi_reduction <maximumf>, %268, %cst_91 [1] : vector<8x128xf32> to vector<8xf32>
    %270 = vector.shape_cast %269 : vector<8xf32> to vector<8x1xf32>
    %271 = vector.broadcast %270 : vector<8x1xf32> to vector<8x128xf32>
    %272 = arith.subf %268, %271 : vector<8x128xf32>
    %273 = math.exp %272 : vector<8x128xf32>
    %cst_92 = arith.constant dense<0.000000e+00> : vector<8xf32>
    %274 = vector.multi_reduction <add>, %273, %cst_92 [1] : vector<8x128xf32> to vector<8xf32>
    %275 = vector.shape_cast %274 : vector<8xf32> to vector<8x1xf32>
    %276 = tpu.reciprocal %275 {approx = true} : vector<8x1xf32> -> vector<8x1xf32>
    %277 = vector.broadcast %276 : vector<8x1xf32> to vector<8x128xf32>
    %278 = arith.mulf %273, %277 : vector<8x128xf32>
    %279 = arith.truncf %278 : vector<8x128xf32> to vector<8x128xbf16>
    %c0_93 = arith.constant 0 : index
    %c0_94 = arith.constant 0 : index
    %280 = vector.load %arg2[%c0_93, %c0_94] : memref<128x128xbf16, #tpu.memory_space<vmem>>, vector<128x128xbf16>
    %cst_95 = arith.constant dense<0.000000e+00> : vector<8x128xf32>
    %281 = tpu.matmul %279, %280, %cst_95 {dimension_numbers = #tpu.dot_dimension_numbers<[1], [0], [0], [1], [0, 0, 1, 1], [], []>} : vector<8x128xbf16>, vector<128x128xbf16>, vector<8x128xf32> -> vector<8x128xf32>
    %c0_96 = arith.constant 0 : index
    %c0_97 = arith.constant 0 : index
    %282 = vector.load %arg3[%c0_96, %c0_97] : memref<128x128xbf16, #tpu.memory_space<vmem>>, vector<128x128xbf16>
    %cst_98 = arith.constant dense<0.000000e+00> : vector<8x128xf32>
    %283 = tpu.matmul %279, %282, %cst_98 {dimension_numbers = #tpu.dot_dimension_numbers<[1], [0], [0], [1], [0, 0, 1, 1], [], []>} : vector<8x128xbf16>, vector<128x128xbf16>, vector<8x128xf32> -> vector<8x128xf32>
    %284 = arith.truncf %260 : vector<8x128xf32> to vector<8x128xbf16>
    %c0_99 = arith.constant 0 : index
    %c0_100 = arith.constant 0 : index
    %285 = vector.load %arg7[%c0_99, %c0_100] : memref<128x128xbf16, #tpu.memory_space<vmem>>, vector<128x128xbf16>
    %cst_101 = arith.constant dense<0.000000e+00> : vector<8x128xf32>
    %286 = tpu.matmul %284, %285, %cst_101 {dimension_numbers = #tpu.dot_dimension_numbers<[1], [0], [0], [1], [0, 0, 1, 1], [], []>} : vector<8x128xbf16>, vector<128x128xbf16>, vector<8x128xf32> -> vector<8x128xf32>
    %287 = arith.truncf %281 : vector<8x128xf32> to vector<8x128xbf16>
    %c0_102 = arith.constant 0 : index
    %c0_103 = arith.constant 0 : index
    %288 = vector.load %arg8[%c0_102, %c0_103] : memref<128x128xbf16, #tpu.memory_space<vmem>>, vector<128x128xbf16>
    %cst_104 = arith.constant dense<0.000000e+00> : vector<8x128xf32>
    %289 = tpu.matmul %287, %288, %cst_104 {dimension_numbers = #tpu.dot_dimension_numbers<[1], [0], [0], [1], [0, 0, 1, 1], [], []>} : vector<8x128xbf16>, vector<128x128xbf16>, vector<8x128xf32> -> vector<8x128xf32>
    %290 = arith.addf %286, %289 : vector<8x128xf32>
    %291 = vector.extract_strided_slice %290 {offsets = [0, 32], sizes = [8, 1], strides = [1, 1]} : vector<8x128xf32> to vector<8x1xf32>
    %292 = arith.addf %291, %264 : vector<8x1xf32>
    %293 = arith.negf %292 : vector<8x1xf32>
    %294 = math.exp %293 : vector<8x1xf32>
    %cst_105 = arith.constant 1.000000e+00 : f32
    %295 = vector.broadcast %cst_105 : f32 to vector<8x1xf32>
    %296 = arith.addf %295, %294 : vector<8x1xf32>
    %297 = arith.divf %295, %296 : vector<8x1xf32>
    %298 = vector.broadcast %1 : vector<1x128xf32> to vector<8x128xf32>
    %299 = arith.addf %290, %298 : vector<8x128xf32>
    %cst_106 = arith.constant dense<0xFF800000> : vector<8xf32>
    %300 = vector.multi_reduction <maximumf>, %299, %cst_106 [1] : vector<8x128xf32> to vector<8xf32>
    %301 = vector.shape_cast %300 : vector<8xf32> to vector<8x1xf32>
    %302 = vector.broadcast %301 : vector<8x1xf32> to vector<8x128xf32>
    %303 = arith.subf %299, %302 : vector<8x128xf32>
    %304 = math.exp %303 : vector<8x128xf32>
    %cst_107 = arith.constant dense<0.000000e+00> : vector<8xf32>
    %305 = vector.multi_reduction <add>, %304, %cst_107 [1] : vector<8x128xf32> to vector<8xf32>
    %306 = vector.shape_cast %305 : vector<8xf32> to vector<8x1xf32>
    %307 = tpu.reciprocal %306 {approx = true} : vector<8x1xf32> -> vector<8x1xf32>
    %308 = vector.broadcast %307 : vector<8x1xf32> to vector<8x128xf32>
    %309 = arith.mulf %304, %308 : vector<8x128xf32>
    %310 = vector.broadcast %297 : vector<8x1xf32> to vector<8x128xf32>
    %311 = arith.mulf %310, %309 : vector<8x128xf32>
    %cst_108 = arith.constant 1.000000e+00 : f32
    %312 = vector.broadcast %cst_108 : f32 to vector<8x1xf32>
    %313 = arith.subf %312, %297 : vector<8x1xf32>
    %314 = vector.broadcast %313 : vector<8x1xf32> to vector<8x128xf32>
    %315 = arith.mulf %314, %283 : vector<8x128xf32>
    %316 = arith.addf %311, %315 : vector<8x128xf32>
    %cst_109 = arith.constant dense<0xFF800000> : vector<8xf32>
    %317 = vector.multi_reduction <maximumf>, %316, %cst_109 [1] : vector<8x128xf32> to vector<8xf32>
    %318 = vector.shape_cast %317 : vector<8xf32> to vector<8x1xf32>
    %319 = vector.broadcast %318 : vector<8x1xf32> to vector<8x128xf32>
    %320 = arith.cmpf oeq, %316, %319 : vector<8x128xf32>
    %c128_i32_110 = arith.constant 128 : i32
    %321 = vector.broadcast %c128_i32_110 : i32 to vector<8x128xi32>
    %322 = arith.select %320, %4, %321 : vector<8x128xi1>, vector<8x128xi32>
    %cst_111 = arith.constant dense<2147483647> : vector<8xi32>
    %323 = vector.multi_reduction <minsi>, %322, %cst_111 [1] : vector<8x128xi32> to vector<8xi32>
    %324 = vector.shape_cast %323 : vector<8xi32> to vector<8x1xi32>
    %c32_i32_112 = arith.constant 32 : i32
    %325 = vector.broadcast %c32_i32_112 : i32 to vector<8x1xi32>
    %326 = arith.cmpi sge, %324, %325 : vector<8x1xi32>
    %c3_i32_113 = arith.constant 3 : i32
    %327 = vector.broadcast %c3_i32_113 : i32 to vector<8x1xi32>
    %328 = arith.select %326, %327, %324 : vector<8x1xi1>, vector<8x1xi32>
    %329 = vector.broadcast %c2_i32 : i32 to vector<8x8xi32>
    %330 = arith.cmpi eq, %5, %329 : vector<8x8xi32>
    %331 = vector.shape_cast %328 : vector<8x1xi32> to vector<8x1xi32>
    %332 = vector.broadcast %331 : vector<8x1xi32> to vector<8x8xi32>
    %333 = arith.select %330, %332, %224 : vector<8x8xi1>, vector<8x8xi32>
    %334 = vector.shape_cast %318 : vector<8x1xf32> to vector<8x1xf32>
    %335 = vector.broadcast %334 : vector<8x1xf32> to vector<8x8xf32>
    %336 = arith.select %330, %335, %227 : vector<8x8xi1>, vector<8x8xf32>
    %c3_i32_114 = arith.constant 3 : i32
    %337 = vector.broadcast %328 : vector<8x1xi32> to vector<8x128xi32>
    %338 = arith.cmpi eq, %3, %337 : vector<8x128xi32>
    %339 = arith.extui %338 : vector<8x128xi1> to vector<8x128xi32>
    %340 = arith.sitofp %339 : vector<8x128xi32> to vector<8x128xf32>
    %341 = arith.truncf %340 : vector<8x128xf32> to vector<8x128xbf16>
    %c0_115 = arith.constant 0 : index
    %c0_116 = arith.constant 0 : index
    %342 = vector.load %arg5[%c0_115, %c0_116] : memref<128x512xbf16, #tpu.memory_space<vmem>>, vector<128x512xbf16>
    %cst_117 = arith.constant dense<0.000000e+00> : vector<8x512xf32>
    %343 = tpu.matmul %341, %342, %cst_117 {dimension_numbers = #tpu.dot_dimension_numbers<[1], [0], [0], [1], [0, 0, 1, 1], [], []>} : vector<8x128xbf16>, vector<128x512xbf16>, vector<8x512xf32> -> vector<8x512xf32>
    %344 = arith.truncf %260 : vector<8x128xf32> to vector<8x128xbf16>
    %c0_118 = arith.constant 0 : index
    %c0_119 = arith.constant 0 : index
    %345 = vector.load %arg6[%c0_118, %c0_119] : memref<128x512xbf16, #tpu.memory_space<vmem>>, vector<128x512xbf16>
    %cst_120 = arith.constant dense<0.000000e+00> : vector<8x512xf32>
    %346 = tpu.matmul %344, %345, %cst_120 {dimension_numbers = #tpu.dot_dimension_numbers<[1], [0], [0], [1], [0, 0, 1, 1], [], []>} : vector<8x128xbf16>, vector<128x512xbf16>, vector<8x512xf32> -> vector<8x512xf32>
    %347 = arith.addf %343, %346 : vector<8x512xf32>
    %348 = vector.extract_strided_slice %347 {offsets = [0, 0], sizes = [8, 128], strides = [1, 1]} : vector<8x512xf32> to vector<8x128xf32>
    %349 = arith.negf %348 : vector<8x128xf32>
    %350 = math.exp %349 : vector<8x128xf32>
    %cst_121 = arith.constant 1.000000e+00 : f32
    %351 = vector.broadcast %cst_121 : f32 to vector<8x128xf32>
    %352 = arith.addf %351, %350 : vector<8x128xf32>
    %353 = arith.divf %351, %352 : vector<8x128xf32>
    %354 = vector.extract_strided_slice %347 {offsets = [0, 128], sizes = [8, 128], strides = [1, 1]} : vector<8x512xf32> to vector<8x128xf32>
    %355 = arith.negf %354 : vector<8x128xf32>
    %356 = math.exp %355 : vector<8x128xf32>
    %cst_122 = arith.constant 1.000000e+00 : f32
    %357 = vector.broadcast %cst_122 : f32 to vector<8x128xf32>
    %358 = arith.addf %357, %356 : vector<8x128xf32>
    %359 = arith.divf %357, %358 : vector<8x128xf32>
    %360 = vector.extract_strided_slice %347 {offsets = [0, 256], sizes = [8, 128], strides = [1, 1]} : vector<8x512xf32> to vector<8x128xf32>
    %361 = vector.extract_strided_slice %347 {offsets = [0, 384], sizes = [8, 128], strides = [1, 1]} : vector<8x512xf32> to vector<8x128xf32>
    %362 = arith.mulf %353, %361 : vector<8x128xf32>
    %363 = arith.addf %360, %362 : vector<8x128xf32>
    %364 = math.tanh %363 : vector<8x128xf32>
    %cst_123 = arith.constant 1.000000e+00 : f32
    %365 = vector.broadcast %cst_123 : f32 to vector<8x128xf32>
    %366 = arith.subf %365, %359 : vector<8x128xf32>
    %367 = arith.mulf %366, %364 : vector<8x128xf32>
    %368 = arith.mulf %359, %260 : vector<8x128xf32>
    %369 = arith.addf %367, %368 : vector<8x128xf32>
    %370 = vector.broadcast %2 : vector<1x128xf32> to vector<8x128xf32>
    %371 = arith.mulf %340, %370 : vector<8x128xf32>
    %cst_124 = arith.constant dense<0.000000e+00> : vector<8xf32>
    %372 = vector.multi_reduction <add>, %371, %cst_124 [1] : vector<8x128xf32> to vector<8xf32>
    %373 = vector.shape_cast %372 : vector<8xf32> to vector<8x1xf32>
    %374 = arith.truncf %369 : vector<8x128xf32> to vector<8x128xbf16>
    %c0_125 = arith.constant 0 : index
    %c0_126 = arith.constant 0 : index
    %375 = vector.load %arg1[%c0_125, %c0_126] : memref<128x128xbf16, #tpu.memory_space<vmem>>, vector<128x128xbf16>
    %cst_127 = arith.constant dense<0.000000e+00> : vector<8x128xf32>
    %376 = tpu.matmul %374, %375, %cst_127 {dimension_numbers = #tpu.dot_dimension_numbers<[1], [0], [0], [1], [0, 0, 1, 1], [], []>} : vector<8x128xbf16>, vector<128x128xbf16>, vector<8x128xf32> -> vector<8x128xf32>
    %377 = arith.addf %376, %0 : vector<8x128xf32>
    %cst_128 = arith.constant dense<0xFF800000> : vector<8xf32>
    %378 = vector.multi_reduction <maximumf>, %377, %cst_128 [1] : vector<8x128xf32> to vector<8xf32>
    %379 = vector.shape_cast %378 : vector<8xf32> to vector<8x1xf32>
    %380 = vector.broadcast %379 : vector<8x1xf32> to vector<8x128xf32>
    %381 = arith.subf %377, %380 : vector<8x128xf32>
    %382 = math.exp %381 : vector<8x128xf32>
    %cst_129 = arith.constant dense<0.000000e+00> : vector<8xf32>
    %383 = vector.multi_reduction <add>, %382, %cst_129 [1] : vector<8x128xf32> to vector<8xf32>
    %384 = vector.shape_cast %383 : vector<8xf32> to vector<8x1xf32>
    %385 = tpu.reciprocal %384 {approx = true} : vector<8x1xf32> -> vector<8x1xf32>
    %386 = vector.broadcast %385 : vector<8x1xf32> to vector<8x128xf32>
    %387 = arith.mulf %382, %386 : vector<8x128xf32>
    %388 = arith.truncf %387 : vector<8x128xf32> to vector<8x128xbf16>
    %c0_130 = arith.constant 0 : index
    %c0_131 = arith.constant 0 : index
    %389 = vector.load %arg2[%c0_130, %c0_131] : memref<128x128xbf16, #tpu.memory_space<vmem>>, vector<128x128xbf16>
    %cst_132 = arith.constant dense<0.000000e+00> : vector<8x128xf32>
    %390 = tpu.matmul %388, %389, %cst_132 {dimension_numbers = #tpu.dot_dimension_numbers<[1], [0], [0], [1], [0, 0, 1, 1], [], []>} : vector<8x128xbf16>, vector<128x128xbf16>, vector<8x128xf32> -> vector<8x128xf32>
    %c0_133 = arith.constant 0 : index
    %c0_134 = arith.constant 0 : index
    %391 = vector.load %arg3[%c0_133, %c0_134] : memref<128x128xbf16, #tpu.memory_space<vmem>>, vector<128x128xbf16>
    %cst_135 = arith.constant dense<0.000000e+00> : vector<8x128xf32>
    %392 = tpu.matmul %388, %391, %cst_135 {dimension_numbers = #tpu.dot_dimension_numbers<[1], [0], [0], [1], [0, 0, 1, 1], [], []>} : vector<8x128xbf16>, vector<128x128xbf16>, vector<8x128xf32> -> vector<8x128xf32>
    %393 = arith.truncf %369 : vector<8x128xf32> to vector<8x128xbf16>
    %c0_136 = arith.constant 0 : index
    %c0_137 = arith.constant 0 : index
    %394 = vector.load %arg7[%c0_136, %c0_137] : memref<128x128xbf16, #tpu.memory_space<vmem>>, vector<128x128xbf16>
    %cst_138 = arith.constant dense<0.000000e+00> : vector<8x128xf32>
    %395 = tpu.matmul %393, %394, %cst_138 {dimension_numbers = #tpu.dot_dimension_numbers<[1], [0], [0], [1], [0, 0, 1, 1], [], []>} : vector<8x128xbf16>, vector<128x128xbf16>, vector<8x128xf32> -> vector<8x128xf32>
    %396 = arith.truncf %390 : vector<8x128xf32> to vector<8x128xbf16>
    %c0_139 = arith.constant 0 : index
    %c0_140 = arith.constant 0 : index
    %397 = vector.load %arg8[%c0_139, %c0_140] : memref<128x128xbf16, #tpu.memory_space<vmem>>, vector<128x128xbf16>
    %cst_141 = arith.constant dense<0.000000e+00> : vector<8x128xf32>
    %398 = tpu.matmul %396, %397, %cst_141 {dimension_numbers = #tpu.dot_dimension_numbers<[1], [0], [0], [1], [0, 0, 1, 1], [], []>} : vector<8x128xbf16>, vector<128x128xbf16>, vector<8x128xf32> -> vector<8x128xf32>
    %399 = arith.addf %395, %398 : vector<8x128xf32>
    %400 = vector.extract_strided_slice %399 {offsets = [0, 32], sizes = [8, 1], strides = [1, 1]} : vector<8x128xf32> to vector<8x1xf32>
    %401 = arith.addf %400, %373 : vector<8x1xf32>
    %402 = arith.negf %401 : vector<8x1xf32>
    %403 = math.exp %402 : vector<8x1xf32>
    %cst_142 = arith.constant 1.000000e+00 : f32
    %404 = vector.broadcast %cst_142 : f32 to vector<8x1xf32>
    %405 = arith.addf %404, %403 : vector<8x1xf32>
    %406 = arith.divf %404, %405 : vector<8x1xf32>
    %407 = vector.broadcast %1 : vector<1x128xf32> to vector<8x128xf32>
    %408 = arith.addf %399, %407 : vector<8x128xf32>
    %cst_143 = arith.constant dense<0xFF800000> : vector<8xf32>
    %409 = vector.multi_reduction <maximumf>, %408, %cst_143 [1] : vector<8x128xf32> to vector<8xf32>
    %410 = vector.shape_cast %409 : vector<8xf32> to vector<8x1xf32>
    %411 = vector.broadcast %410 : vector<8x1xf32> to vector<8x128xf32>
    %412 = arith.subf %408, %411 : vector<8x128xf32>
    %413 = math.exp %412 : vector<8x128xf32>
    %cst_144 = arith.constant dense<0.000000e+00> : vector<8xf32>
    %414 = vector.multi_reduction <add>, %413, %cst_144 [1] : vector<8x128xf32> to vector<8xf32>
    %415 = vector.shape_cast %414 : vector<8xf32> to vector<8x1xf32>
    %416 = tpu.reciprocal %415 {approx = true} : vector<8x1xf32> -> vector<8x1xf32>
    %417 = vector.broadcast %416 : vector<8x1xf32> to vector<8x128xf32>
    %418 = arith.mulf %413, %417 : vector<8x128xf32>
    %419 = vector.broadcast %406 : vector<8x1xf32> to vector<8x128xf32>
    %420 = arith.mulf %419, %418 : vector<8x128xf32>
    %cst_145 = arith.constant 1.000000e+00 : f32
    %421 = vector.broadcast %cst_145 : f32 to vector<8x1xf32>
    %422 = arith.subf %421, %406 : vector<8x1xf32>
    %423 = vector.broadcast %422 : vector<8x1xf32> to vector<8x128xf32>
    %424 = arith.mulf %423, %392 : vector<8x128xf32>
    %425 = arith.addf %420, %424 : vector<8x128xf32>
    %cst_146 = arith.constant dense<0xFF800000> : vector<8xf32>
    %426 = vector.multi_reduction <maximumf>, %425, %cst_146 [1] : vector<8x128xf32> to vector<8xf32>
    %427 = vector.shape_cast %426 : vector<8xf32> to vector<8x1xf32>
    %428 = vector.broadcast %427 : vector<8x1xf32> to vector<8x128xf32>
    %429 = arith.cmpf oeq, %425, %428 : vector<8x128xf32>
    %c128_i32_147 = arith.constant 128 : i32
    %430 = vector.broadcast %c128_i32_147 : i32 to vector<8x128xi32>
    %431 = arith.select %429, %4, %430 : vector<8x128xi1>, vector<8x128xi32>
    %cst_148 = arith.constant dense<2147483647> : vector<8xi32>
    %432 = vector.multi_reduction <minsi>, %431, %cst_148 [1] : vector<8x128xi32> to vector<8xi32>
    %433 = vector.shape_cast %432 : vector<8xi32> to vector<8x1xi32>
    %c32_i32_149 = arith.constant 32 : i32
    %434 = vector.broadcast %c32_i32_149 : i32 to vector<8x1xi32>
    %435 = arith.cmpi sge, %433, %434 : vector<8x1xi32>
    %c3_i32_150 = arith.constant 3 : i32
    %436 = vector.broadcast %c3_i32_150 : i32 to vector<8x1xi32>
    %437 = arith.select %435, %436, %433 : vector<8x1xi1>, vector<8x1xi32>
    %438 = vector.broadcast %c3_i32_114 : i32 to vector<8x8xi32>
    %439 = arith.cmpi eq, %5, %438 : vector<8x8xi32>
    %440 = vector.shape_cast %437 : vector<8x1xi32> to vector<8x1xi32>
    %441 = vector.broadcast %440 : vector<8x1xi32> to vector<8x8xi32>
    %442 = arith.select %439, %441, %333 : vector<8x8xi1>, vector<8x8xi32>
    %443 = vector.shape_cast %427 : vector<8x1xf32> to vector<8x1xf32>
    %444 = vector.broadcast %443 : vector<8x1xf32> to vector<8x8xf32>
    %445 = arith.select %439, %444, %336 : vector<8x8xi1>, vector<8x8xf32>
    %c4_i32 = arith.constant 4 : i32
    %446 = vector.broadcast %437 : vector<8x1xi32> to vector<8x128xi32>
    %447 = arith.cmpi eq, %3, %446 : vector<8x128xi32>
    %448 = arith.extui %447 : vector<8x128xi1> to vector<8x128xi32>
    %449 = arith.sitofp %448 : vector<8x128xi32> to vector<8x128xf32>
    %450 = arith.truncf %449 : vector<8x128xf32> to vector<8x128xbf16>
    %c0_151 = arith.constant 0 : index
    %c0_152 = arith.constant 0 : index
    %451 = vector.load %arg5[%c0_151, %c0_152] : memref<128x512xbf16, #tpu.memory_space<vmem>>, vector<128x512xbf16>
    %cst_153 = arith.constant dense<0.000000e+00> : vector<8x512xf32>
    %452 = tpu.matmul %450, %451, %cst_153 {dimension_numbers = #tpu.dot_dimension_numbers<[1], [0], [0], [1], [0, 0, 1, 1], [], []>} : vector<8x128xbf16>, vector<128x512xbf16>, vector<8x512xf32> -> vector<8x512xf32>
    %453 = arith.truncf %369 : vector<8x128xf32> to vector<8x128xbf16>
    %c0_154 = arith.constant 0 : index
    %c0_155 = arith.constant 0 : index
    %454 = vector.load %arg6[%c0_154, %c0_155] : memref<128x512xbf16, #tpu.memory_space<vmem>>, vector<128x512xbf16>
    %cst_156 = arith.constant dense<0.000000e+00> : vector<8x512xf32>
    %455 = tpu.matmul %453, %454, %cst_156 {dimension_numbers = #tpu.dot_dimension_numbers<[1], [0], [0], [1], [0, 0, 1, 1], [], []>} : vector<8x128xbf16>, vector<128x512xbf16>, vector<8x512xf32> -> vector<8x512xf32>
    %456 = arith.addf %452, %455 : vector<8x512xf32>
    %457 = vector.extract_strided_slice %456 {offsets = [0, 0], sizes = [8, 128], strides = [1, 1]} : vector<8x512xf32> to vector<8x128xf32>
    %458 = arith.negf %457 : vector<8x128xf32>
    %459 = math.exp %458 : vector<8x128xf32>
    %cst_157 = arith.constant 1.000000e+00 : f32
    %460 = vector.broadcast %cst_157 : f32 to vector<8x128xf32>
    %461 = arith.addf %460, %459 : vector<8x128xf32>
    %462 = arith.divf %460, %461 : vector<8x128xf32>
    %463 = vector.extract_strided_slice %456 {offsets = [0, 128], sizes = [8, 128], strides = [1, 1]} : vector<8x512xf32> to vector<8x128xf32>
    %464 = arith.negf %463 : vector<8x128xf32>
    %465 = math.exp %464 : vector<8x128xf32>
    %cst_158 = arith.constant 1.000000e+00 : f32
    %466 = vector.broadcast %cst_158 : f32 to vector<8x128xf32>
    %467 = arith.addf %466, %465 : vector<8x128xf32>
    %468 = arith.divf %466, %467 : vector<8x128xf32>
    %469 = vector.extract_strided_slice %456 {offsets = [0, 256], sizes = [8, 128], strides = [1, 1]} : vector<8x512xf32> to vector<8x128xf32>
    %470 = vector.extract_strided_slice %456 {offsets = [0, 384], sizes = [8, 128], strides = [1, 1]} : vector<8x512xf32> to vector<8x128xf32>
    %471 = arith.mulf %462, %470 : vector<8x128xf32>
    %472 = arith.addf %469, %471 : vector<8x128xf32>
    %473 = math.tanh %472 : vector<8x128xf32>
    %cst_159 = arith.constant 1.000000e+00 : f32
    %474 = vector.broadcast %cst_159 : f32 to vector<8x128xf32>
    %475 = arith.subf %474, %468 : vector<8x128xf32>
    %476 = arith.mulf %475, %473 : vector<8x128xf32>
    %477 = arith.mulf %468, %369 : vector<8x128xf32>
    %478 = arith.addf %476, %477 : vector<8x128xf32>
    %479 = vector.broadcast %2 : vector<1x128xf32> to vector<8x128xf32>
    %480 = arith.mulf %449, %479 : vector<8x128xf32>
    %cst_160 = arith.constant dense<0.000000e+00> : vector<8xf32>
    %481 = vector.multi_reduction <add>, %480, %cst_160 [1] : vector<8x128xf32> to vector<8xf32>
    %482 = vector.shape_cast %481 : vector<8xf32> to vector<8x1xf32>
    %483 = arith.truncf %478 : vector<8x128xf32> to vector<8x128xbf16>
    %c0_161 = arith.constant 0 : index
    %c0_162 = arith.constant 0 : index
    %484 = vector.load %arg1[%c0_161, %c0_162] : memref<128x128xbf16, #tpu.memory_space<vmem>>, vector<128x128xbf16>
    %cst_163 = arith.constant dense<0.000000e+00> : vector<8x128xf32>
    %485 = tpu.matmul %483, %484, %cst_163 {dimension_numbers = #tpu.dot_dimension_numbers<[1], [0], [0], [1], [0, 0, 1, 1], [], []>} : vector<8x128xbf16>, vector<128x128xbf16>, vector<8x128xf32> -> vector<8x128xf32>
    %486 = arith.addf %485, %0 : vector<8x128xf32>
    %cst_164 = arith.constant dense<0xFF800000> : vector<8xf32>
    %487 = vector.multi_reduction <maximumf>, %486, %cst_164 [1] : vector<8x128xf32> to vector<8xf32>
    %488 = vector.shape_cast %487 : vector<8xf32> to vector<8x1xf32>
    %489 = vector.broadcast %488 : vector<8x1xf32> to vector<8x128xf32>
    %490 = arith.subf %486, %489 : vector<8x128xf32>
    %491 = math.exp %490 : vector<8x128xf32>
    %cst_165 = arith.constant dense<0.000000e+00> : vector<8xf32>
    %492 = vector.multi_reduction <add>, %491, %cst_165 [1] : vector<8x128xf32> to vector<8xf32>
    %493 = vector.shape_cast %492 : vector<8xf32> to vector<8x1xf32>
    %494 = tpu.reciprocal %493 {approx = true} : vector<8x1xf32> -> vector<8x1xf32>
    %495 = vector.broadcast %494 : vector<8x1xf32> to vector<8x128xf32>
    %496 = arith.mulf %491, %495 : vector<8x128xf32>
    %497 = arith.truncf %496 : vector<8x128xf32> to vector<8x128xbf16>
    %c0_166 = arith.constant 0 : index
    %c0_167 = arith.constant 0 : index
    %498 = vector.load %arg2[%c0_166, %c0_167] : memref<128x128xbf16, #tpu.memory_space<vmem>>, vector<128x128xbf16>
    %cst_168 = arith.constant dense<0.000000e+00> : vector<8x128xf32>
    %499 = tpu.matmul %497, %498, %cst_168 {dimension_numbers = #tpu.dot_dimension_numbers<[1], [0], [0], [1], [0, 0, 1, 1], [], []>} : vector<8x128xbf16>, vector<128x128xbf16>, vector<8x128xf32> -> vector<8x128xf32>
    %c0_169 = arith.constant 0 : index
    %c0_170 = arith.constant 0 : index
    %500 = vector.load %arg3[%c0_169, %c0_170] : memref<128x128xbf16, #tpu.memory_space<vmem>>, vector<128x128xbf16>
    %cst_171 = arith.constant dense<0.000000e+00> : vector<8x128xf32>
    %501 = tpu.matmul %497, %500, %cst_171 {dimension_numbers = #tpu.dot_dimension_numbers<[1], [0], [0], [1], [0, 0, 1, 1], [], []>} : vector<8x128xbf16>, vector<128x128xbf16>, vector<8x128xf32> -> vector<8x128xf32>
    %502 = arith.truncf %478 : vector<8x128xf32> to vector<8x128xbf16>
    %c0_172 = arith.constant 0 : index
    %c0_173 = arith.constant 0 : index
    %503 = vector.load %arg7[%c0_172, %c0_173] : memref<128x128xbf16, #tpu.memory_space<vmem>>, vector<128x128xbf16>
    %cst_174 = arith.constant dense<0.000000e+00> : vector<8x128xf32>
    %504 = tpu.matmul %502, %503, %cst_174 {dimension_numbers = #tpu.dot_dimension_numbers<[1], [0], [0], [1], [0, 0, 1, 1], [], []>} : vector<8x128xbf16>, vector<128x128xbf16>, vector<8x128xf32> -> vector<8x128xf32>
    %505 = arith.truncf %499 : vector<8x128xf32> to vector<8x128xbf16>
    %c0_175 = arith.constant 0 : index
    %c0_176 = arith.constant 0 : index
    %506 = vector.load %arg8[%c0_175, %c0_176] : memref<128x128xbf16, #tpu.memory_space<vmem>>, vector<128x128xbf16>
    %cst_177 = arith.constant dense<0.000000e+00> : vector<8x128xf32>
    %507 = tpu.matmul %505, %506, %cst_177 {dimension_numbers = #tpu.dot_dimension_numbers<[1], [0], [0], [1], [0, 0, 1, 1], [], []>} : vector<8x128xbf16>, vector<128x128xbf16>, vector<8x128xf32> -> vector<8x128xf32>
    %508 = arith.addf %504, %507 : vector<8x128xf32>
    %509 = vector.extract_strided_slice %508 {offsets = [0, 32], sizes = [8, 1], strides = [1, 1]} : vector<8x128xf32> to vector<8x1xf32>
    %510 = arith.addf %509, %482 : vector<8x1xf32>
    %511 = arith.negf %510 : vector<8x1xf32>
    %512 = math.exp %511 : vector<8x1xf32>
    %cst_178 = arith.constant 1.000000e+00 : f32
    %513 = vector.broadcast %cst_178 : f32 to vector<8x1xf32>
    %514 = arith.addf %513, %512 : vector<8x1xf32>
    %515 = arith.divf %513, %514 : vector<8x1xf32>
    %516 = vector.broadcast %1 : vector<1x128xf32> to vector<8x128xf32>
    %517 = arith.addf %508, %516 : vector<8x128xf32>
    %cst_179 = arith.constant dense<0xFF800000> : vector<8xf32>
    %518 = vector.multi_reduction <maximumf>, %517, %cst_179 [1] : vector<8x128xf32> to vector<8xf32>
    %519 = vector.shape_cast %518 : vector<8xf32> to vector<8x1xf32>
    %520 = vector.broadcast %519 : vector<8x1xf32> to vector<8x128xf32>
    %521 = arith.subf %517, %520 : vector<8x128xf32>
    %522 = math.exp %521 : vector<8x128xf32>
    %cst_180 = arith.constant dense<0.000000e+00> : vector<8xf32>
    %523 = vector.multi_reduction <add>, %522, %cst_180 [1] : vector<8x128xf32> to vector<8xf32>
    %524 = vector.shape_cast %523 : vector<8xf32> to vector<8x1xf32>
    %525 = tpu.reciprocal %524 {approx = true} : vector<8x1xf32> -> vector<8x1xf32>
    %526 = vector.broadcast %525 : vector<8x1xf32> to vector<8x128xf32>
    %527 = arith.mulf %522, %526 : vector<8x128xf32>
    %528 = vector.broadcast %515 : vector<8x1xf32> to vector<8x128xf32>
    %529 = arith.mulf %528, %527 : vector<8x128xf32>
    %cst_181 = arith.constant 1.000000e+00 : f32
    %530 = vector.broadcast %cst_181 : f32 to vector<8x1xf32>
    %531 = arith.subf %530, %515 : vector<8x1xf32>
    %532 = vector.broadcast %531 : vector<8x1xf32> to vector<8x128xf32>
    %533 = arith.mulf %532, %501 : vector<8x128xf32>
    %534 = arith.addf %529, %533 : vector<8x128xf32>
    %cst_182 = arith.constant dense<0xFF800000> : vector<8xf32>
    %535 = vector.multi_reduction <maximumf>, %534, %cst_182 [1] : vector<8x128xf32> to vector<8xf32>
    %536 = vector.shape_cast %535 : vector<8xf32> to vector<8x1xf32>
    %537 = vector.broadcast %536 : vector<8x1xf32> to vector<8x128xf32>
    %538 = arith.cmpf oeq, %534, %537 : vector<8x128xf32>
    %c128_i32_183 = arith.constant 128 : i32
    %539 = vector.broadcast %c128_i32_183 : i32 to vector<8x128xi32>
    %540 = arith.select %538, %4, %539 : vector<8x128xi1>, vector<8x128xi32>
    %cst_184 = arith.constant dense<2147483647> : vector<8xi32>
    %541 = vector.multi_reduction <minsi>, %540, %cst_184 [1] : vector<8x128xi32> to vector<8xi32>
    %542 = vector.shape_cast %541 : vector<8xi32> to vector<8x1xi32>
    %c32_i32_185 = arith.constant 32 : i32
    %543 = vector.broadcast %c32_i32_185 : i32 to vector<8x1xi32>
    %544 = arith.cmpi sge, %542, %543 : vector<8x1xi32>
    %c3_i32_186 = arith.constant 3 : i32
    %545 = vector.broadcast %c3_i32_186 : i32 to vector<8x1xi32>
    %546 = arith.select %544, %545, %542 : vector<8x1xi1>, vector<8x1xi32>
    %547 = vector.broadcast %c4_i32 : i32 to vector<8x8xi32>
    %548 = arith.cmpi eq, %5, %547 : vector<8x8xi32>
    %549 = vector.shape_cast %546 : vector<8x1xi32> to vector<8x1xi32>
    %550 = vector.broadcast %549 : vector<8x1xi32> to vector<8x8xi32>
    %551 = arith.select %548, %550, %442 : vector<8x8xi1>, vector<8x8xi32>
    %552 = vector.shape_cast %536 : vector<8x1xf32> to vector<8x1xf32>
    %553 = vector.broadcast %552 : vector<8x1xf32> to vector<8x8xf32>
    %554 = arith.select %548, %553, %445 : vector<8x8xi1>, vector<8x8xf32>
    %c5_i32 = arith.constant 5 : i32
    %555 = vector.broadcast %546 : vector<8x1xi32> to vector<8x128xi32>
    %556 = arith.cmpi eq, %3, %555 : vector<8x128xi32>
    %557 = arith.extui %556 : vector<8x128xi1> to vector<8x128xi32>
    %558 = arith.sitofp %557 : vector<8x128xi32> to vector<8x128xf32>
    %559 = arith.truncf %558 : vector<8x128xf32> to vector<8x128xbf16>
    %c0_187 = arith.constant 0 : index
    %c0_188 = arith.constant 0 : index
    %560 = vector.load %arg5[%c0_187, %c0_188] : memref<128x512xbf16, #tpu.memory_space<vmem>>, vector<128x512xbf16>
    %cst_189 = arith.constant dense<0.000000e+00> : vector<8x512xf32>
    %561 = tpu.matmul %559, %560, %cst_189 {dimension_numbers = #tpu.dot_dimension_numbers<[1], [0], [0], [1], [0, 0, 1, 1], [], []>} : vector<8x128xbf16>, vector<128x512xbf16>, vector<8x512xf32> -> vector<8x512xf32>
    %562 = arith.truncf %478 : vector<8x128xf32> to vector<8x128xbf16>
    %c0_190 = arith.constant 0 : index
    %c0_191 = arith.constant 0 : index
    %563 = vector.load %arg6[%c0_190, %c0_191] : memref<128x512xbf16, #tpu.memory_space<vmem>>, vector<128x512xbf16>
    %cst_192 = arith.constant dense<0.000000e+00> : vector<8x512xf32>
    %564 = tpu.matmul %562, %563, %cst_192 {dimension_numbers = #tpu.dot_dimension_numbers<[1], [0], [0], [1], [0, 0, 1, 1], [], []>} : vector<8x128xbf16>, vector<128x512xbf16>, vector<8x512xf32> -> vector<8x512xf32>
    %565 = arith.addf %561, %564 : vector<8x512xf32>
    %566 = vector.extract_strided_slice %565 {offsets = [0, 0], sizes = [8, 128], strides = [1, 1]} : vector<8x512xf32> to vector<8x128xf32>
    %567 = arith.negf %566 : vector<8x128xf32>
    %568 = math.exp %567 : vector<8x128xf32>
    %cst_193 = arith.constant 1.000000e+00 : f32
    %569 = vector.broadcast %cst_193 : f32 to vector<8x128xf32>
    %570 = arith.addf %569, %568 : vector<8x128xf32>
    %571 = arith.divf %569, %570 : vector<8x128xf32>
    %572 = vector.extract_strided_slice %565 {offsets = [0, 128], sizes = [8, 128], strides = [1, 1]} : vector<8x512xf32> to vector<8x128xf32>
    %573 = arith.negf %572 : vector<8x128xf32>
    %574 = math.exp %573 : vector<8x128xf32>
    %cst_194 = arith.constant 1.000000e+00 : f32
    %575 = vector.broadcast %cst_194 : f32 to vector<8x128xf32>
    %576 = arith.addf %575, %574 : vector<8x128xf32>
    %577 = arith.divf %575, %576 : vector<8x128xf32>
    %578 = vector.extract_strided_slice %565 {offsets = [0, 256], sizes = [8, 128], strides = [1, 1]} : vector<8x512xf32> to vector<8x128xf32>
    %579 = vector.extract_strided_slice %565 {offsets = [0, 384], sizes = [8, 128], strides = [1, 1]} : vector<8x512xf32> to vector<8x128xf32>
    %580 = arith.mulf %571, %579 : vector<8x128xf32>
    %581 = arith.addf %578, %580 : vector<8x128xf32>
    %582 = math.tanh %581 : vector<8x128xf32>
    %cst_195 = arith.constant 1.000000e+00 : f32
    %583 = vector.broadcast %cst_195 : f32 to vector<8x128xf32>
    %584 = arith.subf %583, %577 : vector<8x128xf32>
    %585 = arith.mulf %584, %582 : vector<8x128xf32>
    %586 = arith.mulf %577, %478 : vector<8x128xf32>
    %587 = arith.addf %585, %586 : vector<8x128xf32>
    %588 = vector.broadcast %2 : vector<1x128xf32> to vector<8x128xf32>
    %589 = arith.mulf %558, %588 : vector<8x128xf32>
    %cst_196 = arith.constant dense<0.000000e+00> : vector<8xf32>
    %590 = vector.multi_reduction <add>, %589, %cst_196 [1] : vector<8x128xf32> to vector<8xf32>
    %591 = vector.shape_cast %590 : vector<8xf32> to vector<8x1xf32>
    %592 = arith.truncf %587 : vector<8x128xf32> to vector<8x128xbf16>
    %c0_197 = arith.constant 0 : index
    %c0_198 = arith.constant 0 : index
    %593 = vector.load %arg1[%c0_197, %c0_198] : memref<128x128xbf16, #tpu.memory_space<vmem>>, vector<128x128xbf16>
    %cst_199 = arith.constant dense<0.000000e+00> : vector<8x128xf32>
    %594 = tpu.matmul %592, %593, %cst_199 {dimension_numbers = #tpu.dot_dimension_numbers<[1], [0], [0], [1], [0, 0, 1, 1], [], []>} : vector<8x128xbf16>, vector<128x128xbf16>, vector<8x128xf32> -> vector<8x128xf32>
    %595 = arith.addf %594, %0 : vector<8x128xf32>
    %cst_200 = arith.constant dense<0xFF800000> : vector<8xf32>
    %596 = vector.multi_reduction <maximumf>, %595, %cst_200 [1] : vector<8x128xf32> to vector<8xf32>
    %597 = vector.shape_cast %596 : vector<8xf32> to vector<8x1xf32>
    %598 = vector.broadcast %597 : vector<8x1xf32> to vector<8x128xf32>
    %599 = arith.subf %595, %598 : vector<8x128xf32>
    %600 = math.exp %599 : vector<8x128xf32>
    %cst_201 = arith.constant dense<0.000000e+00> : vector<8xf32>
    %601 = vector.multi_reduction <add>, %600, %cst_201 [1] : vector<8x128xf32> to vector<8xf32>
    %602 = vector.shape_cast %601 : vector<8xf32> to vector<8x1xf32>
    %603 = tpu.reciprocal %602 {approx = true} : vector<8x1xf32> -> vector<8x1xf32>
    %604 = vector.broadcast %603 : vector<8x1xf32> to vector<8x128xf32>
    %605 = arith.mulf %600, %604 : vector<8x128xf32>
    %606 = arith.truncf %605 : vector<8x128xf32> to vector<8x128xbf16>
    %c0_202 = arith.constant 0 : index
    %c0_203 = arith.constant 0 : index
    %607 = vector.load %arg2[%c0_202, %c0_203] : memref<128x128xbf16, #tpu.memory_space<vmem>>, vector<128x128xbf16>
    %cst_204 = arith.constant dense<0.000000e+00> : vector<8x128xf32>
    %608 = tpu.matmul %606, %607, %cst_204 {dimension_numbers = #tpu.dot_dimension_numbers<[1], [0], [0], [1], [0, 0, 1, 1], [], []>} : vector<8x128xbf16>, vector<128x128xbf16>, vector<8x128xf32> -> vector<8x128xf32>
    %c0_205 = arith.constant 0 : index
    %c0_206 = arith.constant 0 : index
    %609 = vector.load %arg3[%c0_205, %c0_206] : memref<128x128xbf16, #tpu.memory_space<vmem>>, vector<128x128xbf16>
    %cst_207 = arith.constant dense<0.000000e+00> : vector<8x128xf32>
    %610 = tpu.matmul %606, %609, %cst_207 {dimension_numbers = #tpu.dot_dimension_numbers<[1], [0], [0], [1], [0, 0, 1, 1], [], []>} : vector<8x128xbf16>, vector<128x128xbf16>, vector<8x128xf32> -> vector<8x128xf32>
    %611 = arith.truncf %587 : vector<8x128xf32> to vector<8x128xbf16>
    %c0_208 = arith.constant 0 : index
    %c0_209 = arith.constant 0 : index
    %612 = vector.load %arg7[%c0_208, %c0_209] : memref<128x128xbf16, #tpu.memory_space<vmem>>, vector<128x128xbf16>
    %cst_210 = arith.constant dense<0.000000e+00> : vector<8x128xf32>
    %613 = tpu.matmul %611, %612, %cst_210 {dimension_numbers = #tpu.dot_dimension_numbers<[1], [0], [0], [1], [0, 0, 1, 1], [], []>} : vector<8x128xbf16>, vector<128x128xbf16>, vector<8x128xf32> -> vector<8x128xf32>
    %614 = arith.truncf %608 : vector<8x128xf32> to vector<8x128xbf16>
    %c0_211 = arith.constant 0 : index
    %c0_212 = arith.constant 0 : index
    %615 = vector.load %arg8[%c0_211, %c0_212] : memref<128x128xbf16, #tpu.memory_space<vmem>>, vector<128x128xbf16>
    %cst_213 = arith.constant dense<0.000000e+00> : vector<8x128xf32>
    %616 = tpu.matmul %614, %615, %cst_213 {dimension_numbers = #tpu.dot_dimension_numbers<[1], [0], [0], [1], [0, 0, 1, 1], [], []>} : vector<8x128xbf16>, vector<128x128xbf16>, vector<8x128xf32> -> vector<8x128xf32>
    %617 = arith.addf %613, %616 : vector<8x128xf32>
    %618 = vector.extract_strided_slice %617 {offsets = [0, 32], sizes = [8, 1], strides = [1, 1]} : vector<8x128xf32> to vector<8x1xf32>
    %619 = arith.addf %618, %591 : vector<8x1xf32>
    %620 = arith.negf %619 : vector<8x1xf32>
    %621 = math.exp %620 : vector<8x1xf32>
    %cst_214 = arith.constant 1.000000e+00 : f32
    %622 = vector.broadcast %cst_214 : f32 to vector<8x1xf32>
    %623 = arith.addf %622, %621 : vector<8x1xf32>
    %624 = arith.divf %622, %623 : vector<8x1xf32>
    %625 = vector.broadcast %1 : vector<1x128xf32> to vector<8x128xf32>
    %626 = arith.addf %617, %625 : vector<8x128xf32>
    %cst_215 = arith.constant dense<0xFF800000> : vector<8xf32>
    %627 = vector.multi_reduction <maximumf>, %626, %cst_215 [1] : vector<8x128xf32> to vector<8xf32>
    %628 = vector.shape_cast %627 : vector<8xf32> to vector<8x1xf32>
    %629 = vector.broadcast %628 : vector<8x1xf32> to vector<8x128xf32>
    %630 = arith.subf %626, %629 : vector<8x128xf32>
    %631 = math.exp %630 : vector<8x128xf32>
    %cst_216 = arith.constant dense<0.000000e+00> : vector<8xf32>
    %632 = vector.multi_reduction <add>, %631, %cst_216 [1] : vector<8x128xf32> to vector<8xf32>
    %633 = vector.shape_cast %632 : vector<8xf32> to vector<8x1xf32>
    %634 = tpu.reciprocal %633 {approx = true} : vector<8x1xf32> -> vector<8x1xf32>
    %635 = vector.broadcast %634 : vector<8x1xf32> to vector<8x128xf32>
    %636 = arith.mulf %631, %635 : vector<8x128xf32>
    %637 = vector.broadcast %624 : vector<8x1xf32> to vector<8x128xf32>
    %638 = arith.mulf %637, %636 : vector<8x128xf32>
    %cst_217 = arith.constant 1.000000e+00 : f32
    %639 = vector.broadcast %cst_217 : f32 to vector<8x1xf32>
    %640 = arith.subf %639, %624 : vector<8x1xf32>
    %641 = vector.broadcast %640 : vector<8x1xf32> to vector<8x128xf32>
    %642 = arith.mulf %641, %610 : vector<8x128xf32>
    %643 = arith.addf %638, %642 : vector<8x128xf32>
    %cst_218 = arith.constant dense<0xFF800000> : vector<8xf32>
    %644 = vector.multi_reduction <maximumf>, %643, %cst_218 [1] : vector<8x128xf32> to vector<8xf32>
    %645 = vector.shape_cast %644 : vector<8xf32> to vector<8x1xf32>
    %646 = vector.broadcast %645 : vector<8x1xf32> to vector<8x128xf32>
    %647 = arith.cmpf oeq, %643, %646 : vector<8x128xf32>
    %c128_i32_219 = arith.constant 128 : i32
    %648 = vector.broadcast %c128_i32_219 : i32 to vector<8x128xi32>
    %649 = arith.select %647, %4, %648 : vector<8x128xi1>, vector<8x128xi32>
    %cst_220 = arith.constant dense<2147483647> : vector<8xi32>
    %650 = vector.multi_reduction <minsi>, %649, %cst_220 [1] : vector<8x128xi32> to vector<8xi32>
    %651 = vector.shape_cast %650 : vector<8xi32> to vector<8x1xi32>
    %c32_i32_221 = arith.constant 32 : i32
    %652 = vector.broadcast %c32_i32_221 : i32 to vector<8x1xi32>
    %653 = arith.cmpi sge, %651, %652 : vector<8x1xi32>
    %c3_i32_222 = arith.constant 3 : i32
    %654 = vector.broadcast %c3_i32_222 : i32 to vector<8x1xi32>
    %655 = arith.select %653, %654, %651 : vector<8x1xi1>, vector<8x1xi32>
    %656 = vector.broadcast %c5_i32 : i32 to vector<8x8xi32>
    %657 = arith.cmpi eq, %5, %656 : vector<8x8xi32>
    %658 = vector.shape_cast %655 : vector<8x1xi32> to vector<8x1xi32>
    %659 = vector.broadcast %658 : vector<8x1xi32> to vector<8x8xi32>
    %660 = arith.select %657, %659, %551 : vector<8x8xi1>, vector<8x8xi32>
    %661 = vector.shape_cast %645 : vector<8x1xf32> to vector<8x1xf32>
    %662 = vector.broadcast %661 : vector<8x1xf32> to vector<8x8xf32>
    %663 = arith.select %657, %662, %554 : vector<8x8xi1>, vector<8x8xf32>
    %c6_i32 = arith.constant 6 : i32
    %664 = vector.broadcast %655 : vector<8x1xi32> to vector<8x128xi32>
    %665 = arith.cmpi eq, %3, %664 : vector<8x128xi32>
    %666 = arith.extui %665 : vector<8x128xi1> to vector<8x128xi32>
    %667 = arith.sitofp %666 : vector<8x128xi32> to vector<8x128xf32>
    %668 = arith.truncf %667 : vector<8x128xf32> to vector<8x128xbf16>
    %c0_223 = arith.constant 0 : index
    %c0_224 = arith.constant 0 : index
    %669 = vector.load %arg5[%c0_223, %c0_224] : memref<128x512xbf16, #tpu.memory_space<vmem>>, vector<128x512xbf16>
    %cst_225 = arith.constant dense<0.000000e+00> : vector<8x512xf32>
    %670 = tpu.matmul %668, %669, %cst_225 {dimension_numbers = #tpu.dot_dimension_numbers<[1], [0], [0], [1], [0, 0, 1, 1], [], []>} : vector<8x128xbf16>, vector<128x512xbf16>, vector<8x512xf32> -> vector<8x512xf32>
    %671 = arith.truncf %587 : vector<8x128xf32> to vector<8x128xbf16>
    %c0_226 = arith.constant 0 : index
    %c0_227 = arith.constant 0 : index
    %672 = vector.load %arg6[%c0_226, %c0_227] : memref<128x512xbf16, #tpu.memory_space<vmem>>, vector<128x512xbf16>
    %cst_228 = arith.constant dense<0.000000e+00> : vector<8x512xf32>
    %673 = tpu.matmul %671, %672, %cst_228 {dimension_numbers = #tpu.dot_dimension_numbers<[1], [0], [0], [1], [0, 0, 1, 1], [], []>} : vector<8x128xbf16>, vector<128x512xbf16>, vector<8x512xf32> -> vector<8x512xf32>
    %674 = arith.addf %670, %673 : vector<8x512xf32>
    %675 = vector.extract_strided_slice %674 {offsets = [0, 0], sizes = [8, 128], strides = [1, 1]} : vector<8x512xf32> to vector<8x128xf32>
    %676 = arith.negf %675 : vector<8x128xf32>
    %677 = math.exp %676 : vector<8x128xf32>
    %cst_229 = arith.constant 1.000000e+00 : f32
    %678 = vector.broadcast %cst_229 : f32 to vector<8x128xf32>
    %679 = arith.addf %678, %677 : vector<8x128xf32>
    %680 = arith.divf %678, %679 : vector<8x128xf32>
    %681 = vector.extract_strided_slice %674 {offsets = [0, 128], sizes = [8, 128], strides = [1, 1]} : vector<8x512xf32> to vector<8x128xf32>
    %682 = arith.negf %681 : vector<8x128xf32>
    %683 = math.exp %682 : vector<8x128xf32>
    %cst_230 = arith.constant 1.000000e+00 : f32
    %684 = vector.broadcast %cst_230 : f32 to vector<8x128xf32>
    %685 = arith.addf %684, %683 : vector<8x128xf32>
    %686 = arith.divf %684, %685 : vector<8x128xf32>
    %687 = vector.extract_strided_slice %674 {offsets = [0, 256], sizes = [8, 128], strides = [1, 1]} : vector<8x512xf32> to vector<8x128xf32>
    %688 = vector.extract_strided_slice %674 {offsets = [0, 384], sizes = [8, 128], strides = [1, 1]} : vector<8x512xf32> to vector<8x128xf32>
    %689 = arith.mulf %680, %688 : vector<8x128xf32>
    %690 = arith.addf %687, %689 : vector<8x128xf32>
    %691 = math.tanh %690 : vector<8x128xf32>
    %cst_231 = arith.constant 1.000000e+00 : f32
    %692 = vector.broadcast %cst_231 : f32 to vector<8x128xf32>
    %693 = arith.subf %692, %686 : vector<8x128xf32>
    %694 = arith.mulf %693, %691 : vector<8x128xf32>
    %695 = arith.mulf %686, %587 : vector<8x128xf32>
    %696 = arith.addf %694, %695 : vector<8x128xf32>
    %697 = vector.broadcast %2 : vector<1x128xf32> to vector<8x128xf32>
    %698 = arith.mulf %667, %697 : vector<8x128xf32>
    %cst_232 = arith.constant dense<0.000000e+00> : vector<8xf32>
    %699 = vector.multi_reduction <add>, %698, %cst_232 [1] : vector<8x128xf32> to vector<8xf32>
    %700 = vector.shape_cast %699 : vector<8xf32> to vector<8x1xf32>
    %701 = arith.truncf %696 : vector<8x128xf32> to vector<8x128xbf16>
    %c0_233 = arith.constant 0 : index
    %c0_234 = arith.constant 0 : index
    %702 = vector.load %arg1[%c0_233, %c0_234] : memref<128x128xbf16, #tpu.memory_space<vmem>>, vector<128x128xbf16>
    %cst_235 = arith.constant dense<0.000000e+00> : vector<8x128xf32>
    %703 = tpu.matmul %701, %702, %cst_235 {dimension_numbers = #tpu.dot_dimension_numbers<[1], [0], [0], [1], [0, 0, 1, 1], [], []>} : vector<8x128xbf16>, vector<128x128xbf16>, vector<8x128xf32> -> vector<8x128xf32>
    %704 = arith.addf %703, %0 : vector<8x128xf32>
    %cst_236 = arith.constant dense<0xFF800000> : vector<8xf32>
    %705 = vector.multi_reduction <maximumf>, %704, %cst_236 [1] : vector<8x128xf32> to vector<8xf32>
    %706 = vector.shape_cast %705 : vector<8xf32> to vector<8x1xf32>
    %707 = vector.broadcast %706 : vector<8x1xf32> to vector<8x128xf32>
    %708 = arith.subf %704, %707 : vector<8x128xf32>
    %709 = math.exp %708 : vector<8x128xf32>
    %cst_237 = arith.constant dense<0.000000e+00> : vector<8xf32>
    %710 = vector.multi_reduction <add>, %709, %cst_237 [1] : vector<8x128xf32> to vector<8xf32>
    %711 = vector.shape_cast %710 : vector<8xf32> to vector<8x1xf32>
    %712 = tpu.reciprocal %711 {approx = true} : vector<8x1xf32> -> vector<8x1xf32>
    %713 = vector.broadcast %712 : vector<8x1xf32> to vector<8x128xf32>
    %714 = arith.mulf %709, %713 : vector<8x128xf32>
    %715 = arith.truncf %714 : vector<8x128xf32> to vector<8x128xbf16>
    %c0_238 = arith.constant 0 : index
    %c0_239 = arith.constant 0 : index
    %716 = vector.load %arg2[%c0_238, %c0_239] : memref<128x128xbf16, #tpu.memory_space<vmem>>, vector<128x128xbf16>
    %cst_240 = arith.constant dense<0.000000e+00> : vector<8x128xf32>
    %717 = tpu.matmul %715, %716, %cst_240 {dimension_numbers = #tpu.dot_dimension_numbers<[1], [0], [0], [1], [0, 0, 1, 1], [], []>} : vector<8x128xbf16>, vector<128x128xbf16>, vector<8x128xf32> -> vector<8x128xf32>
    %c0_241 = arith.constant 0 : index
    %c0_242 = arith.constant 0 : index
    %718 = vector.load %arg3[%c0_241, %c0_242] : memref<128x128xbf16, #tpu.memory_space<vmem>>, vector<128x128xbf16>
    %cst_243 = arith.constant dense<0.000000e+00> : vector<8x128xf32>
    %719 = tpu.matmul %715, %718, %cst_243 {dimension_numbers = #tpu.dot_dimension_numbers<[1], [0], [0], [1], [0, 0, 1, 1], [], []>} : vector<8x128xbf16>, vector<128x128xbf16>, vector<8x128xf32> -> vector<8x128xf32>
    %720 = arith.truncf %696 : vector<8x128xf32> to vector<8x128xbf16>
    %c0_244 = arith.constant 0 : index
    %c0_245 = arith.constant 0 : index
    %721 = vector.load %arg7[%c0_244, %c0_245] : memref<128x128xbf16, #tpu.memory_space<vmem>>, vector<128x128xbf16>
    %cst_246 = arith.constant dense<0.000000e+00> : vector<8x128xf32>
    %722 = tpu.matmul %720, %721, %cst_246 {dimension_numbers = #tpu.dot_dimension_numbers<[1], [0], [0], [1], [0, 0, 1, 1], [], []>} : vector<8x128xbf16>, vector<128x128xbf16>, vector<8x128xf32> -> vector<8x128xf32>
    %723 = arith.truncf %717 : vector<8x128xf32> to vector<8x128xbf16>
    %c0_247 = arith.constant 0 : index
    %c0_248 = arith.constant 0 : index
    %724 = vector.load %arg8[%c0_247, %c0_248] : memref<128x128xbf16, #tpu.memory_space<vmem>>, vector<128x128xbf16>
    %cst_249 = arith.constant dense<0.000000e+00> : vector<8x128xf32>
    %725 = tpu.matmul %723, %724, %cst_249 {dimension_numbers = #tpu.dot_dimension_numbers<[1], [0], [0], [1], [0, 0, 1, 1], [], []>} : vector<8x128xbf16>, vector<128x128xbf16>, vector<8x128xf32> -> vector<8x128xf32>
    %726 = arith.addf %722, %725 : vector<8x128xf32>
    %727 = vector.extract_strided_slice %726 {offsets = [0, 32], sizes = [8, 1], strides = [1, 1]} : vector<8x128xf32> to vector<8x1xf32>
    %728 = arith.addf %727, %700 : vector<8x1xf32>
    %729 = arith.negf %728 : vector<8x1xf32>
    %730 = math.exp %729 : vector<8x1xf32>
    %cst_250 = arith.constant 1.000000e+00 : f32
    %731 = vector.broadcast %cst_250 : f32 to vector<8x1xf32>
    %732 = arith.addf %731, %730 : vector<8x1xf32>
    %733 = arith.divf %731, %732 : vector<8x1xf32>
    %734 = vector.broadcast %1 : vector<1x128xf32> to vector<8x128xf32>
    %735 = arith.addf %726, %734 : vector<8x128xf32>
    %cst_251 = arith.constant dense<0xFF800000> : vector<8xf32>
    %736 = vector.multi_reduction <maximumf>, %735, %cst_251 [1] : vector<8x128xf32> to vector<8xf32>
    %737 = vector.shape_cast %736 : vector<8xf32> to vector<8x1xf32>
    %738 = vector.broadcast %737 : vector<8x1xf32> to vector<8x128xf32>
    %739 = arith.subf %735, %738 : vector<8x128xf32>
    %740 = math.exp %739 : vector<8x128xf32>
    %cst_252 = arith.constant dense<0.000000e+00> : vector<8xf32>
    %741 = vector.multi_reduction <add>, %740, %cst_252 [1] : vector<8x128xf32> to vector<8xf32>
    %742 = vector.shape_cast %741 : vector<8xf32> to vector<8x1xf32>
    %743 = tpu.reciprocal %742 {approx = true} : vector<8x1xf32> -> vector<8x1xf32>
    %744 = vector.broadcast %743 : vector<8x1xf32> to vector<8x128xf32>
    %745 = arith.mulf %740, %744 : vector<8x128xf32>
    %746 = vector.broadcast %733 : vector<8x1xf32> to vector<8x128xf32>
    %747 = arith.mulf %746, %745 : vector<8x128xf32>
    %cst_253 = arith.constant 1.000000e+00 : f32
    %748 = vector.broadcast %cst_253 : f32 to vector<8x1xf32>
    %749 = arith.subf %748, %733 : vector<8x1xf32>
    %750 = vector.broadcast %749 : vector<8x1xf32> to vector<8x128xf32>
    %751 = arith.mulf %750, %719 : vector<8x128xf32>
    %752 = arith.addf %747, %751 : vector<8x128xf32>
    %cst_254 = arith.constant dense<0xFF800000> : vector<8xf32>
    %753 = vector.multi_reduction <maximumf>, %752, %cst_254 [1] : vector<8x128xf32> to vector<8xf32>
    %754 = vector.shape_cast %753 : vector<8xf32> to vector<8x1xf32>
    %755 = vector.broadcast %754 : vector<8x1xf32> to vector<8x128xf32>
    %756 = arith.cmpf oeq, %752, %755 : vector<8x128xf32>
    %c128_i32_255 = arith.constant 128 : i32
    %757 = vector.broadcast %c128_i32_255 : i32 to vector<8x128xi32>
    %758 = arith.select %756, %4, %757 : vector<8x128xi1>, vector<8x128xi32>
    %cst_256 = arith.constant dense<2147483647> : vector<8xi32>
    %759 = vector.multi_reduction <minsi>, %758, %cst_256 [1] : vector<8x128xi32> to vector<8xi32>
    %760 = vector.shape_cast %759 : vector<8xi32> to vector<8x1xi32>
    %c32_i32_257 = arith.constant 32 : i32
    %761 = vector.broadcast %c32_i32_257 : i32 to vector<8x1xi32>
    %762 = arith.cmpi sge, %760, %761 : vector<8x1xi32>
    %c3_i32_258 = arith.constant 3 : i32
    %763 = vector.broadcast %c3_i32_258 : i32 to vector<8x1xi32>
    %764 = arith.select %762, %763, %760 : vector<8x1xi1>, vector<8x1xi32>
    %765 = vector.broadcast %c6_i32 : i32 to vector<8x8xi32>
    %766 = arith.cmpi eq, %5, %765 : vector<8x8xi32>
    %767 = vector.shape_cast %764 : vector<8x1xi32> to vector<8x1xi32>
    %768 = vector.broadcast %767 : vector<8x1xi32> to vector<8x8xi32>
    %769 = arith.select %766, %768, %660 : vector<8x8xi1>, vector<8x8xi32>
    %770 = vector.shape_cast %754 : vector<8x1xf32> to vector<8x1xf32>
    %771 = vector.broadcast %770 : vector<8x1xf32> to vector<8x8xf32>
    %772 = arith.select %766, %771, %663 : vector<8x8xi1>, vector<8x8xf32>
    %c7_i32 = arith.constant 7 : i32
    %773 = vector.broadcast %764 : vector<8x1xi32> to vector<8x128xi32>
    %774 = arith.cmpi eq, %3, %773 : vector<8x128xi32>
    %775 = arith.extui %774 : vector<8x128xi1> to vector<8x128xi32>
    %776 = arith.sitofp %775 : vector<8x128xi32> to vector<8x128xf32>
    %777 = arith.truncf %776 : vector<8x128xf32> to vector<8x128xbf16>
    %c0_259 = arith.constant 0 : index
    %c0_260 = arith.constant 0 : index
    %778 = vector.load %arg5[%c0_259, %c0_260] : memref<128x512xbf16, #tpu.memory_space<vmem>>, vector<128x512xbf16>
    %cst_261 = arith.constant dense<0.000000e+00> : vector<8x512xf32>
    %779 = tpu.matmul %777, %778, %cst_261 {dimension_numbers = #tpu.dot_dimension_numbers<[1], [0], [0], [1], [0, 0, 1, 1], [], []>} : vector<8x128xbf16>, vector<128x512xbf16>, vector<8x512xf32> -> vector<8x512xf32>
    %780 = arith.truncf %696 : vector<8x128xf32> to vector<8x128xbf16>
    %c0_262 = arith.constant 0 : index
    %c0_263 = arith.constant 0 : index
    %781 = vector.load %arg6[%c0_262, %c0_263] : memref<128x512xbf16, #tpu.memory_space<vmem>>, vector<128x512xbf16>
    %cst_264 = arith.constant dense<0.000000e+00> : vector<8x512xf32>
    %782 = tpu.matmul %780, %781, %cst_264 {dimension_numbers = #tpu.dot_dimension_numbers<[1], [0], [0], [1], [0, 0, 1, 1], [], []>} : vector<8x128xbf16>, vector<128x512xbf16>, vector<8x512xf32> -> vector<8x512xf32>
    %783 = arith.addf %779, %782 : vector<8x512xf32>
    %784 = vector.extract_strided_slice %783 {offsets = [0, 0], sizes = [8, 128], strides = [1, 1]} : vector<8x512xf32> to vector<8x128xf32>
    %785 = arith.negf %784 : vector<8x128xf32>
    %786 = math.exp %785 : vector<8x128xf32>
    %cst_265 = arith.constant 1.000000e+00 : f32
    %787 = vector.broadcast %cst_265 : f32 to vector<8x128xf32>
    %788 = arith.addf %787, %786 : vector<8x128xf32>
    %789 = arith.divf %787, %788 : vector<8x128xf32>
    %790 = vector.extract_strided_slice %783 {offsets = [0, 128], sizes = [8, 128], strides = [1, 1]} : vector<8x512xf32> to vector<8x128xf32>
    %791 = arith.negf %790 : vector<8x128xf32>
    %792 = math.exp %791 : vector<8x128xf32>
    %cst_266 = arith.constant 1.000000e+00 : f32
    %793 = vector.broadcast %cst_266 : f32 to vector<8x128xf32>
    %794 = arith.addf %793, %792 : vector<8x128xf32>
    %795 = arith.divf %793, %794 : vector<8x128xf32>
    %796 = vector.extract_strided_slice %783 {offsets = [0, 256], sizes = [8, 128], strides = [1, 1]} : vector<8x512xf32> to vector<8x128xf32>
    %797 = vector.extract_strided_slice %783 {offsets = [0, 384], sizes = [8, 128], strides = [1, 1]} : vector<8x512xf32> to vector<8x128xf32>
    %798 = arith.mulf %789, %797 : vector<8x128xf32>
    %799 = arith.addf %796, %798 : vector<8x128xf32>
    %800 = math.tanh %799 : vector<8x128xf32>
    %cst_267 = arith.constant 1.000000e+00 : f32
    %801 = vector.broadcast %cst_267 : f32 to vector<8x128xf32>
    %802 = arith.subf %801, %795 : vector<8x128xf32>
    %803 = arith.mulf %802, %800 : vector<8x128xf32>
    %804 = arith.mulf %795, %696 : vector<8x128xf32>
    %805 = arith.addf %803, %804 : vector<8x128xf32>
    %806 = vector.broadcast %2 : vector<1x128xf32> to vector<8x128xf32>
    %807 = arith.mulf %776, %806 : vector<8x128xf32>
    %cst_268 = arith.constant dense<0.000000e+00> : vector<8xf32>
    %808 = vector.multi_reduction <add>, %807, %cst_268 [1] : vector<8x128xf32> to vector<8xf32>
    %809 = vector.shape_cast %808 : vector<8xf32> to vector<8x1xf32>
    %810 = arith.truncf %805 : vector<8x128xf32> to vector<8x128xbf16>
    %c0_269 = arith.constant 0 : index
    %c0_270 = arith.constant 0 : index
    %811 = vector.load %arg1[%c0_269, %c0_270] : memref<128x128xbf16, #tpu.memory_space<vmem>>, vector<128x128xbf16>
    %cst_271 = arith.constant dense<0.000000e+00> : vector<8x128xf32>
    %812 = tpu.matmul %810, %811, %cst_271 {dimension_numbers = #tpu.dot_dimension_numbers<[1], [0], [0], [1], [0, 0, 1, 1], [], []>} : vector<8x128xbf16>, vector<128x128xbf16>, vector<8x128xf32> -> vector<8x128xf32>
    %813 = arith.addf %812, %0 : vector<8x128xf32>
    %cst_272 = arith.constant dense<0xFF800000> : vector<8xf32>
    %814 = vector.multi_reduction <maximumf>, %813, %cst_272 [1] : vector<8x128xf32> to vector<8xf32>
    %815 = vector.shape_cast %814 : vector<8xf32> to vector<8x1xf32>
    %816 = vector.broadcast %815 : vector<8x1xf32> to vector<8x128xf32>
    %817 = arith.subf %813, %816 : vector<8x128xf32>
    %818 = math.exp %817 : vector<8x128xf32>
    %cst_273 = arith.constant dense<0.000000e+00> : vector<8xf32>
    %819 = vector.multi_reduction <add>, %818, %cst_273 [1] : vector<8x128xf32> to vector<8xf32>
    %820 = vector.shape_cast %819 : vector<8xf32> to vector<8x1xf32>
    %821 = tpu.reciprocal %820 {approx = true} : vector<8x1xf32> -> vector<8x1xf32>
    %822 = vector.broadcast %821 : vector<8x1xf32> to vector<8x128xf32>
    %823 = arith.mulf %818, %822 : vector<8x128xf32>
    %824 = arith.truncf %823 : vector<8x128xf32> to vector<8x128xbf16>
    %c0_274 = arith.constant 0 : index
    %c0_275 = arith.constant 0 : index
    %825 = vector.load %arg2[%c0_274, %c0_275] : memref<128x128xbf16, #tpu.memory_space<vmem>>, vector<128x128xbf16>
    %cst_276 = arith.constant dense<0.000000e+00> : vector<8x128xf32>
    %826 = tpu.matmul %824, %825, %cst_276 {dimension_numbers = #tpu.dot_dimension_numbers<[1], [0], [0], [1], [0, 0, 1, 1], [], []>} : vector<8x128xbf16>, vector<128x128xbf16>, vector<8x128xf32> -> vector<8x128xf32>
    %c0_277 = arith.constant 0 : index
    %c0_278 = arith.constant 0 : index
    %827 = vector.load %arg3[%c0_277, %c0_278] : memref<128x128xbf16, #tpu.memory_space<vmem>>, vector<128x128xbf16>
    %cst_279 = arith.constant dense<0.000000e+00> : vector<8x128xf32>
    %828 = tpu.matmul %824, %827, %cst_279 {dimension_numbers = #tpu.dot_dimension_numbers<[1], [0], [0], [1], [0, 0, 1, 1], [], []>} : vector<8x128xbf16>, vector<128x128xbf16>, vector<8x128xf32> -> vector<8x128xf32>
    %829 = arith.truncf %805 : vector<8x128xf32> to vector<8x128xbf16>
    %c0_280 = arith.constant 0 : index
    %c0_281 = arith.constant 0 : index
    %830 = vector.load %arg7[%c0_280, %c0_281] : memref<128x128xbf16, #tpu.memory_space<vmem>>, vector<128x128xbf16>
    %cst_282 = arith.constant dense<0.000000e+00> : vector<8x128xf32>
    %831 = tpu.matmul %829, %830, %cst_282 {dimension_numbers = #tpu.dot_dimension_numbers<[1], [0], [0], [1], [0, 0, 1, 1], [], []>} : vector<8x128xbf16>, vector<128x128xbf16>, vector<8x128xf32> -> vector<8x128xf32>
    %832 = arith.truncf %826 : vector<8x128xf32> to vector<8x128xbf16>
    %c0_283 = arith.constant 0 : index
    %c0_284 = arith.constant 0 : index
    %833 = vector.load %arg8[%c0_283, %c0_284] : memref<128x128xbf16, #tpu.memory_space<vmem>>, vector<128x128xbf16>
    %cst_285 = arith.constant dense<0.000000e+00> : vector<8x128xf32>
    %834 = tpu.matmul %832, %833, %cst_285 {dimension_numbers = #tpu.dot_dimension_numbers<[1], [0], [0], [1], [0, 0, 1, 1], [], []>} : vector<8x128xbf16>, vector<128x128xbf16>, vector<8x128xf32> -> vector<8x128xf32>
    %835 = arith.addf %831, %834 : vector<8x128xf32>
    %836 = vector.extract_strided_slice %835 {offsets = [0, 32], sizes = [8, 1], strides = [1, 1]} : vector<8x128xf32> to vector<8x1xf32>
    %837 = arith.addf %836, %809 : vector<8x1xf32>
    %838 = arith.negf %837 : vector<8x1xf32>
    %839 = math.exp %838 : vector<8x1xf32>
    %cst_286 = arith.constant 1.000000e+00 : f32
    %840 = vector.broadcast %cst_286 : f32 to vector<8x1xf32>
    %841 = arith.addf %840, %839 : vector<8x1xf32>
    %842 = arith.divf %840, %841 : vector<8x1xf32>
    %843 = vector.broadcast %1 : vector<1x128xf32> to vector<8x128xf32>
    %844 = arith.addf %835, %843 : vector<8x128xf32>
    %cst_287 = arith.constant dense<0xFF800000> : vector<8xf32>
    %845 = vector.multi_reduction <maximumf>, %844, %cst_287 [1] : vector<8x128xf32> to vector<8xf32>
    %846 = vector.shape_cast %845 : vector<8xf32> to vector<8x1xf32>
    %847 = vector.broadcast %846 : vector<8x1xf32> to vector<8x128xf32>
    %848 = arith.subf %844, %847 : vector<8x128xf32>
    %849 = math.exp %848 : vector<8x128xf32>
    %cst_288 = arith.constant dense<0.000000e+00> : vector<8xf32>
    %850 = vector.multi_reduction <add>, %849, %cst_288 [1] : vector<8x128xf32> to vector<8xf32>
    %851 = vector.shape_cast %850 : vector<8xf32> to vector<8x1xf32>
    %852 = tpu.reciprocal %851 {approx = true} : vector<8x1xf32> -> vector<8x1xf32>
    %853 = vector.broadcast %852 : vector<8x1xf32> to vector<8x128xf32>
    %854 = arith.mulf %849, %853 : vector<8x128xf32>
    %855 = vector.broadcast %842 : vector<8x1xf32> to vector<8x128xf32>
    %856 = arith.mulf %855, %854 : vector<8x128xf32>
    %cst_289 = arith.constant 1.000000e+00 : f32
    %857 = vector.broadcast %cst_289 : f32 to vector<8x1xf32>
    %858 = arith.subf %857, %842 : vector<8x1xf32>
    %859 = vector.broadcast %858 : vector<8x1xf32> to vector<8x128xf32>
    %860 = arith.mulf %859, %828 : vector<8x128xf32>
    %861 = arith.addf %856, %860 : vector<8x128xf32>
    %cst_290 = arith.constant dense<0xFF800000> : vector<8xf32>
    %862 = vector.multi_reduction <maximumf>, %861, %cst_290 [1] : vector<8x128xf32> to vector<8xf32>
    %863 = vector.shape_cast %862 : vector<8xf32> to vector<8x1xf32>
    %864 = vector.broadcast %863 : vector<8x1xf32> to vector<8x128xf32>
    %865 = arith.cmpf oeq, %861, %864 : vector<8x128xf32>
    %c128_i32_291 = arith.constant 128 : i32
    %866 = vector.broadcast %c128_i32_291 : i32 to vector<8x128xi32>
    %867 = arith.select %865, %4, %866 : vector<8x128xi1>, vector<8x128xi32>
    %cst_292 = arith.constant dense<2147483647> : vector<8xi32>
    %868 = vector.multi_reduction <minsi>, %867, %cst_292 [1] : vector<8x128xi32> to vector<8xi32>
    %869 = vector.shape_cast %868 : vector<8xi32> to vector<8x1xi32>
    %c32_i32_293 = arith.constant 32 : i32
    %870 = vector.broadcast %c32_i32_293 : i32 to vector<8x1xi32>
    %871 = arith.cmpi sge, %869, %870 : vector<8x1xi32>
    %c3_i32_294 = arith.constant 3 : i32
    %872 = vector.broadcast %c3_i32_294 : i32 to vector<8x1xi32>
    %873 = arith.select %871, %872, %869 : vector<8x1xi1>, vector<8x1xi32>
    %874 = vector.broadcast %c7_i32 : i32 to vector<8x8xi32>
    %875 = arith.cmpi eq, %5, %874 : vector<8x8xi32>
    %876 = vector.shape_cast %873 : vector<8x1xi32> to vector<8x1xi32>
    %877 = vector.broadcast %876 : vector<8x1xi32> to vector<8x8xi32>
    %878 = arith.select %875, %877, %769 : vector<8x8xi1>, vector<8x8xi32>
    %879 = vector.shape_cast %863 : vector<8x1xf32> to vector<8x1xf32>
    %880 = vector.broadcast %879 : vector<8x1xf32> to vector<8x8xf32>
    %881 = arith.select %875, %880, %772 : vector<8x8xi1>, vector<8x8xf32>
    %c8_i32 = arith.constant 8 : i32
    %c0_295 = arith.constant 0 : index
    %c0_296 = arith.constant 0 : index
    %882 = vector.load %arg11[%c0_295, %c0_296] : memref<8x8xi32, #tpu.memory_space<vmem>>, vector<8x8xi32>
    tpu.vector_store %arg11[%c0_295, %c0_296], %878 {strides = array<i32>} : memref<8x8xi32, #tpu.memory_space<vmem>>, vector<8x8xi32>,
    %c0_297 = arith.constant 0 : index
    %c0_298 = arith.constant 0 : index
    %883 = vector.load %arg12[%c0_297, %c0_298] : memref<8x8xf32, #tpu.memory_space<vmem>>, vector<8x8xf32>
    tpu.vector_store %arg12[%c0_297, %c0_298], %881 {strides = array<i32>} : memref<8x8xf32, #tpu.memory_space<vmem>>, vector<8x8xf32>,
    %cst_299 = arith.constant 0.000000e+00 : f32
    %884 = vector.broadcast %cst_299 : f32 to vector<8x8xf32>
    %885 = arith.cmpf ogt, %881, %884 : vector<8x8xf32>
    %886 = arith.extui %885 : vector<8x8xi1> to vector<8x8xi32>
    %887 = arith.sitofp %886 : vector<8x8xi32> to vector<8x8xf32>
    %cst_300 = arith.constant dense<0.000000e+00> : vector<8xf32>
    %888 = vector.multi_reduction <add>, %887, %cst_300 [1] : vector<8x8xf32> to vector<8xf32>
    %889 = vector.shape_cast %888 : vector<8xf32> to vector<8x1xf32>
    %cst_301 = arith.constant dense<0.000000e+00> : vector<8xf32>
    %890 = vector.multi_reduction <add>, %881, %cst_301 [1] : vector<8x8xf32> to vector<8xf32>
    %891 = vector.shape_cast %890 : vector<8xf32> to vector<8x1xf32>
    %cst_302 = arith.constant 1.000000e+00 : f32
    %892 = vector.broadcast %cst_302 : f32 to vector<8x1xf32>
    %893 = arith.maximumf %889, %892 : vector<8x1xf32>
    %894 = arith.divf %891, %893 : vector<8x1xf32>
    %c0_303 = arith.constant 0 : index
    %c0_304 = arith.constant 0 : index
    %895 = vector.load %arg13[%c0_303, %c0_304] : memref<8x1xf32, #tpu.memory_space<vmem>>, vector<8x1xf32>
    tpu.vector_store %arg13[%c0_303, %c0_304], %894 {strides = array<i32>} : memref<8x1xf32, #tpu.memory_space<vmem>>, vector<8x1xf32>,
    return
  }
}

</mosaic_0001>

<bundles_post_ra>
// kernel: tpu_custom_call.1
= control target key start
LH: loop header
LB: loop body
LE: loop exit
PB: predicated region body
PF: predicated region fallthrough
CT: control target
= control target key end

     0   :  { %19 = vsyncpa [#allocation3], 0  ;;  %s9653_s0 = inlined_call_operand.hbm [shape: f32[8,128], index: 0, kind: input, shape index: {}]   ;;  %s9654_s1 = inlined_call_operand.hbm [shape: bf16[128,128], index: 1, kind: input, shape index: {}]   ;;  %s9655_s2 = inlined_call_operand.hbm [shape: bf16[128,128], index: 2, kind: input, shape index: {}]   ;;  %s9656_s3 = inlined_call_operand.hbm [shape: bf16[128,128], index: 3, kind: input, shape index: {}]   ;;  %s9657_s4 = inlined_call_operand.vmem [shape: f32[8,128], index: 4, kind: input, shape index: {}]   ;;  %s9658_s5 = inlined_call_operand.hbm [shape: bf16[128,512], index: 5, kind: input, shape index: {}]   ;;  %s9659_s6 = inlined_call_operand.hbm [shape: bf16[128,512], index: 6, kind: input, shape index: {}]   ;;  %s9660_s7 = inlined_call_operand.hbm [shape: bf16[128,128], index: 7, kind: input, shape index: {}]   ;;  %s9661_s8 = inlined_call_operand.hbm [shape: bf16[128,128], index: 8, kind: input, shape index: {}]   ;;  %s9662_s9 = inlined_call_operand.vmem [shape: f32[1,128], index: 9, kind: input, shape index: {}]   ;;  %s9663_s10 = inlined_call_operand.vmem [shape: f32[1,128], index: 10, kind: input, shape index: {}]   ;;  %s9664_s11 = inlined_call_operand.hbm [shape: s32[8,8], index: 11, kind: output, shape index: {0}]   ;;  %s9665_s12 = inlined_call_operand.hbm [shape: f32[8,8], index: 12, kind: output, shape index: {1}]   ;;  %s9666_s13 = inlined_call_operand.vmem [shape: f32[8,1], index: 13, kind: output, shape index: {2}]  }
   0x1   :  { %20 = vsyncpa [#allocation6], 0 }
   0x2   :  { %21 = vsyncpa [#allocation9], 0 }
   0x3   :  { %22 = vsyncpa [#allocation12], 0 }
   0x4   :  { %23 = vsyncpa [#allocation15], 0 }
   0x5   :  { %24 = vsyncpa [#allocation4], 0 }
   0x6   :  { %25 = vsyncpa [#allocation18], 0  ;;  %s6858_s25 = smov [#allocation5]   ;;  %s6624_s29 = scalar_lea.hbm %s9654_s1, 1024 }
   0x7   :  { %s41_s26 = sshll.u32 %s6858_s25, 4  ;;  %p6625_p0 = scmp.ne.s32.totalorder %s9654_s1, %s6624_s29  ;;  %s42_s26 = int_to_ptr.vmem [resolvable:$true] %s41_s26 }
   0x8   :  { %p6628_p1 = scmp.lt.u32.totalorder %s6624_s29, %s9654_s1 }
   0xa   :  { %p6630_p2 = pnand %p6628_p1, %p6625_p0 }
   0xc   :  { %6633 = shalt.err (!%p6630_p2)
}
   0xd   :  { %s6634_s17 = scalar_lea.vmem %s42_s26, 1024  ;;  %p6639_p4 = scmp.lt.s32.totalorder %s42_s26, %s42_s26 }
   0xe   :  { %p6635_p3 = scmp.ne.s32.totalorder %s42_s26, %s6634_s17  ;;  %p6640_p5 = scmp.lt.s32.totalorder %s6634_s17, %s6634_s17 }
  0x10   :  { %p6641_p6 = por %p6640_p5, %p6639_p4 }
  0x12   :  { %p6642_p7 = pnand %p6641_p6, %p6635_p3 }
  0x14   :  { %6645 = shalt.err (!%p6642_p7)
}
  0x15   :  { %s6859_s18 = smov 64   ;;  %s6860_s19 = smov 4  }
  0x16   :  { %47 = dma.hbm_to_vmem [thread:$0]  %s9654_s1, 1024, %s42_s26, [#allocation6], %s6859_s18, %s6859_s18, %s6860_s19  }
  0x17   :  { %s6861_s22 = smov [#allocation8]   ;;  %s6646_s27 = scalar_lea.hbm %s9656_s3, 1024 }
  0x18   :  { %s65_s23 = sshll.u32 %s6861_s22, 4  ;;  %p6647_p8 = scmp.ne.s32.totalorder %s9656_s3, %s6646_s27  ;;  %s66_s23 = int_to_ptr.vmem [resolvable:$true] %s65_s23 }
  0x19   :  { %p6650_p9 = scmp.lt.u32.totalorder %s6646_s27, %s9656_s3 }
  0x1b   :  { %p6652_p10 = pnand %p6650_p9, %p6647_p8 }
  0x1d   :  { %6655 = shalt.err (!%p6652_p10)
}
  0x1e   :  { %s6656_s15 = scalar_lea.vmem %s66_s23, 1024  ;;  %p6661_p12 = scmp.lt.s32.totalorder %s66_s23, %s66_s23 }
  0x1f   :  { %p6657_p11 = scmp.ne.s32.totalorder %s66_s23, %s6656_s15  ;;  %p6662_p13 = scmp.lt.s32.totalorder %s6656_s15, %s6656_s15 }
  0x21   :  { %p6663_p0 = por %p6662_p13, %p6661_p12 }
  0x23   :  { %p6664_p1 = pnand %p6663_p0, %p6657_p11 }
  0x25   :  { %6667 = shalt.err (!%p6664_p1)
}
  0x26   :  { %71 = dma.hbm_to_vmem [thread:$0]  %s9656_s3, 1024, %s66_s23, [#allocation9], %s6859_s18, %s6859_s18, %s6860_s19  }
  0x27   :  { %s6862_s16 = smov [#allocation11]   ;;  %s6863_s20 = smov [#allocation2]  }
  0x28   :  { %s91_s17 = sshll.u32 %s6862_s16, 4  ;;  %s32_s21 = sshll.u32 %s6863_s20, 4  ;;  %s92_s17 = int_to_ptr.vmem [resolvable:$true] %s91_s17  ;;  %s33_s21 = int_to_ptr.vmem [resolvable:$true] %s32_s21 }
  0x29   :  { %s6668_s25 = scalar_lea.hbm %s9659_s6, 4096 }
  0x2a   :  { %p6669_p2 = scmp.ne.s32.totalorder %s9659_s6, %s6668_s25  ;;  %p6672_p3 = scmp.lt.u32.totalorder %s6668_s25, %s9659_s6 }
  0x2c   :  { %p6674_p4 = pnand %p6672_p3, %p6669_p2 }
  0x2e   :  { %6677 = shalt.err (!%p6674_p4)
}
  0x2f   :  { %s6678_s3 = scalar_lea.vmem %s92_s17, 4096  ;;  %p6683_p6 = scmp.lt.s32.totalorder %s92_s17, %s92_s17 }
  0x30   :  { %p6679_p5 = scmp.ne.s32.totalorder %s92_s17, %s6678_s3  ;;  %p6684_p7 = scmp.lt.s32.totalorder %s6678_s3, %s6678_s3 }
  0x32   :  { %p6685_p8 = por %p6684_p7, %p6683_p6 }
  0x34   :  { %p6686_p9 = pnand %p6685_p8, %p6679_p5 }
  0x36   :  { %6689 = shalt.err (!%p6686_p9)
}
  0x37   :  { %s6864_s23 = smov 256   ;;  %s6865_s14 = smov 16  }
  0x38   :  { %97 = dma.hbm_to_vmem [thread:$0]  %s9659_s6, 4096, %s92_s17, [#allocation12], %s6864_s23, %s6864_s23, %s6865_s14  }
  0x39   :  { %s6690_s20 = scalar_lea.hbm %s9653_s0, 128 }
  0x3a   :  { %p6691_p10 = scmp.ne.s32.totalorder %s9653_s0, %s6690_s20  ;;  %p6694_p11 = scmp.lt.u32.totalorder %s6690_s20, %s9653_s0 }
  0x3c   :  { %p6696_p12 = pnand %p6694_p11, %p6691_p10 }
  0x3e   :  { %6699 = shalt.err (!%p6696_p12)
}
  0x3f   :  { %s6700_s28 = scalar_lea.vmem %s33_s21, 128  ;;  %p6705_p0 = scmp.lt.s32.totalorder %s33_s21, %s33_s21 }
  0x40   :  { %p6701_p13 = scmp.ne.s32.totalorder %s33_s21, %s6700_s28  ;;  %p6706_p1 = scmp.lt.s32.totalorder %s6700_s28, %s6700_s28 }
  0x42   :  { %p6707_p2 = por %p6706_p1, %p6705_p0 }
  0x44   :  { %p6708_p3 = pnand %p6707_p2, %p6701_p13 }
  0x46   :  { %6711 = shalt.err (!%p6708_p3)
}
  0x47   :  { %35 = dma.hbm_to_vmem [thread:$0]  %s9653_s0, 128, %s33_s21, [#allocation3]  }
  0x48   :  { %s6866_s29 = smov [#allocation7]   ;;  %s6867_s3 = smov [#allocation10]  }
  0x49   :  { %s53_s30 = sshll.u32 %s6866_s29, 4  ;;  %s79_s15 = sshll.u32 %s6867_s3, 4  ;;  %s54_s30 = int_to_ptr.vmem [resolvable:$true] %s53_s30  ;;  %s7004_s15 = int_to_ptr.vmem [resolvable:$true] %s79_s15 }
  0x4a   :  { %s6712_s16 = scalar_lea.hbm %s9655_s2, 1024 }
  0x4b   :  { %p6713_p4 = scmp.ne.s32.totalorder %s9655_s2, %s6712_s16  ;;  %p6716_p5 = scmp.lt.u32.totalorder %s6712_s16, %s9655_s2 }
  0x4d   :  { %p6718_p6 = pnand %p6716_p5, %p6713_p4 }
  0x4f   :  { %6721 = shalt.err (!%p6718_p6)
}
  0x50   :  { %s6722_s0 = scalar_lea.vmem %s54_s30, 1024  ;;  %p6727_p8 = scmp.lt.s32.totalorder %s54_s30, %s54_s30 }
  0x51   :  { %p6723_p7 = scmp.ne.s32.totalorder %s54_s30, %s6722_s0  ;;  %p6728_p9 = scmp.lt.s32.totalorder %s6722_s0, %s6722_s0 }
  0x53   :  { %p6729_p10 = por %p6728_p9, %p6727_p8 }
  0x55   :  { %p6730_p11 = pnand %p6729_p10, %p6723_p7 }
  0x57   :  { %6733 = shalt.err (!%p6730_p11)
}
  0x58   :  { %59 = dma.hbm_to_vmem [thread:$0]  %s9655_s2, 1024, %s54_s30, [#allocation6], %s6859_s18, %s6859_s18, %s6860_s19  }
  0x59   :  { %s6734_s17 = scalar_lea.hbm %s9658_s5, 4096 }
  0x5a   :  { %p6735_p12 = scmp.ne.s32.totalorder %s9658_s5, %s6734_s17  ;;  %p6738_p13 = scmp.lt.u32.totalorder %s6734_s17, %s9658_s5 }
  0x5c   :  { %p6740_p0 = pnand %p6738_p13, %p6735_p12 }
  0x5e   :  { %6743 = shalt.err (!%p6740_p0)
}
  0x5f   :  { %s6744_s16 = scalar_lea.vmem %s7004_s15, 4096  ;;  %p6749_p2 = scmp.lt.s32.totalorder %s7004_s15, %s7004_s15 }
  0x60   :  { %p6745_p1 = scmp.ne.s32.totalorder %s7004_s15, %s6744_s16  ;;  %p6750_p3 = scmp.lt.s32.totalorder %s6744_s16, %s6744_s16 }
  0x62   :  { %p6751_p4 = por %p6750_p3, %p6749_p2 }
  0x64   :  { %p6752_p5 = pnand %p6751_p4, %p6745_p1 }
  0x66   :  { %6755 = shalt.err (!%p6752_p5)
}
  0x67   :  { %85 = dma.hbm_to_vmem [thread:$0]  %s9658_s5, 4096, %s7004_s15, [#allocation9], %s6864_s23, %s6864_s23, %s6865_s14  }
  0x68   :  { %s6868_s20 = smov [#allocation13]   ;;  %s6869_s24 = smov [#allocation14]  }
  0x69   :  { %s103_s22 = sshll.u32 %s6868_s20, 4  ;;  %s115_s25 = sshll.u32 %s6869_s24, 4  ;;  %s104_s22 = int_to_ptr.vmem [resolvable:$true] %s103_s22  ;;  %s7041_s25 = int_to_ptr.vmem [resolvable:$true] %s115_s25 }
  0x6a   :  { %s6756_s27 = scalar_lea.hbm %s9660_s7, 1024 }
  0x6b   :  { %p6757_p6 = scmp.ne.s32.totalorder %s9660_s7, %s6756_s27  ;;  %p6760_p7 = scmp.lt.u32.totalorder %s6756_s27, %s9660_s7 }
  0x6d   :  { %p6762_p8 = pnand %p6760_p7, %p6757_p6 }
  0x6f   :  { %6765 = shalt.err (!%p6762_p8)
}
  0x70   :  { %s6766_s5 = scalar_lea.vmem %s104_s22, 1024  ;;  %p6771_p10 = scmp.lt.s32.totalorder %s104_s22, %s104_s22 }
  0x71   :  { %p6767_p9 = scmp.ne.s32.totalorder %s104_s22, %s6766_s5  ;;  %p6772_p11 = scmp.lt.s32.totalorder %s6766_s5, %s6766_s5 }
  0x73   :  { %p6773_p12 = por %p6772_p11, %p6771_p10 }
  0x75   :  { %p6774_p13 = pnand %p6773_p12, %p6767_p9 }
  0x77   :  { %6777 = shalt.err (!%p6774_p13)
}
  0x78   :  { %109 = dma.hbm_to_vmem [thread:$0]  %s9660_s7, 1024, %s104_s22, [#allocation12], %s6859_s18, %s6859_s18, %s6860_s19  }
  0x79   :  { %s6778_s1 = scalar_lea.hbm %s9661_s8, 1024 }
  0x7a   :  { %p6779_p0 = scmp.ne.s32.totalorder %s9661_s8, %s6778_s1  ;;  %p6782_p1 = scmp.lt.u32.totalorder %s6778_s1, %s9661_s8 }
  0x7c   :  { %p6784_p2 = pnand %p6782_p1, %p6779_p0 }
  0x7e   :  { %6787 = shalt.err (!%p6784_p2)
}
  0x7f   :  { %s6788_s20 = scalar_lea.vmem %s7041_s25, 1024  ;;  %p6793_p4 = scmp.lt.s32.totalorder %s7041_s25, %s7041_s25 }
  0x80   :  { %p6789_p3 = scmp.ne.s32.totalorder %s7041_s25, %s6788_s20  ;;  %p6794_p5 = scmp.lt.s32.totalorder %s6788_s20, %s6788_s20 }
  0x82   :  { %p6795_p6 = por %p6794_p5, %p6793_p4 }
  0x84   :  { %p6796_p7 = pnand %p6795_p6, %p6789_p3 }
  0x86   :  { %6799 = shalt.err (!%p6796_p7)
}
  0x87   :  { %121 = dma.hbm_to_vmem [thread:$0]  %s9661_s8, 1024, %s7041_s25, [#allocation15], %s6859_s18, %s6859_s18, %s6860_s19  }
  0x88   :  { %6844 = dma.done.wait [#allocation3], 128  }
  0x89   :  { %6845 = vsyncadd [#allocation3], 4294967168 }
  0x8a   :  { %6846 = dma.done.wait [#allocation6], 2048  }
  0x8b   :  { %6847 = vsyncadd [#allocation6], 4294965248 }
  0x8c   :  { %6848 = dma.done.wait [#allocation9], 5120  }
  0x8d   :  { %6849 = vsyncadd [#allocation9], 4294962176 }
  0x8e   :  { %6850 = dma.done.wait [#allocation12], 5120  }
  0x8f   :  { %6851 = vsyncadd [#allocation12], 4294962176 }
  0x90   :  { %6852 = dma.done.wait [#allocation15], 1024  }
  0x91   :  { %6853 = vsyncadd [#allocation15], 4294966272  ;;  %v9667_v0 = vmov 0   ;;  %v7080_v1 = vld [vmem:[#allocation11 + $0x4] ss:$16 sps:$4 sm:$0xff]   ;;  %v154_v25 = vlaneseq  ;;  %v7174_v35 = vld [vmem:[#allocation2] sm:$0xff] }
  0x92   :  { %418 = vmatprep.mubr.bf16.mxu1 %v9667_v0  ;;  %660 = vmatprep.mubr.bf16.mxu0 %v9667_v0  ;;  %v7082_v2 = vld [vmem:[#allocation10 + $0x4] ss:$16 sps:$4 sm:$0xff]   ;;  %v7085_v3 = vld [vmem:[#allocation11] ss:$16 sps:$4 sm:$0xff]   ;;  %v7179_v36 = vld [vmem:[#allocation11 + $0xc] ss:$16 sps:$4 sm:$0xff]   ;;  %v193_v37 = vpack.c.bf16 %v7174_v35, %v7174_v35 }
  0x93   :  { %386 = vmatprep.subr.bf16.mxu1 %v7080_v1  ;;  %v7087_v4 = vld [vmem:[#allocation10] ss:$16 sps:$4 sm:$0xff]   ;;  %628 = vmatprep.subr.bf16.mxu0 %v7082_v2  ;;  %v7090_v5 = vld [vmem:[#allocation11 + $0x24] ss:$16 sps:$4 sm:$0xff]   ;;  %v7160_v30 = vand.u32 127, %v154_v25  ;;  %v7308_v38 = vld [vmem:[#allocation5 + $0x18] sm:$0xff]  }
  0x94   :  { %387 = vmatpush1.bf16.msra.mxu1 %v7085_v3  ;;  %629 = vmatpush1.bf16.msra.mxu0 %v7087_v4  ;;  %v7094_v6 = vld [vmem:[#allocation10 + $0x24] ss:$16 sps:$4 sm:$0xff]   ;;  %v7096_v7 = vld [vmem:[#allocation11 + $0x20] ss:$16 sps:$4 sm:$0xff]   ;;  %v7192_v39 = vld [vmem:[#allocation11 + $0x8] ss:$16 sps:$4 sm:$0xff]  }
  0x95   :  { %388 = vmatprep.subr.bf16.mxu1 %v7090_v5  ;;  %v7099_v8 = vld [vmem:[#allocation10 + $0x20] ss:$16 sps:$4 sm:$0xff]   ;;  %630 = vmatprep.subr.bf16.mxu0 %v7094_v6  ;;  %v7102_v9 = vld [vmem:[#allocation11 + $0x44] ss:$16 sps:$4 sm:$0xff]   ;;  %9851 = vst [vmem:[#allocation29_spill] sm:$0xff] %v7160_v30  ;;  %vm157_vm0 = vcmp.eq.s32.totalorder %v7160_v30, 1 }
  0x96   :  { %v7104_v10 = vld [vmem:[#allocation10 + $0x44] ss:$16 sps:$4 sm:$0xff]   ;;  %v7106_v11 = vld [vmem:[#allocation11 + $0x40] ss:$16 sps:$4 sm:$0xff]   ;;  %vm7186_vm1 = vmpackc.low %vm157_vm0, %vm157_vm0  ;;  %v9669_v41 = vmov 1.0|1.0  }
  0x97   :  { %v7108_v12 = vld [vmem:[#allocation10 + $0x40] ss:$16 sps:$4 sm:$0xff]   ;;  %v7112_v13 = vld [vmem:[#allocation11 + $0x64] ss:$16 sps:$4 sm:$0xff]   ;;  %v7195_v40 = vld [vmem:[#allocation11 + $0x2c] ss:$16 sps:$4 sm:$0xff]  }
  0x98   :  { %389 = vmatpush1.bf16.msra.mxu1 %v7096_v7  ;;  %631 = vmatpush1.bf16.msra.mxu0 %v7099_v8  ;;  %v7116_v14 = vld [vmem:[#allocation10 + $0x64] ss:$16 sps:$4 sm:$0xff]   ;;  %v7118_v15 = vld [vmem:[#allocation11 + $0x60] ss:$16 sps:$4 sm:$0xff]   ;;  %v7201_v42 = vld [vmem:[#allocation11 + $0x28] ss:$16 sps:$4 sm:$0xff]  }
  0x99   :  { %390 = vmatprep.subr.bf16.mxu1 %v7102_v9  ;;  %632 = vmatprep.subr.bf16.mxu0 %v7104_v10  ;;  %v7122_v16 = vld [vmem:[#allocation10 + $0x60] ss:$16 sps:$4 sm:$0xff]   ;;  %v7124_v17 = vld [vmem:[#allocation11 + $0x84] ss:$16 sps:$4 sm:$0xff]   ;;  %v7205_v43 = vld [vmem:[#allocation11 + $0x4c] ss:$16 sps:$4 sm:$0xff]  }
  0x9a   :  { %v7128_v18 = vld [vmem:[#allocation10 + $0x84] ss:$16 sps:$4 sm:$0xff]   ;;  %v7130_v19 = vld [vmem:[#allocation11 + $0x80] ss:$16 sps:$4 sm:$0xff]   ;;  %v7208_v44 = vld [vmem:[#allocation11 + $0x48] ss:$16 sps:$4 sm:$0xff]  }
  0x9b   :  { %v7132_v20 = vld [vmem:[#allocation10 + $0x80] ss:$16 sps:$4 sm:$0xff]   ;;  %v7136_v21 = vld [vmem:[#allocation11 + $0xa4] ss:$16 sps:$4 sm:$0xff]   ;;  %v7211_v45 = vld [vmem:[#allocation11 + $0x6c] ss:$16 sps:$4 sm:$0xff]  }
  0x9c   :  { %391 = vmatpush1.bf16.msra.mxu1 %v7106_v11  ;;  %633 = vmatpush1.bf16.msra.mxu0 %v7108_v12  ;;  %v7140_v22 = vld [vmem:[#allocation10 + $0xa4] ss:$16 sps:$4 sm:$0xff]   ;;  %v7144_v23 = vld [vmem:[#allocation11 + $0xa0] ss:$16 sps:$4 sm:$0xff]   ;;  %v7213_v46 = vld [vmem:[#allocation11 + $0x68] ss:$16 sps:$4 sm:$0xff]  }
  0x9d   :  { %392 = vmatprep.subr.bf16.mxu1 %v7112_v13  ;;  %634 = vmatprep.subr.bf16.mxu0 %v7116_v14  ;;  %v7146_v24 = vld [vmem:[#allocation10 + $0xa0] ss:$16 sps:$4 sm:$0xff]   ;;  %v7150_v26 = vld [vmem:[#allocation11 + $0xc4] ss:$16 sps:$4 sm:$0xff]   ;;  %v7215_v47 = vld [vmem:[#allocation11 + $0x8c] ss:$16 sps:$4 sm:$0xff]  }
  0x9e   :  { %9848 = vst [vmem:[#allocation26_spill] sm:$0xff] %v7146_v24  ;;  %v7152_v27 = vld [vmem:[#allocation10 + $0xc4] ss:$16 sps:$4 sm:$0xff]   ;;  %v7154_v28 = vld [vmem:[#allocation11 + $0xc0] ss:$16 sps:$4 sm:$0xff]   ;;  %9876 = vst [vmem:[#allocation51_spill] sm:$0xff] %v7308_v38 }
  0x9f   :  { %9849 = vst [vmem:[#allocation27_spill] sm:$0xff] %v7152_v27  ;;  %v7158_v29 = vld [vmem:[#allocation10 + $0xc0] ss:$16 sps:$4 sm:$0xff]   ;;  %v7164_v31 = vld [vmem:[#allocation11 + $0xe4] ss:$16 sps:$4 sm:$0xff]   ;;  %vm6873_vm2 = vmmov 0  }
  0xa0   :  { %393 = vmatpush1.bf16.msra.mxu1 %v7118_v15  ;;  %635 = vmatpush1.bf16.msra.mxu0 %v7122_v16  ;;  %9850 = vst [vmem:[#allocation28_spill] sm:$0xff] %v7158_v29  ;;  %v7166_v32 = vld [vmem:[#allocation10 + $0xe4] ss:$16 sps:$4 sm:$0xff]   ;;  %v7168_v33 = vld [vmem:[#allocation11 + $0xe0] ss:$16 sps:$4 sm:$0xff]   ;;  %s6875_s7 = smov [#allocation17]  }
  0xa1   :  { %394 = vmatprep.subr.bf16.mxu1 %v7124_v17  ;;  %636 = vmatprep.subr.bf16.mxu0 %v7128_v18  ;;  %9852 = vst [vmem:[#allocation30_spill] sm:$0xff] %v7166_v32  ;;  %v7170_v34 = vld [vmem:[#allocation10 + $0xe0] ss:$16 sps:$4 sm:$0xff]   ;;  %v7219_v48 = vld [vmem:[#allocation11 + $0x88] ss:$16 sps:$4 sm:$0xff]   ;;  %s4554_s22 = sshll.u32 %s6875_s7, 4  ;;  %s4555_s22 = int_to_ptr.vmem [resolvable:$true] %s4554_s22 }
  0xa2   :  { %9853 = vst [vmem:[#allocation31_spill] sm:$0xff] %v7170_v34  ;;  %v7221_v49 = vld [vmem:[#allocation11 + $0xac] ss:$16 sps:$4 sm:$0xff]   ;;  %v7225_v50 = vld [vmem:[#allocation11 + $0xa8] ss:$16 sps:$4 sm:$0xff]   ;;  %s6800_s8 = scalar_lea.vmem %s4555_s22, 128  ;;  %p6805_p9 = scmp.lt.s32.totalorder %s4555_s22, %s4555_s22 }
  0xa3   :  { %v7227_v51 = vld [vmem:[#allocation11 + $0xcc] ss:$16 sps:$4 sm:$0xff]   ;;  %v7231_v52 = vld [vmem:[#allocation11 + $0xc8] ss:$16 sps:$4 sm:$0xff]   ;;  %p6801_p8 = scmp.ne.s32.totalorder %s4555_s22, %s6800_s8  ;;  %p6806_p10 = scmp.lt.s32.totalorder %s6800_s8, %s6800_s8 }
  0xa4   :  { %395 = vmatpush1.bf16.msra.mxu1 %v7130_v19  ;;  %637 = vmatpush1.bf16.msra.mxu0 %v7132_v20  ;;  %v7233_v53 = vld [vmem:[#allocation11 + $0xec] ss:$16 sps:$4 sm:$0xff]   ;;  %v7237_v54 = vld [vmem:[#allocation11 + $0xe8] ss:$16 sps:$4 sm:$0xff]  }
  0xa5   :  { %396 = vmatprep.subr.bf16.mxu1 %v7136_v21  ;;  %638 = vmatprep.subr.bf16.mxu0 %v7140_v22  ;;  %v7239_v55 = vld [vmem:[#allocation10 + $0xc] ss:$16 sps:$4 sm:$0xff]   ;;  %v7243_v56 = vld [vmem:[#allocation10 + $0x8] ss:$16 sps:$4 sm:$0xff]   ;;  %p6807_p11 = por %p6806_p10, %p6805_p9 }
  0xa6   :  { %9856 = vst [vmem:[#allocation32_spill] sm:$0xff] %v7239_v55  ;;  %9857 = vst [vmem:[#allocation33_spill] sm:$0xff] %v7243_v56  ;;  %v7245_v57 = vld [vmem:[#allocation10 + $0x2c] ss:$16 sps:$4 sm:$0xff]   ;;  %v7249_v58 = vld [vmem:[#allocation10 + $0x28] ss:$16 sps:$4 sm:$0xff]  }
  0xa7   :  { %9858 = vst [vmem:[#allocation34_spill] sm:$0xff] %v7245_v57  ;;  %9859 = vst [vmem:[#allocation35_spill] sm:$0xff] %v7249_v58  ;;  %v7254_v59 = vld [vmem:[#allocation10 + $0x4c] ss:$16 sps:$4 sm:$0xff]   ;;  %v7257_v60 = vld [vmem:[#allocation10 + $0x48] ss:$16 sps:$4 sm:$0xff]   ;;  %p6808_p12 = pnand %p6807_p11, %p6801_p8 }
  0xa8   :  { %397 = vmatpush1.bf16.msra.mxu1 %v7144_v23  ;;  %639 = vmatpush1.bf16.msra.mxu0 %v7146_v24  ;;  %9860 = vst [vmem:[#allocation36_spill] sm:$0xff] %v7254_v59  ;;  %9861 = vst [vmem:[#allocation37_spill] sm:$0xff] %v7257_v60  ;;  %v7260_v61 = vld [vmem:[#allocation10 + $0x6c] ss:$16 sps:$4 sm:$0xff]   ;;  %v7263_v62 = vld [vmem:[#allocation10 + $0x68] ss:$16 sps:$4 sm:$0xff]  }
  0xa9   :  { %398 = vmatprep.subr.bf16.mxu1 %v7150_v26  ;;  %640 = vmatprep.subr.bf16.mxu0 %v7152_v27  ;;  %9862 = vst [vmem:[#allocation38_spill] sm:$0xff] %v7260_v61  ;;  %9863 = vst [vmem:[#allocation39_spill] sm:$0xff] %v7263_v62  ;;  %v7266_v63 = vld [vmem:[#allocation10 + $0x8c] ss:$16 sps:$4 sm:$0xff]   ;;  %v7269_v25 = vld [vmem:[#allocation10 + $0x88] ss:$16 sps:$4 sm:$0xff]  }
  0xaa   :  { %9864 = vst [vmem:[#allocation40_spill] sm:$0xff] %v7266_v63  ;;  %9865 = vst [vmem:[#allocation41_spill] sm:$0xff] %v7269_v25  ;;  %v7281_v30 = vld [vmem:[#allocation10 + $0xc8] ss:$16 sps:$4 sm:$0xff]  }
  0xab   :  { %9869 = vst [vmem:[#allocation45_spill] sm:$0xff] %v7281_v30 }
  0xac   :  { %399 = vmatpush1.bf16.msra.mxu1 %v7154_v28  ;;  %641 = vmatpush1.bf16.msra.mxu0 %v7158_v29 }
  0xad   :  { %400 = vmatprep.subr.bf16.mxu1 %v7164_v31  ;;  %642 = vmatprep.subr.bf16.mxu0 %v7166_v32 }
  0xb0   :  { %401 = vmatpush1.bf16.msra.mxu1 %v7168_v33  ;;  %643 = vmatpush1.bf16.msra.mxu0 %v7170_v34 }
  0xb1   :  { %427 = vmatprep.subr.bf16.mxu1 %v7179_v36 }
  0xb3   :  { %419 = vmatmul.mubr.bf16.vlgmr.msra.gmra.mrb[0].mxu1 %v193_v37  ;;  %4641 = vmatmul.mubr.msk.bf16.vlgmr.msra.gmra.mrb[0].mxu0 %vm7186_vm1, %v9669_v41  ;;  %v7278_v41 = vld [vmem:[#allocation10 + $0xcc] ss:$16 sps:$4 sm:$0xff]  }
  0xb4   :  { %428 = vmatpush1.bf16.msra.mxu1 %v7192_v39  ;;  %459 = vmatprep.mubr.bf16.mxu1 %v9667_v0  ;;  %9868 = vst [vmem:[#allocation44_spill] sm:$0xff] %v7278_v41 }
  0xb5   :  { %429 = vmatprep.subr.bf16.mxu1 %v7195_v40 }
  0xb8   :  { %430 = vmatpush1.bf16.msra.mxu1 %v7201_v42 }
  0xb9   :  { %431 = vmatprep.subr.bf16.mxu1 %v7205_v43 }
  0xbc   :  { %432 = vmatpush1.bf16.msra.mxu1 %v7208_v44 }
  0xbd   :  { %433 = vmatprep.subr.bf16.mxu1 %v7211_v45 }
  0xc0   :  { %434 = vmatpush1.bf16.msra.mxu1 %v7213_v46 }
  0xc1   :  { %435 = vmatprep.subr.bf16.mxu1 %v7215_v47 }
  0xc4   :  { %436 = vmatpush1.bf16.msra.mxu1 %v7219_v48 }
  0xc5   :  { %437 = vmatprep.subr.bf16.mxu1 %v7221_v49 }
  0xc8   :  { %438 = vmatpush1.bf16.msra.mxu1 %v7225_v50 }
  0xc9   :  { %439 = vmatprep.subr.bf16.mxu1 %v7227_v51 }
  0xcc   :  { %440 = vmatpush1.bf16.msra.mxu1 %v7231_v52 }
  0xcd   :  { %441 = vmatprep.subr.bf16.mxu1 %v7233_v53 }
  0xd0   :  { %442 = vmatpush1.bf16.msra.mxu1 %v7237_v54 }
  0xd1   :  { %669 = vmatprep.subr.bf16.mxu1 %v7239_v55 }
  0xd3   :  { %460 = vmatmul.mubr.bf16.vlgmr.msra.gmra.mrb[4].mxu1 %v193_v37  ;;  %v7272_v37 = vld [vmem:[#allocation10 + $0xac] ss:$16 sps:$4 sm:$0xff]  }
  0xd4   :  { %670 = vmatpush1.bf16.msra.mxu1 %v7243_v56  ;;  %701 = vmatprep.mubr.bf16.mxu1 %v9667_v0  ;;  %9866 = vst [vmem:[#allocation42_spill] sm:$0xff] %v7272_v37  ;;  %v7275_v0 = vld [vmem:[#allocation10 + $0xa8] ss:$16 sps:$4 sm:$0xff]  }
  0xd5   :  { %671 = vmatprep.subr.bf16.mxu1 %v7245_v57  ;;  %9867 = vst [vmem:[#allocation43_spill] sm:$0xff] %v7275_v0 }
  0xd8   :  { %672 = vmatpush1.bf16.msra.mxu1 %v7249_v58 }
  0xd9   :  { %673 = vmatprep.subr.bf16.mxu1 %v7254_v59 }
  0xdc   :  { %674 = vmatpush1.bf16.msra.mxu1 %v7257_v60 }
  0xdd   :  { %675 = vmatprep.subr.bf16.mxu1 %v7260_v61 }
  0xe0   :  { %676 = vmatpush1.bf16.msra.mxu1 %v7263_v62  ;;  %v7284_v62 = vld [vmem:[#allocation10 + $0xec] ss:$16 sps:$4 sm:$0xff]  }
  0xe1   :  { %677 = vmatprep.subr.bf16.mxu1 %v7266_v63  ;;  %9870 = vst [vmem:[#allocation46_spill] sm:$0xff] %v7284_v62  ;;  %v7287_v63 = vld [vmem:[#allocation10 + $0xe8] ss:$16 sps:$4 sm:$0xff]  }
  0xe2   :  { %9871 = vst [vmem:[#allocation47_spill] sm:$0xff] %v7287_v63 }
  0xe4   :  { %678 = vmatpush1.bf16.msra.mxu1 %v7269_v25  ;;  %v9872_v25 = vmov 1.0|1.0  }
  0xe5   :  { %679 = vmatprep.subr.bf16.mxu1 %v7272_v37  ;;  %v7294_v37 = vld [vmem:[#allocation5] sm:$0xff]  }
  0xe6   :  { %9873 = vst [vmem:[#allocation48_spill] sm:$0xff] %v7294_v37 }
  0xe8   :  { %680 = vmatpush1.bf16.msra.mxu1 %v7275_v0  ;;  %v9700_v0 = vmov 0.0  }
  0xe9   :  { %681 = vmatprep.subr.bf16.mxu1 %v7278_v41  ;;  %5106 = vmatprep.subr.bf16.mxu0 %v9700_v0 }
  0xea   :  { %5107 = vmatpush3.bf16.msra.mxu0 %v7294_v37  ;;  %v7312_v37 = vld [vmem:[#allocation5 + $0x20] sm:$0xff]   ;;  %5122 = vmatprep.mubr.msk.bf16.mxu0 %vm6873_vm2, %v9700_v0 }
  0xeb   :  { %5108 = vmatprep.subr.bf16.mxu0 %v9700_v0  ;;  %9877 = vst [vmem:[#allocation52_spill] sm:$0xff] %v7312_v37 }
  0xec   :  { %682 = vmatpush1.bf16.msra.mxu1 %v7281_v30  ;;  %v7299_v30 = vld [vmem:[#allocation5 + $0x8] sm:$0xff]  }
  0xed   :  { %683 = vmatprep.subr.bf16.mxu1 %v7284_v62  ;;  %9874 = vst [vmem:[#allocation49_spill] sm:$0xff] %v7299_v30 }
  0xee   :  { %5109 = vmatpush3.bf16.msra.mxu0 %v7299_v30  ;;  %v7327_v30 = vld [vmem:[#allocation5 + $0x38] sm:$0xff]  }
  0xef   :  { %5110 = vmatprep.subr.bf16.mxu0 %v9700_v0  ;;  %9880 = vst [vmem:[#allocation55_spill] sm:$0xff] %v7327_v30 }
  0xf0   :  { %684 = vmatpush1.bf16.msra.mxu1 %v7287_v63  ;;  %v7304_v63 = vld [vmem:[#allocation5 + $0x10] sm:$0xff]  }
  0xf1   :  { %5126 = vmatprep.subr.bf16.mxu1 %v9700_v0  ;;  %9875 = vst [vmem:[#allocation50_spill] sm:$0xff] %v7304_v63 }
  0xf2   :  { %5111 = vmatpush3.bf16.msra.mxu0 %v7304_v63  ;;  %v7319_v63 = vld [vmem:[#allocation5 + $0x28] sm:$0xff]  }
  0xf3   :  { %4643 = vmatmul.mubr.msk.bf16.vlgmr.msra.gmra.mrb[8].mxu1 %vm7186_vm1, %v9872_v25  ;;  %5112 = vmatprep.subr.bf16.mxu0 %v9700_v0  ;;  %9878 = vst [vmem:[#allocation53_spill] sm:$0xff] %v7319_v63 }
  0xf4   :  { %5142 = vmatprep.mubr.msk.bf16.mxu1 %vm6873_vm2, %v9700_v0 }
  0xf6   :  { %5113 = vmatpush3.bf16.msra.mxu0 %v7308_v38  ;;  %v7323_v38 = vld [vmem:[#allocation5 + $0x30] sm:$0xff]  }
  0xf7   :  { %5114 = vmatprep.subr.bf16.mxu0 %v9700_v0  ;;  %9879 = vst [vmem:[#allocation54_spill] sm:$0xff] %v7323_v38 }
  0xfa   :  { %5115 = vmatpush3.bf16.msra.mxu0 %v7312_v37 }
  0xfb   :  { %5116 = vmatprep.subr.bf16.mxu0 %v9700_v0 }
  0xfe   :  { %5117 = vmatpush3.bf16.msra.mxu0 %v7319_v63 }
  0xff   :  { %5118 = vmatprep.subr.bf16.mxu0 %v9700_v0 }
 0x102   :  { %5119 = vmatpush3.bf16.msra.mxu0 %v7323_v38 }
 0x103   :  { %5120 = vmatprep.subr.bf16.mxu0 %v9700_v0 }
 0x106   :  { %5121 = vmatpush3.bf16.msra.mxu0 %v7327_v30 }
 0x107   :  { %5146 = vmatprep.subr.bf16.mxu0 %v9700_v0 }
 0x186   :  { %v420_v37 = vpop.f32.mrb[0].mxu1  ;;  %v662_v25 = vpop.f32.mrb[0].mxu0 }
 0x187   :  { %v663_v62 = vadd.f32 %v662_v25, %v420_v37  ;;  %v422_v41 = vpop.f32.mrb[1].mxu1  ;;  %v664_v61 = vpop.f32.mrb[1].mxu0 }
 0x188   :  { %v665_v63 = vadd.f32 %v664_v61, %v422_v41  ;;  %v424_v60 = vpop.f32.mrb[2].mxu1  ;;  %v666_v59 = vpop.f32.mrb[2].mxu0 }
 0x189   :  { %v425_v58 = vpop.f32.mrb[3].mxu1  ;;  %v667_v57 = vpop.f32.mrb[3].mxu0  ;;  %v4644_v32 = vmul.f32 -1.442695, %v663_v62 }
 0x18a   :  { %v4645_v29 = vmul.f32 -1.442695, %v665_v63 }
 0x18b   :  { %6125 = vpow2.f32 %v4644_v32 }
 0x18c   :  { %6127 = vpow2.f32 %v4645_v29 }
 0x195   :  { %v6126_v30 = vpop.eup %6125 }
 0x196   :  { %v713_v0 = vadd.f32 1.0, %v6126_v30  ;;  %v6128_v27 = vpop.eup %6127  ;;  %v9881_v30 = vmov 0.0  }
 0x197   :  { %v719_v25 = vadd.f32 1.0, %v6128_v27 }
 0x198   :  { %6129 = vrcp.f32 %v713_v0 }
 0x199   :  { %6131 = vrcp.f32 %v719_v25 }
 0x1a2   :  { %v6130_v58 = vpop.eup %6129 }
 0x1a6   :  { %v461_v56 = vpop.f32.mrb[4].mxu1 }
 0x1a7   :  { %v463_v38 = vpop.f32.mrb[5].mxu1 }
 0x1a8   :  { %v465_v55 = vpop.f32.mrb[6].mxu1 }
 0x1a9   :  { %v466_v34 = vpop.f32.mrb[7].mxu1 }
 0x1aa   :  { %v6132_v34 = vpop.eup %6131 }
 0x1ab   :  { %v725_v32 = vsub.f32 1.0, %v6132_v34  ;;  %v727_v29 = vmul.f32 %v6132_v34, %v7174_v35  ;;  %v7372_v34 = vld [vmem:[#allocation7 + $0x18] sm:$0xff]  }
 0x1c6   :  { %v703_v37 = vpop.f32.mrb[8].mxu1 }
 0x1c7   :  { %v704_v24 = vadd.f32 %v703_v37, %v461_v56  ;;  %v705_v41 = vpop.f32.mrb[9].mxu1 }
 0x1c8   :  { %v706_v60 = vadd.f32 %v705_v41, %v463_v38  ;;  %v707_v59 = vpop.f32.mrb[10].mxu1  ;;  %v7348_v41 = vld [vmem:[#allocation8] sm:$0xff]  }
 0x1c9   :  { %v708_v57 = vpop.f32.mrb[11].mxu1  ;;  %v7354_v59 = vld [vmem:[#allocation8 + $0x8] sm:$0xff]  }
 0x1ca   :  { %v722_v61 = vmul.f32 %v6130_v58, %v706_v60  ;;  %v7350_v60 = vld [vmem:[#allocation7] sm:$0xff]   ;;  %v7356_v58 = vld [vmem:[#allocation7 + $0x8] sm:$0xff]   ;;  %v7362_v57 = vld [vmem:[#allocation8 + $0x10] sm:$0xff]  }
 0x1cb   :  { %5127 = vmatpush3.bf16.msra.mxu1 %v7350_v60  ;;  %9883 = vst [vmem:[#allocation57_spill] sm:$0xff] %v7362_v57 }
 0x1cc   :  { %v723_v55 = vadd.f32 %v722_v61, %v704_v24  ;;  %v7345_v24 = vld [vmem:[%s9657_s4] sm:$0xff]  ;;  %5128 = vmatprep.subr.bf16.mxu1 %v9881_v30  ;;  %v7364_v61 = vld [vmem:[#allocation7 + $0x10] sm:$0xff]  }
 0x1cd   :  { %9882 = vst [vmem:[#allocation56_spill] sm:$0xff] %v7345_v24 }
 0x1ce   :  { %6133 = vtanh.f32 %v723_v55  ;;  %v7370_v55 = vld [vmem:[#allocation8 + $0x18] sm:$0xff]  }
 0x1cf   :  { %5129 = vmatpush3.bf16.msra.mxu1 %v7356_v58  ;;  %9884 = vst [vmem:[#allocation58_spill] sm:$0xff] %v7370_v55 }
 0x1d0   :  { %5130 = vmatprep.subr.bf16.mxu1 %v9881_v30 }
 0x1d3   :  { %5131 = vmatpush3.bf16.msra.mxu1 %v7364_v61 }
 0x1d4   :  { %5132 = vmatprep.subr.bf16.mxu1 %v9881_v30 }
 0x1d7   :  { %5133 = vmatpush3.bf16.msra.mxu1 %v7372_v34 }
 0x1d8   :  { %v6134_v62 = vpop.eup %6133  ;;  %5134 = vmatprep.subr.bf16.mxu1 %v9881_v30 }
 0x1d9   :  { %v726_v63 = vmul.f32 %v6134_v62, %v725_v32  ;;  %v7378_v32 = vld [vmem:[#allocation8 + $0x20] sm:$0xff]  }
 0x1da   :  { %9885 = vst [vmem:[#allocation59_spill] sm:$0xff] %v7378_v32 }
 0x1db   :  { %v7333_v0 = vadd.f32 %v727_v29, %v726_v63 }
 0x1dd   :  { %v7337_v27 = vpack.c.bf16 %v7333_v0, %v7333_v0 }
 0x1df   :  { %5123 = vmatmul.mubr.bf16.vlgmr.msra.gmra.mrb[4].mxu0 %v7337_v27 }
 0x1e0   :  { %5162 = vmatprep.mubr.msk.bf16.mxu0 %vm6873_vm2, %v9881_v30  ;;  %5147 = vmatpush3.bf16.msra.mxu0 %v7348_v41 }
 0x1e1   :  { %5148 = vmatprep.subr.bf16.mxu0 %v9881_v30 }
 0x1e4   :  { %5149 = vmatpush3.bf16.msra.mxu0 %v7354_v59 }
 0x1e5   :  { %5150 = vmatprep.subr.bf16.mxu0 %v9881_v30 }
 0x1e8   :  { %5151 = vmatpush3.bf16.msra.mxu0 %v7362_v57  ;;  %v9888_v57 = vmov 0  }
 0x1e9   :  { %5152 = vmatprep.subr.bf16.mxu0 %v9881_v30 }
 0x1ec   :  { %5153 = vmatpush3.bf16.msra.mxu0 %v7370_v55  ;;  %v7412_v55 = vld [vmem:[#allocation14] sm:$0xff]  }
 0x1ed   :  { %5154 = vmatprep.subr.bf16.mxu0 %v9881_v30 }
 0x1f0   :  { %5155 = vmatpush3.bf16.msra.mxu0 %v7378_v32 }
 0x1f1   :  { %5156 = vmatprep.subr.bf16.mxu0 %v9881_v30 }
 0x2b2   :  { %v837_v56 = vpop.f32.mrb[4].mxu0 }
 0x2b3   :  { %v838_v38 = vadd.f32 %v837_v56, %v7345_v24  ;;  %v5124_v35 = vpop.f32.mrb[5].mxu0  ;;  %v7393_v24 = vld [vmem:[#allocation8 + $0x30] sm:$0xff]  }
 0x2b4   :  { %v840_v25 = vpop.f32.mrb[6].mxu0  ;;  %v7384_v35 = vld [vmem:[#allocation7 + $0x20] sm:$0xff]   ;;  %9887 = vst [vmem:[#allocation61_spill] sm:$0xff] %v7393_v24 }
 0x2b5   :  { %v5125_v37 = vpop.f32.mrb[7].mxu0  ;;  %843 = vmax.xlane.f32.xlu0 %v838_v38  ;;  %5135 = vmatpush3.bf16.msra.mxu1 %v7384_v35  ;;  %v7387_v25 = vld [vmem:[#allocation8 + $0x28] sm:$0xff]  }
 0x2b6   :  { %9886 = vst [vmem:[#allocation60_spill] sm:$0xff] %v7387_v25  ;;  %v7389_v37 = vld [vmem:[#allocation7 + $0x28] sm:$0xff]   ;;  %5136 = vmatprep.subr.bf16.mxu1 %v9881_v30  ;;  %5157 = vmatpush3.bf16.msra.mxu0 %v7387_v25 }
 0x2b7   :  { %5158 = vmatprep.subr.bf16.mxu0 %v9881_v30 }
 0x2b9   :  { %5137 = vmatpush3.bf16.msra.mxu1 %v7389_v37 }
 0x2ba   :  { %5138 = vmatprep.subr.bf16.mxu1 %v9881_v30  ;;  %5159 = vmatpush3.bf16.msra.mxu0 %v7393_v24 }
 0x2bb   :  { %5160 = vmatprep.subr.bf16.mxu0 %v9881_v30 }
 0x342   :  { %v844_v62 = vpop.xlane.xlu0 %843 }
 0x343   :  { %v845_v63 = vsub.f32 %v838_v38, %v844_v62  ;;  %v7397_v38 = vld [vmem:[#allocation7 + $0x30] sm:$0xff]   ;;  %v7401_v62 = vld [vmem:[#allocation8 + $0x38] sm:$0xff]  }
 0x344   :  { %5139 = vmatpush3.bf16.msra.mxu1 %v7397_v38  ;;  %5161 = vmatpush3.bf16.msra.mxu0 %v7401_v62 }
 0x345   :  { %v846_v29 = vmul.f32 1.442695, %v845_v63  ;;  %v7405_v63 = vld [vmem:[#allocation7 + $0x38] sm:$0xff]   ;;  %5140 = vmatprep.subr.bf16.mxu1 %v9881_v30  ;;  %1334 = vmatprep.subr.bf16.mxu0 %v7080_v1  ;;  %v7418_v1 = vld [vmem:[#allocation14 + $0x8] sm:$0xff]  }
 0x347   :  { %6135 = vpow2.f32 %v846_v29 }
 0x348   :  { %5141 = vmatpush3.bf16.msra.mxu1 %v7405_v63 }
 0x349   :  { %5166 = vmatprep.subr.bf16.mxu1 %v9881_v30 }
 0x351   :  { %v6136_v56 = vpop.eup %6135 }
 0x352   :  { %848 = vadd.xlane.f32.xlu0 %v6136_v56 }
 0x3df   :  { %v849_v29 = vpop.xlane.xlu0 %848 }
 0x3e0   :  { %6137 = vrcp.f32 %v849_v29 }
 0x3ea   :  { %v6138_v24 = vpop.eup %6137 }
 0x3eb   :  { %v851_v25 = vmul.f32 %v6138_v24, %v6136_v56 }
 0x3ed   :  { %v852_v32 = vpack.c.bf16 %v851_v25, %v851_v25 }
 0x3ef   :  { %5143 = vmatmul.mubr.bf16.vlgmr.msra.gmra.mrb[12].mxu1 %v852_v32  ;;  %5163 = vmatmul.mubr.bf16.vlgmr.msra.gmra.mrb[8].mxu0 %v852_v32  ;;  %v9909_v32 = vld [vmem:[#allocation47_spill] sm:$0xff] }
 0x3f0   :  { %1335 = vmatpush1.bf16.msra.mxu0 %v7085_v3  ;;  %1366 = vmatprep.mubr.bf16.mxu0 %v9888_v57  ;;  %v7426_v3 = vld [vmem:[#allocation14 + $0x10] sm:$0xff]  }
 0x3f1   :  { %1336 = vmatprep.subr.bf16.mxu0 %v7090_v5  ;;  %5167 = vmatpush3.bf16.msra.mxu1 %v7412_v55  ;;  %v7432_v5 = vld [vmem:[#allocation14 + $0x18] sm:$0xff]  }
 0x3f2   :  { %5168 = vmatprep.subr.bf16.mxu1 %v9881_v30  ;;  %5182 = vmatprep.mubr.msk.bf16.mxu1 %vm6873_vm2, %v9881_v30 }
 0x3f4   :  { %1337 = vmatpush1.bf16.msra.mxu0 %v7096_v7  ;;  %v7438_v7 = vld [vmem:[#allocation14 + $0x20] sm:$0xff]  }
 0x3f5   :  { %1338 = vmatprep.subr.bf16.mxu0 %v7102_v9  ;;  %5169 = vmatpush3.bf16.msra.mxu1 %v7418_v1  ;;  %v7444_v9 = vld [vmem:[#allocation14 + $0x28] sm:$0xff]  }
 0x3f6   :  { %5170 = vmatprep.subr.bf16.mxu1 %v9881_v30 }
 0x3f8   :  { %1339 = vmatpush1.bf16.msra.mxu0 %v7106_v11  ;;  %v7450_v11 = vld [vmem:[#allocation14 + $0x30] sm:$0xff]  }
 0x3f9   :  { %1340 = vmatprep.subr.bf16.mxu0 %v7112_v13  ;;  %5171 = vmatpush3.bf16.msra.mxu1 %v7426_v3  ;;  %v7456_v13 = vld [vmem:[#allocation14 + $0x38] sm:$0xff]  }
 0x3fa   :  { %5172 = vmatprep.subr.bf16.mxu1 %v9881_v30 }
 0x3fc   :  { %1341 = vmatpush1.bf16.msra.mxu0 %v7118_v15  ;;  %v7501_v15 = vld [vmem:[#allocation13] sm:$0xff]  }
 0x3fd   :  { %1342 = vmatprep.subr.bf16.mxu0 %v7124_v17  ;;  %5173 = vmatpush3.bf16.msra.mxu1 %v7432_v5 }
 0x3fe   :  { %5174 = vmatprep.subr.bf16.mxu1 %v9881_v30 }
 0x400   :  { %1343 = vmatpush1.bf16.msra.mxu0 %v7130_v19 }
 0x401   :  { %1344 = vmatprep.subr.bf16.mxu0 %v7136_v21  ;;  %5175 = vmatpush3.bf16.msra.mxu1 %v7438_v7 }
 0x402   :  { %5176 = vmatprep.subr.bf16.mxu1 %v9881_v30 }
 0x404   :  { %1345 = vmatpush1.bf16.msra.mxu0 %v7144_v23  ;;  %v7504_v23 = vld [vmem:[#allocation13 + $0x8] sm:$0xff]  }
 0x405   :  { %1346 = vmatprep.subr.bf16.mxu0 %v7150_v26  ;;  %5177 = vmatpush3.bf16.msra.mxu1 %v7444_v9  ;;  %v7510_v26 = vld [vmem:[#allocation13 + $0x10] sm:$0xff]  }
 0x406   :  { %5178 = vmatprep.subr.bf16.mxu1 %v9881_v30 }
 0x408   :  { %1347 = vmatpush1.bf16.msra.mxu0 %v7154_v28  ;;  %v7514_v28 = vld [vmem:[#allocation13 + $0x18] sm:$0xff]  }
 0x409   :  { %1348 = vmatprep.subr.bf16.mxu0 %v7164_v31  ;;  %5179 = vmatpush3.bf16.msra.mxu1 %v7450_v11  ;;  %v7518_v31 = vld [vmem:[#allocation13 + $0x20] sm:$0xff]  }
 0x40a   :  { %5180 = vmatprep.subr.bf16.mxu1 %v9881_v30 }
 0x40c   :  { %1349 = vmatpush1.bf16.msra.mxu0 %v7168_v33  ;;  %v7522_v33 = vld [vmem:[#allocation13 + $0x28] sm:$0xff]  }
 0x40d   :  { %1375 = vmatprep.subr.bf16.mxu0 %v7179_v36  ;;  %5181 = vmatpush3.bf16.msra.mxu1 %v7456_v13  ;;  %v7526_v36 = vld [vmem:[#allocation13 + $0x30] sm:$0xff]  }
 0x40e   :  { %5186 = vmatprep.subr.bf16.mxu1 %v9881_v30 }
 0x40f   :  { %1367 = vmatmul.mubr.bf16.vlgmr.msra.gmra.mrb[12].mxu0 %v7337_v27 }
 0x410   :  { %1376 = vmatpush1.bf16.msra.mxu0 %v7192_v39  ;;  %1407 = vmatprep.mubr.bf16.mxu0 %v9888_v57  ;;  %v7530_v39 = vld [vmem:[#allocation13 + $0x38] sm:$0xff]  }
 0x411   :  { %1377 = vmatprep.subr.bf16.mxu0 %v7195_v40  ;;  %v9894_v40 = vld [vmem:[#allocation32_spill] sm:$0xff] }
 0x414   :  { %1378 = vmatpush1.bf16.msra.mxu0 %v7201_v42  ;;  %v9895_v42 = vld [vmem:[#allocation33_spill] sm:$0xff] }
 0x415   :  { %1379 = vmatprep.subr.bf16.mxu0 %v7205_v43  ;;  %v9896_v43 = vld [vmem:[#allocation34_spill] sm:$0xff] }
 0x418   :  { %1380 = vmatpush1.bf16.msra.mxu0 %v7208_v44  ;;  %v9897_v44 = vld [vmem:[#allocation35_spill] sm:$0xff] }
 0x419   :  { %1381 = vmatprep.subr.bf16.mxu0 %v7211_v45  ;;  %v9898_v45 = vld [vmem:[#allocation36_spill] sm:$0xff] }
 0x41c   :  { %1382 = vmatpush1.bf16.msra.mxu0 %v7213_v46  ;;  %v9899_v46 = vld [vmem:[#allocation37_spill] sm:$0xff] }
 0x41d   :  { %1383 = vmatprep.subr.bf16.mxu0 %v7215_v47  ;;  %v9900_v47 = vld [vmem:[#allocation38_spill] sm:$0xff] }
 0x420   :  { %1384 = vmatpush1.bf16.msra.mxu0 %v7219_v48  ;;  %v9901_v48 = vld [vmem:[#allocation39_spill] sm:$0xff] }
 0x421   :  { %1385 = vmatprep.subr.bf16.mxu0 %v7221_v49  ;;  %v9902_v49 = vld [vmem:[#allocation40_spill] sm:$0xff] }
 0x424   :  { %1386 = vmatpush1.bf16.msra.mxu0 %v7225_v50  ;;  %v9903_v50 = vld [vmem:[#allocation41_spill] sm:$0xff] }
 0x425   :  { %1387 = vmatprep.subr.bf16.mxu0 %v7227_v51  ;;  %v9904_v51 = vld [vmem:[#allocation42_spill] sm:$0xff] }
 0x428   :  { %1388 = vmatpush1.bf16.msra.mxu0 %v7231_v52  ;;  %v9905_v52 = vld [vmem:[#allocation43_spill] sm:$0xff] }
 0x429   :  { %1389 = vmatprep.subr.bf16.mxu0 %v7233_v53  ;;  %v9906_v53 = vld [vmem:[#allocation44_spill] sm:$0xff] }
 0x42c   :  { %1390 = vmatpush1.bf16.msra.mxu0 %v7237_v54  ;;  %v9907_v54 = vld [vmem:[#allocation45_spill] sm:$0xff] }
 0x42d   :  { %1416 = vmatprep.subr.bf16.mxu0 %v7082_v2  ;;  %v9889_v2 = vld [vmem:[#allocation26_spill] sm:$0xff] }
 0x42f   :  { %1408 = vmatmul.mubr.bf16.vlgmr.msra.gmra.mrb[16].mxu0 %v7337_v27 }
 0x430   :  { %1417 = vmatpush1.bf16.msra.mxu0 %v7087_v4  ;;  %1448 = vmatprep.mubr.bf16.mxu0 %v9888_v57  ;;  %v9890_v4 = vld [vmem:[#allocation27_spill] sm:$0xff] }
 0x431   :  { %1418 = vmatprep.subr.bf16.mxu0 %v7094_v6  ;;  %v9891_v6 = vld [vmem:[#allocation28_spill] sm:$0xff] }
 0x434   :  { %1419 = vmatpush1.bf16.msra.mxu0 %v7099_v8  ;;  %v9892_v8 = vld [vmem:[#allocation30_spill] sm:$0xff] }
 0x435   :  { %1420 = vmatprep.subr.bf16.mxu0 %v7104_v10  ;;  %v9893_v10 = vld [vmem:[#allocation31_spill] sm:$0xff] }
 0x438   :  { %1421 = vmatpush1.bf16.msra.mxu0 %v7108_v12 }
 0x439   :  { %1422 = vmatprep.subr.bf16.mxu0 %v7116_v14 }
 0x43c   :  { %1423 = vmatpush1.bf16.msra.mxu0 %v7122_v16 }
 0x43d   :  { %1424 = vmatprep.subr.bf16.mxu0 %v7128_v18 }
 0x440   :  { %1425 = vmatpush1.bf16.msra.mxu0 %v7132_v20 }
 0x441   :  { %1426 = vmatprep.subr.bf16.mxu0 %v7140_v22 }
 0x444   :  { %1427 = vmatpush1.bf16.msra.mxu0 %v9889_v2  ;;  %v7560_v2 = vld [vmem:[%s9662_s9] ss:$0 sm:$0xff] }
 0x445   :  { %1428 = vmatprep.subr.bf16.mxu0 %v9890_v4 }
 0x448   :  { %1429 = vmatpush1.bf16.msra.mxu0 %v9891_v6  ;;  %v7565_v6 = vld [vmem:[%s9663_s10] ss:$0 sm:$0xff] }
 0x449   :  { %1430 = vmatprep.subr.bf16.mxu0 %v9892_v8  ;;  %v9910_v8 = vld [vmem:[#allocation29_spill] sm:$0xff] }
 0x44a   :  { %vm1327_vm10 = vcmp.eq.s32.totalorder %v9910_v8, 0 }
 0x44c   :  { %1431 = vmatpush1.bf16.msra.mxu0 %v9893_v10  ;;  %v4575_v10 = vsel %vm157_vm0, 1.0, %v9881_v30 }
 0x44d   :  { %5226 = vmatprep.subr.bf16.mxu0 %v9881_v30 }
 0x4c2   :  { %v951_v12 = vpop.f32.mrb[12].mxu1  ;;  %v7499_v14 = vpop.f32.mrb[8].mxu0 }
 0x4c3   :  { %v1077_v16 = vpack.c.bf16 %v951_v12, %v951_v12  ;;  %v5144_v17 = vpop.f32.mrb[13].mxu1  ;;  %v5164_v18 = vpop.f32.mrb[9].mxu0 }
 0x4c4   :  { %v954_v19 = vpop.f32.mrb[14].mxu1  ;;  %v1058_v20 = vpop.f32.mrb[10].mxu0 }
 0x4c5   :  { %v5145_v21 = vpop.f32.mrb[15].mxu1  ;;  %v5165_v22 = vpop.f32.mrb[11].mxu0  ;;  %5183 = vmatmul.mubr.bf16.vlgmr.msra.gmra.mrb[16].mxu1 %v1077_v16  ;;  %v735_v19 = vmul.f32 %v7565_v6, %v4575_v10  ;;  %v6874_v20 = vmov 32  }
 0x4c6   :  { %5187 = vmatpush3.bf16.msra.mxu1 %v7501_v15  ;;  %5202 = vmatprep.mubr.msk.bf16.mxu1 %vm6873_vm2, %v9881_v30 }
 0x4c7   :  { %5188 = vmatprep.subr.bf16.mxu1 %v9881_v30  ;;  %5987 = vset.pattern.permute.xlu1 %v6874_v20 }
 0x4c8   :  { %5988 = vset.pattern.permute.xlu0 %v6874_v20 }
 0x4ca   :  { %5189 = vmatpush3.bf16.msra.mxu1 %v7504_v23 }
 0x4cb   :  { %5190 = vmatprep.subr.bf16.mxu1 %v9881_v30 }
 0x4ce   :  { %5191 = vmatpush3.bf16.msra.mxu1 %v7510_v26 }
 0x4cf   :  { %5192 = vmatprep.subr.bf16.mxu1 %v9881_v30 }
 0x4d2   :  { %5193 = vmatpush3.bf16.msra.mxu1 %v7514_v28 }
 0x4d3   :  { %5194 = vmatprep.subr.bf16.mxu1 %v9881_v30 }
 0x4d6   :  { %5195 = vmatpush3.bf16.msra.mxu1 %v7518_v31 }
 0x4d7   :  { %5196 = vmatprep.subr.bf16.mxu1 %v9881_v30 }
 0x4da   :  { %5197 = vmatpush3.bf16.msra.mxu1 %v7522_v33 }
 0x4db   :  { %5198 = vmatprep.subr.bf16.mxu1 %v9881_v30 }
 0x4de   :  { %5199 = vmatpush3.bf16.msra.mxu1 %v7526_v36 }
 0x4df   :  { %5200 = vmatprep.subr.bf16.mxu1 %v9881_v30 }
 0x4e2   :  { %5201 = vmatpush3.bf16.msra.mxu1 %v7530_v39 }
 0x4e3   :  { %1457 = vmatprep.subr.bf16.mxu1 %v9894_v40 }
 0x4e5   :  { %5203 = vmatmul.mubr.bf16.vlgmr.msra.gmra.mrb[16].mxu1 %v7337_v27  ;;  %v9908_v27 = vld [vmem:[#allocation46_spill] sm:$0xff] }
 0x4e6   :  { %1458 = vmatpush1.bf16.msra.mxu1 %v9895_v42  ;;  %1489 = vmatprep.mubr.bf16.mxu1 %v9888_v57 }
 0x4e7   :  { %1459 = vmatprep.subr.bf16.mxu1 %v9896_v43 }
 0x4ea   :  { %1460 = vmatpush1.bf16.msra.mxu1 %v9897_v44 }
 0x4eb   :  { %1461 = vmatprep.subr.bf16.mxu1 %v9898_v45 }
 0x4ee   :  { %1462 = vmatpush1.bf16.msra.mxu1 %v9899_v46 }
 0x4ef   :  { %1463 = vmatprep.subr.bf16.mxu1 %v9900_v47 }
 0x4f2   :  { %1464 = vmatpush1.bf16.msra.mxu1 %v9901_v48 }
 0x4f3   :  { %1465 = vmatprep.subr.bf16.mxu1 %v9902_v49 }
 0x4f6   :  { %1466 = vmatpush1.bf16.msra.mxu1 %v9903_v50 }
 0x4f7   :  { %1467 = vmatprep.subr.bf16.mxu1 %v9904_v51 }
 0x4fa   :  { %1468 = vmatpush1.bf16.msra.mxu1 %v9905_v52 }
 0x4fb   :  { %1469 = vmatprep.subr.bf16.mxu1 %v9906_v53 }
 0x4fe   :  { %1470 = vmatpush1.bf16.msra.mxu1 %v9907_v54 }
 0x4ff   :  { %1471 = vmatprep.subr.bf16.mxu1 %v9908_v27 }
 0x502   :  { %v7551_v24 = vpop.f32.mrb[16].mxu0  ;;  %1472 = vmatpush1.bf16.msra.mxu1 %v9909_v32 }
 0x503   :  { %v7554_v56 = vpop.f32.mrb[17].mxu0  ;;  %5206 = vmatprep.subr.bf16.mxu1 %v9881_v30 }
 0x504   :  { %v1413_v25 = vpop.f32.mrb[18].mxu0 }
 0x505   :  { %v1414_v29 = vpop.f32.mrb[19].mxu0 }
 0x5b8   :  { %v1264_v4 = vpop.f32.mrb[16].mxu1 }
 0x5b9   :  { %v5204_v12 = vpop.f32.mrb[17].mxu1  ;;  %v1283_v16 = vadd.f32 %v7560_v2, %v1264_v4 }
 0x5ba   :  { %v1267_v17 = vpop.f32.mrb[18].mxu1 }
 0x5bb   :  { %1284 = vmax.xlane.f32.xlu1 %v1283_v16  ;;  %v5205_v18 = vpop.f32.mrb[19].mxu1 }
 0x5bf   :  { %736 = vadd.xlane.f32.xlu1 %v735_v19 }
 0x648   :  { %v1285_v21 = vpop.xlane.xlu1 %1284 }
 0x649   :  { %v1286_v22 = vsub.f32 %v1283_v16, %v1285_v21 }
 0x64b   :  { %v1287_v40 = vmul.f32 1.442695, %v1286_v22 }
 0x64c   :  { %v737_v42 = vpop.xlane.xlu1 %736 }
 0x64d   :  { %6139 = vpow2.f32 %v1287_v40  ;;  %v1270_v43 = vadd.f32 %v1264_v4, %v737_v42 }
 0x64f   :  { %v4687_v44 = vmul.f32 -1.442695, %v1270_v43  ;;  %v9912_v43 = vmov 1.0|1.0  }
 0x651   :  { %6141 = vpow2.f32 %v4687_v44  ;;  %v9913_v44 = vld [vmem:[#allocation48_spill] sm:$0xff] }
 0x657   :  { %v6140_v45 = vpop.eup %6139 }
 0x658   :  { %1289 = vadd.xlane.f32.xlu0 %v6140_v45 }
 0x65b   :  { %v6142_v46 = vpop.eup %6141 }
 0x65c   :  { %v1274_v47 = vadd.f32 1.0, %v6142_v46  ;;  %v9915_v46 = vld [vmem:[#allocation50_spill] sm:$0xff] }
 0x65e   :  { %6143 = vrcp.f32 %v1274_v47  ;;  %v9917_v47 = vld [vmem:[#allocation52_spill] sm:$0xff] }
 0x668   :  { %v6144_v48 = vpop.eup %6143 }
 0x669   :  { %1295 = vperm.xlu1 %5987, %v6144_v48   ;;  %v1299_v49 = vsub.f32 1.0, %v6144_v48 }
 0x66e   :  { %1302 = vperm.xlu0 %5988, %v1299_v49  }
 0x6e5   :  { %v1290_v50 = vpop.xlane.xlu0 %1289 }
 0x6e6   :  { %6145 = vrcp.f32 %v1290_v50 }
 0x6e8   :  { %v1296_v54 = vpop.permute.xlu1 %1295 }
 0x6ed   :  { %v1303_v52 = vpop.permute.xlu0 %1302 }
 0x6ee   :  { %v1305_v32 = vmul.f32 %v1303_v52, %v7499_v14 }
 0x6f0   :  { %v6146_v51 = vpop.eup %6145 }
 0x6f1   :  { %v1292_v53 = vmul.f32 %v6146_v51, %v6140_v45  ;;  %v9914_v45 = vld [vmem:[#allocation49_spill] sm:$0xff] }
 0x6f3   :  { %v1298_v27 = vmul.f32 %v1296_v54, %v1292_v53 }
 0x6f5   :  { %v1306_v25 = vadd.f32 %v1305_v32, %v1298_v27 }
 0x6f7   :  { %1307 = vmax.xlane.f32.xlu1 %v1306_v25 }
 0x784   :  { %v7573_v29 = vpop.xlane.xlu1 %1307 }
 0x785   :  { %9911 = vst [vmem:[#allocation26_spill] sm:$0xff] %v7573_v29  ;;  %vm1309_vm3 = vcmp.eq.f32.partialorder %v1306_v25, %v7573_v29  ;;  %v7812_v29 = vld [vmem:[#allocation10 + $0xe4] ss:$16 sps:$4 sm:$0xff]  }
 0x786   :  { %v1310_v4 = vsel %vm1309_vm3, %v9910_v8, 128  ;;  %vm2238_vm3 = vcmp.eq.s32.totalorder %v9910_v8, 2 }
 0x787   :  { %v1312_v10 = vshra.s32 %v1310_v4, 16  ;;  %v1311_v16 = vand.u32 65535, %v1310_v4 }
 0x789   :  { %v1314_v12 = vcvt.s32.f32 %v1312_v10  ;;  %v1313_v18 = vcvt.s32.f32 %v1311_v16 }
 0x78b   :  { %1315 = vmin.xlane.f32.xlu0 %v1314_v12 }
 0x818   :  { %v1316_v17 = vpop.xlane.xlu0 %1315 }
 0x819   :  { %vm1317_vm4 = vcmp.eq.f32.partialorder %v1314_v12, %v1316_v17  ;;  %v1322_v20 = vcvt.f32.s32 %v1316_v17 }
 0x81a   :  { %v1318_v19 = vsel %vm1317_vm4, %v1313_v18, inf }
 0x81b   :  { %1319 = vmin.xlane.f32.xlu1 %v1318_v19  ;;  %v1323_v14 = vshll.u32 %v1322_v20, 16 }
 0x8a8   :  { %v1320_v21 = vpop.xlane.xlu1 %1319 }
 0x8a9   :  { %v1321_v22 = vcvt.f32.s32 %v1320_v21 }
 0x8ab   :  { %v1324_v40 = vadd.s32 %v1323_v14, %v1321_v22  ;;  %v9922_v22 = vld [vmem:[#allocation58_spill] sm:$0xff] }
 0x8ad   :  { %vm1325_vm5 = vcmp.ge.s32.totalorder %v1324_v40, 32 }
 0x8ae   :  { %v7577_v42 = vsel %vm1325_vm5, 3, %v1324_v40  ;;  %v9923_v40 = vld [vmem:[#allocation59_spill] sm:$0xff] }
 0x8af   :  { %vm1330_vm6 = vcmp.eq.s32.totalorder %v9910_v8, %v7577_v42 }
 0x8b0   :  { %vm4690_vm7 = vmpackc.low %vm1330_vm6, %vm1330_vm6 }
 0x8b1   :  { %4691 = vmatmul.mubr.msk.bf16.vlgmr.msra.gmra.mrb[12].mxu0 %vm4690_vm7, %v9912_v43  ;;  %4693 = vmatmul.mubr.msk.bf16.vlgmr.msra.gmra.mrb[20].mxu1 %vm4690_vm7, %v9912_v43 }
 0x8b2   :  { %5207 = vmatpush3.bf16.msra.mxu1 %v9913_v44  ;;  %5222 = vmatprep.mubr.msk.bf16.mxu1 %vm6873_vm2, %v9881_v30  ;;  %v9925_v44 = vld [vmem:[#allocation61_spill] sm:$0xff] }
 0x8b3   :  { %5208 = vmatprep.subr.bf16.mxu1 %v9881_v30  ;;  %5227 = vmatpush3.bf16.msra.mxu0 %v7350_v60  ;;  %v9916_v60 = vld [vmem:[#allocation51_spill] sm:$0xff] }
 0x8b4   :  { %5228 = vmatprep.subr.bf16.mxu0 %v9881_v30  ;;  %5242 = vmatprep.mubr.msk.bf16.mxu0 %vm6873_vm2, %v9881_v30 }
 0x8b6   :  { %5209 = vmatpush3.bf16.msra.mxu1 %v9914_v45 }
 0x8b7   :  { %5210 = vmatprep.subr.bf16.mxu1 %v9881_v30  ;;  %5229 = vmatpush3.bf16.msra.mxu0 %v7356_v58  ;;  %v9918_v58 = vld [vmem:[#allocation53_spill] sm:$0xff] }
 0x8b8   :  { %5230 = vmatprep.subr.bf16.mxu0 %v9881_v30 }
 0x8ba   :  { %5211 = vmatpush3.bf16.msra.mxu1 %v9915_v46  ;;  %v9926_v46 = vld [vmem:[#allocation56_spill] sm:$0xff] }
 0x8bb   :  { %5212 = vmatprep.subr.bf16.mxu1 %v9881_v30  ;;  %5231 = vmatpush3.bf16.msra.mxu0 %v7364_v61  ;;  %v9919_v61 = vld [vmem:[#allocation54_spill] sm:$0xff] }
 0x8bc   :  { %5232 = vmatprep.subr.bf16.mxu0 %v9881_v30 }
 0x8be   :  { %5213 = vmatpush3.bf16.msra.mxu1 %v9916_v60 }
 0x8bf   :  { %5214 = vmatprep.subr.bf16.mxu1 %v9881_v30  ;;  %5233 = vmatpush3.bf16.msra.mxu0 %v7372_v34  ;;  %v9920_v34 = vld [vmem:[#allocation55_spill] sm:$0xff] }
 0x8c0   :  { %5234 = vmatprep.subr.bf16.mxu0 %v9881_v30 }
 0x8c2   :  { %5215 = vmatpush3.bf16.msra.mxu1 %v9917_v47 }
 0x8c3   :  { %5216 = vmatprep.subr.bf16.mxu1 %v9881_v30  ;;  %5235 = vmatpush3.bf16.msra.mxu0 %v7384_v35 }
 0x8c4   :  { %5236 = vmatprep.subr.bf16.mxu0 %v9881_v30 }
 0x8c6   :  { %5217 = vmatpush3.bf16.msra.mxu1 %v9918_v58 }
 0x8c7   :  { %5218 = vmatprep.subr.bf16.mxu1 %v9881_v30  ;;  %5237 = vmatpush3.bf16.msra.mxu0 %v7389_v37 }
 0x8c8   :  { %5238 = vmatprep.subr.bf16.mxu0 %v9881_v30 }
 0x8ca   :  { %5219 = vmatpush3.bf16.msra.mxu1 %v9919_v61 }
 0x8cb   :  { %5220 = vmatprep.subr.bf16.mxu1 %v9881_v30  ;;  %5239 = vmatpush3.bf16.msra.mxu0 %v7397_v38 }
 0x8cc   :  { %5240 = vmatprep.subr.bf16.mxu0 %v9881_v30 }
 0x8ce   :  { %5221 = vmatpush3.bf16.msra.mxu1 %v9920_v34 }
 0x8cf   :  { %5246 = vmatprep.subr.bf16.mxu1 %v9881_v30  ;;  %5241 = vmatpush3.bf16.msra.mxu0 %v7405_v63 }
 0x8d0   :  { %5266 = vmatprep.subr.bf16.mxu0 %v9881_v30 }
 0x984   :  { %v1450_v35 = vpop.f32.mrb[12].mxu0  ;;  %v1491_v37 = vpop.f32.mrb[20].mxu1 }
 0x985   :  { %v4694_v48 = vmul.f32 -1.442695, %v1450_v35  ;;  %v1492_v49 = vadd.f32 %v1491_v37, %v7551_v24  ;;  %v1452_v50 = vpop.f32.mrb[13].mxu0  ;;  %v1493_v51 = vpop.f32.mrb[21].mxu1 }
 0x986   :  { %v1494_v52 = vadd.f32 %v1493_v51, %v7554_v56  ;;  %v1454_v38 = vpop.f32.mrb[14].mxu0  ;;  %v1495_v53 = vpop.f32.mrb[22].mxu1  ;;  %v4695_v32 = vmul.f32 -1.442695, %v1452_v50 }
 0x987   :  { %6147 = vpow2.f32 %v4694_v48  ;;  %v1455_v54 = vpop.f32.mrb[15].mxu0  ;;  %v1496_v27 = vpop.f32.mrb[23].mxu1  ;;  %v7658_v38 = vld [vmem:[#allocation11 + $0x24] ss:$16 sps:$4 sm:$0xff]   ;;  %v7665_v53 = vld [vmem:[#allocation11 + $0x20] ss:$16 sps:$4 sm:$0xff]  }
 0x988   :  { %6149 = vpow2.f32 %v4695_v32  ;;  %v7668_v54 = vld [vmem:[#allocation11 + $0x44] ss:$16 sps:$4 sm:$0xff]   ;;  %v7673_v27 = vld [vmem:[#allocation11 + $0x40] ss:$16 sps:$4 sm:$0xff]  }
 0x989   :  { %v7681_v32 = vld [vmem:[#allocation11 + $0x60] ss:$16 sps:$4 sm:$0xff]  }
 0x991   :  { %v6148_v25 = vpop.eup %6147 }
 0x992   :  { %v1501_v63 = vadd.f32 1.0, %v6148_v25  ;;  %v6150_v4 = vpop.eup %6149  ;;  %v7684_v25 = vld [vmem:[#allocation11 + $0x84] ss:$16 sps:$4 sm:$0xff]  }
 0x993   :  { %v1507_v10 = vadd.f32 1.0, %v6150_v4  ;;  %v7700_v4 = vld [vmem:[#allocation11 + $0xc4] ss:$16 sps:$4 sm:$0xff]  }
 0x994   :  { %6151 = vrcp.f32 %v1501_v63  ;;  %v7692_v63 = vld [vmem:[#allocation11 + $0xa4] ss:$16 sps:$4 sm:$0xff]  }
 0x995   :  { %6153 = vrcp.f32 %v1507_v10  ;;  %v7708_v10 = vld [vmem:[#allocation11 + $0xe4] ss:$16 sps:$4 sm:$0xff]  }
 0x99e   :  { %v6152_v12 = vpop.eup %6151 }
 0x99f   :  { %v1510_v16 = vmul.f32 %v6152_v12, %v1494_v52  ;;  %v6154_v17 = vpop.eup %6153  ;;  %v7654_v52 = vld [vmem:[#allocation11] ss:$16 sps:$4 sm:$0xff]   ;;  %v7716_v12 = vld [vmem:[#allocation11 + $0xc] ss:$16 sps:$4 sm:$0xff]  }
 0x9a0   :  { %v1513_v18 = vsub.f32 1.0, %v6154_v17  ;;  %v1515_v20 = vmul.f32 %v6154_v17, %v7333_v0  ;;  %v9921_v0 = vld [vmem:[#allocation57_spill] sm:$0xff] }
 0x9a1   :  { %v1511_v24 = vadd.f32 %v1510_v16, %v1492_v49  ;;  %v7729_v16 = vld [vmem:[#allocation11 + $0x28] ss:$16 sps:$4 sm:$0xff]   ;;  %v7738_v17 = vld [vmem:[#allocation11 + $0x6c] ss:$16 sps:$4 sm:$0xff]  }
 0x9a3   :  { %6155 = vtanh.f32 %v1511_v24  ;;  %v7732_v24 = vld [vmem:[#allocation11 + $0x4c] ss:$16 sps:$4 sm:$0xff]  }
 0x9ad   :  { %v6156_v56 = vpop.eup %6155 }
 0x9ae   :  { %v1514_v19 = vmul.f32 %v6156_v56, %v1513_v18  ;;  %v7741_v18 = vld [vmem:[#allocation11 + $0x68] ss:$16 sps:$4 sm:$0xff]   ;;  %v7744_v56 = vld [vmem:[#allocation11 + $0x8c] ss:$16 sps:$4 sm:$0xff]  }
 0x9b0   :  { %v7626_v21 = vadd.f32 %v1515_v20, %v1514_v19  ;;  %v7747_v19 = vld [vmem:[#allocation11 + $0x88] ss:$16 sps:$4 sm:$0xff]   ;;  %v7750_v20 = vld [vmem:[#allocation11 + $0xac] ss:$16 sps:$4 sm:$0xff]  }
 0x9b2   :  { %v7630_v14 = vpack.c.bf16 %v7626_v21, %v7626_v21 }
 0x9b4   :  { %5223 = vmatmul.mubr.bf16.vlgmr.msra.gmra.mrb[24].mxu1 %v7630_v14 }
 0x9b5   :  { %5247 = vmatpush3.bf16.msra.mxu1 %v7348_v41  ;;  %5262 = vmatprep.mubr.msk.bf16.mxu1 %vm6873_vm2, %v9881_v30  ;;  %v9924_v41 = vld [vmem:[#allocation60_spill] sm:$0xff] }
 0x9b6   :  { %5248 = vmatprep.subr.bf16.mxu1 %v9881_v30 }
 0x9b9   :  { %5249 = vmatpush3.bf16.msra.mxu1 %v7354_v59  ;;  %v7650_v59 = vld [vmem:[#allocation11 + $0x4] ss:$16 sps:$4 sm:$0xff]  }
 0x9ba   :  { %5250 = vmatprep.subr.bf16.mxu1 %v9881_v30 }
 0x9bd   :  { %5251 = vmatpush3.bf16.msra.mxu1 %v9921_v0  ;;  %v7753_v0 = vld [vmem:[#allocation11 + $0xa8] ss:$16 sps:$4 sm:$0xff]  }
 0x9be   :  { %5252 = vmatprep.subr.bf16.mxu1 %v9881_v30 }
 0x9c1   :  { %5253 = vmatpush3.bf16.msra.mxu1 %v9922_v22  ;;  %v7756_v22 = vld [vmem:[#allocation11 + $0xcc] ss:$16 sps:$4 sm:$0xff]  }
 0x9c2   :  { %5254 = vmatprep.subr.bf16.mxu1 %v9881_v30 }
 0x9c5   :  { %5255 = vmatpush3.bf16.msra.mxu1 %v9923_v40  ;;  %v7759_v40 = vld [vmem:[#allocation11 + $0xc8] ss:$16 sps:$4 sm:$0xff]  }
 0x9c6   :  { %5256 = vmatprep.subr.bf16.mxu1 %v9881_v30 }
 0x9c9   :  { %5257 = vmatpush3.bf16.msra.mxu1 %v9924_v41  ;;  %v7762_v41 = vld [vmem:[#allocation11 + $0xec] ss:$16 sps:$4 sm:$0xff]  }
 0x9ca   :  { %5258 = vmatprep.subr.bf16.mxu1 %v9881_v30 }
 0x9cd   :  { %5259 = vmatpush3.bf16.msra.mxu1 %v9925_v44  ;;  %v7765_v44 = vld [vmem:[#allocation11 + $0xe8] ss:$16 sps:$4 sm:$0xff]  }
 0x9ce   :  { %5260 = vmatprep.subr.bf16.mxu1 %v9881_v30 }
 0x9d1   :  { %5261 = vmatpush3.bf16.msra.mxu1 %v7401_v62 }
 0x9d2   :  { %1789 = vmatprep.subr.bf16.mxu1 %v7650_v59 }
 0xa87   :  { %v1555_v45 = vpop.f32.mrb[24].mxu1 }
 0xa88   :  { %v1556_v60 = vadd.f32 %v1555_v45, %v9926_v46  ;;  %v5224_v47 = vpop.f32.mrb[25].mxu1  ;;  %v7768_v45 = vld [vmem:[#allocation10 + $0x4] ss:$16 sps:$4 sm:$0xff]   ;;  %v7772_v46 = vld [vmem:[#allocation10] ss:$16 sps:$4 sm:$0xff]  }
 0xa89   :  { %v1558_v58 = vpop.f32.mrb[26].mxu1  ;;  %v7779_v47 = vld [vmem:[#allocation10 + $0x20] ss:$16 sps:$4 sm:$0xff]  }
 0xa8a   :  { %1561 = vmax.xlane.f32.xlu1 %v1556_v60  ;;  %v5225_v61 = vpop.f32.mrb[27].mxu1  ;;  %v7782_v58 = vld [vmem:[#allocation10 + $0x44] ss:$16 sps:$4 sm:$0xff]  }
 0xa8b   :  { %9927 = vst [vmem:[#allocation27_spill] sm:$0xff] %v7782_v58  ;;  %v7785_v61 = vld [vmem:[#allocation10 + $0x40] ss:$16 sps:$4 sm:$0xff]  }
 0xa8c   :  { %9928 = vst [vmem:[#allocation28_spill] sm:$0xff] %v7785_v61 }
 0xb17   :  { %v1562_v34 = vpop.xlane.xlu1 %1561 }
 0xb18   :  { %v1563_v35 = vsub.f32 %v1556_v60, %v1562_v34  ;;  %v7776_v60 = vld [vmem:[#allocation10 + $0x24] ss:$16 sps:$4 sm:$0xff]  }
 0xb19   :  { %v7788_v34 = vld [vmem:[#allocation10 + $0x64] ss:$16 sps:$4 sm:$0xff]  }
 0xb1a   :  { %v1564_v37 = vmul.f32 1.442695, %v1563_v35  ;;  %9929 = vst [vmem:[#allocation30_spill] sm:$0xff] %v7788_v34  ;;  %v7791_v35 = vld [vmem:[#allocation10 + $0x60] ss:$16 sps:$4 sm:$0xff]  }
 0xb1b   :  { %9930 = vst [vmem:[#allocation31_spill] sm:$0xff] %v7791_v35 }
 0xb1c   :  { %6157 = vpow2.f32 %v1564_v37  ;;  %v7794_v37 = vld [vmem:[#allocation10 + $0x84] ss:$16 sps:$4 sm:$0xff]  }
 0xb1d   :  { %9931 = vst [vmem:[#allocation32_spill] sm:$0xff] %v7794_v37 }
 0xb26   :  { %v6158_v48 = vpop.eup %6157 }
 0xb27   :  { %1566 = vadd.xlane.f32.xlu1 %v6158_v48 }
 0xbb4   :  { %v1567_v49 = vpop.xlane.xlu1 %1566 }
 0xbb5   :  { %6159 = vrcp.f32 %v1567_v49  ;;  %v7800_v49 = vld [vmem:[#allocation10 + $0xa4] ss:$16 sps:$4 sm:$0xff]  }
 0xbb6   :  { %9933 = vst [vmem:[#allocation34_spill] sm:$0xff] %v7800_v49 }
 0xbbf   :  { %v6160_v62 = vpop.eup %6159 }
 0xbc0   :  { %v1569_v50 = vmul.f32 %v6160_v62, %v6158_v48  ;;  %v7797_v48 = vld [vmem:[#allocation10 + $0x80] ss:$16 sps:$4 sm:$0xff]  }
 0xbc1   :  { %9932 = vst [vmem:[#allocation33_spill] sm:$0xff] %v7797_v48  ;;  %v7803_v62 = vld [vmem:[#allocation10 + $0xa0] ss:$16 sps:$4 sm:$0xff]  }
 0xbc2   :  { %v1570_v51 = vpack.c.bf16 %v1569_v50, %v1569_v50  ;;  %9934 = vst [vmem:[#allocation35_spill] sm:$0xff] %v7803_v62  ;;  %v7806_v50 = vld [vmem:[#allocation10 + $0xc4] ss:$16 sps:$4 sm:$0xff]  }
 0xbc3   :  { %9935 = vst [vmem:[#allocation36_spill] sm:$0xff] %v7806_v50 }
 0xbc4   :  { %5243 = vmatmul.mubr.bf16.vlgmr.msra.gmra.mrb[20].mxu0 %v1570_v51  ;;  %5263 = vmatmul.mubr.bf16.vlgmr.msra.gmra.mrb[28].mxu1 %v1570_v51  ;;  %v7809_v51 = vld [vmem:[#allocation10 + $0xc0] ss:$16 sps:$4 sm:$0xff]  }
 0xbc5   :  { %1790 = vmatpush1.bf16.msra.mxu1 %v7654_v52  ;;  %1821 = vmatprep.mubr.bf16.mxu1 %v9888_v57  ;;  %9936 = vst [vmem:[#allocation37_spill] sm:$0xff] %v7809_v51 }
 0xbc6   :  { %1791 = vmatprep.subr.bf16.mxu1 %v7658_v38  ;;  %5267 = vmatpush3.bf16.msra.mxu0 %v7412_v55  ;;  %v7676_v55 = vld [vmem:[#allocation11 + $0x64] ss:$16 sps:$4 sm:$0xff]  }
 0xbc7   :  { %5268 = vmatprep.subr.bf16.mxu0 %v9881_v30  ;;  %5282 = vmatprep.mubr.msk.bf16.mxu0 %vm6873_vm2, %v9881_v30 }
 0xbc9   :  { %1792 = vmatpush1.bf16.msra.mxu1 %v7665_v53 }
 0xbca   :  { %1793 = vmatprep.subr.bf16.mxu1 %v7668_v54  ;;  %5269 = vmatpush3.bf16.msra.mxu0 %v7418_v1  ;;  %v7689_v1 = vld [vmem:[#allocation11 + $0x80] ss:$16 sps:$4 sm:$0xff]  }
 0xbcb   :  { %5270 = vmatprep.subr.bf16.mxu0 %v9881_v30 }
 0xbcd   :  { %1794 = vmatpush1.bf16.msra.mxu1 %v7673_v27 }
 0xbce   :  { %1795 = vmatprep.subr.bf16.mxu1 %v7676_v55  ;;  %5271 = vmatpush3.bf16.msra.mxu0 %v7426_v3  ;;  %v7697_v3 = vld [vmem:[#allocation11 + $0xa0] ss:$16 sps:$4 sm:$0xff]  }
 0xbcf   :  { %5272 = vmatprep.subr.bf16.mxu0 %v9881_v30 }
 0xbd1   :  { %1796 = vmatpush1.bf16.msra.mxu1 %v7681_v32 }
 0xbd2   :  { %1797 = vmatprep.subr.bf16.mxu1 %v7684_v25  ;;  %5273 = vmatpush3.bf16.msra.mxu0 %v7432_v5  ;;  %v7705_v5 = vld [vmem:[#allocation11 + $0xc0] ss:$16 sps:$4 sm:$0xff]  }
 0xbd3   :  { %5274 = vmatprep.subr.bf16.mxu0 %v9881_v30 }
 0xbd5   :  { %1798 = vmatpush1.bf16.msra.mxu1 %v7689_v1 }
 0xbd6   :  { %1799 = vmatprep.subr.bf16.mxu1 %v7692_v63  ;;  %5275 = vmatpush3.bf16.msra.mxu0 %v7438_v7  ;;  %v7713_v7 = vld [vmem:[#allocation11 + $0xe0] ss:$16 sps:$4 sm:$0xff]  }
 0xbd7   :  { %5276 = vmatprep.subr.bf16.mxu0 %v9881_v30 }
 0xbd9   :  { %1800 = vmatpush1.bf16.msra.mxu1 %v7697_v3 }
 0xbda   :  { %1801 = vmatprep.subr.bf16.mxu1 %v7700_v4  ;;  %5277 = vmatpush3.bf16.msra.mxu0 %v7444_v9  ;;  %v7722_v9 = vld [vmem:[#allocation11 + $0x8] ss:$16 sps:$4 sm:$0xff]  }
 0xbdb   :  { %5278 = vmatprep.subr.bf16.mxu0 %v9881_v30 }
 0xbdd   :  { %1802 = vmatpush1.bf16.msra.mxu1 %v7705_v5 }
 0xbde   :  { %1803 = vmatprep.subr.bf16.mxu1 %v7708_v10  ;;  %5279 = vmatpush3.bf16.msra.mxu0 %v7450_v11  ;;  %v7726_v11 = vld [vmem:[#allocation11 + $0x2c] ss:$16 sps:$4 sm:$0xff]  }
 0xbdf   :  { %5280 = vmatprep.subr.bf16.mxu0 %v9881_v30 }
 0xbe1   :  { %1804 = vmatpush1.bf16.msra.mxu1 %v7713_v7 }
 0xbe2   :  { %1830 = vmatprep.subr.bf16.mxu1 %v7716_v12  ;;  %5281 = vmatpush3.bf16.msra.mxu0 %v7456_v13  ;;  %v7735_v13 = vld [vmem:[#allocation11 + $0x48] ss:$16 sps:$4 sm:$0xff]  }
 0xbe3   :  { %5286 = vmatprep.subr.bf16.mxu0 %v9881_v30 }
 0xbe4   :  { %1822 = vmatmul.mubr.bf16.vlgmr.msra.gmra.mrb[32].mxu1 %v7630_v14 }
 0xbe5   :  { %1831 = vmatpush1.bf16.msra.mxu1 %v7722_v9  ;;  %1862 = vmatprep.mubr.bf16.mxu1 %v9888_v57 }
 0xbe6   :  { %1832 = vmatprep.subr.bf16.mxu1 %v7726_v11 }
 0xbe9   :  { %1833 = vmatpush1.bf16.msra.mxu1 %v7729_v16 }
 0xbea   :  { %1834 = vmatprep.subr.bf16.mxu1 %v7732_v24 }
 0xbed   :  { %1835 = vmatpush1.bf16.msra.mxu1 %v7735_v13 }
 0xbee   :  { %1836 = vmatprep.subr.bf16.mxu1 %v7738_v17 }
 0xbf1   :  { %1837 = vmatpush1.bf16.msra.mxu1 %v7741_v18 }
 0xbf2   :  { %1838 = vmatprep.subr.bf16.mxu1 %v7744_v56 }
 0xbf5   :  { %1839 = vmatpush1.bf16.msra.mxu1 %v7747_v19 }
 0xbf6   :  { %1840 = vmatprep.subr.bf16.mxu1 %v7750_v20 }
 0xbf9   :  { %1841 = vmatpush1.bf16.msra.mxu1 %v7753_v0 }
 0xbfa   :  { %1842 = vmatprep.subr.bf16.mxu1 %v7756_v22 }
 0xbfd   :  { %1843 = vmatpush1.bf16.msra.mxu1 %v7759_v40 }
 0xbfe   :  { %1844 = vmatprep.subr.bf16.mxu1 %v7762_v41 }
 0xc01   :  { %1845 = vmatpush1.bf16.msra.mxu1 %v7765_v44 }
 0xc02   :  { %1871 = vmatprep.subr.bf16.mxu1 %v7768_v45 }
 0xc04   :  { %1863 = vmatmul.mubr.bf16.vlgmr.msra.gmra.mrb[36].mxu1 %v7630_v14 }
 0xc05   :  { %1872 = vmatpush1.bf16.msra.mxu1 %v7772_v46  ;;  %1903 = vmatprep.mubr.bf16.mxu1 %v9888_v57 }
 0xc06   :  { %1873 = vmatprep.subr.bf16.mxu1 %v7776_v60 }
 0xc09   :  { %1874 = vmatpush1.bf16.msra.mxu1 %v7779_v47 }
 0xc0a   :  { %1875 = vmatprep.subr.bf16.mxu1 %v7782_v58 }
 0xc0d   :  { %1876 = vmatpush1.bf16.msra.mxu1 %v7785_v61 }
 0xc0e   :  { %1877 = vmatprep.subr.bf16.mxu1 %v7788_v34 }
 0xc11   :  { %1878 = vmatpush1.bf16.msra.mxu1 %v7791_v35 }
 0xc12   :  { %1879 = vmatprep.subr.bf16.mxu1 %v7794_v37 }
 0xc15   :  { %1880 = vmatpush1.bf16.msra.mxu1 %v7797_v48  ;;  %v7815_v48 = vld [vmem:[#allocation10 + $0xe0] ss:$16 sps:$4 sm:$0xff]  }
 0xc16   :  { %1881 = vmatprep.subr.bf16.mxu1 %v7800_v49 }
 0xc19   :  { %1882 = vmatpush1.bf16.msra.mxu1 %v7803_v62 }
 0xc1a   :  { %1883 = vmatprep.subr.bf16.mxu1 %v7806_v50 }
 0xc1d   :  { %1884 = vmatpush1.bf16.msra.mxu1 %v7809_v51 }
 0xc1e   :  { %1885 = vmatprep.subr.bf16.mxu1 %v7812_v29 }
 0xc21   :  { %1886 = vmatpush1.bf16.msra.mxu1 %v7815_v48 }
 0xc22   :  { %5326 = vmatprep.subr.bf16.mxu1 %v9881_v30 }
 0xc97   :  { %v1605_v49 = vpop.f32.mrb[20].mxu0  ;;  %v7819_v62 = vpop.f32.mrb[28].mxu1 }
 0xc98   :  { %v1651_v37 = vpack.c.bf16 %v1605_v49, %v1605_v49  ;;  %v5244_v35 = vpop.f32.mrb[21].mxu0  ;;  %v5264_v50 = vpop.f32.mrb[29].mxu1  ;;  %v7882_v49 = vld [vmem:[#allocation10 + $0xec] ss:$16 sps:$4 sm:$0xff]  }
 0xc99   :  { %v1608_v34 = vpop.f32.mrb[22].mxu0  ;;  %v1648_v61 = vpop.f32.mrb[30].mxu1  ;;  %v7876_v35 = vld [vmem:[#allocation10 + $0xcc] ss:$16 sps:$4 sm:$0xff]   ;;  %9951 = vst [vmem:[#allocation51_spill] sm:$0xff] %v7882_v49 }
 0xc9a   :  { %v5245_v58 = vpop.f32.mrb[23].mxu0  ;;  %v5265_v51 = vpop.f32.mrb[31].mxu1  ;;  %5283 = vmatmul.mubr.bf16.vlgmr.msra.gmra.mrb[24].mxu0 %v1651_v37  ;;  %v7870_v61 = vld [vmem:[#allocation10 + $0xac] ss:$16 sps:$4 sm:$0xff]   ;;  %v7873_v34 = vld [vmem:[#allocation10 + $0xa8] ss:$16 sps:$4 sm:$0xff]  }
 0xc9b   :  { %5287 = vmatpush3.bf16.msra.mxu0 %v7501_v15  ;;  %5302 = vmatprep.mubr.msk.bf16.mxu0 %vm6873_vm2, %v9881_v30  ;;  %v7838_v15 = vld [vmem:[#allocation10 + $0xc] ss:$16 sps:$4 sm:$0xff]   ;;  %v7867_v58 = vld [vmem:[#allocation10 + $0x88] ss:$16 sps:$4 sm:$0xff]   ;;  %9947 = vst [vmem:[#allocation29_spill] sm:$0xff] %v7870_v61  ;;  %9948 = vst [vmem:[#allocation48_spill] sm:$0xff] %v7873_v34 }
 0xc9c   :  { %5288 = vmatprep.subr.bf16.mxu0 %v9881_v30  ;;  %9937 = vst [vmem:[#allocation38_spill] sm:$0xff] %v7838_v15  ;;  %9946 = vst [vmem:[#allocation47_spill] sm:$0xff] %v7867_v58  ;;  %v7879_v37 = vld [vmem:[#allocation10 + $0xc8] ss:$16 sps:$4 sm:$0xff]  }
 0xc9d   :  { %9949 = vst [vmem:[#allocation49_spill] sm:$0xff] %v7876_v35  ;;  %9950 = vst [vmem:[#allocation50_spill] sm:$0xff] %v7879_v37  ;;  %v7887_v51 = vld [vmem:[#allocation10 + $0xe8] ss:$16 sps:$4 sm:$0xff]  }
 0xc9e   :  { %9952 = vst [vmem:[#allocation52_spill] sm:$0xff] %v7887_v51 }
 0xc9f   :  { %5289 = vmatpush3.bf16.msra.mxu0 %v7504_v23  ;;  %v7842_v23 = vld [vmem:[#allocation10 + $0x8] ss:$16 sps:$4 sm:$0xff]  }
 0xca0   :  { %5290 = vmatprep.subr.bf16.mxu0 %v9881_v30  ;;  %9938 = vst [vmem:[#allocation39_spill] sm:$0xff] %v7842_v23 }
 0xca3   :  { %5291 = vmatpush3.bf16.msra.mxu0 %v7510_v26  ;;  %v7846_v26 = vld [vmem:[#allocation10 + $0x2c] ss:$16 sps:$4 sm:$0xff]  }
 0xca4   :  { %5292 = vmatprep.subr.bf16.mxu0 %v9881_v30  ;;  %9939 = vst [vmem:[#allocation40_spill] sm:$0xff] %v7846_v26 }
 0xca7   :  { %5293 = vmatpush3.bf16.msra.mxu0 %v7514_v28  ;;  %v7849_v28 = vld [vmem:[#allocation10 + $0x28] ss:$16 sps:$4 sm:$0xff]  }
 0xca8   :  { %5294 = vmatprep.subr.bf16.mxu0 %v9881_v30  ;;  %9940 = vst [vmem:[#allocation41_spill] sm:$0xff] %v7849_v28 }
 0xcab   :  { %5295 = vmatpush3.bf16.msra.mxu0 %v7518_v31  ;;  %v7852_v31 = vld [vmem:[#allocation10 + $0x4c] ss:$16 sps:$4 sm:$0xff]  }
 0xcac   :  { %5296 = vmatprep.subr.bf16.mxu0 %v9881_v30  ;;  %9941 = vst [vmem:[#allocation42_spill] sm:$0xff] %v7852_v31 }
 0xcaf   :  { %5297 = vmatpush3.bf16.msra.mxu0 %v7522_v33  ;;  %v7855_v33 = vld [vmem:[#allocation10 + $0x48] ss:$16 sps:$4 sm:$0xff]  }
 0xcb0   :  { %5298 = vmatprep.subr.bf16.mxu0 %v9881_v30  ;;  %9942 = vst [vmem:[#allocation43_spill] sm:$0xff] %v7855_v33 }
 0xcb3   :  { %5299 = vmatpush3.bf16.msra.mxu0 %v7526_v36  ;;  %v7858_v36 = vld [vmem:[#allocation10 + $0x6c] ss:$16 sps:$4 sm:$0xff]  }
 0xcb4   :  { %5300 = vmatprep.subr.bf16.mxu0 %v9881_v30  ;;  %9943 = vst [vmem:[#allocation44_spill] sm:$0xff] %v7858_v36 }
 0xcb7   :  { %5301 = vmatpush3.bf16.msra.mxu0 %v7530_v39  ;;  %v7861_v39 = vld [vmem:[#allocation10 + $0x68] ss:$16 sps:$4 sm:$0xff]  }
 0xcb8   :  { %1912 = vmatprep.subr.bf16.mxu0 %v7838_v15  ;;  %9944 = vst [vmem:[#allocation45_spill] sm:$0xff] %v7861_v39 }
 0xcba   :  { %5303 = vmatmul.mubr.bf16.vlgmr.msra.gmra.mrb[24].mxu0 %v7630_v14  ;;  %v7864_v14 = vld [vmem:[#allocation10 + $0x8c] ss:$16 sps:$4 sm:$0xff]  }
 0xcbb   :  { %1913 = vmatpush1.bf16.msra.mxu0 %v7842_v23  ;;  %1944 = vmatprep.mubr.bf16.mxu0 %v9888_v57  ;;  %9945 = vst [vmem:[#allocation46_spill] sm:$0xff] %v7864_v14 }
 0xcbc   :  { %1914 = vmatprep.subr.bf16.mxu0 %v7846_v26 }
 0xcbf   :  { %1915 = vmatpush1.bf16.msra.mxu0 %v7849_v28 }
 0xcc0   :  { %1916 = vmatprep.subr.bf16.mxu0 %v7852_v31 }
 0xcc3   :  { %1917 = vmatpush1.bf16.msra.mxu0 %v7855_v33 }
 0xcc4   :  { %1918 = vmatprep.subr.bf16.mxu0 %v7858_v36 }
 0xcc7   :  { %1919 = vmatpush1.bf16.msra.mxu0 %v7861_v39 }
 0xcc8   :  { %1920 = vmatprep.subr.bf16.mxu0 %v7864_v14 }
 0xccb   :  { %1921 = vmatpush1.bf16.msra.mxu0 %v7867_v58 }
 0xccc   :  { %1922 = vmatprep.subr.bf16.mxu0 %v7870_v61 }
 0xccf   :  { %1923 = vmatpush1.bf16.msra.mxu0 %v7873_v34 }
 0xcd0   :  { %1924 = vmatprep.subr.bf16.mxu0 %v7876_v35 }
 0xcd3   :  { %1925 = vmatpush1.bf16.msra.mxu0 %v7879_v37 }
 0xcd4   :  { %1926 = vmatprep.subr.bf16.mxu0 %v7882_v49  ;;  %v4689_v49 = vsel %vm1330_vm6, 1.0, %v9881_v30 }
 0xcd7   :  { %v7885_v50 = vpop.f32.mrb[36].mxu1  ;;  %1927 = vmatpush1.bf16.msra.mxu0 %v7887_v51  ;;  %v1517_v51 = vmul.f32 %v4689_v49, %v7565_v6 }
 0xcd8   :  { %v7890_v61 = vpop.f32.mrb[37].mxu1  ;;  %5306 = vmatprep.subr.bf16.mxu0 %v9881_v30 }
 0xcd9   :  { %v1868_v34 = vpop.f32.mrb[38].mxu1 }
 0xcda   :  { %v1869_v35 = vpop.f32.mrb[39].mxu1 }
 0xd8d   :  { %v1726_v58 = vpop.f32.mrb[24].mxu0 }
 0xd8e   :  { %v5304_v14 = vpop.f32.mrb[25].mxu0  ;;  %v1739_v37 = vadd.f32 %v7560_v2, %v1726_v58 }
 0xd8f   :  { %v1729_v39 = vpop.f32.mrb[26].mxu0 }
 0xd90   :  { %1740 = vmax.xlane.f32.xlu1 %v1739_v37  ;;  %v5305_v36 = vpop.f32.mrb[27].mxu0 }
 0xd94   :  { %1518 = vadd.xlane.f32.xlu1 %v1517_v51 }
 0xe1d   :  { %v1741_v33 = vpop.xlane.xlu1 %1740 }
 0xe1e   :  { %v1742_v31 = vsub.f32 %v1739_v37, %v1741_v33 }
 0xe20   :  { %v1743_v28 = vmul.f32 1.442695, %v1742_v31 }
 0xe21   :  { %v1519_v34 = vpop.xlane.xlu1 %1518 }
 0xe22   :  { %6161 = vpow2.f32 %v1743_v28  ;;  %v1732_v35 = vadd.f32 %v1726_v58, %v1519_v34 }
 0xe24   :  { %v4696_v14 = vmul.f32 -1.442695, %v1732_v35 }
 0xe26   :  { %6163 = vpow2.f32 %v4696_v14 }
 0xe2c   :  { %v6162_v2 = vpop.eup %6161 }
 0xe2d   :  { %1745 = vadd.xlane.f32.xlu1 %v6162_v2 }
 0xe30   :  { %v6164_v39 = vpop.eup %6163 }
 0xe31   :  { %v1736_v26 = vadd.f32 1.0, %v6164_v39 }
 0xe33   :  { %6165 = vrcp.f32 %v1736_v26 }
 0xe3d   :  { %v6166_v23 = vpop.eup %6165 }
 0xe3e   :  { %1751 = vperm.xlu1 %5987, %v6166_v23   ;;  %v1755_v15 = vsub.f32 1.0, %v6166_v23 }
 0xe40   :  { %1758 = vperm.xlu0 %5988, %v1755_v15  }
 0xeba   :  { %v1746_v36 = vpop.xlane.xlu1 %1745 }
 0xebb   :  { %6167 = vrcp.f32 %v1746_v36 }
 0xebe   :  { %v1752_v31 = vpop.permute.xlu1 %1751 }
 0xebf   :  { %v1759_v51 = vpop.permute.xlu0 %1758 }
 0xec0   :  { %v1761_v28 = vmul.f32 %v1759_v51, %v7819_v62 }
 0xec5   :  { %v6168_v49 = vpop.eup %6167 }
 0xec6   :  { %v1748_v33 = vmul.f32 %v6168_v49, %v6162_v2 }
 0xec8   :  { %v1754_v37 = vmul.f32 %v1752_v31, %v1748_v33  ;;  %v1328_v31 = vsel %vm1327_vm10, %v7577_v42, 0  ;;  %v7923_v42 = vld [vmem:[#allocation5] sm:$0xff]  }
 0xec9   :  { %9955 = vst [vmem:[#allocation55_spill] sm:$0xff] %v7923_v42 }
 0xeca   :  { %v1762_v58 = vadd.f32 %v1761_v28, %v1754_v37 }
 0xecc   :  { %1763 = vmax.xlane.f32.xlu1 %v1762_v58 }
 0xf59   :  { %v7900_v34 = vpop.xlane.xlu1 %1763 }
 0xf5a   :  { %9953 = vst [vmem:[#allocation53_spill] sm:$0xff] %v7900_v34  ;;  %vm1765_vm8 = vcmp.eq.f32.partialorder %v1762_v58, %v7900_v34  ;;  %v7929_v58 = vld [vmem:[#allocation7] sm:$0xff]   ;;  %v7987_v34 = vld [vmem:[#allocation7 + $0x38] sm:$0xff]  }
 0xf5b   :  { %v1766_v26 = vsel %vm1765_vm8, %v9910_v8, 128  ;;  %9956 = vst [vmem:[#allocation57_spill] sm:$0xff] %v7929_v58  ;;  %9970 = vst [vmem:[#allocation70_spill] sm:$0xff] %v7987_v34 }
 0xf5c   :  { %v1768_v35 = vshra.s32 %v1766_v26, 16  ;;  %v1767_v15 = vand.u32 65535, %v1766_v26  ;;  %v7935_v26 = vld [vmem:[#allocation5 + $0x8] sm:$0xff]  }
 0xf5d   :  { %9957 = vst [vmem:[#allocation58_spill] sm:$0xff] %v7935_v26 }
 0xf5e   :  { %v1770_v23 = vcvt.s32.f32 %v1768_v35  ;;  %v1769_v39 = vcvt.s32.f32 %v1767_v15  ;;  %v7939_v35 = vld [vmem:[#allocation7 + $0x8] sm:$0xff]   ;;  %v7947_v15 = vld [vmem:[#allocation7 + $0x10] sm:$0xff]  }
 0xf5f   :  { %9958 = vst [vmem:[#allocation59_spill] sm:$0xff] %v7939_v35  ;;  %9960 = vst [vmem:[#allocation61_spill] sm:$0xff] %v7947_v15 }
 0xf60   :  { %1771 = vmin.xlane.f32.xlu0 %v1770_v23 }
 0xfed   :  { %v1772_v14 = vpop.xlane.xlu0 %1771 }
 0xfee   :  { %vm1773_vm9 = vcmp.eq.f32.partialorder %v1770_v23, %v1772_v14  ;;  %v1778_v36 = vcvt.f32.s32 %v1772_v14  ;;  %v7943_v23 = vld [vmem:[#allocation5 + $0x10] sm:$0xff]   ;;  %v7951_v14 = vld [vmem:[#allocation5 + $0x18] sm:$0xff]  }
 0xfef   :  { %v1774_v2 = vsel %vm1773_vm9, %v1769_v39, inf  ;;  %9959 = vst [vmem:[#allocation60_spill] sm:$0xff] %v7943_v23  ;;  %9961 = vst [vmem:[#allocation56_spill] sm:$0xff] %v7951_v14  ;;  %v7955_v39 = vld [vmem:[#allocation7 + $0x18] sm:$0xff]   ;;  %vm2694_vm9 = vcmp.eq.s32.totalorder %v9910_v8, 3 }
 0xff0   :  { %1775 = vmin.xlane.f32.xlu1 %v1774_v2  ;;  %v1779_v62 = vshll.u32 %v1778_v36, 16  ;;  %9962 = vst [vmem:[#allocation62_spill] sm:$0xff] %v7955_v39  ;;  %v7959_v2 = vld [vmem:[#allocation5 + $0x20] sm:$0xff]  }
 0xff1   :  { %9963 = vst [vmem:[#allocation63_spill] sm:$0xff] %v7959_v2  ;;  %v7963_v36 = vld [vmem:[#allocation7 + $0x20] sm:$0xff]  }
 0xff2   :  { %9964 = vst [vmem:[#allocation64_spill] sm:$0xff] %v7963_v36 }
0x107d   :  { %v1776_v49 = vpop.xlane.xlu1 %1775 }
0x107e   :  { %v1777_v51 = vcvt.f32.s32 %v1776_v49  ;;  %v7967_v49 = vld [vmem:[#allocation5 + $0x28] sm:$0xff]  }
0x107f   :  { %9965 = vst [vmem:[#allocation65_spill] sm:$0xff] %v7967_v49 }
0x1080   :  { %v1780_v33 = vadd.s32 %v1779_v62, %v1777_v51  ;;  %v7971_v62 = vld [vmem:[#allocation7 + $0x28] sm:$0xff]   ;;  %v7975_v51 = vld [vmem:[#allocation5 + $0x30] sm:$0xff]  }
0x1081   :  { %9966 = vst [vmem:[#allocation66_spill] sm:$0xff] %v7971_v62  ;;  %9967 = vst [vmem:[#allocation67_spill] sm:$0xff] %v7975_v51 }
0x1082   :  { %vm1781_vm11 = vcmp.ge.s32.totalorder %v1780_v33, 32 }
0x1083   :  { %v7908_v37 = vsel %vm1781_vm11, 3, %v1780_v33  ;;  %v7979_v33 = vld [vmem:[#allocation7 + $0x30] sm:$0xff]  }
0x1084   :  { %v7913_v28 = vsel %vm157_vm0, %v7908_v37, %v1328_v31  ;;  %vm1785_vm12 = vcmp.eq.s32.totalorder %v9910_v8, %v7908_v37  ;;  %9968 = vst [vmem:[#allocation68_spill] sm:$0xff] %v7979_v33  ;;  %v7983_v31 = vld [vmem:[#allocation5 + $0x38] sm:$0xff]   ;;  %v9986_v37 = vld [vmem:[#allocation42_spill] sm:$0xff] }
0x1085   :  { %9954 = vst [vmem:[#allocation54_spill] sm:$0xff] %v7913_v28  ;;  %vm4698_vm13 = vmpackc.low %vm1785_vm12, %vm1785_vm12 }
0x1086   :  { %4699 = vmatmul.mubr.msk.bf16.vlgmr.msra.gmra.mrb[32].mxu1 %vm4698_vm13, %v9912_v43  ;;  %4701 = vmatmul.mubr.msk.bf16.vlgmr.msra.gmra.mrb[28].mxu0 %vm4698_vm13, %v9912_v43  ;;  %9969 = vst [vmem:[#allocation69_spill] sm:$0xff] %v7983_v31 }
0x1087   :  { %5307 = vmatpush3.bf16.msra.mxu0 %v7923_v42  ;;  %5322 = vmatprep.mubr.msk.bf16.mxu0 %vm6873_vm2, %v9881_v30 }
0x1088   :  { %5308 = vmatprep.subr.bf16.mxu0 %v9881_v30  ;;  %5327 = vmatpush3.bf16.msra.mxu1 %v7929_v58 }
0x1089   :  { %5328 = vmatprep.subr.bf16.mxu1 %v9881_v30  ;;  %5342 = vmatprep.mubr.msk.bf16.mxu1 %vm6873_vm2, %v9881_v30 }
0x108b   :  { %5309 = vmatpush3.bf16.msra.mxu0 %v7935_v26 }
0x108c   :  { %5310 = vmatprep.subr.bf16.mxu0 %v9881_v30  ;;  %5329 = vmatpush3.bf16.msra.mxu1 %v7939_v35 }
0x108d   :  { %5330 = vmatprep.subr.bf16.mxu1 %v9881_v30 }
0x108f   :  { %5311 = vmatpush3.bf16.msra.mxu0 %v7943_v23 }
0x1090   :  { %5312 = vmatprep.subr.bf16.mxu0 %v9881_v30  ;;  %5331 = vmatpush3.bf16.msra.mxu1 %v7947_v15 }
0x1091   :  { %5332 = vmatprep.subr.bf16.mxu1 %v9881_v30 }
0x1093   :  { %5313 = vmatpush3.bf16.msra.mxu0 %v7951_v14 }
0x1094   :  { %5314 = vmatprep.subr.bf16.mxu0 %v9881_v30  ;;  %5333 = vmatpush3.bf16.msra.mxu1 %v7955_v39 }
0x1095   :  { %5334 = vmatprep.subr.bf16.mxu1 %v9881_v30 }
0x1097   :  { %5315 = vmatpush3.bf16.msra.mxu0 %v7959_v2 }
0x1098   :  { %5316 = vmatprep.subr.bf16.mxu0 %v9881_v30  ;;  %5335 = vmatpush3.bf16.msra.mxu1 %v7963_v36 }
0x1099   :  { %5336 = vmatprep.subr.bf16.mxu1 %v9881_v30 }
0x109b   :  { %5317 = vmatpush3.bf16.msra.mxu0 %v7967_v49 }
0x109c   :  { %5318 = vmatprep.subr.bf16.mxu0 %v9881_v30  ;;  %5337 = vmatpush3.bf16.msra.mxu1 %v7971_v62 }
0x109d   :  { %5338 = vmatprep.subr.bf16.mxu1 %v9881_v30 }
0x109f   :  { %5319 = vmatpush3.bf16.msra.mxu0 %v7975_v51 }
0x10a0   :  { %5320 = vmatprep.subr.bf16.mxu0 %v9881_v30  ;;  %5339 = vmatpush3.bf16.msra.mxu1 %v7979_v33 }
0x10a1   :  { %5340 = vmatprep.subr.bf16.mxu1 %v9881_v30 }
0x10a3   :  { %5321 = vmatpush3.bf16.msra.mxu0 %v7983_v31 }
0x10a4   :  { %5346 = vmatprep.subr.bf16.mxu0 %v9881_v30  ;;  %5341 = vmatpush3.bf16.msra.mxu1 %v7987_v34 }
0x10a5   :  { %5366 = vmatprep.subr.bf16.mxu1 %v9881_v30 }
0x1159   :  { %v1905_v51 = vpop.f32.mrb[32].mxu1  ;;  %v1946_v62 = vpop.f32.mrb[28].mxu0 }
0x115a   :  { %v4702_v49 = vmul.f32 -1.442695, %v1905_v51  ;;  %v1947_v36 = vadd.f32 %v1946_v62, %v7885_v50  ;;  %v1907_v33 = vpop.f32.mrb[33].mxu1  ;;  %v1948_v2 = vpop.f32.mrb[29].mxu0 }
0x115b   :  { %v1949_v39 = vadd.f32 %v1948_v2, %v7890_v61  ;;  %v1909_v14 = vpop.f32.mrb[34].mxu1  ;;  %v1950_v15 = vpop.f32.mrb[30].mxu0  ;;  %v4703_v35 = vmul.f32 -1.442695, %v1907_v33 }
0x115c   :  { %6169 = vpow2.f32 %v4702_v49  ;;  %v1910_v31 = vpop.f32.mrb[35].mxu1  ;;  %v1951_v23 = vpop.f32.mrb[31].mxu0 }
0x115d   :  { %6171 = vpow2.f32 %v4703_v35  ;;  %v8031_v23 = vld [vmem:[#allocation8 + $0x38] sm:$0xff]  }
0x115e   :  { %9971 = vst [vmem:[#allocation71_spill] sm:$0xff] %v8031_v23 }
0x1166   :  { %v6170_v26 = vpop.eup %6169 }
0x1167   :  { %v1956_v34 = vadd.f32 1.0, %v6170_v26  ;;  %v6172_v58 = vpop.eup %6171  ;;  %v8027_v26 = vld [vmem:[#allocation8 + $0x30] sm:$0xff]  }
0x1168   :  { %v1962_v42 = vadd.f32 1.0, %v6172_v58  ;;  %v8023_v58 = vld [vmem:[#allocation8 + $0x28] sm:$0xff]  }
0x1169   :  { %6173 = vrcp.f32 %v1956_v34  ;;  %v8001_v34 = vld [vmem:[#allocation8] sm:$0xff]  }
0x116a   :  { %6175 = vrcp.f32 %v1962_v42  ;;  %v8019_v42 = vld [vmem:[#allocation8 + $0x20] sm:$0xff]  }
0x1173   :  { %v6174_v43 = vpop.eup %6173 }
0x1174   :  { %v1965_v51 = vmul.f32 %v6174_v43, %v1949_v39  ;;  %v6176_v62 = vpop.eup %6175  ;;  %v8007_v43 = vld [vmem:[#allocation8 + $0x8] sm:$0xff]  }
0x1175   :  { %v1968_v28 = vsub.f32 1.0, %v6176_v62  ;;  %v1970_v15 = vmul.f32 %v6176_v62, %v7626_v21  ;;  %v8011_v21 = vld [vmem:[#allocation8 + $0x10] sm:$0xff]  }
0x1176   :  { %v1966_v50 = vadd.f32 %v1965_v51, %v1947_v36  ;;  %v8038_v36 = vld [vmem:[%s9657_s4] sm:$0xff] }
0x1178   :  { %6177 = vtanh.f32 %v1966_v50 }
0x1182   :  { %v6178_v61 = vpop.eup %6177 }
0x1183   :  { %v1969_v14 = vmul.f32 %v6178_v61, %v1968_v28  ;;  %v8015_v28 = vld [vmem:[#allocation8 + $0x18] sm:$0xff]  }
0x1185   :  { %v7994_v2 = vadd.f32 %v1970_v15, %v1969_v14 }
0x1187   :  { %v7998_v35 = vpack.c.bf16 %v7994_v2, %v7994_v2 }
0x1189   :  { %5323 = vmatmul.mubr.bf16.vlgmr.msra.gmra.mrb[32].mxu0 %v7998_v35 }
0x118a   :  { %5347 = vmatpush3.bf16.msra.mxu0 %v8001_v34  ;;  %5362 = vmatprep.mubr.msk.bf16.mxu0 %vm6873_vm2, %v9881_v30 }
0x118b   :  { %5348 = vmatprep.subr.bf16.mxu0 %v9881_v30 }
0x118e   :  { %5349 = vmatpush3.bf16.msra.mxu0 %v8007_v43 }
0x118f   :  { %5350 = vmatprep.subr.bf16.mxu0 %v9881_v30 }
0x1192   :  { %5351 = vmatpush3.bf16.msra.mxu0 %v8011_v21 }
0x1193   :  { %5352 = vmatprep.subr.bf16.mxu0 %v9881_v30 }
0x1196   :  { %5353 = vmatpush3.bf16.msra.mxu0 %v8015_v28 }
0x1197   :  { %5354 = vmatprep.subr.bf16.mxu0 %v9881_v30 }
0x119a   :  { %5355 = vmatpush3.bf16.msra.mxu0 %v8019_v42 }
0x119b   :  { %5356 = vmatprep.subr.bf16.mxu0 %v9881_v30 }
0x119e   :  { %5357 = vmatpush3.bf16.msra.mxu0 %v8023_v58 }
0x119f   :  { %5358 = vmatprep.subr.bf16.mxu0 %v9881_v30 }
0x11a2   :  { %5359 = vmatpush3.bf16.msra.mxu0 %v8027_v26 }
0x11a3   :  { %5360 = vmatprep.subr.bf16.mxu0 %v9881_v30 }
0x11a6   :  { %5361 = vmatpush3.bf16.msra.mxu0 %v8031_v23 }
0x11a7   :  { %2245 = vmatprep.subr.bf16.mxu0 %v7650_v59  ;;  %v4697_v59 = vsel %vm1785_vm12, 1.0, %v9881_v30 }
0x11a8   :  { %v1972_v15 = vmul.f32 %v4697_v59, %v7565_v6  ;;  %v8057_v6 = vld [vmem:[#allocation14 + $0x8] sm:$0xff]  }
0x11a9   :  { %v9994_v59 = vld [vmem:[#allocation49_spill] sm:$0xff] }
0x125c   :  { %v2010_v39 = vpop.f32.mrb[32].mxu0 }
0x125d   :  { %v2011_v49 = vadd.f32 %v8038_v36, %v2010_v39  ;;  %v5324_v33 = vpop.f32.mrb[33].mxu0 }
0x125e   :  { %v2013_v31 = vpop.f32.mrb[34].mxu0 }
0x125f   :  { %2016 = vmax.xlane.f32.xlu0 %v2011_v49  ;;  %v5325_v51 = vpop.f32.mrb[35].mxu0 }
0x1260   :  { %v9988_v51 = vld [vmem:[#allocation44_spill] sm:$0xff] }
0x12ec   :  { %v2017_v50 = vpop.xlane.xlu0 %2016 }
0x12ed   :  { %v2018_v62 = vsub.f32 %v2011_v49, %v2017_v50  ;;  %v8049_v49 = vld [vmem:[#allocation14] sm:$0xff]   ;;  %v9989_v50 = vld [vmem:[#allocation45_spill] sm:$0xff] }
0x12ef   :  { %v2019_v61 = vmul.f32 1.442695, %v2018_v62  ;;  %v9990_v62 = vld [vmem:[#allocation46_spill] sm:$0xff] }
0x12f1   :  { %6179 = vpow2.f32 %v2019_v61  ;;  %v9991_v61 = vld [vmem:[#allocation47_spill] sm:$0xff] }
0x12fb   :  { %v6180_v14 = vpop.eup %6179 }
0x12fc   :  { %2021 = vadd.xlane.f32.xlu1 %v6180_v14 }
0x1300   :  { %1973 = vadd.xlane.f32.xlu1 %v1972_v15  ;;  %v9995_v15 = vld [vmem:[#allocation50_spill] sm:$0xff] }
0x1389   :  { %v2022_v23 = vpop.xlane.xlu1 %2021 }
0x138a   :  { %6181 = vrcp.f32 %v2022_v23  ;;  %v9987_v23 = vld [vmem:[#allocation43_spill] sm:$0xff] }
0x1394   :  { %v6182_v39 = vpop.eup %6181 }
0x1395   :  { %v2024_v33 = vmul.f32 %v6182_v39, %v6180_v14  ;;  %v9993_v14 = vld [vmem:[#allocation48_spill] sm:$0xff]  ;;  %v9996_v39 = vld [vmem:[#allocation51_spill] sm:$0xff] }
0x1397   :  { %v2025_v31 = vpack.c.bf16 %v2024_v33, %v2024_v33 }
0x1399   :  { %5343 = vmatmul.mubr.bf16.vlgmr.msra.gmra.mrb[40].mxu1 %v2025_v31  ;;  %5363 = vmatmul.mubr.bf16.vlgmr.msra.gmra.mrb[36].mxu0 %v2025_v31  ;;  %v9997_v31 = vld [vmem:[#allocation52_spill] sm:$0xff] }
0x139a   :  { %2246 = vmatpush1.bf16.msra.mxu0 %v7654_v52  ;;  %2277 = vmatprep.mubr.bf16.mxu0 %v9888_v57  ;;  %v8063_v52 = vld [vmem:[#allocation14 + $0x10] sm:$0xff]  }
0x139b   :  { %2247 = vmatprep.subr.bf16.mxu0 %v7658_v38  ;;  %5367 = vmatpush3.bf16.msra.mxu1 %v8049_v49  ;;  %v8069_v38 = vld [vmem:[#allocation14 + $0x18] sm:$0xff]  }
0x139c   :  { %5368 = vmatprep.subr.bf16.mxu1 %v9881_v30  ;;  %5382 = vmatprep.mubr.msk.bf16.mxu1 %vm6873_vm2, %v9881_v30 }
0x139e   :  { %2248 = vmatpush1.bf16.msra.mxu0 %v7665_v53  ;;  %v8075_v53 = vld [vmem:[#allocation14 + $0x20] sm:$0xff]  }
0x139f   :  { %2249 = vmatprep.subr.bf16.mxu0 %v7668_v54  ;;  %5369 = vmatpush3.bf16.msra.mxu1 %v8057_v6  ;;  %v8081_v54 = vld [vmem:[#allocation14 + $0x28] sm:$0xff]  }
0x13a0   :  { %5370 = vmatprep.subr.bf16.mxu1 %v9881_v30 }
0x13a2   :  { %2250 = vmatpush1.bf16.msra.mxu0 %v7673_v27  ;;  %v8087_v27 = vld [vmem:[#allocation14 + $0x30] sm:$0xff]  }
0x13a3   :  { %2251 = vmatprep.subr.bf16.mxu0 %v7676_v55  ;;  %5371 = vmatpush3.bf16.msra.mxu1 %v8063_v52  ;;  %v8093_v55 = vld [vmem:[#allocation14 + $0x38] sm:$0xff]  }
0x13a4   :  { %5372 = vmatprep.subr.bf16.mxu1 %v9881_v30 }
0x13a6   :  { %2252 = vmatpush1.bf16.msra.mxu0 %v7681_v32  ;;  %v9972_v32 = vld [vmem:[#allocation27_spill] sm:$0xff] }
0x13a7   :  { %2253 = vmatprep.subr.bf16.mxu0 %v7684_v25  ;;  %5373 = vmatpush3.bf16.msra.mxu1 %v8069_v38  ;;  %v9973_v25 = vld [vmem:[#allocation28_spill] sm:$0xff] }
0x13a8   :  { %5374 = vmatprep.subr.bf16.mxu1 %v9881_v30 }
0x13aa   :  { %2254 = vmatpush1.bf16.msra.mxu0 %v7689_v1  ;;  %v9974_v1 = vld [vmem:[#allocation30_spill] sm:$0xff] }
0x13ab   :  { %2255 = vmatprep.subr.bf16.mxu0 %v7692_v63  ;;  %5375 = vmatpush3.bf16.msra.mxu1 %v8075_v53  ;;  %v9975_v63 = vld [vmem:[#allocation31_spill] sm:$0xff] }
0x13ac   :  { %5376 = vmatprep.subr.bf16.mxu1 %v9881_v30 }
0x13ae   :  { %2256 = vmatpush1.bf16.msra.mxu0 %v7697_v3  ;;  %v9976_v3 = vld [vmem:[#allocation32_spill] sm:$0xff] }
0x13af   :  { %2257 = vmatprep.subr.bf16.mxu0 %v7700_v4  ;;  %5377 = vmatpush3.bf16.msra.mxu1 %v8081_v54  ;;  %v9977_v4 = vld [vmem:[#allocation33_spill] sm:$0xff] }
0x13b0   :  { %5378 = vmatprep.subr.bf16.mxu1 %v9881_v30 }
0x13b2   :  { %2258 = vmatpush1.bf16.msra.mxu0 %v7705_v5  ;;  %v9978_v5 = vld [vmem:[#allocation34_spill] sm:$0xff] }
0x13b3   :  { %2259 = vmatprep.subr.bf16.mxu0 %v7708_v10  ;;  %5379 = vmatpush3.bf16.msra.mxu1 %v8087_v27  ;;  %v9979_v10 = vld [vmem:[#allocation35_spill] sm:$0xff] }
0x13b4   :  { %5380 = vmatprep.subr.bf16.mxu1 %v9881_v30 }
0x13b6   :  { %2260 = vmatpush1.bf16.msra.mxu0 %v7713_v7  ;;  %v9980_v7 = vld [vmem:[#allocation36_spill] sm:$0xff] }
0x13b7   :  { %2286 = vmatprep.subr.bf16.mxu0 %v7716_v12  ;;  %5381 = vmatpush3.bf16.msra.mxu1 %v8093_v55  ;;  %v9981_v12 = vld [vmem:[#allocation37_spill] sm:$0xff] }
0x13b8   :  { %5386 = vmatprep.subr.bf16.mxu1 %v9881_v30 }
0x13b9   :  { %2278 = vmatmul.mubr.bf16.vlgmr.msra.gmra.mrb[40].mxu0 %v7998_v35 }
0x13ba   :  { %2287 = vmatpush1.bf16.msra.mxu0 %v7722_v9  ;;  %2318 = vmatprep.mubr.bf16.mxu0 %v9888_v57 }
0x13bb   :  { %2288 = vmatprep.subr.bf16.mxu0 %v7726_v11 }
0x13be   :  { %2289 = vmatpush1.bf16.msra.mxu0 %v7729_v16 }
0x13bf   :  { %2290 = vmatprep.subr.bf16.mxu0 %v7732_v24 }
0x13c2   :  { %2291 = vmatpush1.bf16.msra.mxu0 %v7735_v13 }
0x13c3   :  { %2292 = vmatprep.subr.bf16.mxu0 %v7738_v17 }
0x13c6   :  { %2293 = vmatpush1.bf16.msra.mxu0 %v7741_v18 }
0x13c7   :  { %2294 = vmatprep.subr.bf16.mxu0 %v7744_v56 }
0x13ca   :  { %2295 = vmatpush1.bf16.msra.mxu0 %v7747_v19 }
0x13cb   :  { %2296 = vmatprep.subr.bf16.mxu0 %v7750_v20  ;;  %v8135_v20 = vld [vmem:[#allocation13] sm:$0xff]  }
0x13ce   :  { %2297 = vmatpush1.bf16.msra.mxu0 %v7753_v0  ;;  %v8145_v0 = vld [vmem:[#allocation13 + $0x10] sm:$0xff]  }
0x13cf   :  { %2298 = vmatprep.subr.bf16.mxu0 %v7756_v22  ;;  %v8149_v22 = vld [vmem:[#allocation13 + $0x18] sm:$0xff]  }
0x13d2   :  { %2299 = vmatpush1.bf16.msra.mxu0 %v7759_v40  ;;  %v8153_v40 = vld [vmem:[#allocation13 + $0x20] sm:$0xff]  }
0x13d3   :  { %2300 = vmatprep.subr.bf16.mxu0 %v7762_v41  ;;  %v8157_v41 = vld [vmem:[#allocation13 + $0x28] sm:$0xff]  }
0x13d6   :  { %2301 = vmatpush1.bf16.msra.mxu0 %v7765_v44  ;;  %v8161_v44 = vld [vmem:[#allocation13 + $0x30] sm:$0xff]  }
0x13d7   :  { %2327 = vmatprep.subr.bf16.mxu0 %v7768_v45  ;;  %v8165_v45 = vld [vmem:[#allocation13 + $0x38] sm:$0xff]  }
0x13d9   :  { %2319 = vmatmul.mubr.bf16.vlgmr.msra.gmra.mrb[44].mxu0 %v7998_v35 }
0x13da   :  { %2328 = vmatpush1.bf16.msra.mxu0 %v7772_v46  ;;  %2359 = vmatprep.mubr.bf16.mxu0 %v9888_v57  ;;  %v9982_v46 = vld [vmem:[#allocation38_spill] sm:$0xff] }
0x13db   :  { %2329 = vmatprep.subr.bf16.mxu0 %v7776_v60  ;;  %v9983_v60 = vld [vmem:[#allocation39_spill] sm:$0xff] }
0x13de   :  { %2330 = vmatpush1.bf16.msra.mxu0 %v7779_v47  ;;  %v9984_v47 = vld [vmem:[#allocation40_spill] sm:$0xff] }
0x13df   :  { %2331 = vmatprep.subr.bf16.mxu0 %v9972_v32 }
0x13e2   :  { %2332 = vmatpush1.bf16.msra.mxu0 %v9973_v25 }
0x13e3   :  { %2333 = vmatprep.subr.bf16.mxu0 %v9974_v1 }
0x13e6   :  { %2334 = vmatpush1.bf16.msra.mxu0 %v9975_v63  ;;  %v1974_v63 = vpop.xlane.xlu1 %1973 }
0x13e7   :  { %2335 = vmatprep.subr.bf16.mxu0 %v9976_v3 }
0x13ea   :  { %2336 = vmatpush1.bf16.msra.mxu0 %v9977_v4 }
0x13eb   :  { %2337 = vmatprep.subr.bf16.mxu0 %v9978_v5 }
0x13ee   :  { %2338 = vmatpush1.bf16.msra.mxu0 %v9979_v10  ;;  %v8194_v10 = vld [vmem:[%s9662_s9] ss:$0 sm:$0xff] }
0x13ef   :  { %2339 = vmatprep.subr.bf16.mxu0 %v9980_v7 }
0x13f2   :  { %2340 = vmatpush1.bf16.msra.mxu0 %v9981_v12 }
0x13f3   :  { %2341 = vmatprep.subr.bf16.mxu0 %v7812_v29  ;;  %v8141_v29 = vld [vmem:[#allocation13 + $0x8] sm:$0xff]  }
0x13f6   :  { %2342 = vmatpush1.bf16.msra.mxu0 %v7815_v48  ;;  %v9985_v48 = vld [vmem:[#allocation41_spill] sm:$0xff] }
0x13f7   :  { %5426 = vmatprep.subr.bf16.mxu0 %v9881_v30 }
0x146c   :  { %v2060_v9 = vpop.f32.mrb[40].mxu1  ;;  %v8133_v11 = vpop.f32.mrb[36].mxu0 }
0x146d   :  { %v2106_v16 = vpack.c.bf16 %v2060_v9, %v2060_v9  ;;  %v5344_v24 = vpop.f32.mrb[41].mxu1  ;;  %v5364_v13 = vpop.f32.mrb[37].mxu0 }
0x146e   :  { %v2063_v17 = vpop.f32.mrb[42].mxu1  ;;  %v2103_v18 = vpop.f32.mrb[38].mxu0 }
0x146f   :  { %v5345_v56 = vpop.f32.mrb[43].mxu1  ;;  %v5365_v19 = vpop.f32.mrb[39].mxu0  ;;  %5383 = vmatmul.mubr.bf16.vlgmr.msra.gmra.mrb[44].mxu1 %v2106_v16 }
0x1470   :  { %5387 = vmatpush3.bf16.msra.mxu1 %v8135_v20  ;;  %5402 = vmatprep.mubr.msk.bf16.mxu1 %vm6873_vm2, %v9881_v30 }
0x1471   :  { %5388 = vmatprep.subr.bf16.mxu1 %v9881_v30 }
0x1474   :  { %5389 = vmatpush3.bf16.msra.mxu1 %v8141_v29 }
0x1475   :  { %5390 = vmatprep.subr.bf16.mxu1 %v9881_v30 }
0x1478   :  { %5391 = vmatpush3.bf16.msra.mxu1 %v8145_v0 }
0x1479   :  { %5392 = vmatprep.subr.bf16.mxu1 %v9881_v30 }
0x147c   :  { %5393 = vmatpush3.bf16.msra.mxu1 %v8149_v22 }
0x147d   :  { %5394 = vmatprep.subr.bf16.mxu1 %v9881_v30 }
0x1480   :  { %5395 = vmatpush3.bf16.msra.mxu1 %v8153_v40 }
0x1481   :  { %5396 = vmatprep.subr.bf16.mxu1 %v9881_v30 }
0x1484   :  { %5397 = vmatpush3.bf16.msra.mxu1 %v8157_v41 }
0x1485   :  { %5398 = vmatprep.subr.bf16.mxu1 %v9881_v30 }
0x1488   :  { %5399 = vmatpush3.bf16.msra.mxu1 %v8161_v44 }
0x1489   :  { %5400 = vmatprep.subr.bf16.mxu1 %v9881_v30 }
0x148c   :  { %5401 = vmatpush3.bf16.msra.mxu1 %v8165_v45 }
0x148d   :  { %2368 = vmatprep.subr.bf16.mxu1 %v9982_v46 }
0x148f   :  { %5403 = vmatmul.mubr.bf16.vlgmr.msra.gmra.mrb[44].mxu1 %v7998_v35  ;;  %v9992_v35 = vld [vmem:[#allocation29_spill] sm:$0xff] }
0x1490   :  { %2369 = vmatpush1.bf16.msra.mxu1 %v9983_v60  ;;  %2400 = vmatprep.mubr.bf16.mxu1 %v9888_v57 }
0x1491   :  { %2370 = vmatprep.subr.bf16.mxu1 %v9984_v47 }
0x1494   :  { %2371 = vmatpush1.bf16.msra.mxu1 %v9985_v48 }
0x1495   :  { %2372 = vmatprep.subr.bf16.mxu1 %v9986_v37 }
0x1498   :  { %2373 = vmatpush1.bf16.msra.mxu1 %v9987_v23 }
0x1499   :  { %2374 = vmatprep.subr.bf16.mxu1 %v9988_v51 }
0x149c   :  { %2375 = vmatpush1.bf16.msra.mxu1 %v9989_v50 }
0x149d   :  { %2376 = vmatprep.subr.bf16.mxu1 %v9990_v62 }
0x14a0   :  { %2377 = vmatpush1.bf16.msra.mxu1 %v9991_v61 }
0x14a1   :  { %2378 = vmatprep.subr.bf16.mxu1 %v9992_v35 }
0x14a4   :  { %2379 = vmatpush1.bf16.msra.mxu1 %v9993_v14 }
0x14a5   :  { %2380 = vmatprep.subr.bf16.mxu1 %v9994_v59 }
0x14a8   :  { %2381 = vmatpush1.bf16.msra.mxu1 %v9995_v15 }
0x14a9   :  { %2382 = vmatprep.subr.bf16.mxu1 %v9996_v39 }
0x14ac   :  { %v8185_v33 = vpop.f32.mrb[44].mxu0  ;;  %2383 = vmatpush1.bf16.msra.mxu1 %v9997_v31 }
0x14ad   :  { %v8188_v32 = vpop.f32.mrb[45].mxu0  ;;  %5406 = vmatprep.subr.bf16.mxu1 %v9881_v30 }
0x14ae   :  { %v2324_v25 = vpop.f32.mrb[46].mxu0 }
0x14af   :  { %v2325_v1 = vpop.f32.mrb[47].mxu0 }
0x1562   :  { %v2181_v3 = vpop.f32.mrb[44].mxu1 }
0x1563   :  { %v2187_v4 = vadd.f32 %v2181_v3, %v1974_v63  ;;  %v5404_v5 = vpop.f32.mrb[45].mxu1  ;;  %v2194_v7 = vadd.f32 %v8194_v10, %v2181_v3 }
0x1564   :  { %v2184_v12 = vpop.f32.mrb[46].mxu1 }
0x1565   :  { %v4704_v9 = vmul.f32 -1.442695, %v2187_v4  ;;  %2195 = vmax.xlane.f32.xlu0 %v2194_v7  ;;  %v5405_v16 = vpop.f32.mrb[47].mxu1  ;;  %v9999_v12 = vld [vmem:[#allocation54_spill] sm:$0xff] }
0x1566   :  { %v10000_v16 = vmov 1.0|1.0  }
0x1567   :  { %6183 = vpow2.f32 %v4704_v9 }
0x1571   :  { %v6184_v24 = vpop.eup %6183 }
0x1572   :  { %v2191_v13 = vadd.f32 1.0, %v6184_v24  ;;  %v10001_v24 = vld [vmem:[#allocation55_spill] sm:$0xff] }
0x1574   :  { %6185 = vrcp.f32 %v2191_v13  ;;  %v10002_v13 = vld [vmem:[#allocation57_spill] sm:$0xff] }
0x157e   :  { %v6186_v17 = vpop.eup %6185 }
0x157f   :  { %2206 = vperm.xlu1 %5987, %v6186_v17   ;;  %v2210_v60 = vsub.f32 1.0, %v6186_v17  ;;  %v10003_v17 = vld [vmem:[#allocation58_spill] sm:$0xff] }
0x15f2   :  { %v2196_v18 = vpop.xlane.xlu0 %2195 }
0x15f3   :  { %v2197_v56 = vsub.f32 %v2194_v7, %v2196_v18  ;;  %v10004_v18 = vld [vmem:[#allocation59_spill] sm:$0xff] }
0x15f5   :  { %v2198_v19 = vmul.f32 1.442695, %v2197_v56  ;;  %v10005_v56 = vld [vmem:[#allocation60_spill] sm:$0xff] }
0x15f7   :  { %6187 = vpow2.f32 %v2198_v19  ;;  %v10006_v19 = vld [vmem:[#allocation61_spill] sm:$0xff] }
0x15fe   :  { %v2207_v51 = vpop.permute.xlu1 %2206 }
0x1601   :  { %v6188_v46 = vpop.eup %6187 }
0x1602   :  { %2200 = vadd.xlane.f32.xlu0 %v6188_v46 }
0x1618   :  { %2213 = vperm.xlu0 %5988, %v2210_v60   ;;  %v10008_v60 = vld [vmem:[#allocation62_spill] sm:$0xff] }
0x168f   :  { %v2201_v47 = vpop.xlane.xlu0 %2200 }
0x1690   :  { %6189 = vrcp.f32 %v2201_v47  ;;  %v10009_v47 = vld [vmem:[#allocation63_spill] sm:$0xff] }
0x1697   :  { %v2214_v37 = vpop.permute.xlu0 %2213 }
0x1698   :  { %v2216_v50 = vmul.f32 %v2214_v37, %v8133_v11  ;;  %v10011_v37 = vld [vmem:[#allocation65_spill] sm:$0xff] }
0x169a   :  { %v6190_v48 = vpop.eup %6189 }
0x169b   :  { %v2203_v23 = vmul.f32 %v6190_v48, %v6188_v46  ;;  %v10007_v46 = vld [vmem:[#allocation56_spill] sm:$0xff] }
0x169c   :  { %v10010_v48 = vld [vmem:[#allocation64_spill] sm:$0xff] }
0x169d   :  { %v2209_v62 = vmul.f32 %v2207_v51, %v2203_v23  ;;  %v10012_v23 = vld [vmem:[#allocation66_spill] sm:$0xff]  ;;  %v10013_v51 = vld [vmem:[#allocation67_spill] sm:$0xff] }
0x169f   :  { %v2217_v61 = vadd.f32 %v2216_v50, %v2209_v62  ;;  %v10014_v50 = vld [vmem:[#allocation68_spill] sm:$0xff]  ;;  %v10015_v62 = vld [vmem:[#allocation69_spill] sm:$0xff] }
0x16a1   :  { %2218 = vmax.xlane.f32.xlu1 %v2217_v61 }
0x172e   :  { %v8198_v35 = vpop.xlane.xlu1 %2218 }
0x172f   :  { %9998 = vst [vmem:[#allocation27_spill] sm:$0xff] %v8198_v35  ;;  %vm2220_vm14 = vcmp.eq.f32.partialorder %v2217_v61, %v8198_v35  ;;  %v10016_v61 = vld [vmem:[#allocation70_spill] sm:$0xff] }
0x1730   :  { %v2221_v14 = vsel %vm2220_vm14, %v9910_v8, 128  ;;  %v8454_v35 = vld [vmem:[#allocation10 + $0xe4] ss:$16 sps:$4 sm:$0xff]  }
0x1731   :  { %v2223_v59 = vshra.s32 %v2221_v14, 16  ;;  %v2222_v39 = vand.u32 65535, %v2221_v14 }
0x1733   :  { %v2225_v15 = vcvt.s32.f32 %v2223_v59  ;;  %v2224_v25 = vcvt.s32.f32 %v2222_v39 }
0x1735   :  { %2226 = vmin.xlane.f32.xlu0 %v2225_v15 }
0x17c2   :  { %v2227_v31 = vpop.xlane.xlu0 %2226 }
0x17c3   :  { %vm2228_vm15 = vcmp.eq.f32.partialorder %v2225_v15, %v2227_v31  ;;  %v2233_v63 = vcvt.f32.s32 %v2227_v31 }
0x17c4   :  { %v2229_v1 = vsel %vm2228_vm15, %v2224_v25, inf }
0x17c5   :  { %2230 = vmin.xlane.f32.xlu1 %v2229_v1  ;;  %v2234_v3 = vshll.u32 %v2233_v63, 16 }
0x1852   :  { %v2231_v11 = vpop.xlane.xlu1 %2230 }
0x1853   :  { %v2232_v4 = vcvt.f32.s32 %v2231_v11 }
0x1855   :  { %v2235_v5 = vadd.s32 %v2234_v3, %v2232_v4 }
0x1857   :  { %vm2236_vm1 = vcmp.ge.s32.totalorder %v2235_v5, 32 }
0x1858   :  { %v8203_v7 = vsel %vm2236_vm1, 3, %v2235_v5  ;;  %vm3150_vm1 = vcmp.eq.s32.totalorder %v9910_v8, 4 }
0x1859   :  { %v8209_v9 = vsel %vm2238_vm3, %v8203_v7, %v9999_v12  ;;  %vm2241_vm4 = vcmp.eq.s32.totalorder %v9910_v8, %v8203_v7  ;;  %v8300_v7 = vld [vmem:[#allocation11 + $0x24] ss:$16 sps:$4 sm:$0xff]  }
0x185a   :  { %vm4706_vm5 = vmpackc.low %vm2241_vm4, %vm2241_vm4 }
0x185b   :  { %4707 = vmatmul.mubr.msk.bf16.vlgmr.msra.gmra.mrb[40].mxu0 %vm4706_vm5, %v10000_v16  ;;  %4709 = vmatmul.mubr.msk.bf16.vlgmr.msra.gmra.mrb[48].mxu1 %vm4706_vm5, %v10000_v16 }
0x185c   :  { %5407 = vmatpush3.bf16.msra.mxu1 %v10001_v24  ;;  %5422 = vmatprep.mubr.msk.bf16.mxu1 %vm6873_vm2, %v9881_v30 }
0x185d   :  { %5408 = vmatprep.subr.bf16.mxu1 %v9881_v30  ;;  %5427 = vmatpush3.bf16.msra.mxu0 %v10002_v13 }
0x185e   :  { %5428 = vmatprep.subr.bf16.mxu0 %v9881_v30  ;;  %5442 = vmatprep.mubr.msk.bf16.mxu0 %vm6873_vm2, %v9881_v30 }
0x1860   :  { %5409 = vmatpush3.bf16.msra.mxu1 %v10003_v17 }
0x1861   :  { %5410 = vmatprep.subr.bf16.mxu1 %v9881_v30  ;;  %5429 = vmatpush3.bf16.msra.mxu0 %v10004_v18 }
0x1862   :  { %5430 = vmatprep.subr.bf16.mxu0 %v9881_v30 }
0x1864   :  { %5411 = vmatpush3.bf16.msra.mxu1 %v10005_v56 }
0x1865   :  { %5412 = vmatprep.subr.bf16.mxu1 %v9881_v30  ;;  %5431 = vmatpush3.bf16.msra.mxu0 %v10006_v19 }
0x1866   :  { %5432 = vmatprep.subr.bf16.mxu0 %v9881_v30 }
0x1868   :  { %5413 = vmatpush3.bf16.msra.mxu1 %v10007_v46 }
0x1869   :  { %5414 = vmatprep.subr.bf16.mxu1 %v9881_v30  ;;  %5433 = vmatpush3.bf16.msra.mxu0 %v10008_v60 }
0x186a   :  { %5434 = vmatprep.subr.bf16.mxu0 %v9881_v30 }
0x186c   :  { %5415 = vmatpush3.bf16.msra.mxu1 %v10009_v47 }
0x186d   :  { %5416 = vmatprep.subr.bf16.mxu1 %v9881_v30  ;;  %5435 = vmatpush3.bf16.msra.mxu0 %v10010_v48 }
0x186e   :  { %5436 = vmatprep.subr.bf16.mxu0 %v9881_v30 }
0x1870   :  { %5417 = vmatpush3.bf16.msra.mxu1 %v10011_v37 }
0x1871   :  { %5418 = vmatprep.subr.bf16.mxu1 %v9881_v30  ;;  %5437 = vmatpush3.bf16.msra.mxu0 %v10012_v23 }
0x1872   :  { %5438 = vmatprep.subr.bf16.mxu0 %v9881_v30 }
0x1874   :  { %5419 = vmatpush3.bf16.msra.mxu1 %v10013_v51 }
0x1875   :  { %5420 = vmatprep.subr.bf16.mxu1 %v9881_v30  ;;  %5439 = vmatpush3.bf16.msra.mxu0 %v10014_v50 }
0x1876   :  { %5440 = vmatprep.subr.bf16.mxu0 %v9881_v30 }
0x1878   :  { %5421 = vmatpush3.bf16.msra.mxu1 %v10015_v62  ;;  %v4705_v62 = vsel %vm2241_vm4, 1.0, %v9881_v30 }
0x1879   :  { %5446 = vmatprep.subr.bf16.mxu1 %v9881_v30  ;;  %5441 = vmatpush3.bf16.msra.mxu0 %v10016_v61  ;;  %v8293_v61 = vld [vmem:[%s9663_s10] ss:$0 sm:$0xff] }
0x187a   :  { %5466 = vmatprep.subr.bf16.mxu0 %v9881_v30 }
0x192e   :  { %v2361_v14 = vpop.f32.mrb[40].mxu0  ;;  %v2402_v59 = vpop.f32.mrb[48].mxu1 }
0x192f   :  { %v4710_v15 = vmul.f32 -1.442695, %v2361_v14  ;;  %v2403_v39 = vadd.f32 %v2402_v59, %v8185_v33  ;;  %v2363_v31 = vpop.f32.mrb[41].mxu0  ;;  %v2404_v25 = vpop.f32.mrb[49].mxu1 }
0x1930   :  { %v2405_v1 = vadd.f32 %v2404_v25, %v8188_v32  ;;  %v2365_v63 = vpop.f32.mrb[42].mxu0  ;;  %v2406_v11 = vpop.f32.mrb[50].mxu1  ;;  %v4711_v5 = vmul.f32 -1.442695, %v2363_v31  ;;  %v8296_v31 = vld [vmem:[#allocation11] ss:$16 sps:$4 sm:$0xff]  }
0x1931   :  { %6191 = vpow2.f32 %v4710_v15  ;;  %v2366_v3 = vpop.f32.mrb[43].mxu0  ;;  %v2407_v4 = vpop.f32.mrb[51].mxu1  ;;  %v8307_v25 = vld [vmem:[#allocation11 + $0x20] ss:$16 sps:$4 sm:$0xff]  }
0x1932   :  { %6193 = vpow2.f32 %v4711_v5  ;;  %v8315_v63 = vld [vmem:[#allocation11 + $0x40] ss:$16 sps:$4 sm:$0xff]   ;;  %v8326_v3 = vld [vmem:[#allocation11 + $0x84] ss:$16 sps:$4 sm:$0xff]  }
0x1933   :  { %v8323_v11 = vld [vmem:[#allocation11 + $0x60] ss:$16 sps:$4 sm:$0xff]   ;;  %v8334_v4 = vld [vmem:[#allocation11 + $0xa4] ss:$16 sps:$4 sm:$0xff]  }
0x1934   :  { %v8342_v5 = vld [vmem:[#allocation11 + $0xc4] ss:$16 sps:$4 sm:$0xff]  }
0x193b   :  { %v6192_v12 = vpop.eup %6191 }
0x193c   :  { %v2412_v24 = vadd.f32 1.0, %v6192_v12  ;;  %v6194_v13 = vpop.eup %6193  ;;  %v8350_v12 = vld [vmem:[#allocation11 + $0xe4] ss:$16 sps:$4 sm:$0xff]  }
0x193d   :  { %v2418_v17 = vadd.f32 1.0, %v6194_v13  ;;  %v8371_v13 = vld [vmem:[#allocation11 + $0x28] ss:$16 sps:$4 sm:$0xff]  }
0x193e   :  { %6195 = vrcp.f32 %v2412_v24  ;;  %v8358_v24 = vld [vmem:[#allocation11 + $0xc] ss:$16 sps:$4 sm:$0xff]  }
0x193f   :  { %6197 = vrcp.f32 %v2418_v17  ;;  %v8374_v17 = vld [vmem:[#allocation11 + $0x4c] ss:$16 sps:$4 sm:$0xff]  }
0x1948   :  { %v6196_v18 = vpop.eup %6195 }
0x1949   :  { %v2421_v56 = vmul.f32 %v6196_v18, %v2405_v1  ;;  %v6198_v19 = vpop.eup %6197  ;;  %v8310_v1 = vld [vmem:[#allocation11 + $0x44] ss:$16 sps:$4 sm:$0xff]   ;;  %v8380_v18 = vld [vmem:[#allocation11 + $0x6c] ss:$16 sps:$4 sm:$0xff]  }
0x194a   :  { %v2424_v46 = vsub.f32 1.0, %v6198_v19  ;;  %v2426_v47 = vmul.f32 %v6198_v19, %v7994_v2  ;;  %v10017_v2 = vld [vmem:[#allocation71_spill] sm:$0xff] }
0x194b   :  { %v2422_v33 = vadd.f32 %v2421_v56, %v2403_v39  ;;  %v8383_v56 = vld [vmem:[#allocation11 + $0x68] ss:$16 sps:$4 sm:$0xff]  }
0x194c   :  { %v8389_v19 = vld [vmem:[#allocation11 + $0x88] ss:$16 sps:$4 sm:$0xff]  }
0x194d   :  { %6199 = vtanh.f32 %v2422_v33  ;;  %v8386_v33 = vld [vmem:[#allocation11 + $0x8c] ss:$16 sps:$4 sm:$0xff]  }
0x1957   :  { %v6200_v32 = vpop.eup %6199 }
0x1958   :  { %v2425_v60 = vmul.f32 %v6200_v32, %v2424_v46  ;;  %v8392_v46 = vld [vmem:[#allocation11 + $0xac] ss:$16 sps:$4 sm:$0xff]   ;;  %v8395_v32 = vld [vmem:[#allocation11 + $0xa8] ss:$16 sps:$4 sm:$0xff]  }
0x195a   :  { %v8258_v48 = vadd.f32 %v2426_v47, %v2425_v60  ;;  %v8398_v60 = vld [vmem:[#allocation11 + $0xcc] ss:$16 sps:$4 sm:$0xff]   ;;  %v8401_v47 = vld [vmem:[#allocation11 + $0xc8] ss:$16 sps:$4 sm:$0xff]  }
0x195c   :  { %v8262_v37 = vpack.c.bf16 %v8258_v48, %v8258_v48 }
0x195e   :  { %5423 = vmatmul.mubr.bf16.vlgmr.msra.gmra.mrb[52].mxu1 %v8262_v37 }
0x195f   :  { %5447 = vmatpush3.bf16.msra.mxu1 %v8001_v34  ;;  %5462 = vmatprep.mubr.msk.bf16.mxu1 %vm6873_vm2, %v9881_v30  ;;  %v8282_v34 = vld [vmem:[#allocation11 + $0x4] ss:$16 sps:$4 sm:$0xff]  }
0x1960   :  { %5448 = vmatprep.subr.bf16.mxu1 %v9881_v30 }
0x1963   :  { %5449 = vmatpush3.bf16.msra.mxu1 %v8007_v43 }
0x1964   :  { %5450 = vmatprep.subr.bf16.mxu1 %v9881_v30 }
0x1967   :  { %5451 = vmatpush3.bf16.msra.mxu1 %v8011_v21 }
0x1968   :  { %5452 = vmatprep.subr.bf16.mxu1 %v9881_v30 }
0x196b   :  { %5453 = vmatpush3.bf16.msra.mxu1 %v8015_v28 }
0x196c   :  { %5454 = vmatprep.subr.bf16.mxu1 %v9881_v30 }
0x196f   :  { %5455 = vmatpush3.bf16.msra.mxu1 %v8019_v42 }
0x1970   :  { %5456 = vmatprep.subr.bf16.mxu1 %v9881_v30 }
0x1973   :  { %5457 = vmatpush3.bf16.msra.mxu1 %v8023_v58 }
0x1974   :  { %5458 = vmatprep.subr.bf16.mxu1 %v9881_v30 }
0x1977   :  { %5459 = vmatpush3.bf16.msra.mxu1 %v8027_v26 }
0x1978   :  { %5460 = vmatprep.subr.bf16.mxu1 %v9881_v30 }
0x197b   :  { %5461 = vmatpush3.bf16.msra.mxu1 %v10017_v2  ;;  %v8404_v2 = vld [vmem:[#allocation11 + $0xec] ss:$16 sps:$4 sm:$0xff]  }
0x197c   :  { %2701 = vmatprep.subr.bf16.mxu1 %v8282_v34 }
0x1a31   :  { %v2466_v43 = vpop.f32.mrb[52].mxu1 }
0x1a32   :  { %v2467_v21 = vadd.f32 %v8038_v36, %v2466_v43  ;;  %v5424_v28 = vpop.f32.mrb[53].mxu1  ;;  %v2428_v36 = vmul.f32 %v8293_v61, %v4705_v62  ;;  %v8407_v43 = vld [vmem:[#allocation11 + $0xe8] ss:$16 sps:$4 sm:$0xff]   ;;  %v8436_v62 = vld [vmem:[#allocation10 + $0x84] ss:$16 sps:$4 sm:$0xff]  }
0x1a33   :  { %v2469_v42 = vpop.f32.mrb[54].mxu1  ;;  %v8414_v28 = vld [vmem:[#allocation10] ss:$16 sps:$4 sm:$0xff]   ;;  %10022 = vst [vmem:[#allocation33_spill] sm:$0xff] %v8436_v62 }
0x1a34   :  { %2472 = vmax.xlane.f32.xlu0 %v2467_v21  ;;  %v5425_v23 = vpop.f32.mrb[55].mxu1  ;;  %v8418_v42 = vld [vmem:[#allocation10 + $0x24] ss:$16 sps:$4 sm:$0xff]  }
0x1a35   :  { %v8421_v23 = vld [vmem:[#allocation10 + $0x20] ss:$16 sps:$4 sm:$0xff]  }
0x1ac1   :  { %v2473_v58 = vpop.xlane.xlu0 %2472 }
0x1ac2   :  { %v2474_v51 = vsub.f32 %v2467_v21, %v2473_v58  ;;  %v8410_v21 = vld [vmem:[#allocation10 + $0x4] ss:$16 sps:$4 sm:$0xff]  }
0x1ac3   :  { %v8424_v58 = vld [vmem:[#allocation10 + $0x44] ss:$16 sps:$4 sm:$0xff]  }
0x1ac4   :  { %v2475_v50 = vmul.f32 1.442695, %v2474_v51  ;;  %10018 = vst [vmem:[#allocation28_spill] sm:$0xff] %v8424_v58  ;;  %v8427_v51 = vld [vmem:[#allocation10 + $0x40] ss:$16 sps:$4 sm:$0xff]  }
0x1ac5   :  { %10019 = vst [vmem:[#allocation30_spill] sm:$0xff] %v8427_v51 }
0x1ac6   :  { %6201 = vpow2.f32 %v2475_v50  ;;  %v8430_v50 = vld [vmem:[#allocation10 + $0x64] ss:$16 sps:$4 sm:$0xff]  }
0x1ac7   :  { %10020 = vst [vmem:[#allocation31_spill] sm:$0xff] %v8430_v50 }
0x1ad0   :  { %v6202_v26 = vpop.eup %6201 }
0x1ad1   :  { %2477 = vadd.xlane.f32.xlu1 %v6202_v26 }
0x1ad5   :  { %2429 = vadd.xlane.f32.xlu1 %v2428_v36  ;;  %v8439_v36 = vld [vmem:[#allocation10 + $0x80] ss:$16 sps:$4 sm:$0xff]  }
0x1ad6   :  { %10023 = vst [vmem:[#allocation34_spill] sm:$0xff] %v8439_v36 }
0x1b5e   :  { %v2478_v14 = vpop.xlane.xlu1 %2477 }
0x1b5f   :  { %6203 = vrcp.f32 %v2478_v14  ;;  %v8442_v14 = vld [vmem:[#allocation10 + $0xa4] ss:$16 sps:$4 sm:$0xff]  }
0x1b60   :  { %10024 = vst [vmem:[#allocation35_spill] sm:$0xff] %v8442_v14 }
0x1b69   :  { %v6204_v59 = vpop.eup %6203 }
0x1b6a   :  { %v2480_v15 = vmul.f32 %v6204_v59, %v6202_v26  ;;  %v8433_v26 = vld [vmem:[#allocation10 + $0x60] ss:$16 sps:$4 sm:$0xff]  }
0x1b6b   :  { %10021 = vst [vmem:[#allocation32_spill] sm:$0xff] %v8433_v26  ;;  %v8445_v59 = vld [vmem:[#allocation10 + $0xa0] ss:$16 sps:$4 sm:$0xff]  }
0x1b6c   :  { %v2481_v39 = vpack.c.bf16 %v2480_v15, %v2480_v15  ;;  %10025 = vst [vmem:[#allocation36_spill] sm:$0xff] %v8445_v59  ;;  %v8448_v15 = vld [vmem:[#allocation10 + $0xc4] ss:$16 sps:$4 sm:$0xff]  }
0x1b6d   :  { %10026 = vst [vmem:[#allocation37_spill] sm:$0xff] %v8448_v15 }
0x1b6e   :  { %5443 = vmatmul.mubr.bf16.vlgmr.msra.gmra.mrb[48].mxu0 %v2481_v39  ;;  %5463 = vmatmul.mubr.bf16.vlgmr.msra.gmra.mrb[56].mxu1 %v2481_v39  ;;  %v8451_v39 = vld [vmem:[#allocation10 + $0xc0] ss:$16 sps:$4 sm:$0xff]  }
0x1b6f   :  { %2702 = vmatpush1.bf16.msra.mxu1 %v8296_v31  ;;  %2733 = vmatprep.mubr.bf16.mxu1 %v9888_v57  ;;  %10027 = vst [vmem:[#allocation38_spill] sm:$0xff] %v8451_v39 }
0x1b70   :  { %2703 = vmatprep.subr.bf16.mxu1 %v8300_v7  ;;  %5467 = vmatpush3.bf16.msra.mxu0 %v8049_v49  ;;  %v8318_v49 = vld [vmem:[#allocation11 + $0x64] ss:$16 sps:$4 sm:$0xff]  }
0x1b71   :  { %5468 = vmatprep.subr.bf16.mxu0 %v9881_v30  ;;  %5482 = vmatprep.mubr.msk.bf16.mxu0 %vm6873_vm2, %v9881_v30 }
0x1b73   :  { %2704 = vmatpush1.bf16.msra.mxu1 %v8307_v25 }
0x1b74   :  { %2705 = vmatprep.subr.bf16.mxu1 %v8310_v1  ;;  %5469 = vmatpush3.bf16.msra.mxu0 %v8057_v6  ;;  %v8331_v6 = vld [vmem:[#allocation11 + $0x80] ss:$16 sps:$4 sm:$0xff]  }
0x1b75   :  { %5470 = vmatprep.subr.bf16.mxu0 %v9881_v30 }
0x1b77   :  { %2706 = vmatpush1.bf16.msra.mxu1 %v8315_v63 }
0x1b78   :  { %2707 = vmatprep.subr.bf16.mxu1 %v8318_v49  ;;  %5471 = vmatpush3.bf16.msra.mxu0 %v8063_v52  ;;  %v8339_v52 = vld [vmem:[#allocation11 + $0xa0] ss:$16 sps:$4 sm:$0xff]  }
0x1b79   :  { %5472 = vmatprep.subr.bf16.mxu0 %v9881_v30 }
0x1b7b   :  { %2708 = vmatpush1.bf16.msra.mxu1 %v8323_v11 }
0x1b7c   :  { %2709 = vmatprep.subr.bf16.mxu1 %v8326_v3  ;;  %5473 = vmatpush3.bf16.msra.mxu0 %v8069_v38  ;;  %v8347_v38 = vld [vmem:[#allocation11 + $0xc0] ss:$16 sps:$4 sm:$0xff]  }
0x1b7d   :  { %5474 = vmatprep.subr.bf16.mxu0 %v9881_v30 }
0x1b7f   :  { %2710 = vmatpush1.bf16.msra.mxu1 %v8331_v6 }
0x1b80   :  { %2711 = vmatprep.subr.bf16.mxu1 %v8334_v4  ;;  %5475 = vmatpush3.bf16.msra.mxu0 %v8075_v53  ;;  %v8355_v53 = vld [vmem:[#allocation11 + $0xe0] ss:$16 sps:$4 sm:$0xff]  }
0x1b81   :  { %5476 = vmatprep.subr.bf16.mxu0 %v9881_v30 }
0x1b83   :  { %2712 = vmatpush1.bf16.msra.mxu1 %v8339_v52 }
0x1b84   :  { %2713 = vmatprep.subr.bf16.mxu1 %v8342_v5  ;;  %5477 = vmatpush3.bf16.msra.mxu0 %v8081_v54  ;;  %v8364_v54 = vld [vmem:[#allocation11 + $0x8] ss:$16 sps:$4 sm:$0xff]  }
0x1b85   :  { %5478 = vmatprep.subr.bf16.mxu0 %v9881_v30 }
0x1b87   :  { %2714 = vmatpush1.bf16.msra.mxu1 %v8347_v38 }
0x1b88   :  { %2715 = vmatprep.subr.bf16.mxu1 %v8350_v12  ;;  %5479 = vmatpush3.bf16.msra.mxu0 %v8087_v27  ;;  %v8368_v27 = vld [vmem:[#allocation11 + $0x2c] ss:$16 sps:$4 sm:$0xff]  }
0x1b89   :  { %5480 = vmatprep.subr.bf16.mxu0 %v9881_v30 }
0x1b8b   :  { %2716 = vmatpush1.bf16.msra.mxu1 %v8355_v53 }
0x1b8c   :  { %2742 = vmatprep.subr.bf16.mxu1 %v8358_v24  ;;  %5481 = vmatpush3.bf16.msra.mxu0 %v8093_v55  ;;  %v8377_v55 = vld [vmem:[#allocation11 + $0x48] ss:$16 sps:$4 sm:$0xff]  }
0x1b8d   :  { %5486 = vmatprep.subr.bf16.mxu0 %v9881_v30 }
0x1b8e   :  { %2734 = vmatmul.mubr.bf16.vlgmr.msra.gmra.mrb[60].mxu1 %v8262_v37 }
0x1b8f   :  { %2743 = vmatpush1.bf16.msra.mxu1 %v8364_v54  ;;  %2774 = vmatprep.mubr.bf16.mxu1 %v9888_v57 }
0x1b90   :  { %2744 = vmatprep.subr.bf16.mxu1 %v8368_v27 }
0x1b93   :  { %2745 = vmatpush1.bf16.msra.mxu1 %v8371_v13 }
0x1b94   :  { %2746 = vmatprep.subr.bf16.mxu1 %v8374_v17 }
0x1b97   :  { %2747 = vmatpush1.bf16.msra.mxu1 %v8377_v55 }
0x1b98   :  { %2748 = vmatprep.subr.bf16.mxu1 %v8380_v18 }
0x1b9b   :  { %2749 = vmatpush1.bf16.msra.mxu1 %v8383_v56 }
0x1b9c   :  { %2750 = vmatprep.subr.bf16.mxu1 %v8386_v33 }
0x1b9f   :  { %2751 = vmatpush1.bf16.msra.mxu1 %v8389_v19 }
0x1ba0   :  { %2752 = vmatprep.subr.bf16.mxu1 %v8392_v46 }
0x1ba3   :  { %2753 = vmatpush1.bf16.msra.mxu1 %v8395_v32 }
0x1ba4   :  { %2754 = vmatprep.subr.bf16.mxu1 %v8398_v60 }
0x1ba7   :  { %2755 = vmatpush1.bf16.msra.mxu1 %v8401_v47 }
0x1ba8   :  { %2756 = vmatprep.subr.bf16.mxu1 %v8404_v2 }
0x1bab   :  { %2757 = vmatpush1.bf16.msra.mxu1 %v8407_v43 }
0x1bac   :  { %2783 = vmatprep.subr.bf16.mxu1 %v8410_v21 }
0x1bae   :  { %2775 = vmatmul.mubr.bf16.vlgmr.msra.gmra.mrb[64].mxu1 %v8262_v37 }
0x1baf   :  { %2784 = vmatpush1.bf16.msra.mxu1 %v8414_v28  ;;  %2815 = vmatprep.mubr.bf16.mxu1 %v9888_v57 }
0x1bb0   :  { %2785 = vmatprep.subr.bf16.mxu1 %v8418_v42 }
0x1bb3   :  { %2786 = vmatpush1.bf16.msra.mxu1 %v8421_v23 }
0x1bb4   :  { %2787 = vmatprep.subr.bf16.mxu1 %v8424_v58 }
0x1bb7   :  { %2788 = vmatpush1.bf16.msra.mxu1 %v8427_v51 }
0x1bb8   :  { %2789 = vmatprep.subr.bf16.mxu1 %v8430_v50 }
0x1bbb   :  { %2790 = vmatpush1.bf16.msra.mxu1 %v8433_v26 }
0x1bbc   :  { %2791 = vmatprep.subr.bf16.mxu1 %v8436_v62 }
0x1bbf   :  { %2792 = vmatpush1.bf16.msra.mxu1 %v8439_v36  ;;  %v8457_v36 = vld [vmem:[#allocation10 + $0xe0] ss:$16 sps:$4 sm:$0xff]  }
0x1bc0   :  { %2793 = vmatprep.subr.bf16.mxu1 %v8442_v14 }
0x1bc3   :  { %2794 = vmatpush1.bf16.msra.mxu1 %v8445_v59 }
0x1bc4   :  { %2795 = vmatprep.subr.bf16.mxu1 %v8448_v15 }
0x1bc7   :  { %2796 = vmatpush1.bf16.msra.mxu1 %v8451_v39 }
0x1bc8   :  { %2797 = vmatprep.subr.bf16.mxu1 %v8454_v35 }
0x1bcb   :  { %2798 = vmatpush1.bf16.msra.mxu1 %v8457_v36 }
0x1bcc   :  { %5526 = vmatprep.subr.bf16.mxu1 %v9881_v30 }
0x1c41   :  { %v2516_v14 = vpop.f32.mrb[48].mxu0  ;;  %v8461_v59 = vpop.f32.mrb[56].mxu1 }
0x1c42   :  { %v2562_v62 = vpack.c.bf16 %v2516_v14, %v2516_v14  ;;  %v5444_v26 = vpop.f32.mrb[49].mxu0  ;;  %v5464_v15 = vpop.f32.mrb[57].mxu1  ;;  %v8524_v14 = vld [vmem:[#allocation10 + $0xec] ss:$16 sps:$4 sm:$0xff]  }
0x1c43   :  { %v2519_v50 = vpop.f32.mrb[50].mxu0  ;;  %v2559_v51 = vpop.f32.mrb[58].mxu1  ;;  %v8518_v26 = vld [vmem:[#allocation10 + $0xcc] ss:$16 sps:$4 sm:$0xff]   ;;  %10042 = vst [vmem:[#allocation52_spill] sm:$0xff] %v8524_v14 }
0x1c44   :  { %v5445_v58 = vpop.f32.mrb[51].mxu0  ;;  %v5465_v39 = vpop.f32.mrb[59].mxu1  ;;  %5483 = vmatmul.mubr.bf16.vlgmr.msra.gmra.mrb[52].mxu0 %v2562_v62  ;;  %v8512_v51 = vld [vmem:[#allocation10 + $0xac] ss:$16 sps:$4 sm:$0xff]   ;;  %v8515_v50 = vld [vmem:[#allocation10 + $0xa8] ss:$16 sps:$4 sm:$0xff]  }
0x1c45   :  { %5487 = vmatpush3.bf16.msra.mxu0 %v8135_v20  ;;  %5502 = vmatprep.mubr.msk.bf16.mxu0 %vm6873_vm2, %v9881_v30  ;;  %v8480_v20 = vld [vmem:[#allocation10 + $0xc] ss:$16 sps:$4 sm:$0xff]   ;;  %v8509_v58 = vld [vmem:[#allocation10 + $0x88] ss:$16 sps:$4 sm:$0xff]   ;;  %10038 = vst [vmem:[#allocation48_spill] sm:$0xff] %v8512_v51  ;;  %10039 = vst [vmem:[#allocation49_spill] sm:$0xff] %v8515_v50 }
0x1c46   :  { %5488 = vmatprep.subr.bf16.mxu0 %v9881_v30  ;;  %10028 = vst [vmem:[#allocation39_spill] sm:$0xff] %v8480_v20  ;;  %10037 = vst [vmem:[#allocation29_spill] sm:$0xff] %v8509_v58  ;;  %v8521_v62 = vld [vmem:[#allocation10 + $0xc8] ss:$16 sps:$4 sm:$0xff]  }
0x1c47   :  { %10040 = vst [vmem:[#allocation50_spill] sm:$0xff] %v8518_v26  ;;  %10041 = vst [vmem:[#allocation51_spill] sm:$0xff] %v8521_v62  ;;  %v8529_v39 = vld [vmem:[#allocation10 + $0xe8] ss:$16 sps:$4 sm:$0xff]  }
0x1c48   :  { %10043 = vst [vmem:[#allocation54_spill] sm:$0xff] %v8529_v39 }
0x1c49   :  { %5489 = vmatpush3.bf16.msra.mxu0 %v8141_v29  ;;  %v8484_v29 = vld [vmem:[#allocation10 + $0x8] ss:$16 sps:$4 sm:$0xff]  }
0x1c4a   :  { %5490 = vmatprep.subr.bf16.mxu0 %v9881_v30  ;;  %10029 = vst [vmem:[#allocation40_spill] sm:$0xff] %v8484_v29 }
0x1c4d   :  { %5491 = vmatpush3.bf16.msra.mxu0 %v8145_v0  ;;  %v8488_v0 = vld [vmem:[#allocation10 + $0x2c] ss:$16 sps:$4 sm:$0xff]  }
0x1c4e   :  { %5492 = vmatprep.subr.bf16.mxu0 %v9881_v30  ;;  %10030 = vst [vmem:[#allocation41_spill] sm:$0xff] %v8488_v0 }
0x1c51   :  { %5493 = vmatpush3.bf16.msra.mxu0 %v8149_v22  ;;  %v8491_v22 = vld [vmem:[#allocation10 + $0x28] ss:$16 sps:$4 sm:$0xff]  }
0x1c52   :  { %5494 = vmatprep.subr.bf16.mxu0 %v9881_v30  ;;  %10031 = vst [vmem:[#allocation42_spill] sm:$0xff] %v8491_v22 }
0x1c55   :  { %5495 = vmatpush3.bf16.msra.mxu0 %v8153_v40  ;;  %v8494_v40 = vld [vmem:[#allocation10 + $0x4c] ss:$16 sps:$4 sm:$0xff]  }
0x1c56   :  { %5496 = vmatprep.subr.bf16.mxu0 %v9881_v30  ;;  %10032 = vst [vmem:[#allocation43_spill] sm:$0xff] %v8494_v40 }
0x1c59   :  { %5497 = vmatpush3.bf16.msra.mxu0 %v8157_v41  ;;  %v8497_v41 = vld [vmem:[#allocation10 + $0x48] ss:$16 sps:$4 sm:$0xff]  }
0x1c5a   :  { %5498 = vmatprep.subr.bf16.mxu0 %v9881_v30  ;;  %10033 = vst [vmem:[#allocation44_spill] sm:$0xff] %v8497_v41 }
0x1c5d   :  { %5499 = vmatpush3.bf16.msra.mxu0 %v8161_v44  ;;  %v8500_v44 = vld [vmem:[#allocation10 + $0x6c] ss:$16 sps:$4 sm:$0xff]  }
0x1c5e   :  { %5500 = vmatprep.subr.bf16.mxu0 %v9881_v30  ;;  %10034 = vst [vmem:[#allocation45_spill] sm:$0xff] %v8500_v44 }
0x1c61   :  { %5501 = vmatpush3.bf16.msra.mxu0 %v8165_v45  ;;  %v8503_v45 = vld [vmem:[#allocation10 + $0x68] ss:$16 sps:$4 sm:$0xff]  }
0x1c62   :  { %2824 = vmatprep.subr.bf16.mxu0 %v8480_v20  ;;  %10035 = vst [vmem:[#allocation46_spill] sm:$0xff] %v8503_v45 }
0x1c64   :  { %5503 = vmatmul.mubr.bf16.vlgmr.msra.gmra.mrb[52].mxu0 %v8262_v37  ;;  %v8506_v37 = vld [vmem:[#allocation10 + $0x8c] ss:$16 sps:$4 sm:$0xff]  }
0x1c65   :  { %2825 = vmatpush1.bf16.msra.mxu0 %v8484_v29  ;;  %2856 = vmatprep.mubr.bf16.mxu0 %v9888_v57  ;;  %10036 = vst [vmem:[#allocation47_spill] sm:$0xff] %v8506_v37 }
0x1c66   :  { %2826 = vmatprep.subr.bf16.mxu0 %v8488_v0 }
0x1c69   :  { %2827 = vmatpush1.bf16.msra.mxu0 %v8491_v22 }
0x1c6a   :  { %2828 = vmatprep.subr.bf16.mxu0 %v8494_v40 }
0x1c6d   :  { %2829 = vmatpush1.bf16.msra.mxu0 %v8497_v41 }
0x1c6e   :  { %2830 = vmatprep.subr.bf16.mxu0 %v8500_v44 }
0x1c71   :  { %2831 = vmatpush1.bf16.msra.mxu0 %v8503_v45 }
0x1c72   :  { %2832 = vmatprep.subr.bf16.mxu0 %v8506_v37 }
0x1c75   :  { %2833 = vmatpush1.bf16.msra.mxu0 %v8509_v58  ;;  %v2430_v58 = vpop.xlane.xlu1 %2429 }
0x1c76   :  { %2834 = vmatprep.subr.bf16.mxu0 %v8512_v51 }
0x1c79   :  { %2835 = vmatpush1.bf16.msra.mxu0 %v8515_v50 }
0x1c7a   :  { %2836 = vmatprep.subr.bf16.mxu0 %v8518_v26 }
0x1c7d   :  { %2837 = vmatpush1.bf16.msra.mxu0 %v8521_v62 }
0x1c7e   :  { %2838 = vmatprep.subr.bf16.mxu0 %v8524_v14 }
0x1c81   :  { %v8527_v15 = vpop.f32.mrb[64].mxu1  ;;  %2839 = vmatpush1.bf16.msra.mxu0 %v8529_v39 }
0x1c82   :  { %v8532_v51 = vpop.f32.mrb[65].mxu1  ;;  %5506 = vmatprep.subr.bf16.mxu0 %v9881_v30 }
0x1c83   :  { %v2780_v50 = vpop.f32.mrb[66].mxu1 }
0x1c84   :  { %v2781_v26 = vpop.f32.mrb[67].mxu1 }
0x1d37   :  { %v2637_v37 = vpop.f32.mrb[52].mxu0 }
0x1d38   :  { %v2643_v45 = vadd.f32 %v2637_v37, %v2430_v58  ;;  %v5504_v62 = vpop.f32.mrb[53].mxu0  ;;  %v2650_v44 = vadd.f32 %v8194_v10, %v2637_v37 }
0x1d39   :  { %v2640_v41 = vpop.f32.mrb[54].mxu0 }
0x1d3a   :  { %v4712_v14 = vmul.f32 -1.442695, %v2643_v45  ;;  %2651 = vmax.xlane.f32.xlu0 %v2650_v44  ;;  %v5505_v40 = vpop.f32.mrb[55].mxu0 }
0x1d3c   :  { %6205 = vpow2.f32 %v4712_v14 }
0x1d46   :  { %v6206_v22 = vpop.eup %6205 }
0x1d47   :  { %v2647_v0 = vadd.f32 1.0, %v6206_v22 }
0x1d49   :  { %6207 = vrcp.f32 %v2647_v0 }
0x1d53   :  { %v6208_v39 = vpop.eup %6207 }
0x1d54   :  { %2662 = vperm.xlu1 %5987, %v6208_v39   ;;  %v2666_v58 = vsub.f32 1.0, %v6208_v39 }
0x1dc7   :  { %v2652_v29 = vpop.xlane.xlu0 %2651 }
0x1dc8   :  { %v2653_v20 = vsub.f32 %v2650_v44, %v2652_v29 }
0x1dca   :  { %v2654_v50 = vmul.f32 1.442695, %v2653_v20 }
0x1dcc   :  { %6209 = vpow2.f32 %v2654_v50 }
0x1dd3   :  { %v2663_v40 = vpop.permute.xlu1 %2662 }
0x1dd6   :  { %v6210_v26 = vpop.eup %6209 }
0x1dd7   :  { %2656 = vadd.xlane.f32.xlu0 %v6210_v26 }
0x1ded   :  { %2669 = vperm.xlu0 %5988, %v2666_v58  }
0x1e64   :  { %v2657_v62 = vpop.xlane.xlu0 %2656 }
0x1e65   :  { %6211 = vrcp.f32 %v2657_v62 }
0x1e6c   :  { %v2670_v41 = vpop.permute.xlu0 %2669 }
0x1e6d   :  { %v2672_v37 = vmul.f32 %v2670_v41, %v8461_v59 }
0x1e6f   :  { %v6212_v10 = vpop.eup %6211 }
0x1e70   :  { %v2659_v45 = vmul.f32 %v6212_v10, %v6210_v26 }
0x1e72   :  { %v2665_v22 = vmul.f32 %v2663_v40, %v2659_v45 }
0x1e74   :  { %v2673_v0 = vadd.f32 %v2672_v37, %v2665_v22  ;;  %v8558_v22 = vld [vmem:[#allocation5] sm:$0xff]  }
0x1e75   :  { %10046 = vst [vmem:[#allocation58_spill] sm:$0xff] %v8558_v22 }
0x1e76   :  { %2674 = vmax.xlane.f32.xlu1 %v2673_v0 }
0x1f03   :  { %v8537_v14 = vpop.xlane.xlu1 %2674 }
0x1f04   :  { %10044 = vst [vmem:[#allocation55_spill] sm:$0xff] %v8537_v14  ;;  %vm2676_vm6 = vcmp.eq.f32.partialorder %v2673_v0, %v8537_v14  ;;  %v8570_v0 = vld [vmem:[#allocation5 + $0x8] sm:$0xff]   ;;  %v8622_v14 = vld [vmem:[#allocation7 + $0x38] sm:$0xff]  }
0x1f05   :  { %v2677_v20 = vsel %vm2676_vm6, %v9910_v8, 128  ;;  %10048 = vst [vmem:[#allocation60_spill] sm:$0xff] %v8570_v0  ;;  %10061 = vst [vmem:[#allocation72_spill] sm:$0xff] %v8622_v14 }
0x1f06   :  { %v2679_v29 = vshra.s32 %v2677_v20, 16  ;;  %v2678_v39 = vand.u32 65535, %v2677_v20  ;;  %v8574_v20 = vld [vmem:[#allocation7 + $0x8] sm:$0xff]  }
0x1f07   :  { %10049 = vst [vmem:[#allocation61_spill] sm:$0xff] %v8574_v20 }
0x1f08   :  { %v2681_v44 = vcvt.s32.f32 %v2679_v29  ;;  %v2680_v58 = vcvt.s32.f32 %v2678_v39  ;;  %v8578_v29 = vld [vmem:[#allocation5 + $0x10] sm:$0xff]   ;;  %v8586_v39 = vld [vmem:[#allocation5 + $0x18] sm:$0xff]  }
0x1f09   :  { %10050 = vst [vmem:[#allocation56_spill] sm:$0xff] %v8578_v29  ;;  %10052 = vst [vmem:[#allocation63_spill] sm:$0xff] %v8586_v39 }
0x1f0a   :  { %2682 = vmin.xlane.f32.xlu0 %v2681_v44 }
0x1f97   :  { %v2683_v50 = vpop.xlane.xlu0 %2682 }
0x1f98   :  { %vm2684_vm7 = vcmp.eq.f32.partialorder %v2681_v44, %v2683_v50  ;;  %v2689_v62 = vcvt.f32.s32 %v2683_v50  ;;  %v8582_v44 = vld [vmem:[#allocation7 + $0x10] sm:$0xff]   ;;  %v8590_v50 = vld [vmem:[#allocation7 + $0x18] sm:$0xff]  }
0x1f99   :  { %v2685_v26 = vsel %vm2684_vm7, %v2680_v58, inf  ;;  %10051 = vst [vmem:[#allocation62_spill] sm:$0xff] %v8582_v44  ;;  %10053 = vst [vmem:[#allocation64_spill] sm:$0xff] %v8590_v50  ;;  %v8594_v58 = vld [vmem:[#allocation5 + $0x20] sm:$0xff]  }
0x1f9a   :  { %2686 = vmin.xlane.f32.xlu1 %v2685_v26  ;;  %v2690_v10 = vshll.u32 %v2689_v62, 16  ;;  %10054 = vst [vmem:[#allocation65_spill] sm:$0xff] %v8594_v58  ;;  %v8598_v26 = vld [vmem:[#allocation7 + $0x20] sm:$0xff]   ;;  %v8602_v62 = vld [vmem:[#allocation5 + $0x28] sm:$0xff]  }
0x1f9b   :  { %10055 = vst [vmem:[#allocation66_spill] sm:$0xff] %v8598_v26  ;;  %10056 = vst [vmem:[#allocation67_spill] sm:$0xff] %v8602_v62 }
0x2027   :  { %v2687_v59 = vpop.xlane.xlu1 %2686 }
0x2028   :  { %v2688_v41 = vcvt.f32.s32 %v2687_v59  ;;  %v8606_v59 = vld [vmem:[#allocation7 + $0x28] sm:$0xff]  }
0x2029   :  { %10057 = vst [vmem:[#allocation68_spill] sm:$0xff] %v8606_v59 }
0x202a   :  { %v2691_v45 = vadd.s32 %v2690_v10, %v2688_v41  ;;  %v8610_v10 = vld [vmem:[#allocation5 + $0x30] sm:$0xff]  }
0x202b   :  { %10058 = vst [vmem:[#allocation69_spill] sm:$0xff] %v8610_v10  ;;  %v8614_v41 = vld [vmem:[#allocation7 + $0x30] sm:$0xff]  }
0x202c   :  { %vm2692_vm8 = vcmp.ge.s32.totalorder %v2691_v45, 32  ;;  %10059 = vst [vmem:[#allocation70_spill] sm:$0xff] %v8614_v41 }
0x202d   :  { %v8542_v40 = vsel %vm2692_vm8, 3, %v2691_v45  ;;  %v8618_v45 = vld [vmem:[#allocation5 + $0x38] sm:$0xff]  }
0x202e   :  { %v8548_v37 = vsel %vm2694_vm9, %v8542_v40, %v8209_v9  ;;  %vm2697_vm11 = vcmp.eq.s32.totalorder %v9910_v8, %v8542_v40  ;;  %v8564_v9 = vld [vmem:[#allocation7] sm:$0xff]   ;;  %10060 = vst [vmem:[#allocation71_spill] sm:$0xff] %v8618_v45  ;;  %v10077_v40 = vld [vmem:[#allocation43_spill] sm:$0xff] }
0x202f   :  { %10045 = vst [vmem:[#allocation57_spill] sm:$0xff] %v8548_v37  ;;  %vm4714_vm12 = vmpackc.low %vm2697_vm11, %vm2697_vm11 }
0x2030   :  { %4715 = vmatmul.mubr.msk.bf16.vlgmr.msra.gmra.mrb[60].mxu1 %vm4714_vm12, %v10000_v16  ;;  %4717 = vmatmul.mubr.msk.bf16.vlgmr.msra.gmra.mrb[56].mxu0 %vm4714_vm12, %v10000_v16  ;;  %10047 = vst [vmem:[#allocation59_spill] sm:$0xff] %v8564_v9 }
0x2031   :  { %5507 = vmatpush3.bf16.msra.mxu0 %v8558_v22  ;;  %5522 = vmatprep.mubr.msk.bf16.mxu0 %vm6873_vm2, %v9881_v30 }
0x2032   :  { %5508 = vmatprep.subr.bf16.mxu0 %v9881_v30  ;;  %5527 = vmatpush3.bf16.msra.mxu1 %v8564_v9 }
0x2033   :  { %5528 = vmatprep.subr.bf16.mxu1 %v9881_v30  ;;  %5542 = vmatprep.mubr.msk.bf16.mxu1 %vm6873_vm2, %v9881_v30 }
0x2035   :  { %5509 = vmatpush3.bf16.msra.mxu0 %v8570_v0 }
0x2036   :  { %5510 = vmatprep.subr.bf16.mxu0 %v9881_v30  ;;  %5529 = vmatpush3.bf16.msra.mxu1 %v8574_v20 }
0x2037   :  { %5530 = vmatprep.subr.bf16.mxu1 %v9881_v30 }
0x2039   :  { %5511 = vmatpush3.bf16.msra.mxu0 %v8578_v29 }
0x203a   :  { %5512 = vmatprep.subr.bf16.mxu0 %v9881_v30  ;;  %5531 = vmatpush3.bf16.msra.mxu1 %v8582_v44 }
0x203b   :  { %5532 = vmatprep.subr.bf16.mxu1 %v9881_v30 }
0x203d   :  { %5513 = vmatpush3.bf16.msra.mxu0 %v8586_v39 }
0x203e   :  { %5514 = vmatprep.subr.bf16.mxu0 %v9881_v30  ;;  %5533 = vmatpush3.bf16.msra.mxu1 %v8590_v50 }
0x203f   :  { %5534 = vmatprep.subr.bf16.mxu1 %v9881_v30 }
0x2041   :  { %5515 = vmatpush3.bf16.msra.mxu0 %v8594_v58 }
0x2042   :  { %5516 = vmatprep.subr.bf16.mxu0 %v9881_v30  ;;  %5535 = vmatpush3.bf16.msra.mxu1 %v8598_v26 }
0x2043   :  { %5536 = vmatprep.subr.bf16.mxu1 %v9881_v30 }
0x2045   :  { %5517 = vmatpush3.bf16.msra.mxu0 %v8602_v62 }
0x2046   :  { %5518 = vmatprep.subr.bf16.mxu0 %v9881_v30  ;;  %5537 = vmatpush3.bf16.msra.mxu1 %v8606_v59 }
0x2047   :  { %5538 = vmatprep.subr.bf16.mxu1 %v9881_v30 }
0x2049   :  { %5519 = vmatpush3.bf16.msra.mxu0 %v8610_v10 }
0x204a   :  { %5520 = vmatprep.subr.bf16.mxu0 %v9881_v30  ;;  %5539 = vmatpush3.bf16.msra.mxu1 %v8614_v41 }
0x204b   :  { %5540 = vmatprep.subr.bf16.mxu1 %v9881_v30 }
0x204d   :  { %5521 = vmatpush3.bf16.msra.mxu0 %v8618_v45 }
0x204e   :  { %5546 = vmatprep.subr.bf16.mxu0 %v9881_v30  ;;  %5541 = vmatpush3.bf16.msra.mxu1 %v8622_v14 }
0x204f   :  { %5566 = vmatprep.subr.bf16.mxu1 %v9881_v30 }
0x2103   :  { %v2817_v10 = vpop.f32.mrb[60].mxu1  ;;  %v2858_v59 = vpop.f32.mrb[56].mxu0 }
0x2104   :  { %v4718_v62 = vmul.f32 -1.442695, %v2817_v10  ;;  %v2859_v26 = vadd.f32 %v2858_v59, %v8527_v15  ;;  %v2819_v41 = vpop.f32.mrb[61].mxu1  ;;  %v2860_v58 = vpop.f32.mrb[57].mxu0 }
0x2105   :  { %v2861_v50 = vadd.f32 %v2860_v58, %v8532_v51  ;;  %v2821_v39 = vpop.f32.mrb[62].mxu1  ;;  %v2862_v44 = vpop.f32.mrb[58].mxu0  ;;  %v4719_v20 = vmul.f32 -1.442695, %v2819_v41 }
0x2106   :  { %6213 = vpow2.f32 %v4718_v62  ;;  %v2822_v45 = vpop.f32.mrb[63].mxu1  ;;  %v2863_v29 = vpop.f32.mrb[59].mxu0 }
0x2107   :  { %6215 = vpow2.f32 %v4719_v20  ;;  %v8666_v29 = vld [vmem:[#allocation8 + $0x38] sm:$0xff]  }
0x2108   :  { %10062 = vst [vmem:[#allocation73_spill] sm:$0xff] %v8666_v29 }
0x2110   :  { %v6214_v0 = vpop.eup %6213 }
0x2111   :  { %v2868_v14 = vadd.f32 1.0, %v6214_v0  ;;  %v6216_v9 = vpop.eup %6215  ;;  %v8662_v0 = vld [vmem:[#allocation8 + $0x30] sm:$0xff]  }
0x2112   :  { %v2874_v22 = vadd.f32 1.0, %v6216_v9  ;;  %v8658_v9 = vld [vmem:[#allocation8 + $0x28] sm:$0xff]  }
0x2113   :  { %6217 = vrcp.f32 %v2868_v14  ;;  %v8636_v14 = vld [vmem:[#allocation8] sm:$0xff]  }
0x2114   :  { %6219 = vrcp.f32 %v2874_v22  ;;  %v8654_v22 = vld [vmem:[#allocation8 + $0x20] sm:$0xff]  }
0x211d   :  { %v6218_v16 = vpop.eup %6217 }
0x211e   :  { %v2877_v10 = vmul.f32 %v6218_v16, %v2861_v50  ;;  %v6220_v59 = vpop.eup %6219  ;;  %v8642_v16 = vld [vmem:[#allocation8 + $0x8] sm:$0xff]  }
0x211f   :  { %v2880_v37 = vsub.f32 1.0, %v6220_v59  ;;  %v2882_v44 = vmul.f32 %v6220_v59, %v8258_v48  ;;  %v8646_v48 = vld [vmem:[#allocation8 + $0x10] sm:$0xff]  }
0x2120   :  { %v2878_v15 = vadd.f32 %v2877_v10, %v2859_v26  ;;  %v8673_v26 = vld [vmem:[%s9657_s4] sm:$0xff] }
0x2122   :  { %6221 = vtanh.f32 %v2878_v15 }
0x212c   :  { %v6222_v51 = vpop.eup %6221 }
0x212d   :  { %v2881_v39 = vmul.f32 %v6222_v51, %v2880_v37  ;;  %v8650_v37 = vld [vmem:[#allocation8 + $0x18] sm:$0xff]  }
0x212f   :  { %v8629_v58 = vadd.f32 %v2882_v44, %v2881_v39 }
0x2131   :  { %v8633_v20 = vpack.c.bf16 %v8629_v58, %v8629_v58 }
0x2133   :  { %5523 = vmatmul.mubr.bf16.vlgmr.msra.gmra.mrb[60].mxu0 %v8633_v20 }
0x2134   :  { %5547 = vmatpush3.bf16.msra.mxu0 %v8636_v14  ;;  %5562 = vmatprep.mubr.msk.bf16.mxu0 %vm6873_vm2, %v9881_v30 }
0x2135   :  { %5548 = vmatprep.subr.bf16.mxu0 %v9881_v30 }
0x2138   :  { %5549 = vmatpush3.bf16.msra.mxu0 %v8642_v16 }
0x2139   :  { %5550 = vmatprep.subr.bf16.mxu0 %v9881_v30 }
0x213c   :  { %5551 = vmatpush3.bf16.msra.mxu0 %v8646_v48 }
0x213d   :  { %5552 = vmatprep.subr.bf16.mxu0 %v9881_v30 }
0x2140   :  { %5553 = vmatpush3.bf16.msra.mxu0 %v8650_v37 }
0x2141   :  { %5554 = vmatprep.subr.bf16.mxu0 %v9881_v30 }
0x2144   :  { %5555 = vmatpush3.bf16.msra.mxu0 %v8654_v22 }
0x2145   :  { %5556 = vmatprep.subr.bf16.mxu0 %v9881_v30 }
0x2148   :  { %5557 = vmatpush3.bf16.msra.mxu0 %v8658_v9 }
0x2149   :  { %5558 = vmatprep.subr.bf16.mxu0 %v9881_v30 }
0x214c   :  { %5559 = vmatpush3.bf16.msra.mxu0 %v8662_v0 }
0x214d   :  { %5560 = vmatprep.subr.bf16.mxu0 %v9881_v30 }
0x2150   :  { %5561 = vmatpush3.bf16.msra.mxu0 %v8666_v29 }
0x2151   :  { %3157 = vmatprep.subr.bf16.mxu0 %v8282_v34  ;;  %v4713_v34 = vsel %vm2697_vm11, 1.0, %v9881_v30  ;;  %vm3606_vm11 = vcmp.eq.s32.totalorder %v9910_v8, 5 }
0x2152   :  { %v2884_v44 = vmul.f32 %v8293_v61, %v4713_v34  ;;  %v8692_v61 = vld [vmem:[#allocation14 + $0x8] sm:$0xff]   ;;  %v10085_v34 = vld [vmem:[#allocation50_spill] sm:$0xff] }
0x2206   :  { %v2922_v50 = vpop.f32.mrb[60].mxu0 }
0x2207   :  { %v2923_v62 = vadd.f32 %v8673_v26, %v2922_v50  ;;  %v5524_v41 = vpop.f32.mrb[61].mxu0 }
0x2208   :  { %v2925_v45 = vpop.f32.mrb[62].mxu0 }
0x2209   :  { %2928 = vmax.xlane.f32.xlu0 %v2923_v62  ;;  %v5525_v10 = vpop.f32.mrb[63].mxu0 }
0x220a   :  { %v10079_v10 = vld [vmem:[#allocation45_spill] sm:$0xff] }
0x2296   :  { %v2929_v15 = vpop.xlane.xlu0 %2928 }
0x2297   :  { %v2930_v59 = vsub.f32 %v2923_v62, %v2929_v15  ;;  %v8684_v62 = vld [vmem:[#allocation14] sm:$0xff]   ;;  %v10080_v15 = vld [vmem:[#allocation46_spill] sm:$0xff] }
0x2299   :  { %v2931_v51 = vmul.f32 1.442695, %v2930_v59  ;;  %v10081_v59 = vld [vmem:[#allocation47_spill] sm:$0xff] }
0x229b   :  { %6223 = vpow2.f32 %v2931_v51  ;;  %v10082_v51 = vld [vmem:[#allocation29_spill] sm:$0xff] }
0x22a5   :  { %v6224_v39 = vpop.eup %6223 }
0x22a6   :  { %2933 = vadd.xlane.f32.xlu1 %v6224_v39 }
0x22aa   :  { %2885 = vadd.xlane.f32.xlu1 %v2884_v44  ;;  %v10086_v44 = vld [vmem:[#allocation51_spill] sm:$0xff] }
0x2333   :  { %v2934_v29 = vpop.xlane.xlu1 %2933 }
0x2334   :  { %6225 = vrcp.f32 %v2934_v29  ;;  %v10078_v29 = vld [vmem:[#allocation44_spill] sm:$0xff] }
0x233e   :  { %v6226_v50 = vpop.eup %6225 }
0x233f   :  { %v2936_v41 = vmul.f32 %v6226_v50, %v6224_v39  ;;  %v10084_v39 = vld [vmem:[#allocation49_spill] sm:$0xff]  ;;  %v10087_v50 = vld [vmem:[#allocation52_spill] sm:$0xff] }
0x2341   :  { %v2937_v45 = vpack.c.bf16 %v2936_v41, %v2936_v41 }
0x2343   :  { %5543 = vmatmul.mubr.bf16.vlgmr.msra.gmra.mrb[68].mxu1 %v2937_v45  ;;  %5563 = vmatmul.mubr.bf16.vlgmr.msra.gmra.mrb[64].mxu0 %v2937_v45  ;;  %v10088_v45 = vld [vmem:[#allocation54_spill] sm:$0xff] }
0x2344   :  { %3158 = vmatpush1.bf16.msra.mxu0 %v8296_v31  ;;  %3189 = vmatprep.mubr.bf16.mxu0 %v9888_v57  ;;  %v8698_v31 = vld [vmem:[#allocation14 + $0x10] sm:$0xff]  }
0x2345   :  { %3159 = vmatprep.subr.bf16.mxu0 %v8300_v7  ;;  %5567 = vmatpush3.bf16.msra.mxu1 %v8684_v62  ;;  %v8704_v7 = vld [vmem:[#allocation14 + $0x18] sm:$0xff]  }
0x2346   :  { %5568 = vmatprep.subr.bf16.mxu1 %v9881_v30  ;;  %5582 = vmatprep.mubr.msk.bf16.mxu1 %vm6873_vm2, %v9881_v30 }
0x2348   :  { %3160 = vmatpush1.bf16.msra.mxu0 %v8307_v25  ;;  %v8710_v25 = vld [vmem:[#allocation14 + $0x20] sm:$0xff]  }
0x2349   :  { %3161 = vmatprep.subr.bf16.mxu0 %v8310_v1  ;;  %5569 = vmatpush3.bf16.msra.mxu1 %v8692_v61  ;;  %v8716_v1 = vld [vmem:[#allocation14 + $0x28] sm:$0xff]  }
0x234a   :  { %5570 = vmatprep.subr.bf16.mxu1 %v9881_v30 }
0x234c   :  { %3162 = vmatpush1.bf16.msra.mxu0 %v8315_v63  ;;  %v8722_v63 = vld [vmem:[#allocation14 + $0x30] sm:$0xff]  }
0x234d   :  { %3163 = vmatprep.subr.bf16.mxu0 %v8318_v49  ;;  %5571 = vmatpush3.bf16.msra.mxu1 %v8698_v31  ;;  %v8728_v49 = vld [vmem:[#allocation14 + $0x38] sm:$0xff]  }
0x234e   :  { %5572 = vmatprep.subr.bf16.mxu1 %v9881_v30 }
0x2350   :  { %3164 = vmatpush1.bf16.msra.mxu0 %v8323_v11  ;;  %v10063_v11 = vld [vmem:[#allocation28_spill] sm:$0xff] }
0x2351   :  { %3165 = vmatprep.subr.bf16.mxu0 %v8326_v3  ;;  %5573 = vmatpush3.bf16.msra.mxu1 %v8704_v7  ;;  %v10064_v3 = vld [vmem:[#allocation30_spill] sm:$0xff] }
0x2352   :  { %5574 = vmatprep.subr.bf16.mxu1 %v9881_v30 }
0x2354   :  { %3166 = vmatpush1.bf16.msra.mxu0 %v8331_v6  ;;  %v10065_v6 = vld [vmem:[#allocation31_spill] sm:$0xff] }
0x2355   :  { %3167 = vmatprep.subr.bf16.mxu0 %v8334_v4  ;;  %5575 = vmatpush3.bf16.msra.mxu1 %v8710_v25  ;;  %v10066_v4 = vld [vmem:[#allocation32_spill] sm:$0xff] }
0x2356   :  { %5576 = vmatprep.subr.bf16.mxu1 %v9881_v30 }
0x2358   :  { %3168 = vmatpush1.bf16.msra.mxu0 %v8339_v52  ;;  %v10067_v52 = vld [vmem:[#allocation33_spill] sm:$0xff] }
0x2359   :  { %3169 = vmatprep.subr.bf16.mxu0 %v8342_v5  ;;  %5577 = vmatpush3.bf16.msra.mxu1 %v8716_v1  ;;  %v10068_v5 = vld [vmem:[#allocation34_spill] sm:$0xff] }
0x235a   :  { %5578 = vmatprep.subr.bf16.mxu1 %v9881_v30 }
0x235c   :  { %3170 = vmatpush1.bf16.msra.mxu0 %v8347_v38  ;;  %v10069_v38 = vld [vmem:[#allocation35_spill] sm:$0xff] }
0x235d   :  { %3171 = vmatprep.subr.bf16.mxu0 %v8350_v12  ;;  %5579 = vmatpush3.bf16.msra.mxu1 %v8722_v63  ;;  %v10070_v12 = vld [vmem:[#allocation36_spill] sm:$0xff] }
0x235e   :  { %5580 = vmatprep.subr.bf16.mxu1 %v9881_v30 }
0x2360   :  { %3172 = vmatpush1.bf16.msra.mxu0 %v8355_v53  ;;  %v10071_v53 = vld [vmem:[#allocation37_spill] sm:$0xff] }
0x2361   :  { %3198 = vmatprep.subr.bf16.mxu0 %v8358_v24  ;;  %5581 = vmatpush3.bf16.msra.mxu1 %v8728_v49  ;;  %v10072_v24 = vld [vmem:[#allocation38_spill] sm:$0xff] }
0x2362   :  { %5586 = vmatprep.subr.bf16.mxu1 %v9881_v30 }
0x2363   :  { %3190 = vmatmul.mubr.bf16.vlgmr.msra.gmra.mrb[68].mxu0 %v8633_v20 }
0x2364   :  { %3199 = vmatpush1.bf16.msra.mxu0 %v8364_v54  ;;  %3230 = vmatprep.mubr.bf16.mxu0 %v9888_v57 }
0x2365   :  { %3200 = vmatprep.subr.bf16.mxu0 %v8368_v27 }
0x2368   :  { %3201 = vmatpush1.bf16.msra.mxu0 %v8371_v13 }
0x2369   :  { %3202 = vmatprep.subr.bf16.mxu0 %v8374_v17 }
0x236c   :  { %3203 = vmatpush1.bf16.msra.mxu0 %v8377_v55 }
0x236d   :  { %3204 = vmatprep.subr.bf16.mxu0 %v8380_v18 }
0x2370   :  { %3205 = vmatpush1.bf16.msra.mxu0 %v8383_v56 }
0x2371   :  { %3206 = vmatprep.subr.bf16.mxu0 %v8386_v33 }
0x2374   :  { %3207 = vmatpush1.bf16.msra.mxu0 %v8389_v19 }
0x2375   :  { %3208 = vmatprep.subr.bf16.mxu0 %v8392_v46  ;;  %v8770_v46 = vld [vmem:[#allocation13] sm:$0xff]  }
0x2378   :  { %3209 = vmatpush1.bf16.msra.mxu0 %v8395_v32  ;;  %v8780_v32 = vld [vmem:[#allocation13 + $0x10] sm:$0xff]  }
0x2379   :  { %3210 = vmatprep.subr.bf16.mxu0 %v8398_v60  ;;  %v8784_v60 = vld [vmem:[#allocation13 + $0x18] sm:$0xff]  }
0x237c   :  { %3211 = vmatpush1.bf16.msra.mxu0 %v8401_v47  ;;  %v8788_v47 = vld [vmem:[#allocation13 + $0x20] sm:$0xff]  }
0x237d   :  { %3212 = vmatprep.subr.bf16.mxu0 %v8404_v2  ;;  %v8792_v2 = vld [vmem:[#allocation13 + $0x28] sm:$0xff]  }
0x2380   :  { %3213 = vmatpush1.bf16.msra.mxu0 %v8407_v43  ;;  %v8796_v43 = vld [vmem:[#allocation13 + $0x30] sm:$0xff]  }
0x2381   :  { %3239 = vmatprep.subr.bf16.mxu0 %v8410_v21  ;;  %v8800_v21 = vld [vmem:[#allocation13 + $0x38] sm:$0xff]  }
0x2383   :  { %3231 = vmatmul.mubr.bf16.vlgmr.msra.gmra.mrb[72].mxu0 %v8633_v20 }
0x2384   :  { %3240 = vmatpush1.bf16.msra.mxu0 %v8414_v28  ;;  %3271 = vmatprep.mubr.bf16.mxu0 %v9888_v57  ;;  %v10073_v28 = vld [vmem:[#allocation39_spill] sm:$0xff] }
0x2385   :  { %3241 = vmatprep.subr.bf16.mxu0 %v8418_v42  ;;  %v10074_v42 = vld [vmem:[#allocation40_spill] sm:$0xff] }
0x2388   :  { %3242 = vmatpush1.bf16.msra.mxu0 %v8421_v23  ;;  %v10075_v23 = vld [vmem:[#allocation41_spill] sm:$0xff] }
0x2389   :  { %3243 = vmatprep.subr.bf16.mxu0 %v10063_v11 }
0x238c   :  { %3244 = vmatpush1.bf16.msra.mxu0 %v10064_v3 }
0x238d   :  { %3245 = vmatprep.subr.bf16.mxu0 %v10065_v6 }
0x2390   :  { %3246 = vmatpush1.bf16.msra.mxu0 %v10066_v4  ;;  %v2886_v4 = vpop.xlane.xlu1 %2885 }
0x2391   :  { %3247 = vmatprep.subr.bf16.mxu0 %v10067_v52 }
0x2394   :  { %3248 = vmatpush1.bf16.msra.mxu0 %v10068_v5 }
0x2395   :  { %3249 = vmatprep.subr.bf16.mxu0 %v10069_v38 }
0x2398   :  { %3250 = vmatpush1.bf16.msra.mxu0 %v10070_v12  ;;  %v8829_v12 = vld [vmem:[%s9662_s9] ss:$0 sm:$0xff] }
0x2399   :  { %3251 = vmatprep.subr.bf16.mxu0 %v10071_v53 }
0x239c   :  { %3252 = vmatpush1.bf16.msra.mxu0 %v10072_v24 }
0x239d   :  { %3253 = vmatprep.subr.bf16.mxu0 %v8454_v35  ;;  %v8776_v35 = vld [vmem:[#allocation13 + $0x8] sm:$0xff]  }
0x23a0   :  { %3254 = vmatpush1.bf16.msra.mxu0 %v8457_v36  ;;  %v10076_v36 = vld [vmem:[#allocation42_spill] sm:$0xff] }
0x23a1   :  { %5626 = vmatprep.subr.bf16.mxu0 %v9881_v30 }
0x2416   :  { %v2972_v54 = vpop.f32.mrb[68].mxu1  ;;  %v8768_v27 = vpop.f32.mrb[64].mxu0 }
0x2417   :  { %v3018_v13 = vpack.c.bf16 %v2972_v54, %v2972_v54  ;;  %v5544_v17 = vpop.f32.mrb[69].mxu1  ;;  %v5564_v55 = vpop.f32.mrb[65].mxu0 }
0x2418   :  { %v2975_v18 = vpop.f32.mrb[70].mxu1  ;;  %v3015_v56 = vpop.f32.mrb[66].mxu0 }
0x2419   :  { %v5545_v33 = vpop.f32.mrb[71].mxu1  ;;  %v5565_v19 = vpop.f32.mrb[67].mxu0  ;;  %5583 = vmatmul.mubr.bf16.vlgmr.msra.gmra.mrb[72].mxu1 %v3018_v13 }
0x241a   :  { %5587 = vmatpush3.bf16.msra.mxu1 %v8770_v46  ;;  %5602 = vmatprep.mubr.msk.bf16.mxu1 %vm6873_vm2, %v9881_v30 }
0x241b   :  { %5588 = vmatprep.subr.bf16.mxu1 %v9881_v30 }
0x241e   :  { %5589 = vmatpush3.bf16.msra.mxu1 %v8776_v35 }
0x241f   :  { %5590 = vmatprep.subr.bf16.mxu1 %v9881_v30 }
0x2422   :  { %5591 = vmatpush3.bf16.msra.mxu1 %v8780_v32 }
0x2423   :  { %5592 = vmatprep.subr.bf16.mxu1 %v9881_v30 }
0x2426   :  { %5593 = vmatpush3.bf16.msra.mxu1 %v8784_v60 }
0x2427   :  { %5594 = vmatprep.subr.bf16.mxu1 %v9881_v30 }
0x242a   :  { %5595 = vmatpush3.bf16.msra.mxu1 %v8788_v47 }
0x242b   :  { %5596 = vmatprep.subr.bf16.mxu1 %v9881_v30 }
0x242e   :  { %5597 = vmatpush3.bf16.msra.mxu1 %v8792_v2 }
0x242f   :  { %5598 = vmatprep.subr.bf16.mxu1 %v9881_v30 }
0x2432   :  { %5599 = vmatpush3.bf16.msra.mxu1 %v8796_v43 }
0x2433   :  { %5600 = vmatprep.subr.bf16.mxu1 %v9881_v30 }
0x2436   :  { %5601 = vmatpush3.bf16.msra.mxu1 %v8800_v21 }
0x2437   :  { %3280 = vmatprep.subr.bf16.mxu1 %v10073_v28 }
0x2439   :  { %5603 = vmatmul.mubr.bf16.vlgmr.msra.gmra.mrb[72].mxu1 %v8633_v20  ;;  %v10083_v20 = vld [vmem:[#allocation48_spill] sm:$0xff] }
0x243a   :  { %3281 = vmatpush1.bf16.msra.mxu1 %v10074_v42  ;;  %3312 = vmatprep.mubr.bf16.mxu1 %v9888_v57 }
0x243b   :  { %3282 = vmatprep.subr.bf16.mxu1 %v10075_v23 }
0x243e   :  { %3283 = vmatpush1.bf16.msra.mxu1 %v10076_v36 }
0x243f   :  { %3284 = vmatprep.subr.bf16.mxu1 %v10077_v40 }
0x2442   :  { %3285 = vmatpush1.bf16.msra.mxu1 %v10078_v29 }
0x2443   :  { %3286 = vmatprep.subr.bf16.mxu1 %v10079_v10 }
0x2446   :  { %3287 = vmatpush1.bf16.msra.mxu1 %v10080_v15 }
0x2447   :  { %3288 = vmatprep.subr.bf16.mxu1 %v10081_v59 }
0x244a   :  { %3289 = vmatpush1.bf16.msra.mxu1 %v10082_v51 }
0x244b   :  { %3290 = vmatprep.subr.bf16.mxu1 %v10083_v20 }
0x244e   :  { %3291 = vmatpush1.bf16.msra.mxu1 %v10084_v39 }
0x244f   :  { %3292 = vmatprep.subr.bf16.mxu1 %v10085_v34 }
0x2452   :  { %3293 = vmatpush1.bf16.msra.mxu1 %v10086_v44 }
0x2453   :  { %3294 = vmatprep.subr.bf16.mxu1 %v10087_v50 }
0x2456   :  { %v8820_v41 = vpop.f32.mrb[72].mxu0  ;;  %3295 = vmatpush1.bf16.msra.mxu1 %v10088_v45 }
0x2457   :  { %v8823_v11 = vpop.f32.mrb[73].mxu0  ;;  %5606 = vmatprep.subr.bf16.mxu1 %v9881_v30 }
0x2458   :  { %v3236_v3 = vpop.f32.mrb[74].mxu0 }
0x2459   :  { %v3237_v6 = vpop.f32.mrb[75].mxu0 }
0x250c   :  { %v3093_v52 = vpop.f32.mrb[72].mxu1 }
0x250d   :  { %v3099_v5 = vadd.f32 %v3093_v52, %v2886_v4  ;;  %v5604_v38 = vpop.f32.mrb[73].mxu1  ;;  %v3106_v53 = vadd.f32 %v8829_v12, %v3093_v52 }
0x250e   :  { %v3096_v24 = vpop.f32.mrb[74].mxu1 }
0x250f   :  { %v4720_v54 = vmul.f32 -1.442695, %v3099_v5  ;;  %3107 = vmax.xlane.f32.xlu0 %v3106_v53  ;;  %v5605_v13 = vpop.f32.mrb[75].mxu1  ;;  %v10090_v24 = vld [vmem:[#allocation57_spill] sm:$0xff] }
0x2510   :  { %v10091_v13 = vmov 1.0|1.0  }
0x2511   :  { %6227 = vpow2.f32 %v4720_v54 }
0x251b   :  { %v6228_v17 = vpop.eup %6227 }
0x251c   :  { %v3103_v55 = vadd.f32 1.0, %v6228_v17  ;;  %v10092_v17 = vld [vmem:[#allocation58_spill] sm:$0xff] }
0x251e   :  { %6229 = vrcp.f32 %v3103_v55  ;;  %v10093_v55 = vld [vmem:[#allocation59_spill] sm:$0xff] }
0x2528   :  { %v6230_v18 = vpop.eup %6229 }
0x2529   :  { %3118 = vperm.xlu1 %5987, %v6230_v18   ;;  %v3122_v42 = vsub.f32 1.0, %v6230_v18  ;;  %v10094_v18 = vld [vmem:[#allocation60_spill] sm:$0xff] }
0x259c   :  { %v3108_v56 = vpop.xlane.xlu0 %3107 }
0x259d   :  { %v3109_v33 = vsub.f32 %v3106_v53, %v3108_v56  ;;  %v10095_v56 = vld [vmem:[#allocation61_spill] sm:$0xff] }
0x259f   :  { %v3110_v19 = vmul.f32 1.442695, %v3109_v33  ;;  %v10096_v33 = vld [vmem:[#allocation56_spill] sm:$0xff] }
0x25a1   :  { %6231 = vpow2.f32 %v3110_v19  ;;  %v10097_v19 = vld [vmem:[#allocation62_spill] sm:$0xff] }
0x25a8   :  { %v3119_v10 = vpop.permute.xlu1 %3118 }
0x25ab   :  { %v6232_v28 = vpop.eup %6231 }
0x25ac   :  { %3112 = vadd.xlane.f32.xlu0 %v6232_v28 }
0x25c2   :  { %3125 = vperm.xlu0 %5988, %v3122_v42   ;;  %v10099_v42 = vld [vmem:[#allocation64_spill] sm:$0xff] }
0x2639   :  { %v3113_v23 = vpop.xlane.xlu0 %3112 }
0x263a   :  { %6233 = vrcp.f32 %v3113_v23  ;;  %v10100_v23 = vld [vmem:[#allocation65_spill] sm:$0xff] }
0x2641   :  { %v3126_v40 = vpop.permute.xlu0 %3125 }
0x2642   :  { %v3128_v15 = vmul.f32 %v3126_v40, %v8768_v27  ;;  %v10102_v40 = vld [vmem:[#allocation67_spill] sm:$0xff] }
0x2644   :  { %v6234_v36 = vpop.eup %6233 }
0x2645   :  { %v3115_v29 = vmul.f32 %v6234_v36, %v6232_v28  ;;  %v10098_v28 = vld [vmem:[#allocation63_spill] sm:$0xff]  ;;  %v10101_v36 = vld [vmem:[#allocation66_spill] sm:$0xff] }
0x2647   :  { %v3121_v59 = vmul.f32 %v3119_v10, %v3115_v29  ;;  %v10103_v29 = vld [vmem:[#allocation68_spill] sm:$0xff]  ;;  %v10104_v10 = vld [vmem:[#allocation69_spill] sm:$0xff] }
0x2649   :  { %v3129_v51 = vadd.f32 %v3128_v15, %v3121_v59  ;;  %v10105_v15 = vld [vmem:[#allocation70_spill] sm:$0xff]  ;;  %v10106_v59 = vld [vmem:[#allocation71_spill] sm:$0xff] }
0x264b   :  { %3130 = vmax.xlane.f32.xlu1 %v3129_v51 }
0x26d8   :  { %v8833_v20 = vpop.xlane.xlu1 %3130 }
0x26d9   :  { %10089 = vst [vmem:[#allocation28_spill] sm:$0xff] %v8833_v20  ;;  %vm3132_vm13 = vcmp.eq.f32.partialorder %v3129_v51, %v8833_v20  ;;  %v10107_v51 = vld [vmem:[#allocation72_spill] sm:$0xff] }
0x26da   :  { %v3133_v39 = vsel %vm3132_vm13, %v9910_v8, 128  ;;  %v9089_v20 = vld [vmem:[#allocation10 + $0xe4] ss:$16 sps:$4 sm:$0xff]  }
0x26db   :  { %v3135_v34 = vshra.s32 %v3133_v39, 16  ;;  %v3134_v50 = vand.u32 65535, %v3133_v39 }
0x26dd   :  { %v3137_v44 = vcvt.s32.f32 %v3135_v34  ;;  %v3136_v3 = vcvt.s32.f32 %v3134_v50 }
0x26df   :  { %3138 = vmin.xlane.f32.xlu0 %v3137_v44 }
0x276c   :  { %v3139_v45 = vpop.xlane.xlu0 %3138 }
0x276d   :  { %vm3140_vm14 = vcmp.eq.f32.partialorder %v3137_v44, %v3139_v45  ;;  %v3145_v4 = vcvt.f32.s32 %v3139_v45 }
0x276e   :  { %v3141_v6 = vsel %vm3140_vm14, %v3136_v3, inf }
0x276f   :  { %3142 = vmin.xlane.f32.xlu1 %v3141_v6  ;;  %v3146_v52 = vshll.u32 %v3145_v4, 16 }
0x27fc   :  { %v3143_v27 = vpop.xlane.xlu1 %3142 }
0x27fd   :  { %v3144_v5 = vcvt.f32.s32 %v3143_v27 }
0x27ff   :  { %v3147_v38 = vadd.s32 %v3146_v52, %v3144_v5 }
0x2801   :  { %vm3148_vm15 = vcmp.ge.s32.totalorder %v3147_v38, 32 }
0x2802   :  { %v8838_v53 = vsel %vm3148_vm15, 3, %v3147_v38 }
0x2803   :  { %v8844_v54 = vsel %vm3150_vm1, %v8838_v53, %v10090_v24  ;;  %vm3153_vm4 = vcmp.eq.s32.totalorder %v9910_v8, %v8838_v53  ;;  %v8935_v53 = vld [vmem:[#allocation11 + $0x24] ss:$16 sps:$4 sm:$0xff]  }
0x2804   :  { %vm4722_vm5 = vmpackc.low %vm3153_vm4, %vm3153_vm4 }
0x2805   :  { %4723 = vmatmul.mubr.msk.bf16.vlgmr.msra.gmra.mrb[68].mxu0 %vm4722_vm5, %v10091_v13  ;;  %4725 = vmatmul.mubr.msk.bf16.vlgmr.msra.gmra.mrb[76].mxu1 %vm4722_vm5, %v10091_v13  ;;  %vm4062_vm5 = vcmp.eq.s32.totalorder %v9910_v8, 6 }
0x2806   :  { %5607 = vmatpush3.bf16.msra.mxu1 %v10092_v17  ;;  %5622 = vmatprep.mubr.msk.bf16.mxu1 %vm6873_vm2, %v9881_v30 }
0x2807   :  { %5608 = vmatprep.subr.bf16.mxu1 %v9881_v30  ;;  %5627 = vmatpush3.bf16.msra.mxu0 %v10093_v55 }
0x2808   :  { %5628 = vmatprep.subr.bf16.mxu0 %v9881_v30  ;;  %5642 = vmatprep.mubr.msk.bf16.mxu0 %vm6873_vm2, %v9881_v30 }
0x280a   :  { %5609 = vmatpush3.bf16.msra.mxu1 %v10094_v18 }
0x280b   :  { %5610 = vmatprep.subr.bf16.mxu1 %v9881_v30  ;;  %5629 = vmatpush3.bf16.msra.mxu0 %v10095_v56 }
0x280c   :  { %5630 = vmatprep.subr.bf16.mxu0 %v9881_v30 }
0x280e   :  { %5611 = vmatpush3.bf16.msra.mxu1 %v10096_v33 }
0x280f   :  { %5612 = vmatprep.subr.bf16.mxu1 %v9881_v30  ;;  %5631 = vmatpush3.bf16.msra.mxu0 %v10097_v19 }
0x2810   :  { %5632 = vmatprep.subr.bf16.mxu0 %v9881_v30 }
0x2812   :  { %5613 = vmatpush3.bf16.msra.mxu1 %v10098_v28 }
0x2813   :  { %5614 = vmatprep.subr.bf16.mxu1 %v9881_v30  ;;  %5633 = vmatpush3.bf16.msra.mxu0 %v10099_v42 }
0x2814   :  { %5634 = vmatprep.subr.bf16.mxu0 %v9881_v30 }
0x2816   :  { %5615 = vmatpush3.bf16.msra.mxu1 %v10100_v23 }
0x2817   :  { %5616 = vmatprep.subr.bf16.mxu1 %v9881_v30  ;;  %5635 = vmatpush3.bf16.msra.mxu0 %v10101_v36 }
0x2818   :  { %5636 = vmatprep.subr.bf16.mxu0 %v9881_v30 }
0x281a   :  { %5617 = vmatpush3.bf16.msra.mxu1 %v10102_v40 }
0x281b   :  { %5618 = vmatprep.subr.bf16.mxu1 %v9881_v30  ;;  %5637 = vmatpush3.bf16.msra.mxu0 %v10103_v29 }
0x281c   :  { %5638 = vmatprep.subr.bf16.mxu0 %v9881_v30 }
0x281e   :  { %5619 = vmatpush3.bf16.msra.mxu1 %v10104_v10 }
0x281f   :  { %5620 = vmatprep.subr.bf16.mxu1 %v9881_v30  ;;  %5639 = vmatpush3.bf16.msra.mxu0 %v10105_v15 }
0x2820   :  { %5640 = vmatprep.subr.bf16.mxu0 %v9881_v30 }
0x2822   :  { %5621 = vmatpush3.bf16.msra.mxu1 %v10106_v59  ;;  %v4721_v59 = vsel %vm3153_vm4, 1.0, %v9881_v30 }
0x2823   :  { %5646 = vmatprep.subr.bf16.mxu1 %v9881_v30  ;;  %5641 = vmatpush3.bf16.msra.mxu0 %v10107_v51  ;;  %v8928_v51 = vld [vmem:[%s9663_s10] ss:$0 sm:$0xff] }
0x2824   :  { %5666 = vmatprep.subr.bf16.mxu0 %v9881_v30 }
0x28d8   :  { %v3273_v39 = vpop.f32.mrb[68].mxu0  ;;  %v3314_v34 = vpop.f32.mrb[76].mxu1 }
0x28d9   :  { %v4726_v44 = vmul.f32 -1.442695, %v3273_v39  ;;  %v3315_v50 = vadd.f32 %v3314_v34, %v8820_v41  ;;  %v3275_v45 = vpop.f32.mrb[69].mxu0  ;;  %v3316_v3 = vpop.f32.mrb[77].mxu1 }
0x28da   :  { %v3317_v6 = vadd.f32 %v3316_v3, %v8823_v11  ;;  %v3277_v4 = vpop.f32.mrb[70].mxu0  ;;  %v3318_v27 = vpop.f32.mrb[78].mxu1  ;;  %v4727_v38 = vmul.f32 -1.442695, %v3275_v45  ;;  %v8931_v45 = vld [vmem:[#allocation11] ss:$16 sps:$4 sm:$0xff]  }
0x28db   :  { %6235 = vpow2.f32 %v4726_v44  ;;  %v3278_v52 = vpop.f32.mrb[71].mxu0  ;;  %v3319_v5 = vpop.f32.mrb[79].mxu1  ;;  %v8942_v3 = vld [vmem:[#allocation11 + $0x20] ss:$16 sps:$4 sm:$0xff]  }
0x28dc   :  { %6237 = vpow2.f32 %v4727_v38  ;;  %v8950_v4 = vld [vmem:[#allocation11 + $0x40] ss:$16 sps:$4 sm:$0xff]   ;;  %v8961_v52 = vld [vmem:[#allocation11 + $0x84] ss:$16 sps:$4 sm:$0xff]  }
0x28dd   :  { %v8958_v27 = vld [vmem:[#allocation11 + $0x60] ss:$16 sps:$4 sm:$0xff]   ;;  %v8969_v5 = vld [vmem:[#allocation11 + $0xa4] ss:$16 sps:$4 sm:$0xff]  }
0x28de   :  { %v8977_v38 = vld [vmem:[#allocation11 + $0xc4] ss:$16 sps:$4 sm:$0xff]  }
0x28e5   :  { %v6236_v24 = vpop.eup %6235 }
0x28e6   :  { %v3324_v17 = vadd.f32 1.0, %v6236_v24  ;;  %v6238_v55 = vpop.eup %6237  ;;  %v8985_v24 = vld [vmem:[#allocation11 + $0xe4] ss:$16 sps:$4 sm:$0xff]  }
0x28e7   :  { %v3330_v18 = vadd.f32 1.0, %v6238_v55  ;;  %v9006_v55 = vld [vmem:[#allocation11 + $0x28] ss:$16 sps:$4 sm:$0xff]  }
0x28e8   :  { %6239 = vrcp.f32 %v3324_v17  ;;  %v8993_v17 = vld [vmem:[#allocation11 + $0xc] ss:$16 sps:$4 sm:$0xff]  }
0x28e9   :  { %6241 = vrcp.f32 %v3330_v18  ;;  %v9009_v18 = vld [vmem:[#allocation11 + $0x4c] ss:$16 sps:$4 sm:$0xff]  }
0x28f2   :  { %v6240_v56 = vpop.eup %6239 }
0x28f3   :  { %v3333_v33 = vmul.f32 %v6240_v56, %v3317_v6  ;;  %v6242_v19 = vpop.eup %6241  ;;  %v8945_v6 = vld [vmem:[#allocation11 + $0x44] ss:$16 sps:$4 sm:$0xff]   ;;  %v9015_v56 = vld [vmem:[#allocation11 + $0x6c] ss:$16 sps:$4 sm:$0xff]  }
0x28f4   :  { %v3336_v28 = vsub.f32 1.0, %v6242_v19  ;;  %v3338_v23 = vmul.f32 %v6242_v19, %v8629_v58  ;;  %v10108_v58 = vld [vmem:[#allocation73_spill] sm:$0xff] }
0x28f5   :  { %v3334_v41 = vadd.f32 %v3333_v33, %v3315_v50  ;;  %v9018_v33 = vld [vmem:[#allocation11 + $0x68] ss:$16 sps:$4 sm:$0xff]  }
0x28f6   :  { %v9024_v19 = vld [vmem:[#allocation11 + $0x88] ss:$16 sps:$4 sm:$0xff]  }
0x28f7   :  { %6243 = vtanh.f32 %v3334_v41  ;;  %v9021_v41 = vld [vmem:[#allocation11 + $0x8c] ss:$16 sps:$4 sm:$0xff]  }
0x2901   :  { %v6244_v11 = vpop.eup %6243 }
0x2902   :  { %v3337_v42 = vmul.f32 %v6244_v11, %v3336_v28  ;;  %v9027_v28 = vld [vmem:[#allocation11 + $0xac] ss:$16 sps:$4 sm:$0xff]   ;;  %v9030_v11 = vld [vmem:[#allocation11 + $0xa8] ss:$16 sps:$4 sm:$0xff]  }
0x2904   :  { %v8893_v36 = vadd.f32 %v3338_v23, %v3337_v42  ;;  %v9033_v42 = vld [vmem:[#allocation11 + $0xcc] ss:$16 sps:$4 sm:$0xff]   ;;  %v9036_v23 = vld [vmem:[#allocation11 + $0xc8] ss:$16 sps:$4 sm:$0xff]  }
0x2906   :  { %v8897_v40 = vpack.c.bf16 %v8893_v36, %v8893_v36 }
0x2908   :  { %5623 = vmatmul.mubr.bf16.vlgmr.msra.gmra.mrb[80].mxu1 %v8897_v40 }
0x2909   :  { %5647 = vmatpush3.bf16.msra.mxu1 %v8636_v14  ;;  %5662 = vmatprep.mubr.msk.bf16.mxu1 %vm6873_vm2, %v9881_v30  ;;  %v8917_v14 = vld [vmem:[#allocation11 + $0x4] ss:$16 sps:$4 sm:$0xff]  }
0x290a   :  { %5648 = vmatprep.subr.bf16.mxu1 %v9881_v30 }
0x290d   :  { %5649 = vmatpush3.bf16.msra.mxu1 %v8642_v16 }
0x290e   :  { %5650 = vmatprep.subr.bf16.mxu1 %v9881_v30 }
0x2911   :  { %5651 = vmatpush3.bf16.msra.mxu1 %v8646_v48 }
0x2912   :  { %5652 = vmatprep.subr.bf16.mxu1 %v9881_v30 }
0x2915   :  { %5653 = vmatpush3.bf16.msra.mxu1 %v8650_v37 }
0x2916   :  { %5654 = vmatprep.subr.bf16.mxu1 %v9881_v30 }
0x2919   :  { %5655 = vmatpush3.bf16.msra.mxu1 %v8654_v22 }
0x291a   :  { %5656 = vmatprep.subr.bf16.mxu1 %v9881_v30 }
0x291d   :  { %5657 = vmatpush3.bf16.msra.mxu1 %v8658_v9 }
0x291e   :  { %5658 = vmatprep.subr.bf16.mxu1 %v9881_v30 }
0x2921   :  { %5659 = vmatpush3.bf16.msra.mxu1 %v8662_v0 }
0x2922   :  { %5660 = vmatprep.subr.bf16.mxu1 %v9881_v30 }
0x2925   :  { %5661 = vmatpush3.bf16.msra.mxu1 %v10108_v58  ;;  %v9039_v58 = vld [vmem:[#allocation11 + $0xec] ss:$16 sps:$4 sm:$0xff]  }
0x2926   :  { %3613 = vmatprep.subr.bf16.mxu1 %v8917_v14 }
0x29db   :  { %v3378_v16 = vpop.f32.mrb[80].mxu1 }
0x29dc   :  { %v3379_v48 = vadd.f32 %v8673_v26, %v3378_v16  ;;  %v5624_v37 = vpop.f32.mrb[81].mxu1  ;;  %v3340_v26 = vmul.f32 %v8928_v51, %v4721_v59  ;;  %v9042_v16 = vld [vmem:[#allocation11 + $0xe8] ss:$16 sps:$4 sm:$0xff]   ;;  %v9071_v59 = vld [vmem:[#allocation10 + $0x84] ss:$16 sps:$4 sm:$0xff]  }
0x29dd   :  { %v3381_v22 = vpop.f32.mrb[82].mxu1  ;;  %v9049_v37 = vld [vmem:[#allocation10] ss:$16 sps:$4 sm:$0xff]   ;;  %10113 = vst [vmem:[#allocation34_spill] sm:$0xff] %v9071_v59 }
0x29de   :  { %3384 = vmax.xlane.f32.xlu0 %v3379_v48  ;;  %v5625_v29 = vpop.f32.mrb[83].mxu1  ;;  %v9053_v22 = vld [vmem:[#allocation10 + $0x24] ss:$16 sps:$4 sm:$0xff]  }
0x29df   :  { %v9056_v29 = vld [vmem:[#allocation10 + $0x20] ss:$16 sps:$4 sm:$0xff]  }
0x2a6b   :  { %v3385_v9 = vpop.xlane.xlu0 %3384 }
0x2a6c   :  { %v3386_v10 = vsub.f32 %v3379_v48, %v3385_v9  ;;  %v9045_v48 = vld [vmem:[#allocation10 + $0x4] ss:$16 sps:$4 sm:$0xff]  }
0x2a6d   :  { %v9059_v9 = vld [vmem:[#allocation10 + $0x44] ss:$16 sps:$4 sm:$0xff]  }
0x2a6e   :  { %v3387_v15 = vmul.f32 1.442695, %v3386_v10  ;;  %10109 = vst [vmem:[#allocation30_spill] sm:$0xff] %v9059_v9  ;;  %v9062_v10 = vld [vmem:[#allocation10 + $0x40] ss:$16 sps:$4 sm:$0xff]  }
0x2a6f   :  { %10110 = vst [vmem:[#allocation31_spill] sm:$0xff] %v9062_v10 }
0x2a70   :  { %6245 = vpow2.f32 %v3387_v15  ;;  %v9065_v15 = vld [vmem:[#allocation10 + $0x64] ss:$16 sps:$4 sm:$0xff]  }
0x2a71   :  { %10111 = vst [vmem:[#allocation32_spill] sm:$0xff] %v9065_v15 }
0x2a7a   :  { %v6246_v0 = vpop.eup %6245 }
0x2a7b   :  { %3389 = vadd.xlane.f32.xlu1 %v6246_v0 }
0x2a7f   :  { %3341 = vadd.xlane.f32.xlu1 %v3340_v26  ;;  %v9074_v26 = vld [vmem:[#allocation10 + $0x80] ss:$16 sps:$4 sm:$0xff]  }
0x2a80   :  { %10114 = vst [vmem:[#allocation35_spill] sm:$0xff] %v9074_v26 }
0x2b08   :  { %v3390_v39 = vpop.xlane.xlu1 %3389 }
0x2b09   :  { %6247 = vrcp.f32 %v3390_v39  ;;  %v9077_v39 = vld [vmem:[#allocation10 + $0xa4] ss:$16 sps:$4 sm:$0xff]  }
0x2b0a   :  { %10115 = vst [vmem:[#allocation36_spill] sm:$0xff] %v9077_v39 }
0x2b13   :  { %v6248_v34 = vpop.eup %6247 }
0x2b14   :  { %v3392_v44 = vmul.f32 %v6248_v34, %v6246_v0  ;;  %v9068_v0 = vld [vmem:[#allocation10 + $0x60] ss:$16 sps:$4 sm:$0xff]  }
0x2b15   :  { %10112 = vst [vmem:[#allocation33_spill] sm:$0xff] %v9068_v0  ;;  %v9080_v34 = vld [vmem:[#allocation10 + $0xa0] ss:$16 sps:$4 sm:$0xff]  }
0x2b16   :  { %v3393_v50 = vpack.c.bf16 %v3392_v44, %v3392_v44  ;;  %10116 = vst [vmem:[#allocation37_spill] sm:$0xff] %v9080_v34  ;;  %v9083_v44 = vld [vmem:[#allocation10 + $0xc4] ss:$16 sps:$4 sm:$0xff]  }
0x2b17   :  { %10117 = vst [vmem:[#allocation38_spill] sm:$0xff] %v9083_v44 }
0x2b18   :  { %5643 = vmatmul.mubr.bf16.vlgmr.msra.gmra.mrb[76].mxu0 %v3393_v50  ;;  %5663 = vmatmul.mubr.bf16.vlgmr.msra.gmra.mrb[84].mxu1 %v3393_v50  ;;  %v9086_v50 = vld [vmem:[#allocation10 + $0xc0] ss:$16 sps:$4 sm:$0xff]  }
0x2b19   :  { %3614 = vmatpush1.bf16.msra.mxu1 %v8931_v45  ;;  %3645 = vmatprep.mubr.bf16.mxu1 %v9888_v57  ;;  %10118 = vst [vmem:[#allocation39_spill] sm:$0xff] %v9086_v50 }
0x2b1a   :  { %3615 = vmatprep.subr.bf16.mxu1 %v8935_v53  ;;  %5667 = vmatpush3.bf16.msra.mxu0 %v8684_v62  ;;  %v8953_v62 = vld [vmem:[#allocation11 + $0x64] ss:$16 sps:$4 sm:$0xff]  }
0x2b1b   :  { %5668 = vmatprep.subr.bf16.mxu0 %v9881_v30  ;;  %5682 = vmatprep.mubr.msk.bf16.mxu0 %vm6873_vm2, %v9881_v30 }
0x2b1d   :  { %3616 = vmatpush1.bf16.msra.mxu1 %v8942_v3 }
0x2b1e   :  { %3617 = vmatprep.subr.bf16.mxu1 %v8945_v6  ;;  %5669 = vmatpush3.bf16.msra.mxu0 %v8692_v61  ;;  %v8966_v61 = vld [vmem:[#allocation11 + $0x80] ss:$16 sps:$4 sm:$0xff]  }
0x2b1f   :  { %5670 = vmatprep.subr.bf16.mxu0 %v9881_v30 }
0x2b21   :  { %3618 = vmatpush1.bf16.msra.mxu1 %v8950_v4 }
0x2b22   :  { %3619 = vmatprep.subr.bf16.mxu1 %v8953_v62  ;;  %5671 = vmatpush3.bf16.msra.mxu0 %v8698_v31  ;;  %v8974_v31 = vld [vmem:[#allocation11 + $0xa0] ss:$16 sps:$4 sm:$0xff]  }
0x2b23   :  { %5672 = vmatprep.subr.bf16.mxu0 %v9881_v30 }
0x2b25   :  { %3620 = vmatpush1.bf16.msra.mxu1 %v8958_v27 }
0x2b26   :  { %3621 = vmatprep.subr.bf16.mxu1 %v8961_v52  ;;  %5673 = vmatpush3.bf16.msra.mxu0 %v8704_v7  ;;  %v8982_v7 = vld [vmem:[#allocation11 + $0xc0] ss:$16 sps:$4 sm:$0xff]  }
0x2b27   :  { %5674 = vmatprep.subr.bf16.mxu0 %v9881_v30 }
0x2b29   :  { %3622 = vmatpush1.bf16.msra.mxu1 %v8966_v61 }
0x2b2a   :  { %3623 = vmatprep.subr.bf16.mxu1 %v8969_v5  ;;  %5675 = vmatpush3.bf16.msra.mxu0 %v8710_v25  ;;  %v8990_v25 = vld [vmem:[#allocation11 + $0xe0] ss:$16 sps:$4 sm:$0xff]  }
0x2b2b   :  { %5676 = vmatprep.subr.bf16.mxu0 %v9881_v30 }
0x2b2d   :  { %3624 = vmatpush1.bf16.msra.mxu1 %v8974_v31 }
0x2b2e   :  { %3625 = vmatprep.subr.bf16.mxu1 %v8977_v38  ;;  %5677 = vmatpush3.bf16.msra.mxu0 %v8716_v1  ;;  %v8999_v1 = vld [vmem:[#allocation11 + $0x8] ss:$16 sps:$4 sm:$0xff]  }
0x2b2f   :  { %5678 = vmatprep.subr.bf16.mxu0 %v9881_v30 }
0x2b31   :  { %3626 = vmatpush1.bf16.msra.mxu1 %v8982_v7 }
0x2b32   :  { %3627 = vmatprep.subr.bf16.mxu1 %v8985_v24  ;;  %5679 = vmatpush3.bf16.msra.mxu0 %v8722_v63  ;;  %v9003_v63 = vld [vmem:[#allocation11 + $0x2c] ss:$16 sps:$4 sm:$0xff]  }
0x2b33   :  { %5680 = vmatprep.subr.bf16.mxu0 %v9881_v30 }
0x2b35   :  { %3628 = vmatpush1.bf16.msra.mxu1 %v8990_v25 }
0x2b36   :  { %3654 = vmatprep.subr.bf16.mxu1 %v8993_v17  ;;  %5681 = vmatpush3.bf16.msra.mxu0 %v8728_v49  ;;  %v9012_v49 = vld [vmem:[#allocation11 + $0x48] ss:$16 sps:$4 sm:$0xff]  }
0x2b37   :  { %5686 = vmatprep.subr.bf16.mxu0 %v9881_v30 }
0x2b38   :  { %3646 = vmatmul.mubr.bf16.vlgmr.msra.gmra.mrb[88].mxu1 %v8897_v40 }
0x2b39   :  { %3655 = vmatpush1.bf16.msra.mxu1 %v8999_v1  ;;  %3686 = vmatprep.mubr.bf16.mxu1 %v9888_v57 }
0x2b3a   :  { %3656 = vmatprep.subr.bf16.mxu1 %v9003_v63 }
0x2b3d   :  { %3657 = vmatpush1.bf16.msra.mxu1 %v9006_v55 }
0x2b3e   :  { %3658 = vmatprep.subr.bf16.mxu1 %v9009_v18 }
0x2b41   :  { %3659 = vmatpush1.bf16.msra.mxu1 %v9012_v49 }
0x2b42   :  { %3660 = vmatprep.subr.bf16.mxu1 %v9015_v56 }
0x2b45   :  { %3661 = vmatpush1.bf16.msra.mxu1 %v9018_v33 }
0x2b46   :  { %3662 = vmatprep.subr.bf16.mxu1 %v9021_v41 }
0x2b49   :  { %3663 = vmatpush1.bf16.msra.mxu1 %v9024_v19 }
0x2b4a   :  { %3664 = vmatprep.subr.bf16.mxu1 %v9027_v28 }
0x2b4d   :  { %3665 = vmatpush1.bf16.msra.mxu1 %v9030_v11 }
0x2b4e   :  { %3666 = vmatprep.subr.bf16.mxu1 %v9033_v42 }
0x2b51   :  { %3667 = vmatpush1.bf16.msra.mxu1 %v9036_v23 }
0x2b52   :  { %3668 = vmatprep.subr.bf16.mxu1 %v9039_v58 }
0x2b55   :  { %3669 = vmatpush1.bf16.msra.mxu1 %v9042_v16 }
0x2b56   :  { %3695 = vmatprep.subr.bf16.mxu1 %v9045_v48 }
0x2b58   :  { %3687 = vmatmul.mubr.bf16.vlgmr.msra.gmra.mrb[92].mxu1 %v8897_v40 }
0x2b59   :  { %3696 = vmatpush1.bf16.msra.mxu1 %v9049_v37  ;;  %3727 = vmatprep.mubr.bf16.mxu1 %v9888_v57 }
0x2b5a   :  { %3697 = vmatprep.subr.bf16.mxu1 %v9053_v22 }
0x2b5d   :  { %3698 = vmatpush1.bf16.msra.mxu1 %v9056_v29 }
0x2b5e   :  { %3699 = vmatprep.subr.bf16.mxu1 %v9059_v9 }
0x2b61   :  { %3700 = vmatpush1.bf16.msra.mxu1 %v9062_v10 }
0x2b62   :  { %3701 = vmatprep.subr.bf16.mxu1 %v9065_v15 }
0x2b65   :  { %3702 = vmatpush1.bf16.msra.mxu1 %v9068_v0 }
0x2b66   :  { %3703 = vmatprep.subr.bf16.mxu1 %v9071_v59 }
0x2b69   :  { %3704 = vmatpush1.bf16.msra.mxu1 %v9074_v26  ;;  %v9092_v26 = vld [vmem:[#allocation10 + $0xe0] ss:$16 sps:$4 sm:$0xff]  }
0x2b6a   :  { %3705 = vmatprep.subr.bf16.mxu1 %v9077_v39 }
0x2b6d   :  { %3706 = vmatpush1.bf16.msra.mxu1 %v9080_v34 }
0x2b6e   :  { %3707 = vmatprep.subr.bf16.mxu1 %v9083_v44 }
0x2b71   :  { %3708 = vmatpush1.bf16.msra.mxu1 %v9086_v50 }
0x2b72   :  { %3709 = vmatprep.subr.bf16.mxu1 %v9089_v20 }
0x2b75   :  { %3710 = vmatpush1.bf16.msra.mxu1 %v9092_v26 }
0x2b76   :  { %5726 = vmatprep.subr.bf16.mxu1 %v9881_v30 }
0x2beb   :  { %v3428_v39 = vpop.f32.mrb[76].mxu0  ;;  %v9096_v34 = vpop.f32.mrb[84].mxu1 }
0x2bec   :  { %v3474_v59 = vpack.c.bf16 %v3428_v39, %v3428_v39  ;;  %v5644_v0 = vpop.f32.mrb[77].mxu0  ;;  %v5664_v44 = vpop.f32.mrb[85].mxu1  ;;  %v9159_v39 = vld [vmem:[#allocation10 + $0xec] ss:$16 sps:$4 sm:$0xff]  }
0x2bed   :  { %v3431_v15 = vpop.f32.mrb[78].mxu0  ;;  %v3471_v10 = vpop.f32.mrb[86].mxu1  ;;  %v9153_v0 = vld [vmem:[#allocation10 + $0xcc] ss:$16 sps:$4 sm:$0xff]   ;;  %10133 = vst [vmem:[#allocation54_spill] sm:$0xff] %v9159_v39 }
0x2bee   :  { %v5645_v9 = vpop.f32.mrb[79].mxu0  ;;  %v5665_v50 = vpop.f32.mrb[87].mxu1  ;;  %5683 = vmatmul.mubr.bf16.vlgmr.msra.gmra.mrb[80].mxu0 %v3474_v59  ;;  %v9147_v10 = vld [vmem:[#allocation10 + $0xac] ss:$16 sps:$4 sm:$0xff]   ;;  %v9150_v15 = vld [vmem:[#allocation10 + $0xa8] ss:$16 sps:$4 sm:$0xff]  }
0x2bef   :  { %5687 = vmatpush3.bf16.msra.mxu0 %v8770_v46  ;;  %5702 = vmatprep.mubr.msk.bf16.mxu0 %vm6873_vm2, %v9881_v30  ;;  %v9115_v46 = vld [vmem:[#allocation10 + $0xc] ss:$16 sps:$4 sm:$0xff]   ;;  %v9144_v9 = vld [vmem:[#allocation10 + $0x88] ss:$16 sps:$4 sm:$0xff]   ;;  %10129 = vst [vmem:[#allocation49_spill] sm:$0xff] %v9147_v10  ;;  %10130 = vst [vmem:[#allocation50_spill] sm:$0xff] %v9150_v15 }
0x2bf0   :  { %5688 = vmatprep.subr.bf16.mxu0 %v9881_v30  ;;  %10119 = vst [vmem:[#allocation40_spill] sm:$0xff] %v9115_v46  ;;  %10128 = vst [vmem:[#allocation48_spill] sm:$0xff] %v9144_v9  ;;  %v9156_v59 = vld [vmem:[#allocation10 + $0xc8] ss:$16 sps:$4 sm:$0xff]  }
0x2bf1   :  { %10131 = vst [vmem:[#allocation51_spill] sm:$0xff] %v9153_v0  ;;  %10132 = vst [vmem:[#allocation52_spill] sm:$0xff] %v9156_v59  ;;  %v9164_v50 = vld [vmem:[#allocation10 + $0xe8] ss:$16 sps:$4 sm:$0xff]  }
0x2bf2   :  { %10134 = vst [vmem:[#allocation57_spill] sm:$0xff] %v9164_v50 }
0x2bf3   :  { %5689 = vmatpush3.bf16.msra.mxu0 %v8776_v35  ;;  %v9119_v35 = vld [vmem:[#allocation10 + $0x8] ss:$16 sps:$4 sm:$0xff]  }
0x2bf4   :  { %5690 = vmatprep.subr.bf16.mxu0 %v9881_v30  ;;  %10120 = vst [vmem:[#allocation41_spill] sm:$0xff] %v9119_v35 }
0x2bf7   :  { %5691 = vmatpush3.bf16.msra.mxu0 %v8780_v32  ;;  %v9123_v32 = vld [vmem:[#allocation10 + $0x2c] ss:$16 sps:$4 sm:$0xff]  }
0x2bf8   :  { %5692 = vmatprep.subr.bf16.mxu0 %v9881_v30  ;;  %10121 = vst [vmem:[#allocation42_spill] sm:$0xff] %v9123_v32 }
0x2bfb   :  { %5693 = vmatpush3.bf16.msra.mxu0 %v8784_v60  ;;  %v9126_v60 = vld [vmem:[#allocation10 + $0x28] ss:$16 sps:$4 sm:$0xff]  }
0x2bfc   :  { %5694 = vmatprep.subr.bf16.mxu0 %v9881_v30  ;;  %10122 = vst [vmem:[#allocation43_spill] sm:$0xff] %v9126_v60 }
0x2bff   :  { %5695 = vmatpush3.bf16.msra.mxu0 %v8788_v47  ;;  %v9129_v47 = vld [vmem:[#allocation10 + $0x4c] ss:$16 sps:$4 sm:$0xff]  }
0x2c00   :  { %5696 = vmatprep.subr.bf16.mxu0 %v9881_v30  ;;  %10123 = vst [vmem:[#allocation44_spill] sm:$0xff] %v9129_v47 }
0x2c03   :  { %5697 = vmatpush3.bf16.msra.mxu0 %v8792_v2  ;;  %v9132_v2 = vld [vmem:[#allocation10 + $0x48] ss:$16 sps:$4 sm:$0xff]  }
0x2c04   :  { %5698 = vmatprep.subr.bf16.mxu0 %v9881_v30  ;;  %10124 = vst [vmem:[#allocation45_spill] sm:$0xff] %v9132_v2 }
0x2c07   :  { %5699 = vmatpush3.bf16.msra.mxu0 %v8796_v43  ;;  %v9135_v43 = vld [vmem:[#allocation10 + $0x6c] ss:$16 sps:$4 sm:$0xff]  }
0x2c08   :  { %5700 = vmatprep.subr.bf16.mxu0 %v9881_v30  ;;  %10125 = vst [vmem:[#allocation46_spill] sm:$0xff] %v9135_v43 }
0x2c0b   :  { %5701 = vmatpush3.bf16.msra.mxu0 %v8800_v21  ;;  %v9138_v21 = vld [vmem:[#allocation10 + $0x68] ss:$16 sps:$4 sm:$0xff]  }
0x2c0c   :  { %3736 = vmatprep.subr.bf16.mxu0 %v9115_v46  ;;  %10126 = vst [vmem:[#allocation47_spill] sm:$0xff] %v9138_v21 }
0x2c0e   :  { %5703 = vmatmul.mubr.bf16.vlgmr.msra.gmra.mrb[80].mxu0 %v8897_v40  ;;  %v9141_v40 = vld [vmem:[#allocation10 + $0x8c] ss:$16 sps:$4 sm:$0xff]  }
0x2c0f   :  { %3737 = vmatpush1.bf16.msra.mxu0 %v9119_v35  ;;  %3768 = vmatprep.mubr.bf16.mxu0 %v9888_v57  ;;  %10127 = vst [vmem:[#allocation29_spill] sm:$0xff] %v9141_v40 }
0x2c10   :  { %3738 = vmatprep.subr.bf16.mxu0 %v9123_v32 }
0x2c13   :  { %3739 = vmatpush1.bf16.msra.mxu0 %v9126_v60 }
0x2c14   :  { %3740 = vmatprep.subr.bf16.mxu0 %v9129_v47 }
0x2c17   :  { %3741 = vmatpush1.bf16.msra.mxu0 %v9132_v2 }
0x2c18   :  { %3742 = vmatprep.subr.bf16.mxu0 %v9135_v43 }
0x2c1b   :  { %3743 = vmatpush1.bf16.msra.mxu0 %v9138_v21 }
0x2c1c   :  { %3744 = vmatprep.subr.bf16.mxu0 %v9141_v40 }
0x2c1f   :  { %3745 = vmatpush1.bf16.msra.mxu0 %v9144_v9  ;;  %v3342_v9 = vpop.xlane.xlu1 %3341 }
0x2c20   :  { %3746 = vmatprep.subr.bf16.mxu0 %v9147_v10 }
0x2c23   :  { %3747 = vmatpush1.bf16.msra.mxu0 %v9150_v15 }
0x2c24   :  { %3748 = vmatprep.subr.bf16.mxu0 %v9153_v0 }
0x2c27   :  { %3749 = vmatpush1.bf16.msra.mxu0 %v9156_v59 }
0x2c28   :  { %3750 = vmatprep.subr.bf16.mxu0 %v9159_v39 }
0x2c2b   :  { %v9162_v44 = vpop.f32.mrb[92].mxu1  ;;  %3751 = vmatpush1.bf16.msra.mxu0 %v9164_v50 }
0x2c2c   :  { %v9167_v10 = vpop.f32.mrb[93].mxu1  ;;  %5706 = vmatprep.subr.bf16.mxu0 %v9881_v30 }
0x2c2d   :  { %v3692_v15 = vpop.f32.mrb[94].mxu1 }
0x2c2e   :  { %v3693_v0 = vpop.f32.mrb[95].mxu1 }
0x2ce1   :  { %v3549_v40 = vpop.f32.mrb[80].mxu0 }
0x2ce2   :  { %v3555_v21 = vadd.f32 %v3549_v40, %v3342_v9  ;;  %v5704_v59 = vpop.f32.mrb[81].mxu0  ;;  %v3562_v43 = vadd.f32 %v8829_v12, %v3549_v40 }
0x2ce3   :  { %v3552_v2 = vpop.f32.mrb[82].mxu0 }
0x2ce4   :  { %v4728_v39 = vmul.f32 -1.442695, %v3555_v21  ;;  %3563 = vmax.xlane.f32.xlu0 %v3562_v43  ;;  %v5705_v47 = vpop.f32.mrb[83].mxu0 }
0x2ce6   :  { %6249 = vpow2.f32 %v4728_v39 }
0x2cf0   :  { %v6250_v60 = vpop.eup %6249 }
0x2cf1   :  { %v3559_v32 = vadd.f32 1.0, %v6250_v60 }
0x2cf3   :  { %6251 = vrcp.f32 %v3559_v32 }
0x2cfd   :  { %v6252_v50 = vpop.eup %6251 }
0x2cfe   :  { %3574 = vperm.xlu1 %5987, %v6252_v50   ;;  %v3578_v9 = vsub.f32 1.0, %v6252_v50 }
0x2d71   :  { %v3564_v35 = vpop.xlane.xlu0 %3563 }
0x2d72   :  { %v3565_v46 = vsub.f32 %v3562_v43, %v3564_v35 }
0x2d74   :  { %v3566_v15 = vmul.f32 1.442695, %v3565_v46 }
0x2d76   :  { %6253 = vpow2.f32 %v3566_v15 }
0x2d7d   :  { %v3575_v47 = vpop.permute.xlu1 %3574 }
0x2d80   :  { %v6254_v0 = vpop.eup %6253 }
0x2d81   :  { %3568 = vadd.xlane.f32.xlu0 %v6254_v0 }
0x2d97   :  { %3581 = vperm.xlu0 %5988, %v3578_v9  }
0x2e0e   :  { %v3569_v59 = vpop.xlane.xlu0 %3568 }
0x2e0f   :  { %6255 = vrcp.f32 %v3569_v59 }
0x2e16   :  { %v3582_v2 = vpop.permute.xlu0 %3581 }
0x2e17   :  { %v3584_v40 = vmul.f32 %v3582_v2, %v9096_v34 }
0x2e19   :  { %v6256_v12 = vpop.eup %6255 }
0x2e1a   :  { %v3571_v21 = vmul.f32 %v6256_v12, %v6254_v0 }
0x2e1c   :  { %v3577_v60 = vmul.f32 %v3575_v47, %v3571_v21 }
0x2e1e   :  { %v3585_v32 = vadd.f32 %v3584_v40, %v3577_v60  ;;  %v9193_v60 = vld [vmem:[#allocation5] sm:$0xff]  }
0x2e1f   :  { %10137 = vst [vmem:[#allocation60_spill] sm:$0xff] %v9193_v60 }
0x2e20   :  { %3586 = vmax.xlane.f32.xlu1 %v3585_v32 }
0x2ead   :  { %v9172_v39 = vpop.xlane.xlu1 %3586 }
0x2eae   :  { %10135 = vst [vmem:[#allocation58_spill] sm:$0xff] %v9172_v39  ;;  %vm3588_vm6 = vcmp.eq.f32.partialorder %v3585_v32, %v9172_v39  ;;  %v9205_v32 = vld [vmem:[#allocation5 + $0x8] sm:$0xff]   ;;  %v9257_v39 = vld [vmem:[#allocation7 + $0x38] sm:$0xff]  }
0x2eaf   :  { %v3589_v46 = vsel %vm3588_vm6, %v9910_v8, 128  ;;  %10139 = vst [vmem:[#allocation56_spill] sm:$0xff] %v9205_v32  ;;  %10152 = vst [vmem:[#allocation74_spill] sm:$0xff] %v9257_v39 }
0x2eb0   :  { %v3591_v35 = vshra.s32 %v3589_v46, 16  ;;  %v3590_v50 = vand.u32 65535, %v3589_v46  ;;  %v9209_v46 = vld [vmem:[#allocation7 + $0x8] sm:$0xff]  }
0x2eb1   :  { %10140 = vst [vmem:[#allocation62_spill] sm:$0xff] %v9209_v46 }
0x2eb2   :  { %v3593_v43 = vcvt.s32.f32 %v3591_v35  ;;  %v3592_v9 = vcvt.s32.f32 %v3590_v50  ;;  %v9213_v35 = vld [vmem:[#allocation5 + $0x10] sm:$0xff]   ;;  %v9221_v50 = vld [vmem:[#allocation5 + $0x18] sm:$0xff]  }
0x2eb3   :  { %10141 = vst [vmem:[#allocation63_spill] sm:$0xff] %v9213_v35  ;;  %10143 = vst [vmem:[#allocation65_spill] sm:$0xff] %v9221_v50 }
0x2eb4   :  { %3594 = vmin.xlane.f32.xlu0 %v3593_v43 }
0x2f41   :  { %v3595_v15 = vpop.xlane.xlu0 %3594 }
0x2f42   :  { %vm3596_vm7 = vcmp.eq.f32.partialorder %v3593_v43, %v3595_v15  ;;  %v3601_v59 = vcvt.f32.s32 %v3595_v15  ;;  %v9217_v43 = vld [vmem:[#allocation7 + $0x10] sm:$0xff]   ;;  %v9225_v15 = vld [vmem:[#allocation7 + $0x18] sm:$0xff]  }
0x2f43   :  { %v3597_v0 = vsel %vm3596_vm7, %v3592_v9, inf  ;;  %10142 = vst [vmem:[#allocation64_spill] sm:$0xff] %v9217_v43  ;;  %10144 = vst [vmem:[#allocation66_spill] sm:$0xff] %v9225_v15  ;;  %v9229_v9 = vld [vmem:[#allocation5 + $0x20] sm:$0xff]  }
0x2f44   :  { %3598 = vmin.xlane.f32.xlu1 %v3597_v0  ;;  %v3602_v12 = vshll.u32 %v3601_v59, 16  ;;  %10145 = vst [vmem:[#allocation67_spill] sm:$0xff] %v9229_v9  ;;  %v9233_v0 = vld [vmem:[#allocation7 + $0x20] sm:$0xff]   ;;  %v9237_v59 = vld [vmem:[#allocation5 + $0x28] sm:$0xff]  }
0x2f45   :  { %10146 = vst [vmem:[#allocation68_spill] sm:$0xff] %v9233_v0  ;;  %10147 = vst [vmem:[#allocation69_spill] sm:$0xff] %v9237_v59 }
0x2fd1   :  { %v3599_v34 = vpop.xlane.xlu1 %3598 }
0x2fd2   :  { %v3600_v2 = vcvt.f32.s32 %v3599_v34  ;;  %v9241_v34 = vld [vmem:[#allocation7 + $0x28] sm:$0xff]  }
0x2fd3   :  { %10148 = vst [vmem:[#allocation70_spill] sm:$0xff] %v9241_v34 }
0x2fd4   :  { %v3603_v21 = vadd.s32 %v3602_v12, %v3600_v2  ;;  %v9245_v12 = vld [vmem:[#allocation5 + $0x30] sm:$0xff]  }
0x2fd5   :  { %10149 = vst [vmem:[#allocation71_spill] sm:$0xff] %v9245_v12  ;;  %v9249_v2 = vld [vmem:[#allocation7 + $0x30] sm:$0xff]  }
0x2fd6   :  { %vm3604_vm8 = vcmp.ge.s32.totalorder %v3603_v21, 32  ;;  %10150 = vst [vmem:[#allocation72_spill] sm:$0xff] %v9249_v2 }
0x2fd7   :  { %v9177_v47 = vsel %vm3604_vm8, 3, %v3603_v21  ;;  %v9253_v21 = vld [vmem:[#allocation5 + $0x38] sm:$0xff]  }
0x2fd8   :  { %v9183_v40 = vsel %vm3606_vm11, %v9177_v47, %v8844_v54  ;;  %vm3609_vm12 = vcmp.eq.s32.totalorder %v9910_v8, %v9177_v47  ;;  %v9199_v54 = vld [vmem:[#allocation7] sm:$0xff]   ;;  %10151 = vst [vmem:[#allocation73_spill] sm:$0xff] %v9253_v21 }
0x2fd9   :  { %10136 = vst [vmem:[#allocation59_spill] sm:$0xff] %v9183_v40  ;;  %vm4730_vm13 = vmpackc.low %vm3609_vm12, %vm3609_vm12  ;;  %v10168_v47 = vld [vmem:[#allocation44_spill] sm:$0xff] }
0x2fda   :  { %4731 = vmatmul.mubr.msk.bf16.vlgmr.msra.gmra.mrb[88].mxu1 %vm4730_vm13, %v10091_v13  ;;  %4733 = vmatmul.mubr.msk.bf16.vlgmr.msra.gmra.mrb[84].mxu0 %vm4730_vm13, %v10091_v13  ;;  %10138 = vst [vmem:[#allocation61_spill] sm:$0xff] %v9199_v54 }
0x2fdb   :  { %5707 = vmatpush3.bf16.msra.mxu0 %v9193_v60  ;;  %5722 = vmatprep.mubr.msk.bf16.mxu0 %vm6873_vm2, %v9881_v30 }
0x2fdc   :  { %5708 = vmatprep.subr.bf16.mxu0 %v9881_v30  ;;  %5727 = vmatpush3.bf16.msra.mxu1 %v9199_v54 }
0x2fdd   :  { %5728 = vmatprep.subr.bf16.mxu1 %v9881_v30  ;;  %5742 = vmatprep.mubr.msk.bf16.mxu1 %vm6873_vm2, %v9881_v30 }
0x2fdf   :  { %5709 = vmatpush3.bf16.msra.mxu0 %v9205_v32 }
0x2fe0   :  { %5710 = vmatprep.subr.bf16.mxu0 %v9881_v30  ;;  %5729 = vmatpush3.bf16.msra.mxu1 %v9209_v46 }
0x2fe1   :  { %5730 = vmatprep.subr.bf16.mxu1 %v9881_v30 }
0x2fe3   :  { %5711 = vmatpush3.bf16.msra.mxu0 %v9213_v35 }
0x2fe4   :  { %5712 = vmatprep.subr.bf16.mxu0 %v9881_v30  ;;  %5731 = vmatpush3.bf16.msra.mxu1 %v9217_v43 }
0x2fe5   :  { %5732 = vmatprep.subr.bf16.mxu1 %v9881_v30 }
0x2fe7   :  { %5713 = vmatpush3.bf16.msra.mxu0 %v9221_v50 }
0x2fe8   :  { %5714 = vmatprep.subr.bf16.mxu0 %v9881_v30  ;;  %5733 = vmatpush3.bf16.msra.mxu1 %v9225_v15 }
0x2fe9   :  { %5734 = vmatprep.subr.bf16.mxu1 %v9881_v30 }
0x2feb   :  { %5715 = vmatpush3.bf16.msra.mxu0 %v9229_v9 }
0x2fec   :  { %5716 = vmatprep.subr.bf16.mxu0 %v9881_v30  ;;  %5735 = vmatpush3.bf16.msra.mxu1 %v9233_v0 }
0x2fed   :  { %5736 = vmatprep.subr.bf16.mxu1 %v9881_v30 }
0x2fef   :  { %5717 = vmatpush3.bf16.msra.mxu0 %v9237_v59 }
0x2ff0   :  { %5718 = vmatprep.subr.bf16.mxu0 %v9881_v30  ;;  %5737 = vmatpush3.bf16.msra.mxu1 %v9241_v34 }
0x2ff1   :  { %5738 = vmatprep.subr.bf16.mxu1 %v9881_v30 }
0x2ff3   :  { %5719 = vmatpush3.bf16.msra.mxu0 %v9245_v12 }
0x2ff4   :  { %5720 = vmatprep.subr.bf16.mxu0 %v9881_v30  ;;  %5739 = vmatpush3.bf16.msra.mxu1 %v9249_v2 }
0x2ff5   :  { %5740 = vmatprep.subr.bf16.mxu1 %v9881_v30 }
0x2ff7   :  { %5721 = vmatpush3.bf16.msra.mxu0 %v9253_v21 }
0x2ff8   :  { %5746 = vmatprep.subr.bf16.mxu0 %v9881_v30  ;;  %5741 = vmatpush3.bf16.msra.mxu1 %v9257_v39 }
0x2ff9   :  { %5766 = vmatprep.subr.bf16.mxu1 %v9881_v30 }
0x30ad   :  { %v3729_v12 = vpop.f32.mrb[88].mxu1  ;;  %v3770_v34 = vpop.f32.mrb[84].mxu0 }
0x30ae   :  { %v4734_v59 = vmul.f32 -1.442695, %v3729_v12  ;;  %v3771_v0 = vadd.f32 %v3770_v34, %v9162_v44  ;;  %v3731_v2 = vpop.f32.mrb[89].mxu1  ;;  %v3772_v9 = vpop.f32.mrb[85].mxu0 }
0x30af   :  { %v3773_v15 = vadd.f32 %v3772_v9, %v9167_v10  ;;  %v3733_v50 = vpop.f32.mrb[90].mxu1  ;;  %v3774_v43 = vpop.f32.mrb[86].mxu0  ;;  %v4735_v46 = vmul.f32 -1.442695, %v3731_v2 }
0x30b0   :  { %6257 = vpow2.f32 %v4734_v59  ;;  %v3734_v21 = vpop.f32.mrb[91].mxu1  ;;  %v3775_v35 = vpop.f32.mrb[87].mxu0 }
0x30b1   :  { %6259 = vpow2.f32 %v4735_v46  ;;  %v9301_v35 = vld [vmem:[#allocation8 + $0x38] sm:$0xff]  }
0x30b2   :  { %10153 = vst [vmem:[#allocation75_spill] sm:$0xff] %v9301_v35 }
0x30ba   :  { %v6258_v32 = vpop.eup %6257 }
0x30bb   :  { %v3780_v39 = vadd.f32 1.0, %v6258_v32  ;;  %v6260_v54 = vpop.eup %6259  ;;  %v9297_v32 = vld [vmem:[#allocation8 + $0x30] sm:$0xff]  }
0x30bc   :  { %v3786_v60 = vadd.f32 1.0, %v6260_v54  ;;  %v9293_v54 = vld [vmem:[#allocation8 + $0x28] sm:$0xff]  }
0x30bd   :  { %6261 = vrcp.f32 %v3780_v39  ;;  %v9271_v39 = vld [vmem:[#allocation8] sm:$0xff]  }
0x30be   :  { %6263 = vrcp.f32 %v3786_v60  ;;  %v9289_v60 = vld [vmem:[#allocation8 + $0x20] sm:$0xff]  }
0x30c7   :  { %v6262_v13 = vpop.eup %6261 }
0x30c8   :  { %v3789_v12 = vmul.f32 %v6262_v13, %v3773_v15  ;;  %v6264_v34 = vpop.eup %6263  ;;  %v9277_v13 = vld [vmem:[#allocation8 + $0x8] sm:$0xff]  }
0x30c9   :  { %v3792_v40 = vsub.f32 1.0, %v6264_v34  ;;  %v3794_v43 = vmul.f32 %v6264_v34, %v8893_v36  ;;  %v9281_v36 = vld [vmem:[#allocation8 + $0x10] sm:$0xff]  }
0x30ca   :  { %v3790_v44 = vadd.f32 %v3789_v12, %v3771_v0  ;;  %v9308_v0 = vld [vmem:[%s9657_s4] sm:$0xff] }
0x30cc   :  { %6265 = vtanh.f32 %v3790_v44 }
0x30d6   :  { %v6266_v10 = vpop.eup %6265 }
0x30d7   :  { %v3793_v50 = vmul.f32 %v6266_v10, %v3792_v40  ;;  %v9285_v40 = vld [vmem:[#allocation8 + $0x18] sm:$0xff]  }
0x30d9   :  { %v9264_v9 = vadd.f32 %v3794_v43, %v3793_v50 }
0x30db   :  { %v9268_v46 = vpack.c.bf16 %v9264_v9, %v9264_v9 }
0x30dd   :  { %5723 = vmatmul.mubr.bf16.vlgmr.msra.gmra.mrb[88].mxu0 %v9268_v46 }
0x30de   :  { %5747 = vmatpush3.bf16.msra.mxu0 %v9271_v39  ;;  %5762 = vmatprep.mubr.msk.bf16.mxu0 %vm6873_vm2, %v9881_v30 }
0x30df   :  { %5748 = vmatprep.subr.bf16.mxu0 %v9881_v30 }
0x30e2   :  { %5749 = vmatpush3.bf16.msra.mxu0 %v9277_v13 }
0x30e3   :  { %5750 = vmatprep.subr.bf16.mxu0 %v9881_v30 }
0x30e6   :  { %5751 = vmatpush3.bf16.msra.mxu0 %v9281_v36 }
0x30e7   :  { %5752 = vmatprep.subr.bf16.mxu0 %v9881_v30 }
0x30ea   :  { %5753 = vmatpush3.bf16.msra.mxu0 %v9285_v40 }
0x30eb   :  { %5754 = vmatprep.subr.bf16.mxu0 %v9881_v30 }
0x30ee   :  { %5755 = vmatpush3.bf16.msra.mxu0 %v9289_v60 }
0x30ef   :  { %5756 = vmatprep.subr.bf16.mxu0 %v9881_v30 }
0x30f2   :  { %5757 = vmatpush3.bf16.msra.mxu0 %v9293_v54 }
0x30f3   :  { %5758 = vmatprep.subr.bf16.mxu0 %v9881_v30 }
0x30f6   :  { %5759 = vmatpush3.bf16.msra.mxu0 %v9297_v32 }
0x30f7   :  { %5760 = vmatprep.subr.bf16.mxu0 %v9881_v30 }
0x30fa   :  { %5761 = vmatpush3.bf16.msra.mxu0 %v9301_v35 }
0x30fb   :  { %4069 = vmatprep.subr.bf16.mxu0 %v8917_v14  ;;  %v4729_v14 = vsel %vm3609_vm12, 1.0, %v9881_v30 }
0x30fc   :  { %v3796_v43 = vmul.f32 %v8928_v51, %v4729_v14  ;;  %v9327_v51 = vld [vmem:[#allocation14 + $0x8] sm:$0xff]   ;;  %v10177_v14 = vld [vmem:[#allocation52_spill] sm:$0xff] }
0x31b0   :  { %v3834_v15 = vpop.f32.mrb[88].mxu0 }
0x31b1   :  { %v3835_v59 = vadd.f32 %v9308_v0, %v3834_v15  ;;  %v5724_v2 = vpop.f32.mrb[89].mxu0 }
0x31b2   :  { %v3837_v21 = vpop.f32.mrb[90].mxu0 }
0x31b3   :  { %3840 = vmax.xlane.f32.xlu0 %v3835_v59  ;;  %v5725_v12 = vpop.f32.mrb[91].mxu0 }
0x31b4   :  { %v10170_v12 = vld [vmem:[#allocation46_spill] sm:$0xff] }
0x3240   :  { %v3841_v44 = vpop.xlane.xlu0 %3840 }
0x3241   :  { %v3842_v34 = vsub.f32 %v3835_v59, %v3841_v44  ;;  %v9319_v59 = vld [vmem:[#allocation14] sm:$0xff]   ;;  %v10171_v44 = vld [vmem:[#allocation47_spill] sm:$0xff] }
0x3243   :  { %v3843_v10 = vmul.f32 1.442695, %v3842_v34  ;;  %v10172_v34 = vld [vmem:[#allocation29_spill] sm:$0xff] }
0x3245   :  { %6267 = vpow2.f32 %v3843_v10  ;;  %v10173_v10 = vld [vmem:[#allocation48_spill] sm:$0xff] }
0x324f   :  { %v6268_v50 = vpop.eup %6267 }
0x3250   :  { %3845 = vadd.xlane.f32.xlu1 %v6268_v50 }
0x3254   :  { %3797 = vadd.xlane.f32.xlu1 %v3796_v43  ;;  %v10178_v43 = vld [vmem:[#allocation54_spill] sm:$0xff] }
0x32dd   :  { %v3846_v35 = vpop.xlane.xlu1 %3845 }
0x32de   :  { %6269 = vrcp.f32 %v3846_v35  ;;  %v10169_v35 = vld [vmem:[#allocation45_spill] sm:$0xff] }
0x32e8   :  { %v6270_v15 = vpop.eup %6269 }
0x32e9   :  { %v3848_v2 = vmul.f32 %v6270_v15, %v6268_v50  ;;  %v10175_v50 = vld [vmem:[#allocation50_spill] sm:$0xff] }
0x32eb   :  { %v3849_v21 = vpack.c.bf16 %v3848_v2, %v3848_v2  ;;  %v10179_v2 = vld [vmem:[#allocation57_spill] sm:$0xff] }
0x32ed   :  { %5743 = vmatmul.mubr.bf16.vlgmr.msra.gmra.mrb[96].mxu1 %v3849_v21  ;;  %5763 = vmatmul.mubr.bf16.vlgmr.msra.gmra.mrb[92].mxu0 %v3849_v21 }
0x32ee   :  { %4070 = vmatpush1.bf16.msra.mxu0 %v8931_v45  ;;  %4101 = vmatprep.mubr.bf16.mxu0 %v9888_v57  ;;  %v9333_v45 = vld [vmem:[#allocation14 + $0x10] sm:$0xff]  }
0x32ef   :  { %4071 = vmatprep.subr.bf16.mxu0 %v8935_v53  ;;  %5767 = vmatpush3.bf16.msra.mxu1 %v9319_v59  ;;  %v9339_v53 = vld [vmem:[#allocation14 + $0x18] sm:$0xff]  }
0x32f0   :  { %5768 = vmatprep.subr.bf16.mxu1 %v9881_v30  ;;  %5782 = vmatprep.mubr.msk.bf16.mxu1 %vm6873_vm2, %v9881_v30 }
0x32f2   :  { %4072 = vmatpush1.bf16.msra.mxu0 %v8942_v3  ;;  %v9345_v3 = vld [vmem:[#allocation14 + $0x20] sm:$0xff]  }
0x32f3   :  { %4073 = vmatprep.subr.bf16.mxu0 %v8945_v6  ;;  %5769 = vmatpush3.bf16.msra.mxu1 %v9327_v51  ;;  %v9351_v6 = vld [vmem:[#allocation14 + $0x28] sm:$0xff]  }
0x32f4   :  { %5770 = vmatprep.subr.bf16.mxu1 %v9881_v30 }
0x32f6   :  { %4074 = vmatpush1.bf16.msra.mxu0 %v8950_v4  ;;  %v9357_v4 = vld [vmem:[#allocation14 + $0x30] sm:$0xff]  }
0x32f7   :  { %4075 = vmatprep.subr.bf16.mxu0 %v8953_v62  ;;  %5771 = vmatpush3.bf16.msra.mxu1 %v9333_v45  ;;  %v9363_v62 = vld [vmem:[#allocation14 + $0x38] sm:$0xff]  }
0x32f8   :  { %5772 = vmatprep.subr.bf16.mxu1 %v9881_v30 }
0x32fa   :  { %4076 = vmatpush1.bf16.msra.mxu0 %v8958_v27  ;;  %v10154_v27 = vld [vmem:[#allocation30_spill] sm:$0xff] }
0x32fb   :  { %4077 = vmatprep.subr.bf16.mxu0 %v8961_v52  ;;  %5773 = vmatpush3.bf16.msra.mxu1 %v9339_v53  ;;  %v10155_v52 = vld [vmem:[#allocation31_spill] sm:$0xff] }
0x32fc   :  { %5774 = vmatprep.subr.bf16.mxu1 %v9881_v30 }
0x32fe   :  { %4078 = vmatpush1.bf16.msra.mxu0 %v8966_v61  ;;  %v10156_v61 = vld [vmem:[#allocation32_spill] sm:$0xff] }
0x32ff   :  { %4079 = vmatprep.subr.bf16.mxu0 %v8969_v5  ;;  %5775 = vmatpush3.bf16.msra.mxu1 %v9345_v3  ;;  %v10157_v5 = vld [vmem:[#allocation33_spill] sm:$0xff] }
0x3300   :  { %5776 = vmatprep.subr.bf16.mxu1 %v9881_v30 }
0x3302   :  { %4080 = vmatpush1.bf16.msra.mxu0 %v8974_v31  ;;  %v10158_v31 = vld [vmem:[#allocation34_spill] sm:$0xff] }
0x3303   :  { %4081 = vmatprep.subr.bf16.mxu0 %v8977_v38  ;;  %5777 = vmatpush3.bf16.msra.mxu1 %v9351_v6  ;;  %v10159_v38 = vld [vmem:[#allocation35_spill] sm:$0xff] }
0x3304   :  { %5778 = vmatprep.subr.bf16.mxu1 %v9881_v30 }
0x3306   :  { %4082 = vmatpush1.bf16.msra.mxu0 %v8982_v7  ;;  %v10160_v7 = vld [vmem:[#allocation36_spill] sm:$0xff] }
0x3307   :  { %4083 = vmatprep.subr.bf16.mxu0 %v8985_v24  ;;  %5779 = vmatpush3.bf16.msra.mxu1 %v9357_v4  ;;  %v10161_v24 = vld [vmem:[#allocation37_spill] sm:$0xff] }
0x3308   :  { %5780 = vmatprep.subr.bf16.mxu1 %v9881_v30 }
0x330a   :  { %4084 = vmatpush1.bf16.msra.mxu0 %v8990_v25  ;;  %v10162_v25 = vld [vmem:[#allocation38_spill] sm:$0xff] }
0x330b   :  { %4110 = vmatprep.subr.bf16.mxu0 %v8993_v17  ;;  %5781 = vmatpush3.bf16.msra.mxu1 %v9363_v62  ;;  %v10163_v17 = vld [vmem:[#allocation39_spill] sm:$0xff] }
0x330c   :  { %5786 = vmatprep.subr.bf16.mxu1 %v9881_v30 }
0x330d   :  { %4102 = vmatmul.mubr.bf16.vlgmr.msra.gmra.mrb[96].mxu0 %v9268_v46 }
0x330e   :  { %4111 = vmatpush1.bf16.msra.mxu0 %v8999_v1  ;;  %4142 = vmatprep.mubr.bf16.mxu0 %v9888_v57 }
0x330f   :  { %4112 = vmatprep.subr.bf16.mxu0 %v9003_v63 }
0x3312   :  { %4113 = vmatpush1.bf16.msra.mxu0 %v9006_v55 }
0x3313   :  { %4114 = vmatprep.subr.bf16.mxu0 %v9009_v18 }
0x3316   :  { %4115 = vmatpush1.bf16.msra.mxu0 %v9012_v49 }
0x3317   :  { %4116 = vmatprep.subr.bf16.mxu0 %v9015_v56 }
0x331a   :  { %4117 = vmatpush1.bf16.msra.mxu0 %v9018_v33 }
0x331b   :  { %4118 = vmatprep.subr.bf16.mxu0 %v9021_v41 }
0x331e   :  { %4119 = vmatpush1.bf16.msra.mxu0 %v9024_v19 }
0x331f   :  { %4120 = vmatprep.subr.bf16.mxu0 %v9027_v28  ;;  %v9405_v28 = vld [vmem:[#allocation13] sm:$0xff]  }
0x3322   :  { %4121 = vmatpush1.bf16.msra.mxu0 %v9030_v11  ;;  %v9415_v11 = vld [vmem:[#allocation13 + $0x10] sm:$0xff]  }
0x3323   :  { %4122 = vmatprep.subr.bf16.mxu0 %v9033_v42  ;;  %v9419_v42 = vld [vmem:[#allocation13 + $0x18] sm:$0xff]  }
0x3326   :  { %4123 = vmatpush1.bf16.msra.mxu0 %v9036_v23  ;;  %v9423_v23 = vld [vmem:[#allocation13 + $0x20] sm:$0xff]  }
0x3327   :  { %4124 = vmatprep.subr.bf16.mxu0 %v9039_v58  ;;  %v9427_v58 = vld [vmem:[#allocation13 + $0x28] sm:$0xff]  }
0x332a   :  { %4125 = vmatpush1.bf16.msra.mxu0 %v9042_v16  ;;  %v9431_v16 = vld [vmem:[#allocation13 + $0x30] sm:$0xff]  }
0x332b   :  { %4151 = vmatprep.subr.bf16.mxu0 %v9045_v48  ;;  %v9435_v48 = vld [vmem:[#allocation13 + $0x38] sm:$0xff]  }
0x332d   :  { %4143 = vmatmul.mubr.bf16.vlgmr.msra.gmra.mrb[100].mxu0 %v9268_v46 }
0x332e   :  { %4152 = vmatpush1.bf16.msra.mxu0 %v9049_v37  ;;  %4183 = vmatprep.mubr.bf16.mxu0 %v9888_v57  ;;  %v10164_v37 = vld [vmem:[#allocation40_spill] sm:$0xff] }
0x332f   :  { %4153 = vmatprep.subr.bf16.mxu0 %v9053_v22  ;;  %v10165_v22 = vld [vmem:[#allocation41_spill] sm:$0xff] }
0x3332   :  { %4154 = vmatpush1.bf16.msra.mxu0 %v9056_v29  ;;  %v10166_v29 = vld [vmem:[#allocation42_spill] sm:$0xff] }
0x3333   :  { %4155 = vmatprep.subr.bf16.mxu0 %v10154_v27 }
0x3336   :  { %4156 = vmatpush1.bf16.msra.mxu0 %v10155_v52 }
0x3337   :  { %4157 = vmatprep.subr.bf16.mxu0 %v10156_v61  ;;  %v3798_v61 = vpop.xlane.xlu1 %3797 }
0x333a   :  { %4158 = vmatpush1.bf16.msra.mxu0 %v10157_v5 }
0x333b   :  { %4159 = vmatprep.subr.bf16.mxu0 %v10158_v31 }
0x333e   :  { %4160 = vmatpush1.bf16.msra.mxu0 %v10159_v38 }
0x333f   :  { %4161 = vmatprep.subr.bf16.mxu0 %v10160_v7  ;;  %v9464_v7 = vld [vmem:[%s9662_s9] ss:$0 sm:$0xff] }
0x3342   :  { %4162 = vmatpush1.bf16.msra.mxu0 %v10161_v24 }
0x3343   :  { %4163 = vmatprep.subr.bf16.mxu0 %v10162_v25 }
0x3346   :  { %4164 = vmatpush1.bf16.msra.mxu0 %v10163_v17 }
0x3347   :  { %4165 = vmatprep.subr.bf16.mxu0 %v9089_v20  ;;  %v9411_v20 = vld [vmem:[#allocation13 + $0x8] sm:$0xff]  }
0x334a   :  { %4166 = vmatpush1.bf16.msra.mxu0 %v9092_v26  ;;  %v10167_v26 = vld [vmem:[#allocation43_spill] sm:$0xff] }
0x334b   :  { %5826 = vmatprep.subr.bf16.mxu0 %v9881_v30 }
0x33c0   :  { %v3884_v1 = vpop.f32.mrb[96].mxu1  ;;  %v9403_v63 = vpop.f32.mrb[92].mxu0 }
0x33c1   :  { %v3930_v55 = vpack.c.bf16 %v3884_v1, %v3884_v1  ;;  %v5744_v18 = vpop.f32.mrb[97].mxu1  ;;  %v5764_v49 = vpop.f32.mrb[93].mxu0 }
0x33c2   :  { %v3887_v56 = vpop.f32.mrb[98].mxu1  ;;  %v3927_v33 = vpop.f32.mrb[94].mxu0 }
0x33c3   :  { %v5745_v41 = vpop.f32.mrb[99].mxu1  ;;  %v5765_v19 = vpop.f32.mrb[95].mxu0  ;;  %5783 = vmatmul.mubr.bf16.vlgmr.msra.gmra.mrb[100].mxu1 %v3930_v55 }
0x33c4   :  { %5787 = vmatpush3.bf16.msra.mxu1 %v9405_v28  ;;  %5802 = vmatprep.mubr.msk.bf16.mxu1 %vm6873_vm2, %v9881_v30 }
0x33c5   :  { %5788 = vmatprep.subr.bf16.mxu1 %v9881_v30 }
0x33c8   :  { %5789 = vmatpush3.bf16.msra.mxu1 %v9411_v20 }
0x33c9   :  { %5790 = vmatprep.subr.bf16.mxu1 %v9881_v30 }
0x33cc   :  { %5791 = vmatpush3.bf16.msra.mxu1 %v9415_v11 }
0x33cd   :  { %5792 = vmatprep.subr.bf16.mxu1 %v9881_v30 }
0x33d0   :  { %5793 = vmatpush3.bf16.msra.mxu1 %v9419_v42 }
0x33d1   :  { %5794 = vmatprep.subr.bf16.mxu1 %v9881_v30 }
0x33d4   :  { %5795 = vmatpush3.bf16.msra.mxu1 %v9423_v23 }
0x33d5   :  { %5796 = vmatprep.subr.bf16.mxu1 %v9881_v30 }
0x33d8   :  { %5797 = vmatpush3.bf16.msra.mxu1 %v9427_v58 }
0x33d9   :  { %5798 = vmatprep.subr.bf16.mxu1 %v9881_v30 }
0x33dc   :  { %5799 = vmatpush3.bf16.msra.mxu1 %v9431_v16 }
0x33dd   :  { %5800 = vmatprep.subr.bf16.mxu1 %v9881_v30 }
0x33e0   :  { %5801 = vmatpush3.bf16.msra.mxu1 %v9435_v48 }
0x33e1   :  { %4192 = vmatprep.subr.bf16.mxu1 %v10164_v37 }
0x33e3   :  { %5803 = vmatmul.mubr.bf16.vlgmr.msra.gmra.mrb[100].mxu1 %v9268_v46  ;;  %v10174_v46 = vld [vmem:[#allocation49_spill] sm:$0xff] }
0x33e4   :  { %4193 = vmatpush1.bf16.msra.mxu1 %v10165_v22  ;;  %4224 = vmatprep.mubr.bf16.mxu1 %v9888_v57  ;;  %v10176_v57 = vld [vmem:[#allocation51_spill] sm:$0xff] }
0x33e5   :  { %4194 = vmatprep.subr.bf16.mxu1 %v10166_v29 }
0x33e8   :  { %4195 = vmatpush1.bf16.msra.mxu1 %v10167_v26 }
0x33e9   :  { %4196 = vmatprep.subr.bf16.mxu1 %v10168_v47 }
0x33ec   :  { %4197 = vmatpush1.bf16.msra.mxu1 %v10169_v35 }
0x33ed   :  { %4198 = vmatprep.subr.bf16.mxu1 %v10170_v12 }
0x33f0   :  { %4199 = vmatpush1.bf16.msra.mxu1 %v10171_v44 }
0x33f1   :  { %4200 = vmatprep.subr.bf16.mxu1 %v10172_v34 }
0x33f4   :  { %4201 = vmatpush1.bf16.msra.mxu1 %v10173_v10 }
0x33f5   :  { %4202 = vmatprep.subr.bf16.mxu1 %v10174_v46 }
0x33f8   :  { %4203 = vmatpush1.bf16.msra.mxu1 %v10175_v50 }
0x33f9   :  { %4204 = vmatprep.subr.bf16.mxu1 %v10176_v57 }
0x33fc   :  { %4205 = vmatpush1.bf16.msra.mxu1 %v10177_v14 }
0x33fd   :  { %4206 = vmatprep.subr.bf16.mxu1 %v10178_v43 }
0x3400   :  { %v9455_v15 = vpop.f32.mrb[100].mxu0  ;;  %4207 = vmatpush1.bf16.msra.mxu1 %v10179_v2 }
0x3401   :  { %v9458_v21 = vpop.f32.mrb[101].mxu0  ;;  %5806 = vmatprep.subr.bf16.mxu1 %v9881_v30 }
0x3402   :  { %v4148_v27 = vpop.f32.mrb[102].mxu0 }
0x3403   :  { %v4149_v52 = vpop.f32.mrb[103].mxu0 }
0x34b6   :  { %v4005_v5 = vpop.f32.mrb[100].mxu1 }
0x34b7   :  { %v4011_v31 = vadd.f32 %v4005_v5, %v3798_v61  ;;  %v5804_v38 = vpop.f32.mrb[101].mxu1  ;;  %v4018_v24 = vadd.f32 %v9464_v7, %v4005_v5 }
0x34b8   :  { %v4008_v25 = vpop.f32.mrb[102].mxu1 }
0x34b9   :  { %v4736_v17 = vmul.f32 -1.442695, %v4011_v31  ;;  %4019 = vmax.xlane.f32.xlu0 %v4018_v24  ;;  %v5805_v1 = vpop.f32.mrb[103].mxu1 }
0x34ba   :  { %v10182_v1 = vld [vmem:[#allocation60_spill] sm:$0xff] }
0x34bb   :  { %6271 = vpow2.f32 %v4736_v17  ;;  %v10181_v17 = vmov 1.0|1.0  }
0x34c5   :  { %v6272_v55 = vpop.eup %6271 }
0x34c6   :  { %v4015_v18 = vadd.f32 1.0, %v6272_v55  ;;  %v10183_v55 = vld [vmem:[#allocation61_spill] sm:$0xff] }
0x34c8   :  { %6273 = vrcp.f32 %v4015_v18  ;;  %v10184_v18 = vld [vmem:[#allocation56_spill] sm:$0xff] }
0x34d2   :  { %v6274_v49 = vpop.eup %6273 }
0x34d3   :  { %4030 = vperm.xlu1 %5987, %v6274_v49   ;;  %v4034_v37 = vsub.f32 1.0, %v6274_v49  ;;  %v10185_v49 = vld [vmem:[#allocation62_spill] sm:$0xff] }
0x3546   :  { %v4020_v56 = vpop.xlane.xlu0 %4019 }
0x3547   :  { %v4021_v33 = vsub.f32 %v4018_v24, %v4020_v56  ;;  %v10180_v24 = vld [vmem:[#allocation59_spill] sm:$0xff] }
0x3548   :  { %v10186_v56 = vld [vmem:[#allocation63_spill] sm:$0xff] }
0x3549   :  { %v4022_v41 = vmul.f32 1.442695, %v4021_v33  ;;  %v10187_v33 = vld [vmem:[#allocation64_spill] sm:$0xff] }
0x354b   :  { %6275 = vpow2.f32 %v4022_v41  ;;  %v10188_v41 = vld [vmem:[#allocation65_spill] sm:$0xff] }
0x3552   :  { %v4031_v35 = vpop.permute.xlu1 %4030 }
0x3555   :  { %v6276_v19 = vpop.eup %6275 }
0x3556   :  { %4024 = vadd.xlane.f32.xlu0 %v6276_v19 }
0x356c   :  { %4037 = vperm.xlu0 %5988, %v4034_v37   ;;  %v10190_v37 = vld [vmem:[#allocation67_spill] sm:$0xff] }
0x35e3   :  { %v4025_v22 = vpop.xlane.xlu0 %4024 }
0x35e4   :  { %6277 = vrcp.f32 %v4025_v22  ;;  %v10191_v22 = vld [vmem:[#allocation68_spill] sm:$0xff] }
0x35eb   :  { %v4038_v26 = vpop.permute.xlu0 %4037 }
0x35ec   :  { %v4040_v12 = vmul.f32 %v4038_v26, %v9403_v63  ;;  %v10193_v26 = vld [vmem:[#allocation70_spill] sm:$0xff] }
0x35ee   :  { %v6278_v29 = vpop.eup %6277 }
0x35ef   :  { %v4027_v47 = vmul.f32 %v6278_v29, %v6276_v19  ;;  %v10189_v19 = vld [vmem:[#allocation66_spill] sm:$0xff]  ;;  %v10192_v29 = vld [vmem:[#allocation69_spill] sm:$0xff] }
0x35f1   :  { %v4033_v44 = vmul.f32 %v4031_v35, %v4027_v47  ;;  %v10194_v47 = vld [vmem:[#allocation71_spill] sm:$0xff]  ;;  %v10195_v35 = vld [vmem:[#allocation72_spill] sm:$0xff] }
0x35f3   :  { %v4041_v34 = vadd.f32 %v4040_v12, %v4033_v44  ;;  %v10196_v12 = vld [vmem:[#allocation73_spill] sm:$0xff]  ;;  %v10197_v44 = vld [vmem:[#allocation74_spill] sm:$0xff] }
0x35f5   :  { %4042 = vmax.xlane.f32.xlu1 %v4041_v34 }
0x3682   :  { %v9468_v10 = vpop.xlane.xlu1 %4042 }
0x3683   :  { %vm4044_vm14 = vcmp.eq.f32.partialorder %v4041_v34, %v9468_v10 }
0x3684   :  { %v4045_v46 = vsel %vm4044_vm14, %v9910_v8, 128 }
0x3685   :  { %v4047_v50 = vshra.s32 %v4045_v46, 16  ;;  %v4046_v14 = vand.u32 65535, %v4045_v46 }
0x3687   :  { %v4049_v57 = vcvt.s32.f32 %v4047_v50  ;;  %v4048_v2 = vcvt.s32.f32 %v4046_v14 }
0x3689   :  { %4050 = vmin.xlane.f32.xlu0 %v4049_v57 }
0x3716   :  { %v4051_v43 = vpop.xlane.xlu0 %4050 }
0x3717   :  { %vm4052_vm15 = vcmp.eq.f32.partialorder %v4049_v57, %v4051_v43  ;;  %v4057_v52 = vcvt.f32.s32 %v4051_v43 }
0x3718   :  { %v4053_v27 = vsel %vm4052_vm15, %v4048_v2, inf }
0x3719   :  { %4054 = vmin.xlane.f32.xlu1 %v4053_v27  ;;  %v4058_v61 = vshll.u32 %v4057_v52, 16 }
0x37a6   :  { %v4055_v63 = vpop.xlane.xlu1 %4054 }
0x37a7   :  { %v4056_v5 = vcvt.f32.s32 %v4055_v63 }
0x37a9   :  { %v4059_v31 = vadd.s32 %v4058_v61, %v4056_v5 }
0x37ab   :  { %vm4060_vm4 = vcmp.ge.s32.totalorder %v4059_v31, 32 }
0x37ac   :  { %v9473_v38 = vsel %vm4060_vm4, 3, %v4059_v31 }
0x37ad   :  { %vm4065_vm6 = vcmp.eq.s32.totalorder %v9910_v8, %v9473_v38  ;;  %v9481_v25 = vsel %vm4062_vm5, %v9473_v38, %v10180_v24 }
0x37ae   :  { %vm4738_vm7 = vmpackc.low %vm4065_vm6, %vm4065_vm6 }
0x37af   :  { %4739 = vmatmul.mubr.msk.bf16.vlgmr.msra.gmra.mrb[96].mxu0 %vm4738_vm7, %v10181_v17  ;;  %4741 = vmatmul.mubr.msk.bf16.vlgmr.msra.gmra.mrb[104].mxu1 %vm4738_vm7, %v10181_v17 }
0x37b0   :  { %5807 = vmatpush3.bf16.msra.mxu1 %v10182_v1  ;;  %5822 = vmatprep.mubr.msk.bf16.mxu1 %vm6873_vm2, %v9881_v30 }
0x37b1   :  { %5808 = vmatprep.subr.bf16.mxu1 %v9881_v30  ;;  %5827 = vmatpush3.bf16.msra.mxu0 %v10183_v55 }
0x37b2   :  { %5828 = vmatprep.subr.bf16.mxu0 %v9881_v30  ;;  %5842 = vmatprep.mubr.msk.bf16.mxu0 %vm6873_vm2, %v9881_v30 }
0x37b4   :  { %5809 = vmatpush3.bf16.msra.mxu1 %v10184_v18 }
0x37b5   :  { %5810 = vmatprep.subr.bf16.mxu1 %v9881_v30  ;;  %5829 = vmatpush3.bf16.msra.mxu0 %v10185_v49 }
0x37b6   :  { %5830 = vmatprep.subr.bf16.mxu0 %v9881_v30 }
0x37b8   :  { %5811 = vmatpush3.bf16.msra.mxu1 %v10186_v56 }
0x37b9   :  { %5812 = vmatprep.subr.bf16.mxu1 %v9881_v30  ;;  %5831 = vmatpush3.bf16.msra.mxu0 %v10187_v33 }
0x37ba   :  { %5832 = vmatprep.subr.bf16.mxu0 %v9881_v30 }
0x37bc   :  { %5813 = vmatpush3.bf16.msra.mxu1 %v10188_v41 }
0x37bd   :  { %5814 = vmatprep.subr.bf16.mxu1 %v9881_v30  ;;  %5833 = vmatpush3.bf16.msra.mxu0 %v10189_v19 }
0x37be   :  { %5834 = vmatprep.subr.bf16.mxu0 %v9881_v30 }
0x37c0   :  { %5815 = vmatpush3.bf16.msra.mxu1 %v10190_v37 }
0x37c1   :  { %5816 = vmatprep.subr.bf16.mxu1 %v9881_v30  ;;  %5835 = vmatpush3.bf16.msra.mxu0 %v10191_v22 }
0x37c2   :  { %5836 = vmatprep.subr.bf16.mxu0 %v9881_v30 }
0x37c4   :  { %5817 = vmatpush3.bf16.msra.mxu1 %v10192_v29 }
0x37c5   :  { %5818 = vmatprep.subr.bf16.mxu1 %v9881_v30  ;;  %5837 = vmatpush3.bf16.msra.mxu0 %v10193_v26 }
0x37c6   :  { %5838 = vmatprep.subr.bf16.mxu0 %v9881_v30 }
0x37c8   :  { %5819 = vmatpush3.bf16.msra.mxu1 %v10194_v47  ;;  %v6623_v47 = vld [vmem:[%s9663_s10] ss:$0 sm:$0xff] }
0x37c9   :  { %5820 = vmatprep.subr.bf16.mxu1 %v9881_v30  ;;  %5839 = vmatpush3.bf16.msra.mxu0 %v10195_v35 }
0x37ca   :  { %5840 = vmatprep.subr.bf16.mxu0 %v9881_v30 }
0x37cc   :  { %5821 = vmatpush3.bf16.msra.mxu1 %v10196_v12 }
0x37cd   :  { %5846 = vmatprep.subr.bf16.mxu1 %v9881_v30  ;;  %5841 = vmatpush3.bf16.msra.mxu0 %v10197_v44 }
0x37ce   :  { %5866 = vmatprep.subr.bf16.mxu0 %v9881_v30 }
0x3882   :  { %v4185_v34 = vpop.f32.mrb[96].mxu0  ;;  %v4226_v46 = vpop.f32.mrb[104].mxu1 }
0x3883   :  { %v4742_v50 = vmul.f32 -1.442695, %v4185_v34  ;;  %v4227_v57 = vadd.f32 %v4226_v46, %v9455_v15  ;;  %v4187_v14 = vpop.f32.mrb[97].mxu0  ;;  %v4228_v43 = vpop.f32.mrb[105].mxu1 }
0x3884   :  { %v4229_v2 = vadd.f32 %v4228_v43, %v9458_v21  ;;  %v4189_v27 = vpop.f32.mrb[98].mxu0  ;;  %v4230_v52 = vpop.f32.mrb[106].mxu1  ;;  %v4743_v5 = vmul.f32 -1.442695, %v4187_v14 }
0x3885   :  { %6279 = vpow2.f32 %v4742_v50  ;;  %v4190_v63 = vpop.f32.mrb[99].mxu0  ;;  %v4231_v61 = vpop.f32.mrb[107].mxu1 }
0x3886   :  { %6281 = vpow2.f32 %v4743_v5 }
0x388f   :  { %v6280_v31 = vpop.eup %6279 }
0x3890   :  { %v4236_v24 = vadd.f32 1.0, %v6280_v31  ;;  %v6282_v17 = vpop.eup %6281 }
0x3891   :  { %v4242_v1 = vadd.f32 1.0, %v6282_v17 }
0x3892   :  { %6283 = vrcp.f32 %v4236_v24 }
0x3893   :  { %6285 = vrcp.f32 %v4242_v1 }
0x389c   :  { %v6284_v55 = vpop.eup %6283 }
0x389d   :  { %v4245_v18 = vmul.f32 %v6284_v55, %v4229_v2  ;;  %v6286_v49 = vpop.eup %6285  ;;  %v10199_v55 = vld [vmem:[#allocation26_spill] sm:$0xff] }
0x389e   :  { %v4248_v56 = vsub.f32 1.0, %v6286_v49  ;;  %v4250_v41 = vmul.f32 %v6286_v49, %v9264_v9  ;;  %v10198_v9 = vld [vmem:[#allocation75_spill] sm:$0xff] }
0x389f   :  { %v4246_v15 = vadd.f32 %v4245_v18, %v4227_v57  ;;  %v1329_v18 = vsel %vm1327_vm10, %v10199_v55, 0.0  ;;  %vm4521_vm10 = vcmask 64512  }
0x38a1   :  { %6287 = vtanh.f32 %v4246_v15  ;;  %v10200_v15 = vld [vmem:[#allocation53_spill] sm:$0xff] }
0x38a2   :  { %v1784_v49 = vsel %vm157_vm0, %v10200_v15, %v1329_v18 }
0x38ab   :  { %v6288_v21 = vpop.eup %6287 }
0x38ac   :  { %v4249_v33 = vmul.f32 %v6288_v21, %v4248_v56  ;;  %v10201_v56 = vld [vmem:[#allocation27_spill] sm:$0xff] }
0x38ad   :  { %v2240_v21 = vsel %vm2238_vm3, %v10201_v56, %v1784_v49 }
0x38ae   :  { %v4251_v19 = vadd.f32 %v4250_v41, %v4249_v33  ;;  %v10202_v33 = vld [vmem:[#allocation55_spill] sm:$0xff] }
0x38af   :  { %v2696_v41 = vsel %vm2694_vm9, %v10202_v33, %v2240_v21 }
0x38b0   :  { %v9528_v37 = vpack.c.bf16 %v4251_v19, %v4251_v19  ;;  %v10203_v19 = vld [vmem:[#allocation28_spill] sm:$0xff] }
0x38b2   :  { %5823 = vmatmul.mubr.bf16.vlgmr.msra.gmra.mrb[108].mxu1 %v9528_v37 }
0x38b3   :  { %5847 = vmatpush3.bf16.msra.mxu1 %v9271_v39  ;;  %5862 = vmatprep.mubr.msk.bf16.mxu1 %vm6873_vm2, %v9881_v30 }
0x38b4   :  { %5848 = vmatprep.subr.bf16.mxu1 %v9881_v30 }
0x38b7   :  { %5849 = vmatpush3.bf16.msra.mxu1 %v9277_v13 }
0x38b8   :  { %5850 = vmatprep.subr.bf16.mxu1 %v9881_v30 }
0x38bb   :  { %5851 = vmatpush3.bf16.msra.mxu1 %v9281_v36 }
0x38bc   :  { %5852 = vmatprep.subr.bf16.mxu1 %v9881_v30 }
0x38bf   :  { %5853 = vmatpush3.bf16.msra.mxu1 %v9285_v40 }
0x38c0   :  { %5854 = vmatprep.subr.bf16.mxu1 %v9881_v30 }
0x38c3   :  { %5855 = vmatpush3.bf16.msra.mxu1 %v9289_v60 }
0x38c4   :  { %5856 = vmatprep.subr.bf16.mxu1 %v9881_v30 }
0x38c7   :  { %5857 = vmatpush3.bf16.msra.mxu1 %v9293_v54 }
0x38c8   :  { %5858 = vmatprep.subr.bf16.mxu1 %v9881_v30 }
0x38cb   :  { %5859 = vmatpush3.bf16.msra.mxu1 %v9297_v32  ;;  %v4737_v32 = vsel %vm4065_vm6, 1.0, %v9881_v30 }
0x38cc   :  { %5860 = vmatprep.subr.bf16.mxu1 %v9881_v30 }
0x38cf   :  { %5861 = vmatpush3.bf16.msra.mxu1 %v10198_v9  ;;  %v10204_v9 = vld [vmem:[#allocation58_spill] sm:$0xff] }
0x3985   :  { %v4290_v39 = vpop.f32.mrb[108].mxu1 }
0x3986   :  { %v4291_v13 = vadd.f32 %v9308_v0, %v4290_v39  ;;  %v5824_v36 = vpop.f32.mrb[109].mxu1  ;;  %v4252_v0 = vmul.f32 %v6623_v47, %v4737_v32 }
0x3987   :  { %v4293_v40 = vpop.f32.mrb[110].mxu1 }
0x3988   :  { %4296 = vmax.xlane.f32.xlu0 %v4291_v13  ;;  %v5825_v22 = vpop.f32.mrb[111].mxu1 }
0x3a15   :  { %v4297_v60 = vpop.xlane.xlu0 %4296 }
0x3a16   :  { %v4298_v29 = vsub.f32 %v4291_v13, %v4297_v60 }
0x3a18   :  { %v4299_v26 = vmul.f32 1.442695, %v4298_v29 }
0x3a1a   :  { %6289 = vpow2.f32 %v4299_v26 }
0x3a24   :  { %v6290_v54 = vpop.eup %6289 }
0x3a25   :  { %4301 = vadd.xlane.f32.xlu1 %v6290_v54 }
0x3a29   :  { %4253 = vadd.xlane.f32.xlu1 %v4252_v0 }
0x3ab2   :  { %v4302_v35 = vpop.xlane.xlu1 %4301 }
0x3ab3   :  { %6291 = vrcp.f32 %v4302_v35 }
0x3abd   :  { %v6292_v12 = vpop.eup %6291 }
0x3abe   :  { %v4304_v44 = vmul.f32 %v6292_v12, %v6290_v54 }
0x3ac0   :  { %v4305_v34 = vpack.c.bf16 %v4304_v44, %v4304_v44 }
0x3ac2   :  { %5843 = vmatmul.mubr.bf16.vlgmr.msra.gmra.mrb[104].mxu0 %v4305_v34  ;;  %5863 = vmatmul.mubr.bf16.vlgmr.msra.gmra.mrb[112].mxu1 %v4305_v34 }
0x3ac3   :  { %5867 = vmatpush3.bf16.msra.mxu0 %v9319_v59  ;;  %5882 = vmatprep.mubr.msk.bf16.mxu0 %vm6873_vm2, %v9881_v30 }
0x3ac4   :  { %5868 = vmatprep.subr.bf16.mxu0 %v9881_v30 }
0x3ac7   :  { %5869 = vmatpush3.bf16.msra.mxu0 %v9327_v51 }
0x3ac8   :  { %5870 = vmatprep.subr.bf16.mxu0 %v9881_v30 }
0x3acb   :  { %5871 = vmatpush3.bf16.msra.mxu0 %v9333_v45 }
0x3acc   :  { %5872 = vmatprep.subr.bf16.mxu0 %v9881_v30 }
0x3acf   :  { %5873 = vmatpush3.bf16.msra.mxu0 %v9339_v53 }
0x3ad0   :  { %5874 = vmatprep.subr.bf16.mxu0 %v9881_v30 }
0x3ad3   :  { %5875 = vmatpush3.bf16.msra.mxu0 %v9345_v3 }
0x3ad4   :  { %5876 = vmatprep.subr.bf16.mxu0 %v9881_v30 }
0x3ad7   :  { %5877 = vmatpush3.bf16.msra.mxu0 %v9351_v6  ;;  %v4254_v6 = vpop.xlane.xlu1 %4253 }
0x3ad8   :  { %5878 = vmatprep.subr.bf16.mxu0 %v9881_v30 }
0x3adb   :  { %5879 = vmatpush3.bf16.msra.mxu0 %v9357_v4 }
0x3adc   :  { %5880 = vmatprep.subr.bf16.mxu0 %v9881_v30 }
0x3adf   :  { %5881 = vmatpush3.bf16.msra.mxu0 %v9363_v62 }
0x3ae0   :  { %5886 = vmatprep.subr.bf16.mxu0 %v9881_v30 }
0x3b95   :  { %v4340_v59 = vpop.f32.mrb[104].mxu0  ;;  %v4380_v51 = vpop.f32.mrb[112].mxu1 }
0x3b96   :  { %v4386_v45 = vpack.c.bf16 %v4340_v59, %v4340_v59  ;;  %v5844_v53 = vpop.f32.mrb[105].mxu0  ;;  %v5864_v38 = vpop.f32.mrb[113].mxu1 }
0x3b97   :  { %v4343_v3 = vpop.f32.mrb[106].mxu0  ;;  %v4383_v46 = vpop.f32.mrb[114].mxu1 }
0x3b98   :  { %v5845_v50 = vpop.f32.mrb[107].mxu0  ;;  %v5865_v57 = vpop.f32.mrb[115].mxu1  ;;  %5883 = vmatmul.mubr.bf16.vlgmr.msra.gmra.mrb[108].mxu0 %v4386_v45 }
0x3b99   :  { %5887 = vmatpush3.bf16.msra.mxu0 %v9405_v28  ;;  %5902 = vmatprep.mubr.msk.bf16.mxu0 %vm6873_vm2, %v9881_v30  ;;  %vm4518_vm2 = vcmp.eq.s32.totalorder %v9910_v8, 7 }
0x3b9a   :  { %5888 = vmatprep.subr.bf16.mxu0 %v9881_v30 }
0x3b9d   :  { %5889 = vmatpush3.bf16.msra.mxu0 %v9411_v20 }
0x3b9e   :  { %5890 = vmatprep.subr.bf16.mxu0 %v9881_v30 }
0x3ba1   :  { %5891 = vmatpush3.bf16.msra.mxu0 %v9415_v11 }
0x3ba2   :  { %5892 = vmatprep.subr.bf16.mxu0 %v9881_v30 }
0x3ba5   :  { %5893 = vmatpush3.bf16.msra.mxu0 %v9419_v42 }
0x3ba6   :  { %5894 = vmatprep.subr.bf16.mxu0 %v9881_v30 }
0x3ba9   :  { %5895 = vmatpush3.bf16.msra.mxu0 %v9423_v23 }
0x3baa   :  { %5896 = vmatprep.subr.bf16.mxu0 %v9881_v30 }
0x3bad   :  { %5897 = vmatpush3.bf16.msra.mxu0 %v9427_v58 }
0x3bae   :  { %5898 = vmatprep.subr.bf16.mxu0 %v9881_v30 }
0x3bb1   :  { %5899 = vmatpush3.bf16.msra.mxu0 %v9431_v16 }
0x3bb2   :  { %5900 = vmatprep.subr.bf16.mxu0 %v9881_v30 }
0x3bb5   :  { %5901 = vmatpush3.bf16.msra.mxu0 %v9435_v48 }
0x3bb8   :  { %5903 = vmatmul.mubr.bf16.vlgmr.msra.gmra.mrb[108].mxu0 %v9528_v37  ;;  %v3152_v37 = vsel %vm3150_vm1, %v10203_v19, %v2696_v41  ;;  %vm4536_vm1 = vcmask 7168  }
0x3bb9   :  { %v3608_v39 = vsel %vm3606_vm11, %v10204_v9, %v3152_v37 }
0x3bba   :  { %v4064_v13 = vsel %vm4062_vm5, %v9468_v10, %v3608_v39 }
0x3c8b   :  { %v4461_v4 = vpop.f32.mrb[108].mxu0 }
0x3c8c   :  { %v4467_v62 = vadd.f32 %v4461_v4, %v4254_v6  ;;  %v5904_v28 = vpop.f32.mrb[109].mxu0  ;;  %v4474_v20 = vadd.f32 %v9464_v7, %v4461_v4 }
0x3c8d   :  { %v4464_v11 = vpop.f32.mrb[110].mxu0 }
0x3c8e   :  { %v4744_v42 = vmul.f32 -1.442695, %v4467_v62  ;;  %4475 = vmax.xlane.f32.xlu0 %v4474_v20  ;;  %v5905_v23 = vpop.f32.mrb[111].mxu0 }
0x3c90   :  { %6293 = vpow2.f32 %v4744_v42 }
0x3c9a   :  { %v6294_v58 = vpop.eup %6293 }
0x3c9b   :  { %v4471_v14 = vadd.f32 1.0, %v6294_v58 }
0x3c9d   :  { %6295 = vrcp.f32 %v4471_v14 }
0x3ca7   :  { %v6296_v16 = vpop.eup %6295 }
0x3ca8   :  { %4486 = vperm.xlu1 %5987, %v6296_v16   ;;  %v4490_v52 = vsub.f32 1.0, %v6296_v16 }
0x3d1b   :  { %v4476_v43 = vpop.xlane.xlu0 %4475 }
0x3d1c   :  { %v4477_v48 = vsub.f32 %v4474_v20, %v4476_v43 }
0x3d1e   :  { %v4478_v2 = vmul.f32 1.442695, %v4477_v48 }
0x3d20   :  { %6297 = vpow2.f32 %v4478_v2 }
0x3d27   :  { %v4487_v31 = vpop.permute.xlu1 %4486 }
0x3d2a   :  { %v6298_v27 = vpop.eup %6297 }
0x3d2b   :  { %4480 = vadd.xlane.f32.xlu0 %v6298_v27 }
0x3d41   :  { %4493 = vperm.xlu0 %5988, %v4490_v52  }
0x3db8   :  { %v4481_v63 = vpop.xlane.xlu0 %4480 }
0x3db9   :  { %6299 = vrcp.f32 %v4481_v63 }
0x3dc0   :  { %v4494_v61 = vpop.permute.xlu0 %4493 }
0x3dc1   :  { %v4496_v24 = vmul.f32 %v4494_v61, %v4380_v51 }
0x3dc3   :  { %v6300_v7 = vpop.eup %6299 }
0x3dc4   :  { %v4483_v5 = vmul.f32 %v6300_v7, %v6298_v27 }
0x3dc6   :  { %v4489_v17 = vmul.f32 %v4487_v31, %v4483_v5 }
0x3dc8   :  { %v4497_v1 = vadd.f32 %v4496_v24, %v4489_v17 }
0x3dca   :  { %4498 = vmax.xlane.f32.xlu1 %v4497_v1 }
0x3e57   :  { %v4499_v36 = vpop.xlane.xlu1 %4498 }
0x3e58   :  { %vm4500_vm0 = vcmp.eq.f32.partialorder %v4497_v1, %v4499_v36  ;;  %v4520_v40 = vsel %vm4518_vm2, %v4499_v36, %v4064_v13 }
0x3e59   :  { %v4501_v22 = vsel %vm4500_vm0, %v9910_v8, 128  ;;  %vm4524_vm3 = vcmp.gt.f32.partialorder %v4520_v40, 0.0  ;;  %4523 = vst.msk [vmem:[#allocation17] sm:$0xff] %vm4521_vm10, %v4520_v40  ;;  %v4530_v10 = vsel %vm4521_vm10, %v4520_v40, 0.0 }
0x3e5a   :  { %v4745_v60 = vsel %vm4524_vm3, 1.0, %v9881_v30  ;;  %v4503_v29 = vshra.s32 %v4501_v22, 16  ;;  %v4502_v32 = vand.u32 65535, %v4501_v22 }
0x3e5b   :  { %v4527_v26 = vsel %vm4521_vm10, %v4745_v60, 0.0 }
0x3e5c   :  { %4528 = vadd.xlane.f32.xlu1 %v4527_v26  ;;  %v4505_v54 = vcvt.s32.f32 %v4503_v29  ;;  %v4504_v12 = vcvt.s32.f32 %v4502_v32 }
0x3e5e   :  { %4506 = vmin.xlane.f32.xlu0 %v4505_v54 }
0x3e60   :  { %4531 = vadd.xlane.f32.xlu1 %v4530_v10 }
0x3ee9   :  { %v4529_v47 = vpop.xlane.xlu1 %4528 }
0x3eea   :  { %v4533_v0 = vmax.f32 %v4529_v47, 1.0 }
0x3eeb   :  { %v4507_v35 = vpop.xlane.xlu0 %4506 }
0x3eec   :  { %6301 = vrcp.f32 %v4533_v0  ;;  %vm4508_vm9 = vcmp.eq.f32.partialorder %v4505_v54, %v4507_v35 }
0x3eed   :  { %v4509_v44 = vsel %vm4508_vm9, %v4504_v12, inf  ;;  %v4532_v30 = vpop.xlane.xlu1 %4531 }
0x3eee   :  { %4510 = vmin.xlane.f32.xlu0 %v4509_v44 }
0x3ef6   :  { %v6302_v34 = vpop.eup %6301 }
0x3ef7   :  { %v4535_v59 = vmul.f32 %v6302_v34, %v4532_v30 }
0x3ef9   :  { %4537 = vst.msk [vmem:[%s9666_s13] sm:$0xff] %vm4536_vm1, %v4535_v59 }
0x3efa   :  { %6811 = shalt.err (!%p6808_p12)
}
0x3efb   :  { %s6812_s24 = scalar_lea.hbm %s9665_s12, 128 }
0x3efc   :  { %p6813_p13 = scmp.ne.s32.totalorder %s9665_s12, %s6812_s24  ;;  %p6816_p0 = scmp.lt.u32.totalorder %s6812_s24, %s9665_s12 }
0x3efe   :  { %p6818_p1 = pnand %p6816_p0, %p6813_p13 }
0x3f00   :  { %6821 = shalt.err (!%p6818_p1)
}
0x3f01   :  { %4557 = dma.vmem_to_hbm [thread:$0]  %s4555_s22, 128, %s9665_s12, [#allocation18]   ;;  %v4513_v51 = vcvt.f32.s32 %v4507_v35 }
0x3f02   :  { %s6876_s6 = smov [#allocation16]  }
0x3f03   :  { %v4514_v53 = vshll.u32 %v4513_v51, 16  ;;  %s4544_s17 = sshll.u32 %s6876_s6, 4  ;;  %s4545_s17 = int_to_ptr.vmem [resolvable:$true] %s4544_s17 }
0x3f04   :  { %s6822_s29 = scalar_lea.vmem %s4545_s17, 128  ;;  %p6827_p3 = scmp.lt.s32.totalorder %s4545_s17, %s4545_s17 }
0x3f05   :  { %p6823_p2 = scmp.ne.s32.totalorder %s4545_s17, %s6822_s29  ;;  %p6828_p4 = scmp.lt.s32.totalorder %s6822_s29, %s6822_s29 }
0x3f07   :  { %p6829_p5 = por %p6828_p4, %p6827_p3 }
0x3f09   :  { %p6830_p6 = pnand %p6829_p5, %p6823_p2 }
0x3f7b   :  { %v4511_v45 = vpop.xlane.xlu0 %4510 }
0x3f7c   :  { %v4512_v38 = vcvt.f32.s32 %v4511_v45 }
0x3f7e   :  { %v4515_v3 = vadd.s32 %v4514_v53, %v4512_v38 }
0x3f80   :  { %vm4516_vm8 = vcmp.ge.s32.totalorder %v4515_v3, 32 }
0x3f81   :  { %v4517_v46 = vsel %vm4516_vm8, 3, %v4515_v3 }
0x3f82   :  { %v4519_v50 = vsel %vm4518_vm2, %v4517_v46, %v9481_v25 }
0x3f83   :  { %4522 = vst.msk [vmem:[#allocation16] sm:$0xff] %vm4521_vm10, %v4519_v50 }
0x3f84   :  { %6833 = shalt.err (!%p6830_p6)
}
0x3f85   :  { %s6834_s23 = scalar_lea.hbm %s9664_s11, 128 }
0x3f86   :  { %p6835_p7 = scmp.ne.s32.totalorder %s9664_s11, %s6834_s23  ;;  %p6838_p8 = scmp.lt.u32.totalorder %s6834_s23, %s9664_s11 }
0x3f88   :  { %p6840_p9 = pnand %p6838_p8, %p6835_p7 }
0x3f8a   :  { %6843 = shalt.err (!%p6840_p9)
}
0x3f8b   :  { %4547 = dma.vmem_to_hbm [thread:$0]  %s4545_s17, 128, %s9664_s11, [#allocation4]  }
0x3f8c   :  { %6854 = dma.done.wait [#allocation4], 128  }
0x3f8d   :  { %6855 = vsyncadd [#allocation4], 4294967168 }
0x3f8e   :  { %6856 = dma.done.wait [#allocation18], 128  }
0x3f8f   :  { %6857 = vsyncadd [#allocation18], 4294967168 }
0x3f90   :  { %4568 = vsyncpa [#allocation3], 1 }
0x3f91   :  { %4569 = vsyncpa [#allocation6], 1 }
0x3f92   :  { %4570 = vsyncpa [#allocation9], 1 }
0x3f93   :  { %4571 = vsyncpa [#allocation12], 1 }
0x3f94   :  { %4572 = vsyncpa [#allocation15], 1 }
0x3f95   :  { %4573 = vsyncpa [#allocation4], 1 }
0x3f96   :  { %4574 = vsyncpa [#allocation18], 1 }

</bundles_post_ra>
